<compile_context>
chip_gen: v7x
topology: tpu7x:2x2x1
jax: 0.10.0
libtpu: 0.0.40
codegen_flags: <defaults>
</compile_context>

<pallas_src>
import functools
import math

import jax
import jax.numpy as jnp
from jax import lax
from jax.experimental import pallas as pl
from jax.experimental.pallas import tpu as pltpu

# Geographic bounds used by input_fn's np.linspace buckets (module-level
# constants in the original spec).
LAT_MIN, LAT_MAX = -90.0, 90.0
LON_MIN, LON_MAX = -180.0, 180.0


def _round_up(x, m):
    return -(-x // m) * m


def _latlong_kernel(ll_ref, tab_ref, out_ref, *, lat_bins, lon_bins, total_bins,
                    pack, lat_min, lat_inv_step, lon_min, lon_inv_step):
    # ll_ref  : (tile_rows, 2*pack) f32 raw degrees; cols [0:pack]=lat, [pack:]=lon
    # tab_ref : (k_pad, 128) f32 packed block-diagonal table (VMEM-resident)
    # out_ref : (tile_rows, 128) f32; physical row r holds logical rows
    #           r*pack + p at columns [p*2D, (p+1)*2D)
    tile_rows = out_ref.shape[0]
    k_pad = tab_ref.shape[0]

    ll = ll_ref[...]
    lat_vals = ll[:, :pack]
    lon_vals = ll[:, pack:]

    # Fused bucketization (VPU).  np.digitize(x, linspace(min, max, bins-1),
    # right=False) on a uniform grid == clip(floor((x-min)/step)+1, 0, bins-1).
    lat_idx = jnp.clip(
        jnp.floor((lat_vals - lat_min) * lat_inv_step).astype(jnp.int32) + 1,
        0, lat_bins - 1)                                     # (tile_rows, pack)
    lon_idx = jnp.clip(
        jnp.floor((lon_vals - lon_min) * lon_inv_step).astype(jnp.int32) + 1,
        0, lon_bins - 1)                                     # (tile_rows, pack)

    # Fused one-hot gather on the MXU.  Logical slot p of a physical row selects
    # from table rows [p*total_bins, (p+1)*total_bins), whose nonzero columns are
    # exactly [p*2D, (p+1)*2D) -- one matmul writes the whole 128-lane row.
    iota = lax.broadcasted_iota(jnp.int32, (tile_rows, k_pad), 1)
    hit = None
    for p in range(pack):                 # pack is a small static int (unrolled)
        base = p * total_bins
        h = (iota == (lat_idx[:, p:p + 1] + base)) | \
            (iota == (lon_idx[:, p:p + 1] + (base + lat_bins)))
        hit = h if hit is None else (hit | h)
    oh = hit.astype(jnp.float32)

    # Precision pinned: the matmul is a pure gather, so any bf16 rounding of the
    # table would show up verbatim in the output.
    out_ref[...] = jnp.dot(oh, tab_ref[...],
                           precision=lax.Precision.HIGHEST,
                           preferred_element_type=jnp.float32)


@functools.partial(
    jax.jit,
    static_argnames=("lat_bins", "lon_bins", "pack", "preferred_tile_m"))
def _latlong_embedding(lat, lon, packed_table, *, lat_bins, lon_bins, pack,
                       preferred_tile_m=2048):
    """Fused digitize + embedding lookup. Returns (*lat.shape, 2*D) float32."""
    assert lat.shape == lon.shape
    lead_shape = lat.shape
    n = math.prod(lead_shape) if lead_shape else 1

    k_pad, out_width = packed_table.shape
    d2 = out_width // pack                      # = 2 * embedding_dim
    total_bins = lat_bins + lon_bins

    # Tile selection: large tiles amortize the ~0.35us/step grid overhead, but
    # keep >= 2 "parallel" steps when there is enough work so both v7x
    # TensorCores get a tile.  tile_m stays a multiple of 512 (so tile_rows is a
    # multiple of 8 for any pack that divides 128).
    tile_m = min(preferred_tile_m, max(512, _round_up(n, 1024) // 2))
    n_pad = _round_up(n, tile_m)
    tile_rows = tile_m // pack
    n_rows = n_pad // pack

    # Pack raw degrees so each physical output row finds its `pack` lat values
    # and `pack` lon values on its own row (targets land directly in sublanes;
    # no in-kernel relayout).  Index-stream traffic is 8 B per logical row.
    def _prep(x):
        x = x.reshape(-1).astype(jnp.float32)
        if n_pad != n:
            x = jnp.pad(x, (0, n_pad - n))      # pad rows are valid & discarded
        return x.reshape(n_rows, pack)

    ll = jnp.concatenate([_prep(lat), _prep(lon)], axis=1)   # (n_rows, 2*pack)

    kernel = functools.partial(
        _latlong_kernel,
        lat_bins=lat_bins, lon_bins=lon_bins, total_bins=total_bins, pack=pack,
        lat_min=float(LAT_MIN),
        lat_inv_step=float((lat_bins - 2) / (LAT_MAX - LAT_MIN)),
        lon_min=float(LON_MIN),
        lon_inv_step=float((lon_bins - 2) / (LON_MAX - LON_MIN)))

    grid = (n_rows // tile_rows,)

    out = pl.pallas_call(
        kernel,
        out_shape=jax.ShapeDtypeStruct((n_rows, out_width), jnp.float32),
        grid_spec=pltpu.PrefetchScalarGridSpec(
            num_scalar_prefetch=0,
            grid=grid,
            in_specs=[
                pl.BlockSpec((tile_rows, 2 * pack), lambda i: (i, 0)),
                # Full table, constant index_map -> fetched once, VMEM-resident.
                pl.BlockSpec((k_pad, out_width), lambda i: (0, 0)),
            ],
            out_specs=pl.BlockSpec((tile_rows, out_width), lambda i: (i, 0)),
        ),
        compiler_params=pltpu.CompilerParams(
            dimension_semantics=("parallel",),
            vmem_limit_bytes=32 * 1024 * 1024),
    )(ll, packed_table)

    # (n_rows, pack*2D) -> (n_pad, 2D) is a contiguous (free) reshape.
    out = out.reshape(n_pad, d2)[:n]
    return out.reshape(*lead_shape, d2)


def _build_packed_table(lat_table, lon_table, pack, k_pad):
    """Packed block-diagonal table, built ONCE at init (not inside the jit)."""
    lat_bins, d = lat_table.shape
    lon_bins, d2 = lon_table.shape
    assert d == d2
    total_bins = lat_bins + lon_bins
    out_width = pack * 2 * d
    tab = jnp.zeros((k_pad, out_width), jnp.float32)
    for p in range(pack):
        r0 = p * total_bins
        c0 = p * 2 * d
        tab = tab.at[r0:r0 + lat_bins, c0:c0 + d].set(lat_table.astype(jnp.float32))
        tab = tab.at[r0 + lat_bins:r0 + total_bins, c0 + d:c0 + 2 * d].set(
            lon_table.astype(jnp.float32))
    return tab


class EmbeddingLayerPallas:
    """Pallas TPU equivalent of EmbeddingLayer (input_fn + LatLongEmbedding)."""

    def __init__(self, num_bins, embedding_dim, lat_table, lon_table):
        self.bins = int(num_bins)
        self.embedding_dim = int(embedding_dim)
        d2 = 2 * self.embedding_dim
        # Pack several logical rows per 128-lane physical output row when 2*D
        # divides 128; otherwise fall back to pack=1 (lane-padded stores).
        self.pack = 128 // d2 if (d2 <= 128 and 128 % d2 == 0) else 1
        total_bins = 2 * self.bins
        # Pad the one-hot K dim to a multiple of 256 (clean MXU passes).
        self.k_pad = _round_up(self.pack * total_bins, 256)
        self.packed_table = _build_packed_table(lat_table, lon_table,
                                                self.pack, self.k_pad)

    def __call__(self, lat, lon):
        # Note: out-of-range values are clipped to the boundary buckets, exactly
        # like np.digitize; indices are therefore always valid table rows.
        return _latlong_embedding(
            jnp.asarray(lat), jnp.asarray(lon), self.packed_table,
            lat_bins=self.bins, lon_bins=self.bins, pack=self.pack)


if __name__ == "__main__":
    B, S = 2, 8                 # batch of 2, sequence of 8 lat/lon pairs
    num_bins = 100              # EmbeddingLayer / input_fn use 100 bins
    embedding_dim = 32

    key = jax.random.PRNGKey(0)
    k_lat_tab, k_lon_tab, k_lat, k_lon = jax.random.split(key, 4)

    # nn.Embedding default init is N(0, 1).
    lat_table = jax.random.normal(k_lat_tab, (num_bins, embedding_dim), jnp.float32)
    lon_table = jax.random.normal(k_lon_tab, (num_bins, embedding_dim), jnp.float32)

    # Raw lat/lon degrees (forward bucketizes them itself).
    lat = jax.random.uniform(k_lat, (B, S), jnp.float32, LAT_MIN, LAT_MAX)
    lon = jax.random.uniform(k_lon, (B, S), jnp.float32, LON_MIN, LON_MAX)

    layer = EmbeddingLayerPallas(num_bins, embedding_dim, lat_table, lon_table)
    out = jax.block_until_ready(layer(lat, lon))

    # Pure-JAX reference, faithful to the PyTorch module:
    # np.digitize(x, edges, right=False) == searchsorted(edges, x, side='right'),
    # then nn.Embedding gathers + torch.cat.
    lat_edges = jnp.linspace(LAT_MIN, LAT_MAX, num_bins - 1)
    lon_edges = jnp.linspace(LON_MIN, LON_MAX, num_bins - 1)
    lat_idx = jnp.searchsorted(lat_edges, lat, side="right")
    lon_idx = jnp.searchsorted(lon_edges, lon, side="right")
    ref = jnp.concatenate([lat_table[lat_idx], lon_table[lon_idx]], axis=-1)

    assert out.shape == (B, S, 2 * embedding_dim), out.shape
    max_err = float(jnp.max(jnp.abs(out - ref)))
    assert jnp.allclose(out, ref, atol=1e-5), f"mismatch vs reference: {max_err}"

    print("KERNEL_OK")
</pallas_src>

<mosaic_0001>
module attributes {stable_mosaic.version = 11 : i64} {
  func.func @_latlong_kernel(%arg0: i32, %arg1: memref<256x4xf32, #tpu.memory_space<vmem>>, %arg2: memref<512x128xf32, #tpu.memory_space<vmem>>, %arg3: memref<256x128xf32, #tpu.memory_space<vmem>>) attributes {dimension_semantics = [#tpu.dimension_semantics<parallel>], iteration_bounds = array<i64: 1>, scalar_prefetch = 0 : i64, scratch_operands = 0 : i64, tpu.core_type = #tpu.core_type<tc>, window_params = [{transform_indices = @transform_0, window_bounds = array<i64: 256, 4>}, {pipeline_mode = #tpu.pipeline_mode<synchronous>, transform_indices = @transform_1, window_bounds = array<i64: 512, 128>}, {transform_indices = @transform_2, window_bounds = array<i64: 256, 128>}]} {
    %c0 = arith.constant 0 : index
    %c0_0 = arith.constant 0 : index
    %0 = vector.load %arg1[%c0, %c0_0] : memref<256x4xf32, #tpu.memory_space<vmem>>, vector<256x4xf32>
    %1 = vector.extract_strided_slice %0 {offsets = [0, 0], sizes = [256, 2], strides = [1, 1]} : vector<256x4xf32> to vector<256x2xf32>
    %2 = vector.extract_strided_slice %0 {offsets = [0, 2], sizes = [256, 2], strides = [1, 1]} : vector<256x4xf32> to vector<256x2xf32>
    %cst = arith.constant -9.000000e+01 : f32
    %3 = vector.broadcast %cst : f32 to vector<256x2xf32>
    %4 = arith.subf %1, %3 : vector<256x2xf32>
    %cst_1 = arith.constant 0.544444442 : f32
    %5 = vector.broadcast %cst_1 : f32 to vector<256x2xf32>
    %6 = arith.mulf %4, %5 : vector<256x2xf32>
    %7 = math.floor %6 : vector<256x2xf32>
    %8 = arith.fptosi %7 : vector<256x2xf32> to vector<256x2xi32>
    %c1_i32 = arith.constant 1 : i32
    %9 = vector.broadcast %c1_i32 : i32 to vector<256x2xi32>
    %10 = arith.addi %8, %9 : vector<256x2xi32>
    %c0_i32 = arith.constant 0 : i32
    %c99_i32 = arith.constant 99 : i32
    %11 = vector.broadcast %c0_i32 : i32 to vector<256x2xi32>
    %12 = arith.maxsi %11, %10 : vector<256x2xi32>
    %13 = vector.broadcast %c99_i32 : i32 to vector<256x2xi32>
    %14 = arith.minsi %13, %12 : vector<256x2xi32>
    %cst_2 = arith.constant -1.800000e+02 : f32
    %15 = vector.broadcast %cst_2 : f32 to vector<256x2xf32>
    %16 = arith.subf %2, %15 : vector<256x2xf32>
    %cst_3 = arith.constant 0.272222221 : f32
    %17 = vector.broadcast %cst_3 : f32 to vector<256x2xf32>
    %18 = arith.mulf %16, %17 : vector<256x2xf32>
    %19 = math.floor %18 : vector<256x2xf32>
    %20 = arith.fptosi %19 : vector<256x2xf32> to vector<256x2xi32>
    %c1_i32_4 = arith.constant 1 : i32
    %21 = vector.broadcast %c1_i32_4 : i32 to vector<256x2xi32>
    %22 = arith.addi %20, %21 : vector<256x2xi32>
    %c0_i32_5 = arith.constant 0 : i32
    %c99_i32_6 = arith.constant 99 : i32
    %23 = vector.broadcast %c0_i32_5 : i32 to vector<256x2xi32>
    %24 = arith.maxsi %23, %22 : vector<256x2xi32>
    %25 = vector.broadcast %c99_i32_6 : i32 to vector<256x2xi32>
    %26 = arith.minsi %25, %24 : vector<256x2xi32>
    %27 = tpu.iota {dimensions = array<i32: 1>} : vector<256x512xi32>
    %28 = vector.extract_strided_slice %14 {offsets = [0, 0], sizes = [256, 1], strides = [1, 1]} : vector<256x2xi32> to vector<256x1xi32>
    %c0_i32_7 = arith.constant 0 : i32
    %29 = vector.broadcast %c0_i32_7 : i32 to vector<256x1xi32>
    %30 = arith.addi %28, %29 : vector<256x1xi32>
    %31 = vector.broadcast %30 : vector<256x1xi32> to vector<256x512xi32>
    %32 = arith.cmpi eq, %27, %31 : vector<256x512xi32>
    %33 = vector.extract_strided_slice %26 {offsets = [0, 0], sizes = [256, 1], strides = [1, 1]} : vector<256x2xi32> to vector<256x1xi32>
    %c100_i32 = arith.constant 100 : i32
    %34 = vector.broadcast %c100_i32 : i32 to vector<256x1xi32>
    %35 = arith.addi %33, %34 : vector<256x1xi32>
    %36 = vector.broadcast %35 : vector<256x1xi32> to vector<256x512xi32>
    %37 = arith.cmpi eq, %27, %36 : vector<256x512xi32>
    %38 = arith.ori %32, %37 : vector<256x512xi1>
    %39 = vector.extract_strided_slice %14 {offsets = [0, 1], sizes = [256, 1], strides = [1, 1]} : vector<256x2xi32> to vector<256x1xi32>
    %c200_i32 = arith.constant 200 : i32
    %40 = vector.broadcast %c200_i32 : i32 to vector<256x1xi32>
    %41 = arith.addi %39, %40 : vector<256x1xi32>
    %42 = vector.broadcast %41 : vector<256x1xi32> to vector<256x512xi32>
    %43 = arith.cmpi eq, %27, %42 : vector<256x512xi32>
    %44 = vector.extract_strided_slice %26 {offsets = [0, 1], sizes = [256, 1], strides = [1, 1]} : vector<256x2xi32> to vector<256x1xi32>
    %c300_i32 = arith.constant 300 : i32
    %45 = vector.broadcast %c300_i32 : i32 to vector<256x1xi32>
    %46 = arith.addi %44, %45 : vector<256x1xi32>
    %47 = vector.broadcast %46 : vector<256x1xi32> to vector<256x512xi32>
    %48 = arith.cmpi eq, %27, %47 : vector<256x512xi32>
    %49 = arith.ori %43, %48 : vector<256x512xi1>
    %50 = arith.ori %38, %49 : vector<256x512xi1>
    %51 = arith.extui %50 : vector<256x512xi1> to vector<256x512xi32>
    %52 = arith.sitofp %51 : vector<256x512xi32> to vector<256x512xf32>
    %c0_8 = arith.constant 0 : index
    %c0_9 = arith.constant 0 : index
    %53 = vector.load %arg2[%c0_8, %c0_9] : memref<512x128xf32, #tpu.memory_space<vmem>>, vector<512x128xf32>
    %cst_10 = arith.constant dense<0.000000e+00> : vector<256x128xf32>
    %54 = tpu.matmul %52, %53, %cst_10 {dimension_numbers = #tpu.dot_dimension_numbers<[1], [0], [0], [1], [0, 0, 1, 1], [], []>, precision = #tpu.contract_precision<fp32>} : vector<256x512xf32>, vector<512x128xf32>, vector<256x128xf32> -> vector<256x128xf32>
    %c0_11 = arith.constant 0 : index
    %c0_12 = arith.constant 0 : index
    %55 = vector.load %arg3[%c0_11, %c0_12] : memref<256x128xf32, #tpu.memory_space<vmem>>, vector<256x128xf32>
    tpu.vector_store %arg3[%c0_11, %c0_12], %54 {strides = array<i32>} : memref<256x128xf32, #tpu.memory_space<vmem>>, vector<256x128xf32>,
    return
  }
  func.func @transform_0(%arg0: i32) -> (i32, i32) {
    %c0_i32 = arith.constant 0 : i32
    %c0_i32_0 = arith.constant 0 : i32
    return %arg0, %c0_i32 : i32, i32
  }
  func.func @transform_1(%arg0: i32) -> (i32, i32) {
    %c0_i32 = arith.constant 0 : i32
    %c0_i32_0 = arith.constant 0 : i32
    %c0_i32_1 = arith.constant 0 : i32
    return %c0_i32, %c0_i32_0 : i32, i32
  }
  func.func @transform_2(%arg0: i32) -> (i32, i32) {
    %c0_i32 = arith.constant 0 : i32
    %c0_i32_0 = arith.constant 0 : i32
    return %arg0, %c0_i32 : i32, i32
  }
}

</mosaic_0001>

<bundles_post_ra>
// kernel: _latlong_embedding.1
= control target key start
LH: loop header
LB: loop body
LE: loop exit
PB: predicated region body
PF: predicated region fallthrough
CT: control target
= control target key end

     0   :  { %v18544_v0 = vmov 0   ;;  %s18537_s0 = inlined_call_operand.vmem [shape: f32[256,4], index: 0, kind: input, shape index: {}]   ;;  %s18538_s1 = inlined_call_operand.vmem [shape: f32[512,128], index: 1, kind: input, shape index: {}]   ;;  %s18539_s2 = inlined_call_operand.vmem [shape: f32[256,128], index: 2, kind: output, shape index: {}]  }
   0x1   :  { %9512 = vset.pattern.permute.xlu1 %v18544_v0  ;;  %9511 = vset.pattern.permute.xlu0 %v18544_v0  ;;  %v12_v1 = vld [vmem:[%s18537_s0 + $0x8] sm:$0xff]  ;;  %v11_v2 = vld [vmem:[%s18537_s0] sm:$0xff]  ;;  %v13_v3 = vld [vmem:[%s18537_s0 + $0x10] sm:$0xff] }
   0x2   :  { %v7553_v4 = vadd.f32 90.0, %v12_v1  ;;  %v7585_v5 = vadd.f32 180.0, %v12_v1  ;;  %v7552_v6 = vadd.f32 90.0, %v11_v2  ;;  %v7584_v7 = vadd.f32 180.0, %v11_v2  ;;  %v9646_v8 = vld [vmem:[%s18537_s0 + $0x20] sm:$0xff]  ;;  %v9651_v9 = vld [vmem:[%s18537_s0 + $0x38] sm:$0xff] }
   0x3   :  { %v7554_v10 = vadd.f32 90.0, %v13_v3  ;;  %v7586_v11 = vadd.f32 180.0, %v13_v3  ;;  %v7588_v12 = vadd.f32 180.0, %v9646_v8  ;;  %v7591_v13 = vadd.f32 180.0, %v9651_v9  ;;  %v9658_v14 = vld [vmem:[%s18537_s0 + $0x50] sm:$0xff]  ;;  %v9673_v63 = vld [vmem:[%s18537_s0 + $0x28] sm:$0xff] }
   0x4   :  { %v76_v15 = vmul.f32 0.54444444, %v7553_v4  ;;  %v364_v16 = vmul.f32 0.27222222, %v7585_v5  ;;  %v75_v17 = vmul.f32 0.54444444, %v7552_v6 }
   0x5   :  { %v363_v18 = vmul.f32 0.27222222, %v7584_v7  ;;  %v77_v19 = vmul.f32 0.54444444, %v7554_v10  ;;  %v9660_v20 = vmul.f32 0.27222222, %v7586_v11 }
   0x6   :  { %v108_v21 = vfloor.f32 %v76_v15  ;;  %v396_v22 = vfloor.f32 %v364_v16  ;;  %v107_v23 = vfloor.f32 %v75_v17  ;;  %v367_v24 = vmul.f32 0.27222222, %v7588_v12  ;;  %v9681_v10 = vld [vmem:[%s18537_s0 + $0x40] sm:$0xff]  ;;  %v9692_v17 = vld [vmem:[%s18537_s0 + $0x58] sm:$0xff] }
   0x7   :  { %v395_v25 = vfloor.f32 %v363_v18  ;;  %v109_v26 = vfloor.f32 %v77_v19  ;;  %v370_v27 = vmul.f32 0.27222222, %v7591_v13  ;;  %v7594_v28 = vadd.f32 180.0, %v9658_v14 }
   0x8   :  { %v9378_v29 = vtrunc.f32 %v108_v21  ;;  %v9376_v30 = vtrunc.f32 %v107_v23  ;;  %v9442_v31 = vtrunc.f32 %v396_v22  ;;  %v399_v32 = vfloor.f32 %v367_v24  ;;  %v14_v21 = vld [vmem:[%s18537_s0 + $0x18] sm:$0xff] }
   0x9   :  { %v9380_v33 = vtrunc.f32 %v109_v26  ;;  %v402_v34 = vfloor.f32 %v370_v27  ;;  %v9440_v35 = vtrunc.f32 %v395_v25  ;;  %v373_v36 = vmul.f32 0.27222222, %v7594_v28 }
   0xa   :  { %v9379_v37 = vcvt.f32.s32 %v9378_v29  ;;  %v9377_v38 = vcvt.f32.s32 %v9376_v30  ;;  %v9443_v39 = vcvt.f32.s32 %v9442_v31  ;;  %v9448_v40 = vtrunc.f32 %v399_v32 }
   0xb   :  { %v9381_v41 = vcvt.f32.s32 %v9380_v33  ;;  %v9454_v42 = vtrunc.f32 %v402_v34  ;;  %v9441_v43 = vcvt.f32.s32 %v9440_v35  ;;  %v405_v44 = vfloor.f32 %v373_v36  ;;  %v25_v33 = vld [vmem:[%s18537_s0 + $0x70] sm:$0xff] }
   0xc   :  { %v172_v45 = vadd.s32 1, %v9379_v37  ;;  %v171_v46 = vadd.s32 1, %v9377_v38  ;;  %v460_v47 = vadd.s32 1, %v9443_v39  ;;  %v9449_v48 = vcvt.f32.s32 %v9448_v40 }
   0xd   :  { %v173_v49 = vadd.s32 1, %v9381_v41  ;;  %v9455_v50 = vcvt.f32.s32 %v9454_v42  ;;  %v459_v51 = vadd.s32 1, %v9441_v43  ;;  %v9460_v52 = vtrunc.f32 %v405_v44  ;;  %v28_v42 = vld [vmem:[%s18537_s0 + $0x88] sm:$0xff] }
   0xe   :  { %vm205_vm0 = vcmp.gt.s32.totalorder %v172_v45, 0  ;;  %vm203_vm1 = vcmp.gt.s32.totalorder %v171_v46, 0  ;;  %vm493_vm2 = vcmp.gt.s32.totalorder %v460_v47, 0  ;;  %v463_v53 = vadd.s32 1, %v9449_v48 }
   0xf   :  { %v206_v54 = vsel %vm205_vm0, %v172_v45, 0  ;;  %v204_v55 = vsel %vm203_vm1, %v171_v46, 0  ;;  %vm207_vm3 = vcmp.gt.s32.totalorder %v173_v49, 0  ;;  %v494_v56 = vsel %vm493_vm2, %v460_v47, 0 }
  0x10   :  { %vm269_vm4 = vcmp.lt.s32.totalorder %v206_v54, 99  ;;  %vm267_vm5 = vcmp.lt.s32.totalorder %v204_v55, 99  ;;  %v208_v57 = vsel %vm207_vm3, %v173_v49, 0  ;;  %vm557_vm6 = vcmp.lt.s32.totalorder %v494_v56, 99 }
  0x11   :  { %v9663_v58 = vsel %vm269_vm4, %v206_v54, 99  ;;  %v268_v59 = vsel %vm267_vm5, %v204_v55, 99  ;;  %vm271_vm7 = vcmp.lt.s32.totalorder %v208_v57, 99  ;;  %v9665_v60 = vsel %vm557_vm6, %v494_v56, 99 }
  0x12   :  { %628 = vperm.xlu1 %9512, %v9663_v58   ;;  %625 = vperm.xlu0 %9511, %v268_v59   ;;  %v1232_v61 = vadd.s32 200, %v268_v59  ;;  %v9668_v62 = vsel %vm271_vm7, %v208_v57, 99  ;;  %v1489_v1 = vadd.s32 300, %v9665_v60  ;;  %vm499_vm8 = vcmp.gt.s32.totalorder %v463_v53, 0 }
  0x13   :  { %v466_v2 = vadd.s32 1, %v9455_v50  ;;  %vm491_vm9 = vcmp.gt.s32.totalorder %v459_v51, 0  ;;  %v500_v3 = vsel %vm499_vm8, %v463_v53, 0  ;;  %v9461_v5 = vcvt.f32.s32 %v9460_v52 }
  0x14   :  { %v492_v4 = vsel %vm491_vm9, %v459_v51, 0  ;;  %v397_v6 = vfloor.f32 %v9660_v20  ;;  %vm563_vm10 = vcmp.lt.s32.totalorder %v500_v3, 99  ;;  %v7557_v7 = vadd.f32 90.0, %v9673_v63 }
  0x15   :  { %vm505_vm11 = vcmp.gt.s32.totalorder %v466_v2, 0  ;;  %vm555_vm12 = vcmp.lt.s32.totalorder %v492_v4, 99  ;;  %v18542_v11 = vmov 3   ;;  %v9685_v12 = vsel %vm563_vm10, %v500_v3, 99 }
  0x16   :  { %631 = vperm.xlu1 %9512, %v9668_v62   ;;  %9516 = vset.pattern.permute.xlu0 %v18542_v11  ;;  %v506_v13 = vsel %vm505_vm11, %v466_v2, 0  ;;  %v9687_v15 = vsel %vm555_vm12, %v492_v4, 99  ;;  %v469_v16 = vadd.s32 1, %v9461_v5  ;;  %v1492_v18 = vadd.s32 300, %v9685_v12 }
  0x17   :  { %1524 = vperm.xlu0 %9516, %v1489_v1   ;;  %vm569_vm13 = vcmp.lt.s32.totalorder %v506_v13, 99  ;;  %v1488_v19 = vadd.s32 300, %v9687_v15  ;;  %v9444_v20 = vtrunc.f32 %v397_v6  ;;  %v80_v23 = vmul.f32 0.54444444, %v7557_v7 }
  0x18   :  { %v9699_v22 = vsel %vm569_vm13, %v506_v13, 99  ;;  %vm511_vm14 = vcmp.gt.s32.totalorder %v469_v16, 0  ;;  %v7560_v24 = vadd.f32 90.0, %v9681_v10  ;;  %v7563_v28 = vadd.f32 90.0, %v9692_v17 }
  0x19   :  { %v1495_v25 = vadd.s32 300, %v9699_v22  ;;  %v512_v26 = vsel %vm511_vm14, %v469_v16, 0  ;;  %v9445_v27 = vcvt.f32.s32 %v9444_v20  ;;  %v18548_v29 = vmov 1  }
  0x1a   :  { %9513 = vset.pattern.permute.xlu1 %v18548_v29  ;;  %vm575_vm15 = vcmp.lt.s32.totalorder %v512_v26, 99  ;;  %v112_v30 = vfloor.f32 %v80_v23  ;;  %v83_v31 = vmul.f32 0.54444444, %v7560_v24  ;;  %v7555_v32 = vadd.f32 90.0, %v14_v21 }
  0x1b   :  { %1533 = vperm.xlu0 %9516, %v1492_v18   ;;  %1265 = vperm.xlu1 %9513, %v1232_v61   ;;  %v9708_v34 = vsel %vm575_vm15, %v512_v26, 99  ;;  %v461_v35 = vadd.s32 1, %v9445_v27  ;;  %v86_v36 = vmul.f32 0.54444444, %v7563_v28  ;;  %v7587_v37 = vadd.f32 180.0, %v14_v21 }
  0x1c   :  { %v1498_v38 = vadd.s32 300, %v9708_v34  ;;  %v9386_v39 = vtrunc.f32 %v112_v30  ;;  %v115_v40 = vfloor.f32 %v83_v31  ;;  %v78_v41 = vmul.f32 0.54444444, %v7555_v32  ;;  %v17_v31 = vld [vmem:[%s18537_s0 + $0x30] sm:$0xff] }
  0x1d   :  { %vm495_vm0 = vcmp.gt.s32.totalorder %v461_v35, 0  ;;  %v118_v43 = vfloor.f32 %v86_v36  ;;  %v366_v44 = vmul.f32 0.27222222, %v7587_v37  ;;  %v7566_v45 = vadd.f32 90.0, %v25_v33  ;;  %v9733_v36 = vld [vmem:[%s18537_s0 + $0x48] sm:$0xff] }
  0x1e   :  { %v496_v46 = vsel %vm495_vm0, %v461_v35, 0  ;;  %v9387_v47 = vcvt.f32.s32 %v9386_v39  ;;  %v9392_v48 = vtrunc.f32 %v115_v40  ;;  %v110_v49 = vfloor.f32 %v78_v41 }
  0x1f   :  { %1542 = vperm.xlu0 %9516, %v1495_v25   ;;  %9514 = vset.pattern.permute.xlu1 %v18542_v11  ;;  %vm559_vm1 = vcmp.lt.s32.totalorder %v496_v46, 99  ;;  %v9398_v50 = vtrunc.f32 %v118_v43  ;;  %v89_v51 = vmul.f32 0.54444444, %v7566_v45  ;;  %v7569_v52 = vadd.f32 90.0, %v28_v42 }
  0x20   :  { %v1233_v53 = vadd.s32 200, %v9663_v58  ;;  %1521 = vperm.xlu1 %9514, %v1488_v19   ;;  %v176_v54 = vadd.s32 1, %v9387_v47  ;;  %v9393_v55 = vcvt.f32.s32 %v9392_v48  ;;  %v9382_v56 = vtrunc.f32 %v110_v49  ;;  %v9743_v47 = vld [vmem:[%s18537_s0 + $0x60] sm:$0xff] }
  0x21   :  { %v1234_v57 = vadd.s32 200, %v9668_v62  ;;  %v560_v59 = vsel %vm559_vm1, %v496_v46, 99  ;;  %v9399_v61 = vcvt.f32.s32 %v9398_v50  ;;  %v121_v1 = vfloor.f32 %v89_v51 }
  0x22   :  { %vm213_vm2 = vcmp.gt.s32.totalorder %v176_v54, 0  ;;  %v179_v2 = vadd.s32 1, %v9393_v55  ;;  %v9383_v3 = vcvt.f32.s32 %v9382_v56  ;;  %v92_v4 = vmul.f32 0.54444444, %v7569_v52 }
  0x23   :  { %1551 = vperm.xlu0 %9516, %v1498_v38   ;;  %v214_v5 = vsel %vm213_vm2, %v176_v54, 0  ;;  %v182_v6 = vadd.s32 1, %v9399_v61  ;;  %v9404_v7 = vtrunc.f32 %v121_v1  ;;  %v398_v13 = vfloor.f32 %v366_v44  ;;  %v26_v61 = vld [vmem:[%s18537_s0 + $0x78] sm:$0xff] }
  0x24   :  { %9515 = vset.pattern.permute.xlu1 %v18548_v29  ;;  %vm277_vm3 = vcmp.lt.s32.totalorder %v214_v5, 99  ;;  %vm219_vm4 = vcmp.gt.s32.totalorder %v179_v2, 0  ;;  %v174_v58 = vadd.s32 1, %v9383_v3  ;;  %v124_v16 = vfloor.f32 %v92_v4  ;;  %v29_v3 = vld [vmem:[%s18537_s0 + $0x90] sm:$0xff] }
  0x25   :  { %1268 = vperm.xlu1 %9515, %v1233_v53   ;;  %v9718_v62 = vsel %vm277_vm3, %v214_v5, 99  ;;  %v220_v18 = vsel %vm219_vm4, %v179_v2, 0  ;;  %vm225_vm5 = vcmp.gt.s32.totalorder %v182_v6, 0  ;;  %v9405_v19 = vcvt.f32.s32 %v9404_v7 }
  0x26   :  { %v850_v20 = vadd.s32 100, %v560_v59  ;;  %vm283_vm6 = vcmp.lt.s32.totalorder %v220_v18, 99  ;;  %v226_v21 = vsel %vm225_vm5, %v182_v6, 0  ;;  %vm209_vm7 = vcmp.gt.s32.totalorder %v174_v58, 0 }
  0x27   :  { %9540 = vset.pattern.permute.xlu0 %v18548_v29  ;;  %vm289_vm8 = vcmp.lt.s32.totalorder %v226_v21, 99  ;;  %v185_v23 = vadd.s32 1, %v9405_v19  ;;  %v1237_v24 = vadd.s32 200, %v9718_v62  ;;  %v9722_v25 = vsel %vm283_vm6, %v220_v18, 99 }
  0x28   :  { %1271 = vperm.xlu0 %9540, %v1234_v57   ;;  %v9410_v26 = vtrunc.f32 %v124_v16  ;;  %v18540_v27 = vmov 2   ;;  %v210_v28 = vsel %vm209_vm7, %v174_v58, 0  ;;  %v9446_v30 = vtrunc.f32 %v398_v13 }
  0x29   :  { %9517 = vset.pattern.permute.xlu1 %v18540_v27  ;;  %vm231_vm9 = vcmp.gt.s32.totalorder %v185_v23, 0  ;;  %v9728_v32 = vsel %vm289_vm8, %v226_v21, 99  ;;  %v1490_v37 = vadd.s32 300, %v560_v59  ;;  %v1240_v38 = vadd.s32 200, %v9722_v25 }
  0x2a   :  { %887 = vperm.xlu1 %9517, %v850_v20   ;;  %v232_v33 = vsel %vm231_vm9, %v185_v23, 0  ;;  %v9411_v35 = vcvt.f32.s32 %v9410_v26  ;;  %v9447_v39 = vcvt.f32.s32 %v9446_v30  ;;  %vm273_vm11 = vcmp.lt.s32.totalorder %v210_v28, 99 }
  0x2b   :  { %vm295_vm10 = vcmp.lt.s32.totalorder %v232_v33, 99  ;;  %v7556_v41 = vadd.f32 90.0, %v9646_v8  ;;  %v7590_v42 = vadd.f32 180.0, %v17_v31  ;;  %v1243_v43 = vadd.s32 200, %v9728_v32 }
  0x2c   :  { %1280 = vperm.xlu0 %9540, %v1237_v24   ;;  %v188_v40 = vadd.s32 1, %v9411_v35  ;;  %v462_v44 = vadd.s32 1, %v9447_v39  ;;  %v7593_v45 = vadd.f32 180.0, %v9733_v36  ;;  %v7589_v46 = vadd.f32 180.0, %v9673_v63 }
  0x2d   :  { %v9746_v48 = vsel %vm295_vm10, %v232_v33, 99  ;;  %v79_v49 = vmul.f32 0.54444444, %v7556_v41  ;;  %v369_v8 = vmul.f32 0.27222222, %v7590_v42  ;;  %v7596_v55 = vadd.f32 180.0, %v9743_v47 }
  0x2e   :  { %9518 = vset.pattern.permute.xlu1 %v18542_v11  ;;  %vm237_vm12 = vcmp.gt.s32.totalorder %v188_v40, 0  ;;  %vm497_vm13 = vcmp.gt.s32.totalorder %v462_v44, 0  ;;  %v372_v51 = vmul.f32 0.27222222, %v7593_v45  ;;  %v368_v52 = vmul.f32 0.27222222, %v7589_v46 }
  0x2f   :  { %1527 = vperm.xlu1 %9518, %v1490_v37   ;;  %v238_v50 = vsel %vm237_vm12, %v188_v40, 0  ;;  %v498_v53 = vsel %vm497_vm13, %v462_v44, 0  ;;  %v111_v63 = vfloor.f32 %v79_v49  ;;  %v401_v54 = vfloor.f32 %v369_v8  ;;  %v32_v44 = vld [vmem:[%s18537_s0 + $0xa8] sm:$0xff] }
  0x30   :  { %1289 = vperm.xlu0 %9540, %v1240_v38   ;;  %v274_v56 = vsel %vm273_vm11, %v210_v28, 99  ;;  %v404_v57 = vfloor.f32 %v372_v51  ;;  %v400_v59 = vfloor.f32 %v368_v52  ;;  %vm301_vm14 = vcmp.lt.s32.totalorder %v238_v50, 99 }
  0x31   :  { %vm561_vm15 = vcmp.lt.s32.totalorder %v498_v53, 99  ;;  %v9384_v1 = vtrunc.f32 %v111_v63  ;;  %v9452_v2 = vtrunc.f32 %v401_v54  ;;  %v1235_v4 = vadd.s32 200, %v274_v56 }
  0x32   :  { %v1246_v5 = vadd.s32 200, %v9746_v48  ;;  %v9458_v6 = vtrunc.f32 %v404_v57  ;;  %v9450_v7 = vtrunc.f32 %v400_v59  ;;  %v375_v16 = vmul.f32 0.27222222, %v7596_v55 }
  0x33   :  { %9519 = vset.pattern.permute.xlu1 %v18544_v0  ;;  %v9385_v13 = vcvt.f32.s32 %v9384_v1  ;;  %v9453_v58 = vcvt.f32.s32 %v9452_v2  ;;  %v7599_v18 = vadd.f32 180.0, %v26_v61  ;;  %v9759_v19 = vsel %vm301_vm14, %v238_v50, 99 }
  0x34   :  { %1298 = vperm.xlu0 %9540, %v1243_v43   ;;  %634 = vperm.xlu1 %9519, %v274_v56   ;;  %v562_v20 = vsel %vm561_vm15, %v498_v53, 99  ;;  %v7558_v21 = vadd.f32 90.0, %v17_v31  ;;  %v7602_v23 = vadd.f32 180.0, %v29_v3  ;;  %v407_v28 = vfloor.f32 %v375_v16 }
  0x35   :  { %v175_v24 = vadd.s32 1, %v9385_v13  ;;  %v465_v26 = vadd.s32 1, %v9453_v58  ;;  %v378_v30 = vmul.f32 0.27222222, %v7599_v18  ;;  %v9459_v33 = vcvt.f32.s32 %v9458_v6 }
  0x36   :  { %v1249_v35 = vadd.s32 200, %v9759_v19  ;;  %v9451_v37 = vcvt.f32.s32 %v9450_v7  ;;  %v1491_v38 = vadd.s32 300, %v562_v20  ;;  %v9464_v39 = vtrunc.f32 %v407_v28 }
  0x37   :  { %vm211_vm0 = vcmp.gt.s32.totalorder %v175_v24, 0  ;;  %v81_v40 = vmul.f32 0.54444444, %v7558_v21  ;;  %vm503_vm1 = vcmp.gt.s32.totalorder %v465_v26, 0  ;;  %v410_v31 = vfloor.f32 %v378_v30 }
  0x38   :  { %1307 = vperm.xlu0 %9540, %v1246_v5   ;;  %9520 = vset.pattern.permute.xlu1 %v18548_v29  ;;  %v212_v41 = vsel %vm211_vm0, %v175_v24, 0  ;;  %v381_v42 = vmul.f32 0.27222222, %v7602_v23  ;;  %v468_v43 = vadd.s32 1, %v9459_v33  ;;  %v464_v45 = vadd.s32 1, %v9451_v37  ;;  %v2256_v33 = vld [vmem:[%s18538_s1] sm:$0xff] }
  0x39   :  { %1274 = vperm.xlu1 %9520, %v1235_v4   ;;  %v848_v46 = vadd.s32 100, %v9687_v15  ;;  %vm275_vm2 = vcmp.lt.s32.totalorder %v212_v41, 99  ;;  %v504_v49 = vsel %vm503_vm1, %v465_v26, 0  ;;  %v9465_v8 = vcvt.f32.s32 %v9464_v39 }
  0x3a   :  { %v9470_v50 = vtrunc.f32 %v410_v31  ;;  %v113_v51 = vfloor.f32 %v81_v40  ;;  %v413_v52 = vfloor.f32 %v381_v42  ;;  %v7605_v53 = vadd.f32 180.0, %v32_v44  ;;  %v2257_v40 = vld [vmem:[%s18538_s1 + $0x8] sm:$0xff] }
  0x3b   :  { %v852_v63 = vadd.s32 100, %v9685_v12  ;;  %vm509_vm3 = vcmp.gt.s32.totalorder %v468_v43, 0  ;;  %v471_v54 = vadd.s32 1, %v9465_v8  ;;  %v7559_v55 = vadd.f32 90.0, %v9651_v9  ;;  %v2288_v8 = vld [vmem:[%s18538_s1 + $0x100] sm:$0xff] }
  0x3c   :  { %1316 = vperm.xlu0 %9540, %v1249_v35   ;;  %v849_v56 = vadd.s32 100, %v9665_v60  ;;  %vm501_vm4 = vcmp.gt.s32.totalorder %v464_v45, 0  ;;  %v9471_v15 = vcvt.f32.s32 %v9470_v50  ;;  %v384_v57 = vmul.f32 0.27222222, %v7605_v53  ;;  %v2289_v50 = vld [vmem:[%s18538_s1 + $0x108] sm:$0xff] }
  0x3d   :  { %9521 = vset.pattern.permute.xlu1 %v18542_v11  ;;  %v9774_v59 = vsel %vm275_vm2, %v212_v41, 99  ;;  %vm567_vm5 = vcmp.lt.s32.totalorder %v504_v49, 99  ;;  %v9388_v61 = vtrunc.f32 %v113_v51  ;;  %v9476_v1 = vtrunc.f32 %v413_v52 }
  0x3e   :  { %1530 = vperm.xlu1 %9521, %v1491_v38   ;;  %v510_v12 = vsel %vm509_vm3, %v468_v43, 0  ;;  %v474_v2 = vadd.s32 1, %v9471_v15  ;;  %v82_v3 = vmul.f32 0.54444444, %v7559_v55  ;;  %vm515_vm6 = vcmp.gt.s32.totalorder %v471_v54, 0 }
  0x3f   :  { %v416_v9 = vfloor.f32 %v384_v57  ;;  %v1236_v60 = vadd.s32 200, %v9774_v59  ;;  %v851_v4 = vadd.s32 100, %v562_v20  ;;  %v568_v5 = vsel %vm567_vm5, %v504_v49, 99 }
  0x40   :  { %9559 = vset.pattern.permute.xlu0 %v18540_v27  ;;  %v502_v6 = vsel %vm501_vm4, %v464_v45, 0  ;;  %vm573_vm7 = vcmp.lt.s32.totalorder %v510_v12, 99  ;;  %v9389_v7 = vcvt.f32.s32 %v9388_v61  ;;  %v9477_v13 = vcvt.f32.s32 %v9476_v1 }
  0x41   :  { %881 = vperm.xlu0 %9559, %v848_v46   ;;  %v9482_v58 = vtrunc.f32 %v416_v9  ;;  %v516_v16 = vsel %vm515_vm6, %v471_v54, 0  ;;  %vm521_vm8 = vcmp.gt.s32.totalorder %v474_v2, 0  ;;  %v114_v18 = vfloor.f32 %v82_v3  ;;  %v2259_v54 = vld [vmem:[%s18538_s1 + $0x18] sm:$0xff] }
  0x42   :  { %9522 = vset.pattern.permute.xlu1 %v18540_v27  ;;  %vm565_vm9 = vcmp.lt.s32.totalorder %v502_v6, 99  ;;  %v854_v23 = vadd.s32 100, %v568_v5  ;;  %v9780_v24 = vsel %vm573_vm7, %v510_v12, 99  ;;  %v7592_v20 = vadd.f32 180.0, %v9681_v10 }
  0x43   :  { %893 = vperm.xlu1 %9522, %v852_v63   ;;  %v9483_v21 = vcvt.f32.s32 %v9482_v58  ;;  %vm579_vm10 = vcmp.lt.s32.totalorder %v516_v16, 99  ;;  %v522_v26 = vsel %vm521_vm8, %v474_v2, 0  ;;  %v177_v28 = vadd.s32 1, %v9389_v7  ;;  %v2258_v63 = vld [vmem:[%s18538_s1 + $0x10] sm:$0xff] }
  0x44   :  { %v477_v30 = vadd.s32 1, %v9477_v13  ;;  %v566_v35 = vsel %vm565_vm9, %v502_v6, 99  ;;  %v9390_v38 = vtrunc.f32 %v114_v18  ;;  %v857_v39 = vadd.s32 100, %v9780_v24  ;;  %v2260_v18 = vld [vmem:[%s18538_s1 + $0x20] sm:$0xff] }
  0x45   :  { %884 = vperm.xlu0 %9559, %v849_v56   ;;  %v480_v37 = vadd.s32 1, %v9483_v21  ;;  %v9791_v10 = vsel %vm579_vm10, %v516_v16, 99  ;;  %vm585_vm11 = vcmp.lt.s32.totalorder %v522_v26, 99  ;;  %v371_v41 = vmul.f32 0.27222222, %v7592_v20 }
  0x46   :  { %v18546_v31 = vmov 0.0|0.0   ;;  %v2321_v42 = vand.u32 4294901760, %v2256_v33  ;;  %v853_v43 = vadd.s32 100, %v566_v35  ;;  %v1493_v44 = vadd.s32 300, %v566_v35 }
  0x47   :  { %9523 = vset.pattern.permute.xlu1 %v18548_v29  ;;  %8128 = vmatprep.subr.bf16.mxu1 %v18546_v31  ;;  %vm215_vm12 = vcmp.gt.s32.totalorder %v177_v28, 0  ;;  %vm527_vm13 = vcmp.gt.s32.totalorder %v477_v30, 0  ;;  %vm533_vm14 = vcmp.gt.s32.totalorder %v480_v37, 0  ;;  %v9391_v45 = vcvt.f32.s32 %v9390_v38 }
  0x48   :  { %1277 = vperm.xlu1 %9523, %v1236_v60   ;;  %8416 = vmatprep.subr.bf16.mxu0 %v18546_v31  ;;  %v2324_v46 = vand.u32 4294901760, %v2257_v40  ;;  %v9796_v49 = vsub.f32 %v2256_v33, %v2321_v42  ;;  %v9806_v51 = vsel %vm585_vm11, %v522_v26, 99  ;;  %v9808_v52 = vadd.s32 300, %v568_v5  ;;  %v2291_v5 = vld [vmem:[%s18538_s1 + $0x118] sm:$0xff] }
  0x49   :  { %890 = vperm.xlu0 %9559, %v851_v4   ;;  %v9811_v53 = vadd.f32 90.0, %v9733_v36  ;;  %v216_v55 = vsel %vm215_vm12, %v177_v28, 0  ;;  %v528_v56 = vsel %vm527_vm13, %v477_v30, 0  ;;  %v403_v15 = vfloor.f32 %v371_v41  ;;  %v2290_v4 = vld [vmem:[%s18538_s1 + $0x110] sm:$0xff]  ;;  %v2261_v28 = vld [vmem:[%s18538_s1 + $0x28] sm:$0xff] }
  0x4a   :  { %19588 = vst [vmem:[#allocation2_spill] sm:$0xff] %v9796_v49  ;;  %v9819_v57 = vpack.c.bf16 %v2324_v46, %v2321_v42  ;;  %v534_v61 = vsel %vm533_vm14, %v480_v37, 0  ;;  %v9823_v36 = vsub.f32 %v2257_v40, %v2324_v46  ;;  %v4919_v1 = vand.u32 4294901760, %v2288_v8  ;;  %v2293_v37 = vld [vmem:[%s18538_s1 + $0x128] sm:$0xff] }
  0x4b   :  { %v4922_v12 = vand.u32 4294901760, %v2289_v50  ;;  %v863_v2 = vadd.s32 100, %v9806_v51  ;;  %v178_v3 = vadd.s32 1, %v9391_v45  ;;  %v2327_v9 = vand.u32 4294901760, %v2258_v63 }
  0x4c   :  { %9524 = vset.pattern.permute.xlu1 %v18544_v0  ;;  %19589 = vst [vmem:[#allocation3_spill] sm:$0xff] %v9819_v57  ;;  %19590 = vst [vmem:[#allocation4_spill] sm:$0xff] %v9823_v36  ;;  %8130 = vmatpush1.bf16.msra.mxu1 %v9819_v57  ;;  %v2330_v60 = vand.u32 4294901760, %v2259_v54  ;;  %vm279_vm15 = vcmp.lt.s32.totalorder %v216_v55, 99  ;;  %vm591_vm0 = vcmp.lt.s32.totalorder %v528_v56, 99  ;;  %v9835_v7 = vsub.f32 %v2288_v8, %v4919_v1 }
  0x4d   :  { %899 = vperm.xlu0 %9559, %v854_v23   ;;  %640 = vperm.xlu1 %9524, %v9718_v62   ;;  %v860_v62 = vadd.s32 100, %v9791_v10  ;;  %v9833_v6 = vpack.c.bf16 %v4922_v12, %v4919_v1  ;;  %vm597_vm1 = vcmp.lt.s32.totalorder %v534_v61, 99  ;;  %v9838_v13 = vsub.f32 %v2289_v50, %v4922_v12  ;;  %v2294_v1 = vld [vmem:[%s18538_s1 + $0x130] sm:$0xff]  ;;  %v2295_v12 = vld [vmem:[%s18538_s1 + $0x138] sm:$0xff] }
  0x4e   :  { %19592 = vst [vmem:[#allocation6_spill] sm:$0xff] %v9835_v7  ;;  %8131 = vmatprep.subr.bf16.mxu1 %v18546_v31  ;;  %v9840_v58 = vpack.c.bf16 %v2330_v60, %v2327_v9  ;;  %v9842_v16 = vsub.f32 %v2258_v63, %v2327_v9  ;;  %v9848_v21 = vsub.f32 %v2259_v54, %v2330_v60  ;;  %v4925_v23 = vand.u32 4294901760, %v2290_v4  ;;  %v2262_v63 = vld [vmem:[%s18538_s1 + $0x30] sm:$0xff]  ;;  %v2263_v54 = vld [vmem:[%s18538_s1 + $0x38] sm:$0xff] }
  0x4f   :  { %19591 = vst [vmem:[#allocation5_spill] sm:$0xff] %v9833_v6  ;;  %19593 = vst [vmem:[#allocation7_spill] sm:$0xff] %v9838_v13  ;;  %8418 = vmatpush1.bf16.msra.mxu0 %v9833_v6  ;;  %v4928_v20 = vand.u32 4294901760, %v2291_v5  ;;  %v7562_v26 = vadd.f32 90.0, %v9658_v14  ;;  %v280_v30 = vsel %vm279_vm15, %v216_v55, 99  ;;  %v9857_v33 = vsel %vm591_vm0, %v528_v56, 99 }
  0x50   :  { %19594 = vst [vmem:[#allocation8_spill] sm:$0xff] %v9840_v58  ;;  %19595 = vst [vmem:[#allocation9_spill] sm:$0xff] %v9842_v16  ;;  %vm217_vm2 = vcmp.gt.s32.totalorder %v178_v3, 0  ;;  %v9859_v35 = vtrunc.f32 %v403_v15  ;;  %8419 = vmatprep.subr.bf16.mxu0 %v18546_v31  ;;  %v2292_v14 = vld [vmem:[%s18538_s1 + $0x120] sm:$0xff]  ;;  %8133 = vmatpush1.bf16.msra.mxu1 %v9840_v58  ;;  %v2333_v41 = vand.u32 4294901760, %v2260_v18  ;;  %v1238_v42 = vadd.s32 200, %v280_v30 }
  0x51   :  { %908 = vperm.xlu0 %9559, %v857_v39   ;;  %9525 = vset.pattern.permute.xlu1 %v18540_v27  ;;  %19596 = vst [vmem:[#allocation10_spill] sm:$0xff] %v9848_v21  ;;  %v9869_v38 = vpack.c.bf16 %v4928_v20, %v4925_v23  ;;  %v9871_v39 = vsub.f32 %v2290_v4, %v4925_v23  ;;  %v85_v45 = vmul.f32 0.54444444, %v7562_v26  ;;  %v2336_v46 = vand.u32 4294901760, %v2261_v28  ;;  %v2265_v4 = vld [vmem:[%s18538_s1 + $0x48] sm:$0xff] }
  0x52   :  { %896 = vperm.xlu1 %9525, %v853_v43   ;;  %v9873_v40 = vsub.f32 %v2291_v5, %v4928_v20  ;;  %v9876_v43 = vsel %vm597_vm1, %v534_v61, 99  ;;  %8134 = vmatprep.subr.bf16.mxu1 %v18546_v31  ;;  %v9881_v8 = vsub.f32 %v2260_v18, %v2333_v41  ;;  %v4931_v50 = vand.u32 4294901760, %v2292_v14  ;;  %v2296_v5 = vld [vmem:[%s18538_s1 + $0x140] sm:$0xff] }
  0x53   :  { %19597 = vst [vmem:[#allocation11_spill] sm:$0xff] %v9869_v38  ;;  %19598 = vst [vmem:[#allocation12_spill] sm:$0xff] %v9871_v39  ;;  %8421 = vmatpush1.bf16.msra.mxu0 %v9869_v38  ;;  %v9890_v55 = vsel %vm217_vm2, %v178_v3, 0  ;;  %v9894_v15 = vmul.f32 0.54444444, %v9811_v53  ;;  %v117_v61 = vfloor.f32 %v85_v45  ;;  %v869_v53 = vadd.s32 100, %v9876_v43 }
  0x54   :  { %19599 = vst [vmem:[#allocation13_spill] sm:$0xff] %v9873_v40  ;;  %19600 = vst [vmem:[#allocation14_spill] sm:$0xff] %v9881_v8  ;;  %8422 = vmatprep.subr.bf16.mxu0 %v18546_v31  ;;  %v9908_v3 = vpack.c.bf16 %v2336_v46, %v2333_v41  ;;  %v9910_v9 = vsub.f32 %v2261_v28, %v2336_v46  ;;  %v9920_v23 = vsub.f32 %v2292_v14, %v4931_v50  ;;  %v2297_v14 = vld [vmem:[%s18538_s1 + $0x148] sm:$0xff]  ;;  %v2270_v38 = vld [vmem:[%s18538_s1 + $0x70] sm:$0xff]  ;;  %v19757_v16 = vmov 0.0  }
  0x55   :  { %917 = vperm.xlu0 %9559, %v860_v62   ;;  %v4934_v62 = vand.u32 4294901760, %v2293_v37  ;;  %v9396_v18 = vtrunc.f32 %v117_v61  ;;  %v2339_v26 = vand.u32 4294901760, %v2262_v63  ;;  %v2342_v28 = vand.u32 4294901760, %v2263_v54 }
  0x56   :  { %9526 = vset.pattern.permute.xlu1 %v18542_v11  ;;  %19601 = vst [vmem:[#allocation15_spill] sm:$0xff] %v9908_v3  ;;  %19602 = vst [vmem:[#allocation16_spill] sm:$0xff] %v9910_v9  ;;  %8136 = vmatpush1.bf16.msra.mxu1 %v9908_v3  ;;  %v4937_v41 = vand.u32 4294901760, %v2294_v1  ;;  %v4940_v45 = vand.u32 4294901760, %v2295_v12  ;;  %v116_v11 = vfloor.f32 %v9894_v15  ;;  %vm281_vm3 = vcmp.lt.s32.totalorder %v9890_v55, 99 }
  0x57   :  { %1536 = vperm.xlu1 %9526, %v1493_v44   ;;  %v866_v44 = vadd.s32 100, %v9857_v33  ;;  %v9912_v60 = vpack.c.bf16 %v4934_v62, %v4931_v50  ;;  %19604 = vst [vmem:[#allocation18_spill] sm:$0xff] %v9920_v23  ;;  %v9922_v20 = vsub.f32 %v2293_v37, %v4934_v62  ;;  %v9397_v27 = vcvt.f32.s32 %v9396_v18  ;;  %8137 = vmatprep.subr.bf16.mxu1 %v18546_v31  ;;  %v2267_v18 = vld [vmem:[%s18538_s1 + $0x58] sm:$0xff] }
  0x58   :  { %v9927_v56 = vsub.f32 %v2262_v63, %v2339_v26  ;;  %v4943_v37 = vand.u32 4294901760, %v2296_v5  ;;  %v9935_v50 = vsub.f32 %v2263_v54, %v2342_v28  ;;  %v9937_v62 = vpack.c.bf16 %v4940_v45, %v4937_v41  ;;  %v2266_v63 = vld [vmem:[%s18538_s1 + $0x50] sm:$0xff] }
  0x59   :  { %926 = vperm.xlu0 %9559, %v863_v2   ;;  %v2264_v2 = vld [vmem:[%s18538_s1 + $0x40] sm:$0xff]  ;;  %19603 = vst [vmem:[#allocation17_spill] sm:$0xff] %v9912_v60  ;;  %19605 = vst [vmem:[#allocation19_spill] sm:$0xff] %v9922_v20  ;;  %8424 = vmatpush1.bf16.msra.mxu0 %v9912_v60  ;;  %v9939_v61 = vsub.f32 %v2294_v1, %v4937_v41  ;;  %v2298_v1 = vld [vmem:[%s18538_s1 + $0x150] sm:$0xff]  ;;  %v4946_v41 = vand.u32 4294901760, %v2297_v14  ;;  %v2351_v15 = vand.u32 4294901760, %v2266_v63  ;;  %v9394_v58 = vtrunc.f32 %v116_v11 }
  0x5a   :  { %v2345_v46 = vand.u32 4294901760, %v2264_v2  ;;  %19606 = vst [vmem:[#allocation20_spill] sm:$0xff] %v9927_v56  ;;  %8425 = vmatprep.subr.bf16.mxu0 %v18546_v31  ;;  %19608 = vst [vmem:[#allocation22_spill] sm:$0xff] %v9935_v50  ;;  %v9959_v31 = vsub.f32 %v2296_v5, %v4943_v37  ;;  %v19734_v23 = vmov 0  ;;  %v19759_v7 = vmov 0 }
  0x5b   :  { %9527 = vset.pattern.permute.xlu1 %v18544_v0  ;;  %19609 = vst [vmem:[#allocation23_spill] sm:$0xff] %v9937_v62  ;;  %19610 = vst [vmem:[#allocation24_spill] sm:$0xff] %v9939_v61  ;;  %v9949_v0 = vsub.f32 %v2295_v12, %v4940_v45  ;;  %v2354_v12 = vand.u32 4294901760, %v2267_v18  ;;  %v9972_v5 = vsub.f32 %v2297_v14, %v4946_v41  ;;  %v4949_v45 = vand.u32 4294901760, %v2298_v1  ;;  %v2300_v14 = vld [vmem:[%s18538_s1 + $0x160] sm:$0xff] }
  0x5c   :  { %643 = vperm.xlu1 %9527, %v280_v30   ;;  %v2348_v30 = vand.u32 4294901760, %v2265_v4  ;;  %v9951_v54 = vsub.f32 %v2264_v2, %v2345_v46  ;;  %19614 = vst [vmem:[#allocation28_spill] sm:$0xff] %v9959_v31  ;;  %v19779_v49 = vmov 0 }
  0x5d   :  { %935 = vperm.xlu0 %9559, %v866_v44   ;;  %v9933_v44 = vpack.c.bf16 %v2342_v28, %v2339_v26  ;;  %v181_v26 = vadd.s32 1, %v9397_v27  ;;  %19611 = vst [vmem:[#allocation25_spill] sm:$0xff] %v9949_v0  ;;  %8427 = vmatpush1.bf16.msra.mxu0 %v9937_v62  ;;  %19618 = vst [vmem:[#allocation31_spill] sm:$0xff] %v9972_v5  ;;  %v9983_v62 = vsub.f32 %v2267_v18, %v2354_v12 }
  0x5e   :  { %19612 = vst [vmem:[#allocation26_spill] sm:$0xff] %v9951_v54  ;;  %v9957_v28 = vsub.f32 %v2265_v4, %v2348_v30  ;;  %v9963_v27 = vpack.c.bf16 %v2348_v30, %v2345_v46  ;;  %v9970_v4 = vpack.c.bf16 %v4946_v41, %v4943_v37  ;;  %v2268_v46 = vld [vmem:[%s18538_s1 + $0x60] sm:$0xff]  ;;  %v2269_v30 = vld [vmem:[%s18538_s1 + $0x68] sm:$0xff]  ;;  %v19621_v41 = vmov 0  }
  0x5f   :  { %19607 = vst [vmem:[#allocation21_spill] sm:$0xff] %v9933_v44  ;;  %vm223_vm4 = vcmp.gt.s32.totalorder %v181_v26, 0  ;;  %8139 = vmatpush1.bf16.msra.mxu1 %v9933_v44  ;;  %19620 = vst [vmem:[#allocation33_spill] sm:$0xff] %v9983_v62  ;;  %v2301_v37 = vld [vmem:[%s18538_s1 + $0x168] sm:$0xff]  ;;  %v19622_v44 = vmov 3   ;;  %v9998_v3 = vsub.f32 %v2298_v1, %v4949_v45  ;;  %v2357_v6 = vand.u32 4294901760, %v2268_v46 }
  0x60   :  { %9528 = vset.pattern.permute.xlu1 %v18548_v29  ;;  %19613 = vst [vmem:[#allocation27_spill] sm:$0xff] %v9957_v28  ;;  %19615 = vst [vmem:[#allocation29_spill] sm:$0xff] %v9963_v27  ;;  %v224_v2 = vsel %vm223_vm4, %v181_v26, 0  ;;  %v855_v29 = vadd.s32 100, %v9699_v22  ;;  %v9981_v26 = vsub.f32 %v2266_v63, %v2351_v15  ;;  %v282_v22 = vsel %vm281_vm3, %v9890_v55, 99 }
  0x61   :  { %944 = vperm.xlu0 %9559, %v869_v53   ;;  %1283 = vperm.xlu1 %9528, %v1238_v42   ;;  %v2299_v42 = vld [vmem:[%s18538_s1 + $0x158] sm:$0xff]  ;;  %v19616_v53 = vmov 0.0|0.0   ;;  %19617 = vst [vmem:[#allocation30_spill] sm:$0xff] %v9970_v4  ;;  %v19623_v63 = vcvt.f32.s32 %v9859_v35  ;;  %19624 = vst [vmem:[#allocation34_spill] sm:$0xff] %v9998_v3  ;;  %vm287_vm5 = vcmp.lt.s32.totalorder %v224_v2, 99  ;;  %v2360_v57 = vand.u32 4294901760, %v2269_v30 }
  0x62   :  { %8140 = vmatprep.subr.bf16.mxu1 %v19616_v53  ;;  %8428 = vmatprep.subr.bf16.mxu0 %v19616_v53  ;;  %19619 = vst [vmem:[#allocation32_spill] sm:$0xff] %v9981_v26  ;;  %v4952_v60 = vand.u32 4294901760, %v2299_v42  ;;  %v10007_v35 = vpack.c.bf16 %v2354_v12, %v2351_v15  ;;  %v4955_v1 = vand.u32 4294901760, %v2300_v14  ;;  %v2363_v15 = vand.u32 4294901760, %v2270_v38  ;;  %v2302_v12 = vld [vmem:[%s18538_s1 + $0x170] sm:$0xff]  ;;  %v2272_v3 = vld [vmem:[%s18538_s1 + $0x80] sm:$0xff] }
  0x63   :  { %v467_v18 = vadd.s32 1, %v19623_v63  ;;  %8142 = vmatpush1.bf16.msra.mxu1 %v9963_v27  ;;  %8430 = vmatpush1.bf16.msra.mxu0 %v9970_v4  ;;  %v4958_v63 = vand.u32 4294901760, %v2301_v37  ;;  %v10020_v27 = vsub.f32 %v2269_v30, %v2360_v57  ;;  %v10031_v4 = vld [vmem:[%s18537_s0 + $0x68] sm:$0xff]  ;;  %v9395_v30 = vcvt.f32.s32 %v9394_v58 }
  0x64   :  { %19625 = vst [vmem:[#allocation35_spill] sm:$0xff] %v10007_v35  ;;  %v10009_v55 = vsub.f32 %v2299_v42, %v4952_v60  ;;  %8143 = vmatprep.subr.bf16.mxu1 %v19616_v53  ;;  %8431 = vmatprep.subr.bf16.mxu0 %v19616_v53  ;;  %v10016_v11 = vpack.c.bf16 %v4952_v60, %v4949_v45  ;;  %v2303_v42 = vld [vmem:[%s18538_s1 + $0x178] sm:$0xff]  ;;  %v2273_v58 = vld [vmem:[%s18538_s1 + $0x88] sm:$0xff]  ;;  %v2369_v62 = vand.u32 4294901760, %v2272_v3 }
  0x65   :  { %9570 = vset.pattern.permute.xlu0 %v19621_v41  ;;  %9529 = vset.pattern.permute.xlu1 %v19622_v44  ;;  %19629 = vst [vmem:[#allocation39_spill] sm:$0xff] %v10020_v27  ;;  %vm507_vm6 = vcmp.gt.s32.totalorder %v467_v18, 0  ;;  %v10033_v60 = vsub.f32 %v2300_v14, %v4955_v1  ;;  %v10035_v45 = vsub.f32 %v2301_v37, %v4958_v63  ;;  %v10039_v27 = vsel %vm287_vm5, %v224_v2, 99 }
  0x66   :  { %637 = vperm.xlu0 %9570, %v9774_v59   ;;  %1539 = vperm.xlu1 %9529, %v9808_v52   ;;  %19626 = vst [vmem:[#allocation36_spill] sm:$0xff] %v10009_v55  ;;  %v2271_v59 = vld [vmem:[%s18538_s1 + $0x78] sm:$0xff]  ;;  %19627 = vst [vmem:[#allocation37_spill] sm:$0xff] %v10016_v11  ;;  %v10018_v52 = vsub.f32 %v2268_v46, %v2357_v6  ;;  %v19632_v46 = vmov 2   ;;  %v10041_v55 = vsub.f32 %v2270_v38, %v2363_v15  ;;  %v4961_v37 = vand.u32 4294901760, %v2302_v12 }
  0x67   :  { %19630 = vst [vmem:[#allocation40_spill] sm:$0xff] %v10033_v60  ;;  %19631 = vst [vmem:[#allocation41_spill] sm:$0xff] %v10035_v45  ;;  %8145 = vmatpush1.bf16.msra.mxu1 %v10007_v35  ;;  %v10047_v14 = vpack.c.bf16 %v2360_v57, %v2357_v6  ;;  %v4964_v45 = vand.u32 4294901760, %v2303_v42  ;;  %v7565_v60 = vadd.f32 90.0, %v10031_v4  ;;  %v1239_v2 = vadd.s32 200, %v282_v22  ;;  %8433 = vmatpush1.bf16.msra.mxu0 %v10016_v11 }
  0x68   :  { %19628 = vst [vmem:[#allocation38_spill] sm:$0xff] %v10018_v52  ;;  %v2366_v52 = vand.u32 4294901760, %v2271_v59  ;;  %19633 = vst [vmem:[#allocation42_spill] sm:$0xff] %v10041_v55  ;;  %v508_v38 = vsel %vm507_vm6, %v467_v18, 0  ;;  %8146 = vmatprep.subr.bf16.mxu1 %v19616_v53  ;;  %8434 = vmatprep.subr.bf16.mxu0 %v19616_v53  ;;  %v10061_v57 = vsub.f32 %v2302_v12, %v4961_v37  ;;  %v180_v18 = vadd.s32 1, %v9395_v30 }
  0x69   :  { %19634 = vst [vmem:[#allocation43_spill] sm:$0xff] %v10047_v14  ;;  %v10063_v6 = vsub.f32 %v2303_v42, %v4964_v45  ;;  %v88_v55 = vmul.f32 0.54444444, %v7565_v60  ;;  %v2372_v11 = vand.u32 4294901760, %v2273_v58  ;;  %vm571_vm7 = vcmp.lt.s32.totalorder %v508_v38, 99  ;;  %v10081_v60 = vld [vmem:[%s18537_s0 + $0x80] sm:$0xff] }
  0x6a   :  { %9530 = vset.pattern.permute.xlu1 %v19632_v46  ;;  %646 = vperm.xlu0 %9570, %v282_v22   ;;  %v10058_v35 = vsub.f32 %v2271_v59, %v2366_v52  ;;  %19637 = vst [vmem:[#allocation46_spill] sm:$0xff] %v10061_v57  ;;  %v2304_v22 = vld [vmem:[%s18538_s1 + $0x180] sm:$0xff]  ;;  %v10074_v59 = vpack.c.bf16 %v2366_v52, %v2363_v15  ;;  %v7595_v30 = vadd.f32 180.0, %v9692_v17  ;;  %v2275_v17 = vld [vmem:[%s18538_s1 + $0x98] sm:$0xff]  ;;  %v572_v15 = vsel %vm571_vm7, %v508_v38, 99 }
  0x6b   :  { %902 = vperm.xlu1 %9530, %v855_v29   ;;  %v10056_v29 = vpack.c.bf16 %v4958_v63, %v4955_v1  ;;  %19638 = vst [vmem:[#allocation47_spill] sm:$0xff] %v10063_v6  ;;  %v2305_v1 = vld [vmem:[%s18538_s1 + $0x188] sm:$0xff]  ;;  %v19639_v63 = vmov 1   ;;  %8148 = vmatpush1.bf16.msra.mxu1 %v10047_v14  ;;  %v120_v12 = vfloor.f32 %v88_v55  ;;  %v10076_v42 = vsub.f32 %v2272_v3, %v2369_v62  ;;  %v2274_v3 = vld [vmem:[%s18538_s1 + $0x90] sm:$0xff] }
  0x6c   :  { %19636 = vst [vmem:[#allocation45_spill] sm:$0xff] %v10058_v35  ;;  %19640 = vst [vmem:[#allocation48_spill] sm:$0xff] %v10074_v59  ;;  %v10085_v6 = vpack.c.bf16 %v4964_v45, %v4961_v37  ;;  %v10087_v57 = vsub.f32 %v2273_v58, %v2372_v11  ;;  %v4967_v14 = vand.u32 4294901760, %v2304_v22  ;;  %8149 = vmatprep.subr.bf16.mxu1 %v19616_v53  ;;  %v4970_v52 = vand.u32 4294901760, %v2305_v1  ;;  %v2306_v58 = vld [vmem:[%s18538_s1 + $0x190] sm:$0xff] }
  0x6d   :  { %19635 = vst [vmem:[#allocation44_spill] sm:$0xff] %v10056_v29  ;;  %19641 = vst [vmem:[#allocation49_spill] sm:$0xff] %v10076_v42  ;;  %8436 = vmatpush1.bf16.msra.mxu0 %v10056_v29  ;;  %v9402_v55 = vtrunc.f32 %v120_v12  ;;  %vm221_vm8 = vcmp.gt.s32.totalorder %v180_v18, 0  ;;  %v7568_v37 = vadd.f32 90.0, %v10081_v60  ;;  %v10108_v29 = vpack.c.bf16 %v2372_v11, %v2369_v62 }
  0x6e   :  { %655 = vperm.xlu0 %9570, %v10039_v27   ;;  %19642 = vst [vmem:[#allocation50_spill] sm:$0xff] %v10085_v6  ;;  %19643 = vst [vmem:[#allocation51_spill] sm:$0xff] %v10087_v57  ;;  %8437 = vmatprep.subr.bf16.mxu0 %v19616_v53  ;;  %v10098_v45 = vsub.f32 %v2304_v22, %v4967_v14  ;;  %v10110_v57 = vsub.f32 %v2305_v1, %v4970_v52  ;;  %v2375_v38 = vand.u32 4294901760, %v2274_v3  ;;  %v10123_v1 = vld [vmem:[%s18537_s0 + $0x98] sm:$0xff] }
  0x6f   :  { %9531 = vset.pattern.permute.xlu1 %v19639_v63  ;;  %8151 = vmatpush1.bf16.msra.mxu1 %v10074_v59  ;;  %v9403_v12 = vcvt.f32.s32 %v9402_v55  ;;  %19645 = vst [vmem:[#allocation53_spill] sm:$0xff] %v10108_v29  ;;  %v374_v22 = vmul.f32 0.27222222, %v7595_v30  ;;  %v91_v42 = vmul.f32 0.54444444, %v7568_v37  ;;  %v2378_v35 = vand.u32 4294901760, %v2275_v17 }
  0x70   :  { %1286 = vperm.xlu1 %9531, %v1239_v2   ;;  %19644 = vst [vmem:[#allocation52_spill] sm:$0xff] %v10098_v45  ;;  %v2307_v2 = vld [vmem:[%s18538_s1 + $0x198] sm:$0xff]  ;;  %19646 = vst [vmem:[#allocation54_spill] sm:$0xff] %v10110_v57  ;;  %v10114_v45 = vpack.c.bf16 %v4970_v52, %v4967_v14  ;;  %8152 = vmatprep.subr.bf16.mxu1 %v19616_v53  ;;  %v10118_v55 = vsub.f32 %v2274_v3, %v2375_v38  ;;  %v4973_v62 = vand.u32 4294901760, %v2306_v58 }
  0x71   :  { %8439 = vmatpush1.bf16.msra.mxu0 %v10085_v6  ;;  %v184_v26 = vadd.s32 1, %v9403_v12  ;;  %v4976_v11 = vand.u32 4294901760, %v2307_v2  ;;  %v856_v30 = vadd.s32 100, %v572_v15  ;;  %v222_v14 = vsel %vm221_vm8, %v180_v18, 0 }
  0x72   :  { %19647 = vst [vmem:[#allocation55_spill] sm:$0xff] %v10114_v45  ;;  %19648 = vst [vmem:[#allocation56_spill] sm:$0xff] %v10118_v55  ;;  %8440 = vmatprep.subr.bf16.mxu0 %v19616_v53  ;;  %v123_v52 = vfloor.f32 %v91_v42  ;;  %v10127_v37 = vsub.f32 %v2275_v17, %v2378_v35  ;;  %v10132_v3 = vsub.f32 %v2306_v58, %v4973_v62  ;;  %v7571_v42 = vadd.f32 90.0, %v10123_v1  ;;  %v2276_v17 = vld [vmem:[%s18538_s1 + $0xa0] sm:$0xff] }
  0x73   :  { %vm229_vm9 = vcmp.gt.s32.totalorder %v184_v26, 0  ;;  %8154 = vmatpush1.bf16.msra.mxu1 %v10108_v29  ;;  %v10134_v12 = vsub.f32 %v2307_v2, %v4976_v11  ;;  %v10138_v18 = vpack.c.bf16 %v4976_v11, %v4973_v62  ;;  %vm285_vm10 = vcmp.lt.s32.totalorder %v222_v14, 99  ;;  %v2308_v62 = vld [vmem:[%s18538_s1 + $0x1a0] sm:$0xff] }
  0x74   :  { %9532 = vset.pattern.permute.xlu1 %v19621_v41  ;;  %19649 = vst [vmem:[#allocation57_spill] sm:$0xff] %v10127_v37  ;;  %19651 = vst [vmem:[#allocation59_spill] sm:$0xff] %v10132_v3  ;;  %v230_v6 = vsel %vm229_vm9, %v184_v26, 0  ;;  %v9408_v59 = vtrunc.f32 %v123_v52  ;;  %8155 = vmatprep.subr.bf16.mxu1 %v19616_v53  ;;  %v2277_v26 = vld [vmem:[%s18538_s1 + $0xa8] sm:$0xff]  ;;  %v1496_v11 = vadd.s32 300, %v572_v15  ;;  %v10158_v52 = vadd.s32 300, %v9780_v24 }
  0x75   :  { %649 = vperm.xlu1 %9532, %v9722_v25   ;;  %v10130_v25 = vpack.c.bf16 %v2378_v35, %v2375_v38  ;;  %19652 = vst [vmem:[#allocation60_spill] sm:$0xff] %v10134_v12  ;;  %8442 = vmatpush1.bf16.msra.mxu0 %v10114_v45  ;;  %19653 = vst [vmem:[#allocation61_spill] sm:$0xff] %v10138_v18  ;;  %v406_v35 = vfloor.f32 %v374_v22  ;;  %vm293_vm11 = vcmp.lt.s32.totalorder %v230_v6, 99  ;;  %v94_v38 = vmul.f32 0.54444444, %v7571_v42  ;;  %v2309_v22 = vld [vmem:[%s18538_s1 + $0x1a8] sm:$0xff] }
  0x76   :  { %8443 = vmatprep.subr.bf16.mxu0 %v19616_v53  ;;  %v10149_v58 = vsel %vm293_vm11, %v230_v6, 99  ;;  %v9409_v2 = vcvt.f32.s32 %v9408_v59  ;;  %v2381_v6 = vand.u32 4294901760, %v2276_v17  ;;  %v286_v59 = vsel %vm285_vm10, %v222_v14, 99 }
  0x77   :  { %19650 = vst [vmem:[#allocation58_spill] sm:$0xff] %v10130_v25  ;;  %664 = vperm.xlu0 %9570, %v10149_v58   ;;  %8157 = vmatpush1.bf16.msra.mxu1 %v10130_v25  ;;  %v126_v42 = vfloor.f32 %v94_v38  ;;  %v2384_v45 = vand.u32 4294901760, %v2277_v26  ;;  %v10165_v29 = vtrunc.f32 %v406_v35  ;;  %v4979_v15 = vand.u32 4294901760, %v2308_v62  ;;  %v10173_v25 = vld [vmem:[%s18537_s0 + $0xb0] sm:$0xff] }
  0x78   :  { %8158 = vmatprep.subr.bf16.mxu1 %v19616_v53  ;;  %v10168_v24 = vsub.f32 %v2276_v17, %v2381_v6  ;;  %v4982_v12 = vand.u32 4294901760, %v2309_v22  ;;  %v2278_v17 = vld [vmem:[%s18538_s1 + $0xb0] sm:$0xff]  ;;  %v7597_v35 = vadd.f32 180.0, %v10031_v4 }
  0x79   :  { %9533 = vset.pattern.permute.xlu1 %v19632_v46  ;;  %8445 = vmatpush1.bf16.msra.mxu0 %v10138_v18  ;;  %v9414_v14 = vtrunc.f32 %v126_v42  ;;  %v10178_v38 = vsub.f32 %v2277_v26, %v2384_v45  ;;  %v10186_v3 = vsub.f32 %v2308_v62, %v4979_v15  ;;  %v2279_v42 = vld [vmem:[%s18538_s1 + $0xb8] sm:$0xff]  ;;  %v7574_v26 = vadd.f32 90.0, %v10173_v25  ;;  %v2310_v4 = vld [vmem:[%s18538_s1 + $0x1b0] sm:$0xff] }
  0x7a   :  { %905 = vperm.xlu1 %9533, %v856_v30   ;;  %v187_v30 = vadd.s32 1, %v9409_v2  ;;  %8446 = vmatprep.subr.bf16.mxu0 %v19616_v53  ;;  %19654 = vst [vmem:[#allocation62_spill] sm:$0xff] %v10168_v24  ;;  %v10176_v2 = vpack.c.bf16 %v2384_v45, %v2381_v6  ;;  %v10184_v24 = vpack.c.bf16 %v4982_v12, %v4979_v15  ;;  %v2311_v62 = vld [vmem:[%s18538_s1 + $0x1b8] sm:$0xff] }
  0x7b   :  { %19656 = vst [vmem:[#allocation64_spill] sm:$0xff] %v10178_v38  ;;  %19658 = vst [vmem:[#allocation66_spill] sm:$0xff] %v10186_v3  ;;  %v9415_v6 = vcvt.f32.s32 %v9414_v14  ;;  %v10192_v45 = vsub.f32 %v2309_v22, %v4982_v12  ;;  %v2387_v12 = vand.u32 4294901760, %v2278_v17  ;;  %v7564_v22 = vadd.f32 90.0, %v9743_v47 }
  0x7c   :  { %vm235_vm12 = vcmp.gt.s32.totalorder %v187_v30, 0  ;;  %19655 = vst [vmem:[#allocation63_spill] sm:$0xff] %v10176_v2  ;;  %19657 = vst [vmem:[#allocation65_spill] sm:$0xff] %v10184_v24  ;;  %8160 = vmatpush1.bf16.msra.mxu1 %v10176_v2  ;;  %v97_v2 = vmul.f32 0.54444444, %v7574_v26  ;;  %v4988_v38 = vand.u32 4294901760, %v2311_v62 }
  0x7d   :  { %v236_v18 = vsel %vm235_vm12, %v187_v30, 0  ;;  %19659 = vst [vmem:[#allocation67_spill] sm:$0xff] %v10192_v45  ;;  %v9463_v30 = vcvt.f32.s32 %v10165_v29  ;;  %8448 = vmatpush1.bf16.msra.mxu0 %v10184_v24  ;;  %8161 = vmatprep.subr.bf16.mxu1 %v19616_v53  ;;  %v190_v14 = vadd.s32 1, %v9415_v6  ;;  %v2390_v45 = vand.u32 4294901760, %v2279_v42  ;;  %v10215_v24 = vld [vmem:[%s18537_s0 + $0xc8] sm:$0xff] }
  0x7e   :  { %9534 = vset.pattern.permute.xlu1 %v19622_v44  ;;  %vm299_vm13 = vcmp.lt.s32.totalorder %v236_v18, 99  ;;  %8449 = vmatprep.subr.bf16.mxu0 %v19616_v53  ;;  %v376_v3 = vmul.f32 0.27222222, %v7597_v35  ;;  %v10210_v29 = vsub.f32 %v2278_v17, %v2387_v12  ;;  %v129_v47 = vfloor.f32 %v97_v2  ;;  %v2280_v35 = vld [vmem:[%s18538_s1 + $0xc0] sm:$0xff]  ;;  %v2281_v17 = vld [vmem:[%s18538_s1 + $0xc8] sm:$0xff] }
  0x7f   :  { %1545 = vperm.xlu1 %9534, %v1496_v11   ;;  %v1241_v11 = vadd.s32 200, %v286_v59  ;;  %v10202_v15 = vsel %vm299_vm13, %v236_v18, 99  ;;  %v4985_v18 = vand.u32 4294901760, %v2310_v4  ;;  %vm241_vm14 = vcmp.gt.s32.totalorder %v190_v14, 0 }
  0x80   :  { %673 = vperm.xlu0 %9570, %v10202_v15   ;;  %19660 = vst [vmem:[#allocation68_spill] sm:$0xff] %v10210_v29  ;;  %v10217_v6 = vpack.c.bf16 %v2390_v45, %v2387_v12  ;;  %v10219_v26 = vsub.f32 %v2279_v42, %v2390_v45  ;;  %v242_v29 = vsel %vm241_vm14, %v190_v14, 0  ;;  %v10234_v2 = vadd.s32 100, %v9708_v34  ;;  %v2312_v12 = vld [vmem:[%s18538_s1 + $0x1c0] sm:$0xff] }
  0x81   :  { %v10227_v37 = vpack.c.bf16 %v4988_v38, %v4985_v18  ;;  %v10229_v55 = vsub.f32 %v2310_v4, %v4985_v18  ;;  %vm305_vm15 = vcmp.lt.s32.totalorder %v242_v29, 99  ;;  %v9420_v42 = vtrunc.f32 %v129_v47  ;;  %v2282_v18 = vld [vmem:[%s18538_s1 + $0xd0] sm:$0xff] }
  0x82   :  { %19661 = vst [vmem:[#allocation69_spill] sm:$0xff] %v10217_v6  ;;  %19662 = vst [vmem:[#allocation70_spill] sm:$0xff] %v10219_v26  ;;  %8163 = vmatpush1.bf16.msra.mxu1 %v10217_v6  ;;  %v7577_v45 = vadd.f32 90.0, %v10215_v24  ;;  %v10241_v14 = vsel %vm305_vm15, %v242_v29, 99  ;;  %v408_v4 = vfloor.f32 %v376_v3  ;;  %v2396_v34 = vand.u32 4294901760, %v2281_v17  ;;  %v2283_v29 = vld [vmem:[%s18538_s1 + $0xd8] sm:$0xff] }
  0x83   :  { %9535 = vset.pattern.permute.xlu1 %v19621_v41  ;;  %19663 = vst [vmem:[#allocation71_spill] sm:$0xff] %v10227_v37  ;;  %19664 = vst [vmem:[#allocation72_spill] sm:$0xff] %v10229_v55  ;;  %8451 = vmatpush1.bf16.msra.mxu0 %v10227_v37  ;;  %v10255_v47 = vadd.s32 1, %v9463_v30  ;;  %v87_v3 = vmul.f32 0.54444444, %v7564_v22  ;;  %v9421_v37 = vcvt.f32.s32 %v9420_v42  ;;  %v4991_v31 = vand.u32 4294901760, %v2312_v12 }
  0x84   :  { %652 = vperm.xlu1 %9535, %v286_v59   ;;  %v10231_v59 = vsub.f32 %v2311_v62, %v4988_v38  ;;  %8164 = vmatprep.subr.bf16.mxu1 %v19616_v53  ;;  %v2393_v38 = vand.u32 4294901760, %v2280_v35  ;;  %v2313_v62 = vld [vmem:[%s18538_s1 + $0x1c8] sm:$0xff]  ;;  %v100_v6 = vmul.f32 0.54444444, %v7577_v45  ;;  %v9466_v55 = vtrunc.f32 %v408_v4 }
  0x85   :  { %682 = vperm.xlu0 %9570, %v10241_v14   ;;  %8452 = vmatprep.subr.bf16.mxu0 %v19616_v53  ;;  %v10266_v5 = vsub.f32 %v2281_v17, %v2396_v34  ;;  %v193_v30 = vadd.s32 1, %v9421_v37  ;;  %v4994_v28 = vand.u32 4294901760, %v2313_v62  ;;  %v2399_v45 = vand.u32 4294901760, %v2282_v18  ;;  %v2315_v37 = vld [vmem:[%s18538_s1 + $0x1d8] sm:$0xff] }
  0x86   :  { %19665 = vst [vmem:[#allocation73_spill] sm:$0xff] %v10231_v59  ;;  %v2314_v59 = vld [vmem:[%s18538_s1 + $0x1d0] sm:$0xff]  ;;  %v10262_v26 = vpack.c.bf16 %v2396_v34, %v2393_v38  ;;  %v10264_v57 = vsub.f32 %v2280_v35, %v2393_v38  ;;  %v132_v22 = vfloor.f32 %v100_v6  ;;  %v9467_v42 = vcvt.f32.s32 %v9466_v55  ;;  %v2284_v34 = vld [vmem:[%s18538_s1 + $0xe0] sm:$0xff] }
  0x87   :  { %19668 = vst [vmem:[#allocation76_spill] sm:$0xff] %v10266_v5  ;;  %v2402_v54 = vand.u32 4294901760, %v2283_v29  ;;  %v4997_v0 = vand.u32 4294901760, %v2314_v59  ;;  %vm247_vm0 = vcmp.gt.s32.totalorder %v193_v30, 0  ;;  %v10269_v4 = vpack.c.bf16 %v4994_v28, %v4991_v31 }
  0x88   :  { %9536 = vset.pattern.permute.xlu1 %v19639_v63  ;;  %19666 = vst [vmem:[#allocation74_spill] sm:$0xff] %v10262_v26  ;;  %19667 = vst [vmem:[#allocation75_spill] sm:$0xff] %v10264_v57  ;;  %8166 = vmatpush1.bf16.msra.mxu1 %v10262_v26  ;;  %v10271_v61 = vsub.f32 %v2312_v12, %v4991_v31  ;;  %v248_v55 = vsel %vm247_vm0, %v193_v30, 0  ;;  %v472_v6 = vadd.s32 1, %v9467_v42  ;;  %vm513_vm2 = vcmp.gt.s32.totalorder %v10255_v47, 0 }
  0x89   :  { %1292 = vperm.xlu1 %9536, %v1241_v11   ;;  %v9426_v11 = vtrunc.f32 %v132_v22  ;;  %19669 = vst [vmem:[#allocation77_spill] sm:$0xff] %v10269_v4  ;;  %8167 = vmatprep.subr.bf16.mxu1 %v19616_v53  ;;  %v10278_v35 = vsub.f32 %v2313_v62, %v4994_v28  ;;  %v10280_v17 = vpack.c.bf16 %v2402_v54, %v2399_v45  ;;  %vm311_vm1 = vcmp.lt.s32.totalorder %v248_v55, 99  ;;  %v2285_v28 = vld [vmem:[%s18538_s1 + $0xe8] sm:$0xff] }
  0x8a   :  { %19670 = vst [vmem:[#allocation78_spill] sm:$0xff] %v10271_v61  ;;  %8454 = vmatpush1.bf16.msra.mxu0 %v10269_v4  ;;  %v10284_v31 = vsub.f32 %v2282_v18, %v2399_v45  ;;  %v10286_v12 = vsub.f32 %v2283_v29, %v2402_v54  ;;  %v119_v62 = vfloor.f32 %v87_v3  ;;  %v10294_v30 = vsel %vm311_vm1, %v248_v55, 99 }
  0x8b   :  { %19671 = vst [vmem:[#allocation79_spill] sm:$0xff] %v10278_v35  ;;  %19672 = vst [vmem:[#allocation80_spill] sm:$0xff] %v10280_v17  ;;  %v9427_v38 = vcvt.f32.s32 %v9426_v11  ;;  %8455 = vmatprep.subr.bf16.mxu0 %v19616_v53  ;;  %v10298_v18 = vsub.f32 %v2314_v59, %v4997_v0  ;;  %691 = vperm.xlu0 %9570, %v10294_v30   ;;  %vm517_vm3 = vcmp.gt.s32.totalorder %v472_v6, 0  ;;  %v2405_v45 = vand.u32 4294901760, %v2284_v34 }
  0x8c   :  { %19673 = vst [vmem:[#allocation81_spill] sm:$0xff] %v10284_v31  ;;  %19674 = vst [vmem:[#allocation82_spill] sm:$0xff] %v10286_v12  ;;  %8169 = vmatpush1.bf16.msra.mxu1 %v10280_v17  ;;  %v2408_v11 = vand.u32 4294901760, %v2285_v28  ;;  %v9400_v59 = vtrunc.f32 %v119_v62  ;;  %v518_v55 = vsel %vm517_vm3, %v472_v6, 0  ;;  %v2316_v6 = vld [vmem:[%s18538_s1 + $0x1e0] sm:$0xff] }
  0x8d   :  { %9537 = vset.pattern.permute.xlu1 %v19622_v44  ;;  %19675 = vst [vmem:[#allocation83_spill] sm:$0xff] %v10298_v18  ;;  %v196_v54 = vadd.s32 1, %v9427_v38  ;;  %8170 = vmatprep.subr.bf16.mxu1 %v19616_v53  ;;  %v1242_v38 = vadd.s32 200, %v10039_v27  ;;  %v2317_v27 = vld [vmem:[%s18538_s1 + $0x1e8] sm:$0xff]  ;;  %vm581_vm6 = vcmp.lt.s32.totalorder %v518_v55, 99  ;;  %v5003_v4 = vand.u32 4294901760, %v2316_v6 }
  0x8e   :  { %1548 = vperm.xlu1 %9537, %v10158_v52   ;;  %v5000_v52 = vand.u32 4294901760, %v2315_v37  ;;  %v5006_v26 = vand.u32 4294901760, %v2317_v27 }
  0x8f   :  { %vm253_vm4 = vcmp.gt.s32.totalorder %v196_v54, 0 }
  0x90   :  { %v10307_v22 = vpack.c.bf16 %v5000_v52, %v4997_v0  ;;  %v10309_v42 = vsub.f32 %v2315_v37, %v5000_v52  ;;  %v514_v0 = vsel %vm513_vm2, %v10255_v47, 0  ;;  %v254_v17 = vsel %vm253_vm4, %v196_v54, 0  ;;  %v2286_v47 = vld [vmem:[%s18538_s1 + $0xf0] sm:$0xff] }
  0x91   :  { %v10303_v29 = vpop.permute.xlu1 %628  ;;  %v10305_v3 = vpop.permute.xlu0 %625  ;;  %vm317_vm5 = vcmp.lt.s32.totalorder %v254_v17, 99  ;;  %v10321_v52 = vpack.c.bf16 %v2408_v11, %v2405_v45  ;;  %vm577_vm7 = vcmp.lt.s32.totalorder %v514_v0, 99  ;;  %v9401_v54 = vcvt.f32.s32 %v9400_v59 }
  0x92   :  { %19676 = vst [vmem:[#allocation84_spill] sm:$0xff] %v10307_v22  ;;  %19677 = vst [vmem:[#allocation85_spill] sm:$0xff] %v10309_v42  ;;  %9538 = vset.pattern.permute.xlu1 %v19632_v46  ;;  %8457 = vmatpush1.bf16.msra.mxu0 %v10307_v22  ;;  %v10343_v22 = vsub.f32 %v2285_v28, %v2408_v11  ;;  %v10347_v42 = vsel %vm581_vm6, %v518_v55, 99  ;;  %v2411_v18 = vand.u32 4294901760, %v2286_v47 }
  0x93   :  { %911 = vperm.xlu1 %9538, %v10234_v2   ;;  %8458 = vmatprep.subr.bf16.mxu0 %v19616_v53  ;;  %19678 = vst [vmem:[#allocation86_spill] sm:$0xff] %v10321_v52  ;;  %v10323_v2 = vsub.f32 %v2284_v34, %v2405_v45  ;;  %v2287_v34 = vld [vmem:[%s18538_s1 + $0xf8] sm:$0xff]  ;;  %v10340_v45 = vsel %vm317_vm5, %v254_v17, 99  ;;  %v2318_v17 = vld [vmem:[%s18538_s1 + $0x1f0] sm:$0xff]  ;;  %v1501_v11 = vadd.s32 300, %v10347_v42  ;;  %v10362_v55 = vsub.f32 %v2317_v27, %v5006_v26 }
  0x94   :  { %8172 = vmatpush1.bf16.msra.mxu1 %v10321_v52  ;;  %19680 = vst [vmem:[#allocation88_spill] sm:$0xff] %v10343_v22  ;;  %700 = vperm.xlu0 %9570, %v10340_v45   ;;  %v2414_v12 = vand.u32 4294901760, %v2287_v34  ;;  %v578_v52 = vsel %vm577_vm7, %v514_v0, 99  ;;  %v2319_v22 = vld [vmem:[%s18538_s1 + $0x1f8] sm:$0xff]  ;;  %v183_v31 = vadd.s32 1, %v9401_v54  ;;  %v5009_v35 = vand.u32 4294901760, %v2318_v17 }
  0x95   :  { %v10319_v37 = vpop.permute.xlu1 %631  ;;  %19679 = vst [vmem:[#allocation87_spill] sm:$0xff] %v10323_v2  ;;  %v7600_v2 = vadd.f32 180.0, %v10081_v60  ;;  %8173 = vmatprep.subr.bf16.mxu1 %v19616_v53  ;;  %v10360_v60 = vsub.f32 %v2316_v6, %v5003_v4  ;;  %19683 = vst [vmem:[#allocation91_spill] sm:$0xff] %v10362_v55  ;;  %v859_v0 = vadd.s32 100, %v578_v52  ;;  %v5012_v55 = vand.u32 4294901760, %v2319_v22 }
  0x96   :  { %v10331_v62 = vpop.permute.xlu0 %1524  ;;  %v10371_v61 = vpack.c.bf16 %v2414_v12, %v2411_v18  ;;  %v10380_v54 = vsub.f32 %v2318_v17, %v5009_v35  ;;  %vm227_vm8 = vcmp.gt.s32.totalorder %v183_v31, 0  ;;  %v1499_v17 = vadd.s32 300, %v578_v52 }
  0x97   :  { %9539 = vset.pattern.permute.xlu1 %v19639_v63  ;;  %19682 = vst [vmem:[#allocation90_spill] sm:$0xff] %v10360_v60  ;;  %v379_v27 = vmul.f32 0.27222222, %v7600_v2  ;;  %v10392_v2 = vsub.f32 %v2319_v22, %v5012_v55 }
  0x98   :  { %1295 = vperm.xlu1 %9539, %v1242_v38   ;;  %v10358_v38 = vpack.c.bf16 %v5006_v26, %v5003_v4  ;;  %9581 = vset.pattern.permute.xlu0 %v19622_v44  ;;  %19684 = vst [vmem:[#allocation92_spill] sm:$0xff] %v10371_v61  ;;  %v10373_v4 = vsub.f32 %v2286_v47, %v2411_v18  ;;  %19687 = vst [vmem:[#allocation95_spill] sm:$0xff] %v10380_v54 }
  0x99   :  { %v10375_v26 = vsub.f32 %v2287_v34, %v2414_v12  ;;  %1560 = vperm.xlu0 %9581, %v1501_v11   ;;  %8175 = vmatpush1.bf16.msra.mxu1 %v10371_v61  ;;  %v10390_v18 = vpack.c.bf16 %v5012_v55, %v5009_v35  ;;  %19689 = vst [vmem:[#allocation97_spill] sm:$0xff] %v10392_v2  ;;  %v411_v34 = vfloor.f32 %v379_v27  ;;  %v228_v11 = vsel %vm227_vm8, %v183_v31, 0  ;;  %v9605_v35 = vld [vmem:[%s18537_s0 + $0x78] sm:$0xff] }
  0x9a   :  { %v10353_v59 = vpop.permute.xlu1 %1265  ;;  %v10355_v28 = vpop.permute.xlu0 %1533  ;;  %19681 = vst [vmem:[#allocation89_spill] sm:$0xff] %v10358_v38  ;;  %19685 = vst [vmem:[#allocation93_spill] sm:$0xff] %v10373_v4  ;;  %8460 = vmatpush1.bf16.msra.mxu0 %v10358_v38  ;;  %8176 = vmatprep.subr.bf16.mxu1 %v19616_v53  ;;  %v7603_v38 = vadd.f32 180.0, %v10123_v1  ;;  %v7567_v22 = vadd.f32 90.0, %v9605_v35  ;;  %vm291_vm9 = vcmp.lt.s32.totalorder %v228_v11, 99 }
  0x9b   :  { %19686 = vst [vmem:[#allocation94_spill] sm:$0xff] %v10375_v26  ;;  %8461 = vmatprep.subr.bf16.mxu0 %v19616_v53  ;;  %19688 = vst [vmem:[#allocation96_spill] sm:$0xff] %v10390_v18  ;;  %v9472_v55 = vtrunc.f32 %v411_v34  ;;  %v292_v2 = vsel %vm291_vm9, %v228_v11, 99 }
  0x9c   :  { %9541 = vset.pattern.permute.xlu1 %v19621_v41  ;;  %v382_v1 = vmul.f32 0.27222222, %v7603_v38  ;;  %v90_v27 = vmul.f32 0.54444444, %v7567_v22  ;;  %v9606_v38 = vld [vmem:[%s18537_s0 + $0x88] sm:$0xff]  ;;  %v1244_v22 = vadd.s32 200, %v292_v2 }
  0x9d   :  { %658 = vperm.xlu1 %9541, %v9728_v32   ;;  %v9604_v32 = vld [vmem:[%s18537_s0 + $0x70] sm:$0xff]  ;;  %v9473_v52 = vcvt.f32.s32 %v9472_v55 }
  0x9e   :  { %v10377_v6 = vpop.permute.xlu0 %1542  ;;  %v7598_v12 = vadd.f32 180.0, %v9604_v32  ;;  %8463 = vmatpush1.bf16.msra.mxu0 %v10390_v18  ;;  %v619_v18 = vlaneseq  ;;  %v414_v35 = vfloor.f32 %v382_v1  ;;  %v122_v55 = vfloor.f32 %v90_v27 }
  0x9f   :  { %v10382_v60 = vpop.permute.xlu1 %1521  ;;  %8464 = vmatprep.subr.bf16.mxu0 %v19616_v53  ;;  %v475_v54 = vadd.s32 1, %v9473_v52  ;;  %v7606_v1 = vadd.f32 180.0, %v10173_v25  ;;  %v1500_v25 = vadd.s32 300, %v9791_v10 }
  0xa0   :  { %v377_v61 = vmul.f32 0.27222222, %v7598_v12  ;;  %v10422_v5 = vtrunc.f32 %v414_v35  ;;  %v9406_v27 = vtrunc.f32 %v122_v55 }
  0xa1   :  { %9542 = vset.pattern.permute.xlu1 %v19632_v46  ;;  %vm523_vm10 = vcmp.gt.s32.totalorder %v475_v54, 0 }
  0xa2   :  { %914 = vperm.xlu1 %9542, %v859_v0   ;;  %v10395_v47 = vpop.permute.xlu0 %1551  ;;  %v409_v0 = vfloor.f32 %v377_v61  ;;  %v7601_v61 = vadd.f32 180.0, %v9606_v38  ;;  %v524_v4 = vsel %vm523_vm10, %v475_v54, 0  ;;  %v9407_v10 = vcvt.f32.s32 %v9406_v27 }
  0xa3   :  { %19690 = vst [vmem:[#allocation98_spill] sm:$0xff] %v10395_v47  ;;  %vm587_vm11 = vcmp.lt.s32.totalorder %v524_v4, 99  ;;  %v18671_v27 = vmov 0.0  }
  0xa4   :  { %v10399_v32 = vpop.permute.xlu1 %1268  ;;  %v9468_v26 = vtrunc.f32 %v409_v0  ;;  %v380_v57 = vmul.f32 0.27222222, %v7601_v61  ;;  %v10439_v35 = vsel %vm587_vm11, %v524_v4, 99  ;;  %v186_v56 = vadd.s32 1, %v9407_v10 }
  0xa5   :  { %v1504_v50 = vadd.s32 300, %v10439_v35 }
  0xa6   :  { %9543 = vset.pattern.permute.xlu1 %v19622_v44  ;;  %v9469_v0 = vcvt.f32.s32 %v9468_v26  ;;  %v9479_v26 = vcvt.f32.s32 %v10422_v5  ;;  %v412_v4 = vfloor.f32 %v380_v57  ;;  %v10461_v5 = vadd.f32 180.0, %v10215_v24 }
  0xa7   :  { %1554 = vperm.xlu1 %9543, %v1499_v17   ;;  %v10406_v31 = vpop.permute.xlu0 %1271  ;;  %v10416_v17 = vand.u32 127, %v619_v18  ;;  %v861_v24 = vadd.s32 100, %v10347_v42  ;;  %1569 = vperm.xlu0 %9581, %v1504_v50   ;;  %v9607_v42 = vld [vmem:[%s18537_s0 + $0x90] sm:$0xff]  ;;  %v19721_v57 = vmov 0 }
  0xa8   :  { %v9474_v20 = vtrunc.f32 %v412_v4  ;;  %v478_v40 = vadd.s32 1, %v9479_v26 }
  0xa9   :  { %v10408_v12 = vpop.permute.xlu1 %887  ;;  %v10427_v38 = vadd.s32 128, %v10416_v17  ;;  %v10430_v18 = vadd.s32 256, %v10416_v17  ;;  %v10433_v54 = vadd.s32 384, %v10416_v17  ;;  %vm728_vm14 = vcmp.eq.s32.totalorder %v10416_v17, %v10319_v37 }
  0xaa   :  { %vm984_vm12 = vcmp.eq.s32.totalorder %v10416_v17, %v10408_v12  ;;  %vm1368_vm6 = vcmp.eq.s32.totalorder %v10416_v17, %v10406_v31  ;;  %v9475_v9 = vcvt.f32.s32 %v9474_v20  ;;  %v19770_v20 = vmov 0 }
  0xab   :  { %9544 = vset.pattern.permute.xlu1 %v19621_v41  ;;  %v10411_v34 = vpop.permute.xlu0 %1280  ;;  %vm985_vm13 = vcmp.eq.s32.totalorder %v10427_v38, %v10408_v12  ;;  %vm729_vm15 = vcmp.eq.s32.totalorder %v10427_v38, %v10319_v37  ;;  %vm986_vm0 = vcmp.eq.s32.totalorder %v10430_v18, %v10408_v12  ;;  %vm730_vm1 = vcmp.eq.s32.totalorder %v10430_v18, %v10319_v37  ;;  %vm10472_vm4 = vmor %vm728_vm14, %vm984_vm12 }
  0xac   :  { %661 = vperm.xlu1 %9544, %v292_v2   ;;  %v10436_v2 = vadd.s32 200, %v10149_v58  ;;  %v473_v58 = vadd.s32 1, %v9469_v0  ;;  %vm731_vm2 = vcmp.eq.s32.totalorder %v10433_v54, %v10319_v37  ;;  %vm987_vm3 = vcmp.eq.s32.totalorder %v10433_v54, %v10408_v12  ;;  %vm10486_vm8 = vmor %vm729_vm15, %vm985_vm13 }
  0xad   :  { %vm1369_vm7 = vcmp.eq.s32.totalorder %v10427_v38, %v10406_v31  ;;  %v7570_v0 = vadd.f32 90.0, %v9607_v42  ;;  %vm10503_vm10 = vmor %vm730_vm1, %vm986_vm0  ;;  %vm1371_vm5 = vcmp.eq.s32.totalorder %v10433_v54, %v10406_v31 }
  0xae   :  { %v10418_v11 = vpop.permute.xlu1 %1527  ;;  %vm519_vm12 = vcmp.gt.s32.totalorder %v473_v58, 0  ;;  %vm10523_vm0 = vmor %vm731_vm2, %vm987_vm3 }
  0xaf   :  { %v10420_v52 = vpop.permute.xlu0 %1289  ;;  %vm1624_vm9 = vcmp.eq.s32.totalorder %v10416_v17, %v10418_v11  ;;  %vm1625_vm11 = vcmp.eq.s32.totalorder %v10427_v38, %v10418_v11  ;;  %vm1626_vm1 = vcmp.eq.s32.totalorder %v10430_v18, %v10418_v11  ;;  %vm1627_vm15 = vcmp.eq.s32.totalorder %v10433_v54, %v10418_v11 }
  0xb0   :  { %9545 = vset.pattern.permute.xlu1 %v19639_v63  ;;  %vm10543_vm2 = vmor %vm1368_vm6, %vm1624_vm9  ;;  %v520_v4 = vsel %vm519_vm12, %v473_v58, 0  ;;  %vm19706_vm9 = vcmp.eq.s32.totalorder %v10430_v18, %v10406_v31  ;;  %v93_v8 = vmul.f32 0.54444444, %v7570_v0  ;;  %vm1361_vm12 = vcmp.eq.s32.totalorder %v10427_v38, %v10353_v59 }
  0xb1   :  { %1301 = vperm.xlu1 %9545, %v1244_v22   ;;  %v10448_v22 = vmul.f32 0.27222222, %v7606_v1  ;;  %vm10560_vm6 = vmor %vm1369_vm7, %vm1625_vm11  ;;  %vm19712_vm11 = vcmp.eq.s32.totalorder %v10416_v17, %v10353_v59  ;;  %v19713_v58 = vmov 0  ;;  %v19715_v31 = vmov 0 }
  0xb2   :  { %vm10570_vm13 = vmor %vm19706_vm9, %vm1626_vm1  ;;  %vm19711_vm9 = vcmp.eq.s32.totalorder %v10416_v17, %v10382_v60  ;;  %vm583_vm3 = vcmp.lt.s32.totalorder %v520_v4, 99  ;;  %v19728_v1 = vmov 0  ;;  %v125_v12 = vfloor.f32 %v93_v8 }
  0xb3   :  { %v10444_v55 = vpop.permute.xlu1 %634  ;;  %v10446_v61 = vpop.permute.xlu0 %1298  ;;  %vm10588_vm1 = vmor %vm1371_vm5, %vm1627_vm15  ;;  %vm1362_vm15 = vcmp.eq.s32.totalorder %v10430_v18, %v10353_v59  ;;  %vm1363_vm5 = vcmp.eq.s32.totalorder %v10433_v54, %v10353_v59  ;;  %v10645_v59 = vadd.s32 300, %v9806_v51  ;;  %v476_v51 = vadd.s32 1, %v9475_v9  ;;  %v10682_v9 = vld [vmem:[%s18537_s0 + $0xa0] sm:$0xff] }
  0xb4   :  { %19691 = vst [vmem:[#allocation99_spill] sm:$0xff] %v10446_v61  ;;  %vm10600_vm7 = vmor %vm19712_vm11, %vm19711_vm9  ;;  %vm19718_vm11 = vcmp.eq.s32.totalorder %v10427_v38, %v10382_v60  ;;  %v584_v8 = vsel %vm583_vm3, %v520_v4, 99  ;;  %v10731_v39 = vtrunc.f32 %v125_v12  ;;  %v19813_v12 = vmov 0 }
  0xb5   :  { %9546 = vset.pattern.permute.xlu1 %v19622_v44  ;;  %v19714_v58 = vsel %vm10600_vm7, 4294967295, %v19713_v58  ;;  %vm10614_vm14 = vmor %vm10472_vm4, %vm10543_vm2  ;;  %vm19724_vm4 = vcmp.eq.s32.totalorder %v10430_v18, %v10382_v60 }
  0xb6   :  { %1557 = vperm.xlu1 %9546, %v1500_v25   ;;  %v19716_v31 = vsel %vm10614_vm14, 4294967295, %v19715_v31  ;;  %vm10621_vm9 = vmor %vm1361_vm12, %vm19718_vm11  ;;  %vm19727_vm12 = vcmp.gt.s32.totalorder %v186_v56, 0  ;;  %v7624_v13 = vsel %vm10614_vm14, 1.0, %v19757_v16  ;;  %v9413_v36 = vcvt.f32.s32 %v10731_v39 }
  0xb7   :  { %v10492_v50 = vpop.permute.xlu0 %1307  ;;  %19717 = vst [vmem:[#allocation102_spill] sm:$0xff] %v19716_v31  ;;  %vm10631_vm7 = vmor %vm10486_vm8, %vm10560_vm6  ;;  %v234_v0 = vsel %vm19727_vm12, %v186_v56, 0  ;;  %v19732_v56 = vmov 0  ;;  %v19766_v31 = vmov 0 }
  0xb8   :  { %19696 = vst [vmem:[#allocation100_spill] sm:$0xff] %v10492_v50  ;;  %v10509_v25 = vpop.permute.xlu1 %1274  ;;  %v19722_v57 = vsel %vm10631_vm7, 4294967295, %v19721_v57  ;;  %vm10639_vm2 = vmor %vm1362_vm15, %vm19724_vm4  ;;  %vm19731_vm15 = vcmp.eq.s32.totalorder %v10433_v54, %v10382_v60  ;;  %vm529_vm4 = vcmp.gt.s32.totalorder %v478_v40, 0  ;;  %v7625_v42 = vsel %vm10631_vm7, 1.0, %v18671_v27 }
  0xb9   :  { %19723 = vst [vmem:[#allocation103_spill] sm:$0xff] %v19722_v57  ;;  %vm10653_vm6 = vmor %vm10503_vm10, %vm10570_vm13  ;;  %v530_v4 = vsel %vm529_vm4, %v478_v40, 0  ;;  %v10734_v40 = vadd.f32 90.0, %v10682_v9  ;;  %v10756_v53 = vsub.f32 %v7625_v42, %v7625_v42  ;;  %v10831_v27 = vsub.f32 %v7624_v13, %v7624_v13 }
  0xba   :  { %9547 = vset.pattern.permute.xlu1 %v19632_v46  ;;  %v19729_v1 = vsel %vm10653_vm6, 4294967295, %v19728_v1  ;;  %vm10660_vm11 = vmor %vm1363_vm5, %vm19731_vm15  ;;  %vm19740_vm15 = vcmp.eq.s32.totalorder %v10427_v38, %v10305_v3  ;;  %vm593_vm4 = vcmp.lt.s32.totalorder %v530_v4, 99  ;;  %v19824_v50 = vmov 0 }
  0xbb   :  { %920 = vperm.xlu1 %9547, %v861_v24   ;;  %v10564_v10 = vpop.permute.xlu0 %1316  ;;  %19730 = vst [vmem:[#allocation104_spill] sm:$0xff] %v19729_v1  ;;  %v19733_v56 = vsel %vm10660_vm11, 4294967295, %v19732_v56  ;;  %vm10669_vm10 = vmor %vm10523_vm0, %vm10588_vm1  ;;  %vm19737_vm1 = vcmp.eq.s32.totalorder %v10416_v17, %v10305_v3  ;;  %vm19756_vm11 = vcmp.lt.s32.totalorder %v234_v0, 99  ;;  %v10788_v42 = vsel %vm593_vm4, %v530_v4, 99 }
  0xbc   :  { %19705 = vst [vmem:[#allocation101_spill] sm:$0xff] %v10564_v10  ;;  %v19735_v23 = vsel %vm10669_vm10, 4294967295, %v19734_v23  ;;  %19755 = vst [vmem:[#allocation106_spill] sm:$0xff] %v10756_v53  ;;  %v1507_v11 = vadd.s32 300, %v10788_v42  ;;  %vm19773_vm4 = vcmp.eq.s32.totalorder %v10433_v54, %v10331_v62 }
  0xbd   :  { %v10592_v26 = vpop.permute.xlu1 %1530  ;;  %19736 = vst [vmem:[#allocation105_spill] sm:$0xff] %v19735_v23  ;;  %19777 = vst [vmem:[#allocation110_spill] sm:$0xff] %v10831_v27 }
  0xbe   :  { %1578 = vperm.xlu0 %9581, %v1507_v11  }
  0xbf   :  { %9548 = vset.pattern.permute.xlu1 %v19639_v63 }
  0xc0   :  { %v882_v37 = vpop.permute.xlu0 %881  ;;  %1304 = vperm.xlu1 %9548, %v10436_v2  }
  0xc1   :  { %vm976_vm13 = vcmp.eq.s32.totalorder %v10416_v17, %v882_v37  ;;  %vm977_vm5 = vcmp.eq.s32.totalorder %v10427_v38, %v882_v37  ;;  %vm19743_vm0 = vcmp.eq.s32.totalorder %v10430_v18, %v882_v37  ;;  %vm19747_vm3 = vcmp.eq.s32.totalorder %v10433_v54, %v882_v37 }
  0xc2   :  { %vm10688_vm8 = vmor %vm19737_vm1, %vm976_vm13  ;;  %v10692_v2 = vpop.permute.xlu1 %893  ;;  %vm19744_vm13 = vcmp.eq.s32.totalorder %v10430_v18, %v10305_v3  ;;  %v862_v37 = vadd.s32 100, %v584_v8 }
  0xc3   :  { %vm10710_vm12 = vmor %vm19740_vm15, %vm977_vm5  ;;  %vm19751_vm5 = vcmp.eq.s32.totalorder %v10416_v17, %v10331_v62  ;;  %vm19752_vm15 = vcmp.eq.s32.totalorder %v10416_v17, %v10399_v32 }
  0xc4   :  { %vm10722_vm1 = vmor %vm19744_vm13, %vm19743_vm0  ;;  %v10728_v57 = vpop.permute.xlu0 %884  ;;  %9549 = vset.pattern.permute.xlu1 %v19621_v41  ;;  %vm19748_vm0 = vcmp.eq.s32.totalorder %v10433_v54, %v10305_v3  ;;  %v10759_v3 = vsel %vm19756_vm11, %v234_v0, 99  ;;  %v1502_v0 = vadd.s32 300, %v584_v8 }
  0xc5   :  { %vm10741_vm13 = vmor %vm19748_vm0, %vm19747_vm3  ;;  %667 = vperm.xlu1 %9549, %v9746_v48   ;;  %vm19758_vm3 = vnez %v19714_v58  ;;  %vm19763_vm0 = vcmp.eq.s32.totalorder %v10427_v38, %v10399_v32  ;;  %v7627_v58 = vsel %vm10669_vm10, 1.0, %v19757_v16  ;;  %v10786_v60 = vadd.s32 200, %v10759_v3 }
  0xc6   :  { %vm10751_vm7 = vmor %vm19752_vm15, %vm19751_vm5  ;;  %vm19762_vm15 = vcmp.eq.s32.totalorder %v10427_v38, %v10331_v62  ;;  %v10861_v39 = vsub.f32 %v7627_v58, %v7627_v58  ;;  %vm19799_vm14 = vcmp.eq.s32.totalorder %v10430_v18, %v10728_v57  ;;  %vm19806_vm10 = vcmp.eq.s32.totalorder %v10433_v54, %v10303_v29 }
  0xc7   :  { %vm10768_vm5 = vmor %vm10688_vm8, %vm19758_vm3  ;;  %v10800_v8 = vpop.permute.xlu1 %1277  ;;  %vm19783_vm3 = vcmp.eq.s32.totalorder %v10430_v18, %v10399_v32 }
  0xc8   :  { %v19760_v7 = vsel %vm10768_vm5, 4294967295, %v19759_v7  ;;  %vm10778_vm11 = vmor %vm19763_vm0, %vm19762_vm15  ;;  %v7616_v23 = vsel %vm10768_vm5, 1.0, %v19757_v16  ;;  %vm19769_vm15 = vcmp.gt.s32.totalorder %v476_v51, 0  ;;  %vm19774_vm0 = vcmp.eq.s32.totalorder %v10433_v54, %v10399_v32  ;;  %v10829_v24 = vpop.permute.xlu0 %890  ;;  %19786 = vst [vmem:[#allocation112_spill] sm:$0xff] %v10861_v39 }
  0xc9   :  { %19761 = vst [vmem:[#allocation107_spill] sm:$0xff] %v19760_v7  ;;  %vm10794_vm8 = vmor %vm10710_vm12, %vm10621_vm9  ;;  %v10806_v4 = vsel %vm19769_vm15, %v476_v51, 0  ;;  %v7626_v7 = vsel %vm10653_vm6, 1.0, %v19757_v16  ;;  %vm19782_vm12 = vcmp.eq.s32.totalorder %v10430_v18, %v10331_v62  ;;  %9550 = vset.pattern.permute.xlu1 %v19632_v46  ;;  %v10881_v58 = vsub.f32 %v7616_v23, %v7616_v23 }
  0xca   :  { %v19767_v31 = vsel %vm10794_vm8, 4294967295, %v19766_v31  ;;  %vm10813_vm9 = vmor %vm10722_vm1, %vm10639_vm2  ;;  %vm19778_vm2 = vnez %v19733_v56  ;;  %923 = vperm.xlu1 %9550, %v862_v37   ;;  %v7617_v32 = vsel %vm10794_vm8, 1.0, %v19757_v16 }
  0xcb   :  { %19768 = vst [vmem:[#allocation108_spill] sm:$0xff] %v19767_v31  ;;  %v19771_v20 = vsel %vm10813_vm9, 4294967295, %v19770_v20  ;;  %vm10825_vm15 = vmor %vm19774_vm0, %vm19773_vm4  ;;  %v7618_v21 = vsel %vm10813_vm9, 1.0, %v19757_v16  ;;  %v10900_v23 = vsub.f32 %v7617_v32, %v7617_v32  ;;  %v19804_v31 = vfloor.f32 %v10448_v22 }
  0xcc   :  { %19772 = vst [vmem:[#allocation109_spill] sm:$0xff] %v19771_v20  ;;  %vm10841_vm1 = vmor %vm10741_vm13, %vm19778_vm2  ;;  %vm19787_vm13 = vcmp.eq.s32.totalorder %v10416_v17, %v10728_v57  ;;  %vm19788_vm2 = vcmp.eq.s32.totalorder %v10416_v17, %v10303_v29  ;;  %v10904_v11 = vsub.f32 %v7618_v21, %v7618_v21  ;;  %v10920_v32 = vpop.permute.xlu1 %640  ;;  %v10922_v21 = vpop.permute.xlu0 %899  ;;  %v19816_v61 = vand.u32 4294901760, %v10881_v58 }
  0xcd   :  { %v19780_v49 = vsel %vm10841_vm1, 4294967295, %v19779_v49  ;;  %vm10855_vm6 = vmor %vm19783_vm3, %vm19782_vm12  ;;  %v7619_v56 = vsel %vm10841_vm1, 1.0, %v19757_v16  ;;  %19791 = vst [vmem:[#allocation113_spill] sm:$0xff] %v10881_v58  ;;  %v10929_v10 = vtrunc.f32 %v19804_v31  ;;  %vm19805_vm12 = vcmp.eq.s32.totalorder %v10433_v54, %v10728_v57 }
  0xce   :  { %19781 = vst [vmem:[#allocation111_spill] sm:$0xff] %v19780_v49  ;;  %vm10869_vm0 = vmor %vm19788_vm2, %vm19787_vm13  ;;  %vm19792_vm13 = vcmp.eq.s32.totalorder %v10427_v38, %v10728_v57  ;;  %vm19793_vm2 = vcmp.eq.s32.totalorder %v10427_v38, %v10303_v29  ;;  %v10902_v1 = vsub.f32 %v7619_v56, %v7619_v56  ;;  %v10925_v49 = vsub.f32 %v7626_v7, %v7626_v7 }
  0xcf   :  { %vm10894_vm3 = vmor %vm19793_vm2, %vm19792_vm13  ;;  %19796 = vst [vmem:[#allocation114_spill] sm:$0xff] %v10900_v23  ;;  %vm19800_vm13 = vcmp.eq.s32.totalorder %v10430_v18, %v10303_v29  ;;  %v19809_v31 = vmov 0  ;;  %9551 = vset.pattern.permute.xlu1 %v19622_v44  ;;  %v19812_v29 = vand.u32 4294901760, %v10756_v53  ;;  %v10967_v56 = vadd.s32 1, %v9413_v36 }
  0xd0   :  { %19797 = vst [vmem:[#allocation115_spill] sm:$0xff] %v10902_v1  ;;  %19798 = vst [vmem:[#allocation116_spill] sm:$0xff] %v10904_v11  ;;  %v18718_v62 = vand.u32 4294901760, %v10900_v23  ;;  %1563 = vperm.xlu1 %9551, %v1502_v0   ;;  %v11005_v48 = vpop.permute.xlu0 %908  ;;  %v9485_v22 = vcvt.f32.s32 %v10929_v10  ;;  %v19828_v10 = vand.u32 4294901760, %v10904_v11  ;;  %v19867_v36 = vmov 0 }
  0xd1   :  { %vm10914_vm2 = vmor %vm19800_vm13, %vm19799_vm14  ;;  %19803 = vst [vmem:[#allocation117_spill] sm:$0xff] %v10925_v49  ;;  %vm1628_vm13 = vcmp.eq.s32.totalorder %v10416_v17, %v10592_v26  ;;  %vm1630_vm14 = vcmp.eq.s32.totalorder %v10430_v18, %v10592_v26  ;;  %v10964_v57 = vsub.f32 %v10756_v53, %v19812_v29  ;;  %v2425_v29 = vsub.f32 %v10881_v58, %v19816_v61  ;;  %v11031_v7 = vpop.permute.xlu1 %896 }
  0xd2   :  { %vm10943_vm9 = vmor %vm19806_vm10, %vm19805_vm12  ;;  %vm19821_vm12 = vcmp.eq.s32.totalorder %v10427_v38, %v10509_v25  ;;  %v2419_v53 = vsub.f32 %v10900_v23, %v18718_v62  ;;  %v19827_v58 = vand.u32 4294901760, %v10902_v1  ;;  %v5023_v51 = vsub.f32 %v10904_v11, %v19828_v10 }
  0xd3   :  { %vm10956_vm4 = vmor %vm10869_vm0, %vm10751_vm7  ;;  %vm988_vm7 = vcmp.eq.s32.totalorder %v10416_v17, %v10829_v24  ;;  %v2426_v20 = vand.u32 4294901760, %v2425_v29  ;;  %v19863_v61 = vmov 0  ;;  %vm19962_vm8 = vcmp.eq.s32.totalorder %v10430_v18, %v10922_v21 }
  0xd4   :  { %v19810_v31 = vsel %vm10956_vm4, 4294967295, %v19809_v31  ;;  %vm10973_vm10 = vmor %vm10894_vm3, %vm10778_vm11  ;;  %vm19817_vm11 = vcmp.eq.s32.totalorder %v10416_v17, %v10509_v25  ;;  %vm19820_vm3 = vcmp.eq.s32.totalorder %v10427_v38, %v10592_v26  ;;  %v5017_v37 = vsub.f32 %v10902_v1, %v19827_v58  ;;  %9552 = vset.pattern.permute.xlu1 %v19621_v41 }
  0xd5   :  { %19811 = vst [vmem:[#allocation118_spill] sm:$0xff] %v19810_v31  ;;  %v19814_v12 = vsel %vm10973_vm10, 4294967295, %v19813_v12  ;;  %vm10991_vm0 = vmor %vm19817_vm11, %vm1628_vm13  ;;  %v7621_v0 = vsel %vm10973_vm10, 1.0, %v19757_v16  ;;  %v7620_v58 = vsel %vm10956_vm4, 1.0, %v19757_v16  ;;  %v2420_v62 = vand.u32 4294901760, %v2419_v53  ;;  %670 = vperm.xlu1 %9552, %v10759_v3  }
  0xd6   :  { %19815 = vst [vmem:[#allocation119_spill] sm:$0xff] %v19814_v12  ;;  %vm11001_vm5 = vmor %vm19821_vm12, %vm19820_vm3  ;;  %v19829_v12 = vmov 0  ;;  %vm19832_vm12 = vcmp.eq.s32.totalorder %v10430_v18, %v10509_v25  ;;  %v5018_v11 = vand.u32 4294901760, %v5017_v37  ;;  %v5024_v1 = vand.u32 4294901760, %v5023_v51  ;;  %v11092_v51 = vpop.permute.xlu0 %917 }
  0xd7   :  { %vm11016_vm13 = vmor %vm10943_vm9, %vm10825_vm15  ;;  %vm990_vm15 = vcmp.eq.s32.totalorder %v10430_v18, %v10829_v24  ;;  %v11068_v23 = vsub.f32 %v7621_v0, %v7621_v0  ;;  %vm19840_vm3 = vcmp.eq.s32.totalorder %v10427_v38, %v10444_v55  ;;  %v19843_v0 = vand.u32 4294901760, %v10861_v39  ;;  %2421 = vmatprep.mubr.f32.mxu1 %v2420_v62 }
  0xd8   :  { %v19825_v50 = vsel %vm11016_vm13, 4294967295, %v19824_v50  ;;  %vm11037_vm9 = vmor %vm10914_vm2, %vm10855_vm6  ;;  %vm19835_vm6 = vcmp.eq.s32.totalorder %v10416_v17, %v10444_v55  ;;  %v7623_v53 = vsel %vm11016_vm13, 1.0, %v19757_v16  ;;  %v19844_v31 = vand.u32 4294901760, %v10831_v27  ;;  %5019 = vmatprep.mubr.f32.mxu0 %v5018_v11  ;;  %2427 = vmatmul.mubr.f32.vlgmr.msra.gmra.mrb[0].mxu1 %v2426_v20 }
  0xd9   :  { %19826 = vst [vmem:[#allocation120_spill] sm:$0xff] %v19825_v50  ;;  %v19830_v12 = vsel %vm11037_vm9, 4294967295, %v19829_v12  ;;  %vm11051_vm11 = vmor %vm19832_vm12, %vm1630_vm14  ;;  %vm19839_vm12 = vcmp.eq.s32.totalorder %v10427_v38, %v10829_v24  ;;  %v11089_v37 = vsub.f32 %v10861_v39, %v19843_v0  ;;  %v18734_v3 = vand.u32 4294901760, %v11068_v23  ;;  %5025 = vmatmul.mubr.f32.vlgmr.msra.gmra.mrb[0].mxu0 %v5024_v1  ;;  %9553 = vset.pattern.permute.xlu1 %v19639_v63 }
  0xda   :  { %19831 = vst [vmem:[#allocation121_spill] sm:$0xff] %v19830_v12  ;;  %vm11064_vm2 = vmor %vm19835_vm6, %vm988_vm7  ;;  %v11097_v47 = vsub.f32 %v10831_v27, %v19844_v31  ;;  %vm19845_vm6 = vcmp.eq.s32.totalorder %v10430_v18, %v10444_v55  ;;  %v11112_v39 = vsub.f32 %v7623_v53, %v7623_v53  ;;  %v11114_v31 = vsub.f32 %v7620_v58, %v7620_v58  ;;  %v11171_v20 = vpop.permute.xlu0 %926 }
  0xdb   :  { %19838 = vst [vmem:[#allocation122_spill] sm:$0xff] %v11068_v23  ;;  %vm11079_vm7 = vmor %vm19840_vm3, %vm19839_vm12  ;;  %vm19850_vm3 = vcmp.eq.s32.totalorder %v10433_v54, %v10829_v24  ;;  %vm19851_vm14 = vcmp.eq.s32.totalorder %v10433_v54, %v10444_v55  ;;  %v7622_v11 = vsel %vm11037_vm9, 1.0, %v19757_v16  ;;  %v2450_v62 = vand.u32 4294901760, %v10964_v57  ;;  %v11135_v24 = vpop.permute.xlu1 %1536  ;;  %1310 = vperm.xlu1 %9553, %v10786_v60  }
  0xdc   :  { %vm11107_vm12 = vmor %vm19845_vm6, %vm990_vm15  ;;  %19848 = vst [vmem:[#allocation123_spill] sm:$0xff] %v11112_v39  ;;  %v19854_v58 = vand.u32 4294901760, %v10925_v49  ;;  %v11137_v55 = vadd.s32 1, %v9485_v22  ;;  %v2434_v57 = vsub.f32 %v11068_v23, %v18734_v3  ;;  %v18737_v22 = vand.u32 4294901760, %v11112_v39 }
  0xdd   :  { %19849 = vst [vmem:[#allocation124_spill] sm:$0xff] %v11114_v31  ;;  %vm11122_vm4 = vmor %vm19851_vm14, %vm19850_vm3  ;;  %vm19855_vm14 = vcmp.eq.s32.totalorder %v10433_v54, %v10592_v26  ;;  %vm19856_vm3 = vcmp.eq.s32.totalorder %v10433_v54, %v10509_v25  ;;  %v19860_v25 = vmov 0  ;;  %v5048_v26 = vand.u32 4294901760, %v11089_v37 }
  0xde   :  { %v11133_v53 = vsub.f32 %v10925_v49, %v19854_v58  ;;  %vm11147_vm6 = vmor %vm19856_vm3, %vm19855_vm14  ;;  %v11156_v58 = vsub.f32 %v7622_v11, %v7622_v11  ;;  %v2456_v3 = vand.u32 4294901760, %v11097_v47  ;;  %v11175_v11 = vmul.f32 0.54444444, %v10734_v40 }
  0xdf   :  { %vm11164_vm14 = vmor %vm11079_vm7, %vm11001_vm5  ;;  %v2435_v47 = vand.u32 4294901760, %v2434_v57  ;;  %v5032_v29 = vsub.f32 %v11112_v39, %v18737_v22  ;;  %v19866_v37 = vand.u32 4294901760, %v11114_v31  ;;  %vm740_vm15 = vcmp.eq.s32.totalorder %v10416_v17, %v10920_v32  ;;  %v11226_v22 = vpop.permute.xlu1 %643  ;;  %9554 = vset.pattern.permute.xlu1 %v19622_v44 }
  0xe0   :  { %19859 = vst [vmem:[#allocation125_spill] sm:$0xff] %v11156_v58  ;;  %v19861_v25 = vsel %vm11164_vm14, 4294967295, %v19860_v25  ;;  %vm11183_vm5 = vmor %vm11064_vm2, %vm10991_vm0  ;;  %v18738_v49 = vand.u32 4294901760, %v11156_v58  ;;  %v5054_v10 = vand.u32 4294901760, %v11133_v53  ;;  %v7629_v60 = vsel %vm11164_vm14, 1.0, %v19757_v16  ;;  %1566 = vperm.xlu1 %9554, %v10645_v59  }
  0xe1   :  { %19862 = vst [vmem:[#allocation126_spill] sm:$0xff] %v19861_v25  ;;  %v19864_v61 = vsel %vm11183_vm5, 4294967295, %v19863_v61  ;;  %v2440_v40 = vsub.f32 %v11114_v31, %v19866_v37  ;;  %vm11202_vm2 = vmor %vm11122_vm4, %vm11147_vm6  ;;  %v19870_v27 = vmov 0  ;;  %2436 = vmatprep.mubr.f32.mxu1 %v2435_v47  ;;  %v5033_v1 = vand.u32 4294901760, %v5032_v29  ;;  %v11238_v47 = vpop.permute.xlu0 %935 }
  0xe2   :  { %19865 = vst [vmem:[#allocation127_spill] sm:$0xff] %v19864_v61  ;;  %v19868_v36 = vsel %vm11202_vm2, 4294967295, %v19867_v36  ;;  %vm11217_vm0 = vmor %vm11107_vm12, %vm11051_vm11  ;;  %v5038_v53 = vsub.f32 %v11156_v58, %v18738_v49  ;;  %v11224_v37 = vsub.f32 %v7629_v60, %v7629_v60  ;;  %vm996_vm4 = vcmp.eq.s32.totalorder %v10416_v17, %v11031_v7 }
  0xe3   :  { %19869 = vst [vmem:[#allocation128_spill] sm:$0xff] %v19868_v36  ;;  %v19871_v27 = vsel %vm11217_vm0, 4294967295, %v19870_v27  ;;  %v2441_v57 = vand.u32 4294901760, %v2440_v40  ;;  %vm997_vm11 = vcmp.eq.s32.totalorder %v10427_v38, %v11031_v7  ;;  %v7631_v13 = vsel %vm11202_vm2, 1.0, %v19757_v16  ;;  %5034 = vmatprep.mubr.f32.mxu0 %v5033_v1  ;;  %vm11261_vm7 = vmor %vm740_vm15, %vm996_vm4 }
  0xe4   :  { %19872 = vst [vmem:[#allocation129_spill] sm:$0xff] %v19871_v27  ;;  %19873 = vst [vmem:[#allocation130_spill] sm:$0xff] %v11224_v37  ;;  %v7628_v0 = vsel %vm11183_vm5, 1.0, %v19757_v16  ;;  %v5039_v29 = vand.u32 4294901760, %v5038_v53  ;;  %v18741_v40 = vand.u32 4294901760, %v11224_v37  ;;  %v11241_v60 = vsub.f32 %v7631_v13, %v7631_v13  ;;  %9555 = vset.pattern.permute.xlu1 %v19632_v46 }
  0xe5   :  { %2442 = vmatmul.mubr.f32.gmra.mrb[2].mxu1 %v2441_v57  ;;  %v11243_v49 = vsub.f32 %v7628_v0, %v7628_v0  ;;  %vm741_vm12 = vcmp.eq.s32.totalorder %v10427_v38, %v10920_v32  ;;  %v7630_v1 = vsel %vm11217_vm0, 1.0, %v19757_v16  ;;  %vm743_vm3 = vcmp.eq.s32.totalorder %v10433_v54, %v10920_v32  ;;  %v11288_v59 = vpop.permute.xlu0 %944 }
  0xe6   :  { %19874 = vst [vmem:[#allocation131_spill] sm:$0xff] %v11241_v60  ;;  %2451 = vmatprep.mubr.f32.mxu1 %v2450_v62  ;;  %5040 = vmatmul.mubr.f32.gmra.mrb[2].mxu0 %v5039_v29  ;;  %v2464_v62 = vsub.f32 %v11224_v37, %v18741_v40  ;;  %v18754_v53 = vand.u32 4294901760, %v11241_v60  ;;  %v11270_v0 = vsub.f32 %v7630_v1, %v7630_v1  ;;  %vm11278_vm15 = vmor %vm741_vm12, %vm997_vm11  ;;  %v11286_v1 = vpop.permute.xlu1 %1283  ;;  %vm19881_vm0 = vcmp.gt.s32.totalorder %v11137_v55, 0 }
  0xe7   :  { %19875 = vst [vmem:[#allocation132_spill] sm:$0xff] %v11243_v49  ;;  %5049 = vmatprep.mubr.f32.mxu0 %v5048_v26  ;;  %v536_v40 = vsel %vm19881_vm0, %v11137_v55, 0  ;;  %vm19882_vm11 = vcmp.eq.s32.totalorder %v10433_v54, %v11031_v7  ;;  %v19885_v58 = vand.u32 4294901760, %v11243_v49  ;;  %v864_v55 = vadd.s32 100, %v10439_v35 }
  0xe8   :  { %19878 = vst [vmem:[#allocation133_spill] sm:$0xff] %v11270_v0  ;;  %vm11296_vm12 = vmor %vm743_vm3, %vm19882_vm11  ;;  %v2465_v26 = vand.u32 4294901760, %v2464_v62  ;;  %v5062_v37 = vsub.f32 %v11241_v60, %v18754_v53  ;;  %vm19886_vm3 = vcmp.eq.s32.totalorder %v10416_v17, %v11135_v24  ;;  %vm19887_vm11 = vcmp.eq.s32.totalorder %v10416_v17, %v10411_v34 }
  0xe9   :  { %2457 = vmatmul.mubr.f32.gmra.mrb[4].mxu1 %v2456_v3  ;;  %v2470_v31 = vsub.f32 %v11243_v49, %v19885_v58  ;;  %vm11315_vm6 = vmor %vm19887_vm11, %vm19886_vm3  ;;  %vm19890_vm4 = vcmp.gt.s32.totalorder %v10967_v56, 0  ;;  %v127_v62 = vfloor.f32 %v11175_v11  ;;  %vm19891_vm0 = vcmp.eq.s32.totalorder %v10427_v38, %v11135_v24  ;;  %929 = vperm.xlu1 %9555, %v864_v55  }
  0xea   :  { %v240_v58 = vsel %vm19890_vm4, %v10967_v56, 0  ;;  %5055 = vmatmul.mubr.f32.gmra.mrb[4].mxu0 %v5054_v10  ;;  %vm19892_vm5 = vcmp.eq.s32.totalorder %v10427_v38, %v10411_v34  ;;  %2466 = vmatprep.mubr.f32.mxu1 %v2465_v26  ;;  %v5063_v39 = vand.u32 4294901760, %v5062_v37  ;;  %v19895_v49 = vand.u32 4294901760, %v11270_v0  ;;  %v11375_v37 = vpop.permute.xlu1 %1539 }
  0xeb   :  { %vm11330_vm2 = vmor %vm19892_vm5, %vm19891_vm0  ;;  %v2471_v35 = vand.u32 4294901760, %v2470_v31  ;;  %v11338_v11 = vadd.s32 300, %v9857_v33  ;;  %v11341_v10 = vadd.s32 300, %v9876_v43  ;;  %v1248_v60 = vadd.s32 200, %v10202_v15 }
  0xec   :  { %v5068_v56 = vsub.f32 %v11270_v0, %v19895_v49  ;;  %vm19896_vm5 = vcmp.eq.s32.totalorder %v10433_v54, %v11135_v24  ;;  %vm19897_vm0 = vcmp.eq.s32.totalorder %v10433_v54, %v10411_v34  ;;  %vm19900_vm11 = vcmp.lt.s32.totalorder %v10806_v4, 99  ;;  %5064 = vmatprep.mubr.f32.mxu0 %v5063_v39 }
  0xed   :  { %vm11350_vm3 = vmor %vm19897_vm0, %vm19896_vm5  ;;  %v590_v49 = vsel %vm19900_vm11, %v10806_v4, 99  ;;  %v11363_v33 = vmul.f32 0.27222222, %v10461_v5  ;;  %vm19901_vm5 = vcmp.eq.s32.totalorder %v10430_v18, %v11135_v24  ;;  %vm19902_vm0 = vcmp.eq.s32.totalorder %v10430_v18, %v10411_v34  ;;  %2472 = vmatmul.mubr.f32.gmra.mrb[6].mxu1 %v2471_v35  ;;  %v638_v4 = vpop.permute.xlu0 %637  ;;  %9556 = vset.pattern.permute.xlu1 %v19639_v63 }
  0xee   :  { %vm11371_vm9 = vmor %vm19902_vm0, %vm19901_vm5  ;;  %v5069_v15 = vand.u32 4294901760, %v5068_v56  ;;  %vm998_vm14 = vcmp.eq.s32.totalorder %v10430_v18, %v11031_v7  ;;  %v19905_v34 = vmov 0  ;;  %vm19908_vm4 = vcmp.lt.s32.totalorder %v536_v40, 99  ;;  %v11441_v7 = vpop.permute.xlu1 %902  ;;  %1313 = vperm.xlu1 %9556, %v1248_v60  }
  0xef   :  { %vm11385_vm5 = vmor %vm11278_vm15, %vm11330_vm2  ;;  %v11390_v5 = vsel %vm19908_vm4, %v536_v40, 99  ;;  %v19909_v39 = vmov 0  ;;  %v11404_v24 = vadd.s32 100, %v590_v49  ;;  %v11406_v53 = vadd.s32 300, %v590_v49 }
  0xf0   :  { %v19906_v34 = vsel %vm11385_vm5, 4294967295, %v19905_v34  ;;  %vm11398_vm11 = vmor %vm11296_vm12, %vm11350_vm3  ;;  %5070 = vmatmul.mubr.f32.gmra.mrb[6].mxu0 %v5069_v15  ;;  %v9416_v40 = vtrunc.f32 %v127_v62  ;;  %vm742_vm15 = vcmp.eq.s32.totalorder %v10430_v18, %v10920_v32  ;;  %v19912_v13 = vmov 0 }
  0xf1   :  { %19907 = vst [vmem:[#allocation134_spill] sm:$0xff] %v19906_v34  ;;  %v19910_v39 = vsel %vm11398_vm11, 4294967295, %v19909_v39  ;;  %vm11414_vm12 = vmor %vm11261_vm7, %vm11315_vm6  ;;  %vm736_vm4 = vcmp.eq.s32.totalorder %v10416_v17, %v638_v4  ;;  %vm737_vm0 = vcmp.eq.s32.totalorder %v10427_v38, %v638_v4  ;;  %vm995_vm7 = vcmp.eq.s32.totalorder %v10433_v54, %v10692_v2  ;;  %v11574_v0 = vpop.permute.xlu0 %646 }
  0xf2   :  { %19911 = vst [vmem:[#allocation135_spill] sm:$0xff] %v19910_v39  ;;  %v19913_v13 = vsel %vm11414_vm12, 4294967295, %v19912_v13  ;;  %vm1126_vm2 = vmor %vm742_vm15, %vm998_vm14  ;;  %vm19915_vm6 = vcmp.lt.s32.totalorder %v240_v58, 99  ;;  %v1510_v57 = vadd.s32 300, %v11390_v5  ;;  %v19916_v29 = vmov 0  ;;  %9557 = vset.pattern.permute.xlu1 %v19621_v41 }
  0xf3   :  { %19914 = vst [vmem:[#allocation136_spill] sm:$0xff] %v19913_v13  ;;  %v11430_v32 = vsel %vm19915_vm6, %v240_v58, 99  ;;  %vm11435_vm3 = vmor %vm1126_vm2, %vm11371_vm9  ;;  %vm738_vm13 = vcmp.eq.s32.totalorder %v10430_v18, %v638_v4  ;;  %v7637_v26 = vsel %vm11385_vm5, 1.0, %v19757_v16  ;;  %v7639_v3 = vsel %vm11398_vm11, 1.0, %v19757_v16  ;;  %676 = vperm.xlu1 %9557, %v9759_v19  }
  0xf4   :  { %v19917_v29 = vsel %vm11435_vm3, 4294967295, %v19916_v29  ;;  %v11450_v55 = vadd.s32 200, %v11430_v32  ;;  %vm19919_vm2 = vcmp.eq.s32.totalorder %v10416_v17, %v10692_v2  ;;  %v7636_v62 = vsel %vm11414_vm12, 1.0, %v19757_v16  ;;  %1587 = vperm.xlu0 %9581, %v1510_v57  }
  0xf5   :  { %19918 = vst [vmem:[#allocation137_spill] sm:$0xff] %v19917_v29  ;;  %vm11460_vm15 = vmor %vm736_vm4, %vm19919_vm2  ;;  %v9417_v35 = vcvt.f32.s32 %v9416_v40  ;;  %vm19922_vm4 = vcmp.eq.s32.totalorder %v10427_v38, %v10692_v2  ;;  %v7604_v56 = vadd.f32 180.0, %v10682_v9  ;;  %vm19925_vm9 = vcmp.eq.s32.totalorder %v10430_v18, %v10692_v2 }
  0xf6   :  { %vm11478_vm2 = vmor %vm737_vm0, %vm19922_vm4  ;;  %v11494_v49 = vsub.f32 %v7637_v26, %v7637_v26  ;;  %v11496_v43 = vsub.f32 %v7639_v3, %v7639_v3  ;;  %v7638_v9 = vsel %vm11435_vm3, 1.0, %v19757_v16  ;;  %v11514_v40 = vsub.f32 %v7636_v62, %v7636_v62  ;;  %v39_v26 = vld [vmem:[%s18537_s0 + $0xe0] sm:$0xff] }
  0xf7   :  { %vm11490_vm14 = vmor %vm738_vm13, %vm19925_vm9  ;;  %vm19930_vm13 = vcmp.eq.s32.totalorder %v10433_v54, %v638_v4  ;;  %v420_v57 = vfloor.f32 %v11363_v33  ;;  %vm19934_vm3 = vcmp.eq.s32.totalorder %v10416_v17, %v10355_v28  ;;  %v11534_v33 = vpop.permute.xlu1 %1286  ;;  %v11536_v4 = vadd.s32 1, %v9417_v35  ;;  %9558 = vset.pattern.permute.xlu1 %v19632_v46 }
  0xf8   :  { %19928 = vst [vmem:[#allocation138_spill] sm:$0xff] %v11494_v49  ;;  %19929 = vst [vmem:[#allocation139_spill] sm:$0xff] %v11496_v43  ;;  %vm19939_vm0 = vcmp.eq.s32.totalorder %v10427_v38, %v10800_v8  ;;  %v11558_v62 = vsub.f32 %v7638_v9, %v7638_v9  ;;  %vm19943_vm6 = vcmp.eq.s32.totalorder %v10430_v18, %v10355_v28  ;;  %v7612_v13 = vadd.f32 180.0, %v39_v26 }
  0xf9   :  { %vm11510_vm9 = vmor %vm19930_vm13, %vm995_vm7  ;;  %19933 = vst [vmem:[#allocation140_spill] sm:$0xff] %v11514_v40  ;;  %vm19935_vm7 = vcmp.eq.s32.totalorder %v10416_v17, %v10800_v8  ;;  %vm19944_vm11 = vcmp.eq.s32.totalorder %v10430_v18, %v10800_v8  ;;  %vm19952_vm5 = vcmp.eq.s32.totalorder %v10433_v54, %v10800_v8  ;;  %v9490_v29 = vtrunc.f32 %v420_v57  ;;  %932 = vperm.xlu1 %9558, %v11404_v24  }
  0xfa   :  { %vm11529_vm13 = vmor %vm19935_vm7, %vm19934_vm3  ;;  %vm19938_vm7 = vcmp.eq.s32.totalorder %v10427_v38, %v10355_v28  ;;  %19942 = vst [vmem:[#allocation141_spill] sm:$0xff] %v11558_v62  ;;  %vm19948_vm3 = vcmp.eq.s32.totalorder %v10416_v17, %v11226_v22  ;;  %v19966_v58 = vmov 0  ;;  %v11656_v26 = vmul.f32 0.27222222, %v7604_v56 }
  0xfb   :  { %vm11553_vm12 = vmor %vm19939_vm0, %vm19938_vm7  ;;  %vm19947_vm7 = vcmp.eq.s32.totalorder %v10416_v17, %v10922_v21  ;;  %v11653_v2 = vpop.permute.xlu1 %649  ;;  %v9491_v3 = vcvt.f32.s32 %v9490_v29  ;;  %v19973_v34 = vmov 0  ;;  %v19977_v29 = vand.u32 4294901760, %v11494_v49 }
  0xfc   :  { %vm11570_vm0 = vmor %vm19944_vm11, %vm19943_vm6  ;;  %vm19951_vm6 = vcmp.eq.s32.totalorder %v10433_v54, %v10355_v28  ;;  %v19959_v28 = vmov 0  ;;  %v19978_v31 = vand.u32 4294901760, %v11496_v43  ;;  %v19979_v24 = vmov 0 }
  0xfd   :  { %vm11584_vm4 = vmor %vm19948_vm3, %vm19947_vm7  ;;  %vm19955_vm3 = vcmp.eq.s32.totalorder %v10427_v38, %v10922_v21  ;;  %vm19956_vm7 = vcmp.eq.s32.totalorder %v10427_v38, %v11226_v22  ;;  %v11689_v56 = vsub.f32 %v11494_v49, %v19977_v29  ;;  %v19983_v9 = vand.u32 4294901760, %v11514_v40  ;;  %9560 = vset.pattern.permute.xlu1 %v19622_v44 }
  0xfe   :  { %vm11596_vm10 = vmor %vm19952_vm5, %vm19951_vm6  ;;  %vm1640_vm6 = vcmp.eq.s32.totalorder %v10416_v17, %v11375_v37  ;;  %v11694_v35 = vsub.f32 %v11496_v43, %v19978_v31  ;;  %v391_v31 = vmul.f32 0.27222222, %v7612_v13  ;;  %1572 = vperm.xlu1 %9560, %v11406_v53   ;;  %v20008_v53 = vmov 0 }
  0xff   :  { %vm11607_vm11 = vmor %vm19956_vm7, %vm19955_vm3  ;;  %v11716_v15 = vsub.f32 %v11514_v40, %v19983_v9  ;;  %v484_v40 = vadd.s32 1, %v9491_v3  ;;  %v19993_v3 = vand.u32 4294901760, %v11558_v62  ;;  %v20012_v39 = vmov 0 }
 0x100   :  { %vm11615_vm5 = vmor %vm11460_vm15, %vm11529_vm13  ;;  %vm19963_vm15 = vcmp.eq.s32.totalorder %v10430_v18, %v11226_v22 }
 0x101   :  { %v19960_v28 = vsel %vm11615_vm5, 4294967295, %v19959_v28  ;;  %vm11633_vm13 = vmor %vm19963_vm15, %vm19962_vm8  ;;  %v7632_v57 = vsel %vm11615_vm5, 1.0, %v19757_v16  ;;  %vm19969_vm8 = vcmp.eq.s32.totalorder %v10433_v54, %v10922_v21  ;;  %v11759_v49 = vsub.f32 %v11558_v62, %v19993_v3  ;;  %v11780_v62 = vpop.permute.xlu1 %905 }
 0x102   :  { %19961 = vst [vmem:[#allocation142_spill] sm:$0xff] %v19960_v28  ;;  %vm11641_vm1 = vmor %vm11478_vm2, %vm11553_vm12  ;;  %vm19970_vm12 = vcmp.eq.s32.totalorder %v10433_v54, %v11226_v22  ;;  %v11684_v22 = vsub.f32 %v7632_v57, %v7632_v57  ;;  %9561 = vset.pattern.permute.xlu1 %v19621_v41 }
 0x103   :  { %v19967_v58 = vsel %vm11641_vm1, 4294967295, %v19966_v58  ;;  %vm11664_vm2 = vmor %vm19970_vm12, %vm19969_vm8  ;;  %v7633_v21 = vsel %vm11641_vm1, 1.0, %v19757_v16  ;;  %vm20000_vm8 = vcmp.eq.s32.totalorder %v10433_v54, %v11286_v1  ;;  %679 = vperm.xlu1 %9561, %v11430_v32  }
 0x104   :  { %19968 = vst [vmem:[#allocation143_spill] sm:$0xff] %v19967_v58  ;;  %vm11672_vm15 = vmor %vm11490_vm14, %vm11570_vm0  ;;  %v11708_v57 = vsub.f32 %v7633_v21, %v7633_v21  ;;  %vm19989_vm0 = vcmp.eq.s32.totalorder %v10427_v38, %v11286_v1 }
 0x105   :  { %v19974_v34 = vsel %vm11672_vm15, 4294967295, %v19973_v34  ;;  %19976 = vst [vmem:[#allocation145_spill] sm:$0xff] %v11684_v22  ;;  %vm11700_vm14 = vmor %vm11510_vm9, %vm11596_vm10  ;;  %v7634_v29 = vsel %vm11672_vm15, 1.0, %v19757_v16  ;;  %vm19984_vm9 = vcmp.eq.s32.totalorder %v10416_v17, %v11286_v1  ;;  %vm20052_vm15 = vcmp.eq.s32.totalorder %v10433_v54, %v10377_v6 }
 0x106   :  { %19975 = vst [vmem:[#allocation144_spill] sm:$0xff] %v19974_v34  ;;  %v19980_v24 = vsel %vm11700_vm14, 4294967295, %v19979_v24  ;;  %19982 = vst [vmem:[#allocation147_spill] sm:$0xff] %v11708_v57  ;;  %v7635_v13 = vsel %vm11700_vm14, 1.0, %v19757_v16  ;;  %v11737_v60 = vsub.f32 %v7634_v29, %v7634_v29  ;;  %v20016_v34 = vmov 0 }
 0x107   :  { %19981 = vst [vmem:[#allocation146_spill] sm:$0xff] %v19980_v24  ;;  %vm11725_vm12 = vmor %vm19984_vm9, %vm1640_vm6  ;;  %vm19988_vm9 = vcmp.eq.s32.totalorder %v10427_v38, %v11375_v37  ;;  %v11754_v9 = vsub.f32 %v7635_v13, %v7635_v13  ;;  %v19998_v13 = vand.u32 4294901760, %v11684_v22  ;;  %vm541_vm6 = vcmp.gt.s32.totalorder %v484_v40, 0  ;;  %9562 = vset.pattern.permute.xlu1 %v19639_v63 }
 0x108   :  { %19987 = vst [vmem:[#allocation148_spill] sm:$0xff] %v11737_v60  ;;  %vm11747_vm10 = vmor %vm19989_vm0, %vm19988_vm9  ;;  %vm19994_vm0 = vcmp.eq.s32.totalorder %v10430_v18, %v11375_v37  ;;  %vm19995_vm9 = vcmp.eq.s32.totalorder %v10430_v18, %v11286_v1  ;;  %v2495_v24 = vand.u32 4294901760, %v11689_v56  ;;  %v20004_v1 = vmov 0  ;;  %1319 = vperm.xlu1 %9562, %v11450_v55  }
 0x109   :  { %19992 = vst [vmem:[#allocation149_spill] sm:$0xff] %v11754_v9  ;;  %vm11769_vm7 = vmor %vm19995_vm9, %vm19994_vm0  ;;  %v2485_v3 = vsub.f32 %v11684_v22, %v19998_v13  ;;  %vm19999_vm9 = vcmp.eq.s32.totalorder %v10433_v54, %v11375_v37  ;;  %v20003_v13 = vand.u32 4294901760, %v11708_v57  ;;  %v423_v37 = vfloor.f32 %v391_v31 }
 0x10a   :  { %vm11790_vm3 = vmor %vm20000_vm8, %vm19999_vm9  ;;  %v20007_v58 = vand.u32 4294901760, %v11737_v60  ;;  %v5093_v22 = vand.u32 4294901760, %v11694_v35  ;;  %v415_v56 = vfloor.f32 %v11656_v26  ;;  %v20011_v31 = vand.u32 4294901760, %v11754_v9 }
 0x10b   :  { %v2479_v29 = vsub.f32 %v11708_v57, %v20003_v13  ;;  %vm11806_vm8 = vmor %vm11584_vm4, %vm11725_vm12  ;;  %v2486_v27 = vand.u32 4294901760, %v2485_v3  ;;  %v542_v35 = vsel %vm541_vm6, %v484_v40, 0  ;;  %vm20026_vm12 = vcmp.eq.s32.totalorder %v10427_v38, %v11574_v0 }
 0x10c   :  { %v20005_v1 = vsel %vm11806_vm8, 4294967295, %v20004_v1  ;;  %v5083_v13 = vsub.f32 %v11737_v60, %v20007_v58  ;;  %vm11819_vm9 = vmor %vm11607_vm11, %vm11747_vm10  ;;  %v5077_v21 = vsub.f32 %v11754_v9, %v20011_v31  ;;  %v7640_v58 = vsel %vm11806_vm8, 1.0, %v19757_v16  ;;  %9563 = vset.pattern.permute.xlu1 %v19622_v44 }
 0x10d   :  { %20006 = vst [vmem:[#allocation150_spill] sm:$0xff] %v20005_v1  ;;  %v20009_v53 = vsel %vm11819_vm9, 4294967295, %v20008_v53  ;;  %v2480_v23 = vand.u32 4294901760, %v2479_v29  ;;  %vm11834_vm4 = vmor %vm11633_vm13, %vm11769_vm7  ;;  %v7641_v26 = vsel %vm11819_vm9, 1.0, %v19757_v16  ;;  %v11841_v29 = vsub.f32 %v7640_v58, %v7640_v58  ;;  %1575 = vperm.xlu1 %9563, %v11338_v11  }
 0x10e   :  { %20010 = vst [vmem:[#allocation151_spill] sm:$0xff] %v20009_v53  ;;  %v20013_v39 = vsel %vm11834_vm4, 4294967295, %v20012_v39  ;;  %v5084_v43 = vand.u32 4294901760, %v5083_v13  ;;  %vm605_vm11 = vcmp.lt.s32.totalorder %v542_v35, 99  ;;  %vm11847_vm10 = vmor %vm11664_vm2, %vm11790_vm3  ;;  %v5078_v40 = vand.u32 4294901760, %v5077_v21  ;;  %v11857_v13 = vpop.permute.xlu1 %1545 }
 0x10f   :  { %20014 = vst [vmem:[#allocation152_spill] sm:$0xff] %v20013_v39  ;;  %20015 = vst [vmem:[#allocation153_spill] sm:$0xff] %v11841_v29  ;;  %v20017_v34 = vsel %vm11847_vm10, 4294967295, %v20016_v34  ;;  %2481 = vmatprep.mubr.f32.mxu1 %v2480_v23  ;;  %v11851_v8 = vsub.f32 %v7641_v26, %v7641_v26  ;;  %v7642_v3 = vsel %vm11834_vm4, 1.0, %v19757_v16  ;;  %v9496_v31 = vtrunc.f32 %v423_v37 }
 0x110   :  { %20018 = vst [vmem:[#allocation154_spill] sm:$0xff] %v20017_v34  ;;  %vm20020_vm7 = vcmp.eq.s32.totalorder %v10416_v17, %v11441_v7  ;;  %vm20021_vm3 = vcmp.eq.s32.totalorder %v10416_v17, %v11574_v0  ;;  %2487 = vmatmul.mubr.f32.gmra.mrb[8].mxu1 %v2486_v27  ;;  %v7643_v28 = vsel %vm11847_vm10, 1.0, %v19757_v16  ;;  %v18813_v23 = vand.u32 4294901760, %v11841_v29  ;;  %5079 = vmatprep.mubr.f32.mxu0 %v5078_v40  ;;  %v9608_v40 = vld [vmem:[%s18537_s0 + $0xa8] sm:$0xff] }
 0x111   :  { %20019 = vst [vmem:[#allocation155_spill] sm:$0xff] %v11851_v8  ;;  %vm11865_vm13 = vmor %vm20021_vm3, %vm20020_vm7  ;;  %v11873_v21 = vsub.f32 %v7642_v3, %v7642_v3  ;;  %v11876_v37 = vsel %vm605_vm11, %v542_v35, 99  ;;  %vm20025_vm2 = vcmp.eq.s32.totalorder %v10427_v38, %v11441_v7  ;;  %2496 = vmatprep.mubr.f32.mxu1 %v2495_v24  ;;  %v2501_v58 = vand.u32 4294901760, %v11716_v15  ;;  %5085 = vmatmul.mubr.f32.gmra.mrb[8].mxu0 %v5084_v43 }
 0x112   :  { %vm11884_vm6 = vmor %vm20026_vm12, %vm20025_vm2  ;;  %v18814_v26 = vand.u32 4294901760, %v11851_v8  ;;  %v11890_v3 = vsub.f32 %v7643_v28, %v7643_v28  ;;  %v9480_v32 = vtrunc.f32 %v415_v56  ;;  %vm20030_vm11 = vcmp.eq.s32.totalorder %v10430_v18, %v11441_v7  ;;  %5094 = vmatprep.mubr.f32.mxu0 %v5093_v22  ;;  %9564 = vset.pattern.permute.xlu1 %v19632_v46 }
 0x113   :  { %20024 = vst [vmem:[#allocation156_spill] sm:$0xff] %v11873_v21  ;;  %vm20031_vm7 = vcmp.eq.s32.totalorder %v10430_v18, %v11574_v0  ;;  %v2515_v24 = vsub.f32 %v11841_v29, %v18813_v23  ;;  %vm20034_vm2 = vcmp.gt.s32.totalorder %v11536_v4, 0  ;;  %v7573_v28 = vadd.f32 90.0, %v9608_v40 }
 0x114   :  { %20029 = vst [vmem:[#allocation157_spill] sm:$0xff] %v11890_v3  ;;  %vm11898_vm3 = vmor %vm20031_vm7, %vm20030_vm11  ;;  %v11909_v56 = vsel %vm20034_vm2, %v11536_v4, 0  ;;  %vm20035_vm12 = vcmp.eq.s32.totalorder %v10433_v54, %v11441_v7  ;;  %vm20036_vm11 = vcmp.eq.s32.totalorder %v10433_v54, %v11574_v0  ;;  %v2509_v4 = vsub.f32 %v11851_v8, %v18814_v26  ;;  %2502 = vmatmul.mubr.f32.gmra.mrb[10].mxu1 %v2501_v58  ;;  %v11948_v26 = vpop.permute.xlu1 %652 }
 0x115   :  { %vm11920_vm7 = vmor %vm20036_vm11, %vm20035_vm12  ;;  %v18830_v23 = vand.u32 4294901760, %v11890_v3  ;;  %v1513_v15 = vadd.s32 300, %v11876_v37  ;;  %v9497_v40 = vcvt.f32.s32 %v9496_v31  ;;  %vm20039_vm12 = vcmp.eq.s32.totalorder %v10416_v17, %v10377_v6 }
 0x116   :  { %vm20040_vm11 = vcmp.eq.s32.totalorder %v10416_v17, %v11534_v33  ;;  %v5099_v7 = vand.u32 4294901760, %v11759_v49  ;;  %v20043_v22 = vand.u32 4294901760, %v11873_v21  ;;  %v2510_v49 = vand.u32 4294901760, %v2509_v4 }
 0x117   :  { %vm11939_vm0 = vmor %vm20040_vm11, %vm20039_vm12  ;;  %vm20044_vm12 = vcmp.eq.s32.totalorder %v10427_v38, %v10377_v6  ;;  %vm20045_vm11 = vcmp.eq.s32.totalorder %v10427_v38, %v11534_v33  ;;  %1596 = vperm.xlu0 %9581, %v1513_v15   ;;  %v9481_v29 = vcvt.f32.s32 %v9480_v32  ;;  %v487_v55 = vadd.s32 1, %v9497_v40 }
 0x118   :  { %v5113_v31 = vsub.f32 %v11873_v21, %v20043_v22  ;;  %vm11958_vm2 = vmor %vm20045_vm11, %vm20044_vm12  ;;  %v5107_v22 = vsub.f32 %v11890_v3, %v18830_v23  ;;  %v11967_v21 = vadd.s32 100, %v10788_v42  ;;  %vm20048_vm12 = vcmp.eq.s32.totalorder %v10430_v18, %v10377_v6  ;;  %5100 = vmatmul.mubr.f32.gmra.mrb[10].mxu0 %v5099_v7  ;;  %2511 = vmatprep.mubr.f32.mxu1 %v2510_v49  ;;  %v12026_v40 = vpop.permute.xlu1 %1292  ;;  %v12177_v3 = vld [vmem:[%s18537_s0 + $0xb8] sm:$0xff] }
 0x119   :  { %vm20049_vm11 = vcmp.eq.s32.totalorder %v10430_v18, %v11534_v33  ;;  %v2516_v42 = vand.u32 4294901760, %v2515_v24  ;;  %v96_v32 = vmul.f32 0.54444444, %v7573_v28  ;;  %vm20053_vm9 = vcmp.eq.s32.totalorder %v10433_v54, %v11534_v33  ;;  %vm12004_vm8 = vmor %vm11865_vm13, %vm11939_vm0 }
 0x11a   :  { %vm11977_vm4 = vmor %vm20049_vm11, %vm20048_vm12  ;;  %vm753_vm12 = vcmp.eq.s32.totalorder %v10427_v38, %v11653_v2  ;;  %v5108_v24 = vand.u32 4294901760, %v5107_v22  ;;  %v20056_v6 = vmov 0  ;;  %v5114_v33 = vand.u32 4294901760, %v5113_v31  ;;  %938 = vperm.xlu1 %9564, %v11967_v21  }
 0x11b   :  { %vm11990_vm5 = vmor %vm20053_vm9, %vm20052_vm15  ;;  %v20057_v6 = vsel %vm12004_vm8, 4294967295, %v20056_v6  ;;  %vm1008_vm15 = vcmp.eq.s32.totalorder %v10416_v17, %v11780_v62  ;;  %vm1009_vm9 = vcmp.eq.s32.totalorder %v10427_v38, %v11780_v62  ;;  %2517 = vmatmul.mubr.f32.gmra.mrb[12].mxu1 %v2516_v42  ;;  %vm547_vm11 = vcmp.gt.s32.totalorder %v487_v55, 0 }
 0x11c   :  { %20058 = vst [vmem:[#allocation158_spill] sm:$0xff] %v20057_v6  ;;  %vm12016_vm10 = vmor %vm11884_vm6, %vm11958_vm2  ;;  %v20059_v28 = vmov 0  ;;  %5109 = vmatprep.mubr.f32.mxu0 %v5108_v24  ;;  %vm1010_vm0 = vcmp.eq.s32.totalorder %v10430_v18, %v11780_v62  ;;  %v7644_v19 = vsel %vm12004_vm8, 1.0, %v19757_v16  ;;  %v548_v0 = vsel %vm547_vm11, %v487_v55, 0 }
 0x11d   :  { %v20060_v28 = vsel %vm12016_vm10, 4294967295, %v20059_v28  ;;  %v479_v7 = vadd.s32 1, %v9481_v29  ;;  %vm12032_vm13 = vmor %vm11898_vm3, %vm11977_vm4  ;;  %v20062_v27 = vmov 0  ;;  %vm1011_vm6 = vcmp.eq.s32.totalorder %v10433_v54, %v11780_v62  ;;  %5115 = vmatmul.mubr.f32.gmra.mrb[12].mxu0 %v5114_v33 }
 0x11e   :  { %20061 = vst [vmem:[#allocation159_spill] sm:$0xff] %v20060_v28  ;;  %v20063_v27 = vsel %vm12032_vm13, 4294967295, %v20062_v27  ;;  %v7645_v31 = vsel %vm12016_vm10, 1.0, %v19757_v16  ;;  %v12041_v58 = vsub.f32 %v7644_v19, %v7644_v19  ;;  %v128_v29 = vfloor.f32 %v96_v32  ;;  %vm12048_vm4 = vmor %vm11920_vm7, %vm11990_vm5  ;;  %9565 = vset.pattern.permute.xlu1 %v19639_v63 }
 0x11f   :  { %20064 = vst [vmem:[#allocation160_spill] sm:$0xff] %v20063_v27  ;;  %v20066_v35 = vmov 0  ;;  %v12052_v49 = vsub.f32 %v7645_v31, %v7645_v31  ;;  %v7646_v11 = vsel %vm12032_vm13, 1.0, %v19757_v16  ;;  %vm20070_vm5 = vcmp.eq.s32.totalorder %v10416_v17, %v11653_v2  ;;  %vm12083_vm2 = vmor %vm753_vm12, %vm1009_vm9  ;;  %v20712_v27 = vld [vmem:[#allocation25_spill] sm:$0xff] }
 0x120   :  { %20065 = vst [vmem:[#allocation161_spill] sm:$0xff] %v12041_v58  ;;  %v20067_v35 = vsel %vm12048_vm4, 4294967295, %v20066_v35  ;;  %vm12067_vm7 = vmor %vm20070_vm5, %vm1008_vm15  ;;  %v7647_v22 = vsel %vm12048_vm4, 1.0, %v19757_v16  ;;  %v18829_v4 = vand.u32 4294901760, %v12041_v58  ;;  %v12075_v42 = vsub.f32 %v7646_v11, %v7646_v11 }
 0x121   :  { %20068 = vst [vmem:[#allocation162_spill] sm:$0xff] %v20067_v35  ;;  %20069 = vst [vmem:[#allocation163_spill] sm:$0xff] %v12052_v49  ;;  %vm611_vm11 = vcmp.lt.s32.totalorder %v548_v0, 99  ;;  %v18831_v32 = vand.u32 4294901760, %v12052_v49  ;;  %v12088_v15 = vsub.f32 %v7647_v22, %v7647_v22  ;;  %vm20077_vm5 = vcmp.eq.s32.totalorder %v10430_v18, %v11653_v2 }
 0x122   :  { %20073 = vst [vmem:[#allocation164_spill] sm:$0xff] %v12075_v42  ;;  %v12090_v24 = vsel %vm611_vm11, %v548_v0, 99  ;;  %vm12098_vm3 = vmor %vm20077_vm5, %vm1010_vm0  ;;  %v2530_v19 = vsub.f32 %v12041_v58, %v18829_v4  ;;  %v12107_v0 = vpop.permute.xlu1 %1548  ;;  %v9418_v22 = vtrunc.f32 %v128_v29  ;;  %vm20080_vm9 = vcmp.eq.s32.totalorder %v10433_v54, %v11653_v2 }
 0x123   :  { %20076 = vst [vmem:[#allocation165_spill] sm:$0xff] %v12088_v15  ;;  %v1516_v11 = vadd.s32 300, %v12090_v24  ;;  %vm12118_vm0 = vmor %vm20080_vm9, %vm1011_vm6  ;;  %v2524_v23 = vsub.f32 %v12052_v49, %v18831_v32  ;;  %v18840_v31 = vand.u32 4294901760, %v12088_v15  ;;  %vm1650_vm11 = vcmp.eq.s32.totalorder %v10430_v18, %v11857_v13 }
 0x124   :  { %v1251_v62 = vadd.s32 200, %v10241_v14  ;;  %vm20083_vm9 = vcmp.eq.s32.totalorder %v10416_v17, %v11857_v13  ;;  %vm20084_vm12 = vcmp.eq.s32.totalorder %v10416_v17, %v10420_v52  ;;  %v20087_v21 = vand.u32 4294901760, %v12075_v42 }
 0x125   :  { %vm12140_vm15 = vmor %vm20084_vm12, %vm20083_vm9  ;;  %1605 = vperm.xlu0 %9581, %v1516_v11   ;;  %v2525_v32 = vand.u32 4294901760, %v2524_v23  ;;  %v5122_v14 = vsub.f32 %v12088_v15, %v18840_v31  ;;  %vm20088_vm5 = vcmp.eq.s32.totalorder %v10427_v38, %v11857_v13  ;;  %vm20089_vm6 = vcmp.eq.s32.totalorder %v10427_v38, %v10420_v52 }
 0x126   :  { %v5128_v29 = vsub.f32 %v12075_v42, %v20087_v21  ;;  %vm12156_vm12 = vmor %vm20089_vm6, %vm20088_vm5  ;;  %vm20092_vm9 = vcmp.lt.s32.totalorder %v11909_v56, 99  ;;  %vm20093_vm13 = vcmp.gt.s32.totalorder %v479_v7, 0  ;;  %v12165_v11 = vadd.s32 200, %v10294_v30  ;;  %1322 = vperm.xlu1 %9565, %v1251_v62  }
 0x127   :  { %v308_v21 = vsel %vm20092_vm9, %v11909_v56, 99  ;;  %v532_v23 = vsel %vm20093_vm13, %v479_v7, 0  ;;  %vm20094_vm8 = vcmp.eq.s32.totalorder %v10430_v18, %v10420_v52  ;;  %v2531_v42 = vand.u32 4294901760, %v2530_v19  ;;  %2526 = vmatprep.mubr.f32.mxu1 %v2525_v32  ;;  %vm12207_vm13 = vmor %vm12067_vm7, %vm12140_vm15 }
 0x128   :  { %vm12170_vm4 = vmor %vm20094_vm8, %vm1650_vm11  ;;  %v1252_v15 = vadd.s32 200, %v308_v21  ;;  %v9419_v49 = vcvt.f32.s32 %v9418_v22  ;;  %v12180_v56 = vadd.s32 200, %v10340_v45  ;;  %v5123_v30 = vand.u32 4294901760, %v5122_v14  ;;  %v12197_v45 = vpop.permute.xlu1 %911 }
 0x129   :  { %vm20097_vm11 = vcmp.eq.s32.totalorder %v10433_v54, %v11857_v13  ;;  %vm20098_vm5 = vcmp.eq.s32.totalorder %v10433_v54, %v10420_v52  ;;  %vm1014_vm9 = vcmp.eq.s32.totalorder %v10430_v18, %v11005_v48  ;;  %v20101_v52 = vmov 0  ;;  %2532 = vmatmul.mubr.f32.gmra.mrb[14].mxu1 %v2531_v42  ;;  %9592 = vset.pattern.permute.xlu0 %v19639_v63 }
 0x12a   :  { %vm12192_vm6 = vmor %vm20098_vm5, %vm20097_vm11  ;;  %v20102_v52 = vsel %vm12207_vm13, 4294967295, %v20101_v52  ;;  %v5129_v13 = vand.u32 4294901760, %v5128_v29  ;;  %vm595_vm11 = vcmp.lt.s32.totalorder %v532_v23, 99  ;;  %5124 = vmatprep.mubr.f32.mxu0 %v5123_v30  ;;  %v20104_v32 = vmov 0  ;;  %1325 = vperm.xlu0 %9592, %v1252_v15  }
 0x12b   :  { %20103 = vst [vmem:[#allocation166_spill] sm:$0xff] %v20102_v52  ;;  %vm12215_vm5 = vmor %vm12083_vm2, %vm12156_vm12  ;;  %vm756_vm8 = vcmp.eq.s32.totalorder %v10416_v17, %v11948_v26  ;;  %vm757_vm7 = vcmp.eq.s32.totalorder %v10427_v38, %v11948_v26  ;;  %v7648_v43 = vsel %vm12207_vm13, 1.0, %v19757_v16  ;;  %v7575_v58 = vadd.f32 90.0, %v12177_v3  ;;  %9566 = vset.pattern.permute.xlu1 %v19621_v41 }
 0x12c   :  { %v20105_v32 = vsel %vm12215_vm5, 4294967295, %v20104_v32  ;;  %vm12232_vm2 = vmor %vm12098_vm3, %vm12170_vm4  ;;  %v20107_v42 = vmov 0  ;;  %5130 = vmatmul.mubr.f32.gmra.mrb[14].mxu0 %v5129_v13  ;;  %vm758_vm15 = vcmp.eq.s32.totalorder %v10430_v18, %v11948_v26  ;;  %v7649_v55 = vsel %vm12215_vm5, 1.0, %v19757_v16  ;;  %v12278_v14 = vpop.permute.xlu1 %1295  ;;  %685 = vperm.xlu1 %9566, %v308_v21  }
 0x12d   :  { %20106 = vst [vmem:[#allocation167_spill] sm:$0xff] %v20105_v32  ;;  %v20108_v42 = vsel %vm12232_vm2, 4294967295, %v20107_v42  ;;  %v12241_v19 = vsub.f32 %v7648_v43, %v7648_v43  ;;  %v192_v22 = vadd.s32 1, %v9419_v49  ;;  %vm12247_vm4 = vmor %vm12118_vm0, %vm12192_vm6  ;;  %v20111_v33 = vmov 0 }
 0x12e   :  { %20109 = vst [vmem:[#allocation168_spill] sm:$0xff] %v20108_v42  ;;  %v20112_v33 = vsel %vm12247_vm4, 4294967295, %v20111_v33  ;;  %vm759_vm3 = vcmp.eq.s32.totalorder %v10433_v54, %v11948_v26  ;;  %v12253_v31 = vsub.f32 %v7649_v55, %v7649_v55  ;;  %v7650_v62 = vsel %vm12232_vm2, 1.0, %v19757_v16 }
 0x12f   :  { %20110 = vst [vmem:[#allocation169_spill] sm:$0xff] %v12241_v19  ;;  %20113 = vst [vmem:[#allocation170_spill] sm:$0xff] %v20112_v33  ;;  %v596_v15 = vsel %vm595_vm11, %v532_v23, 99  ;;  %vm20115_vm12 = vcmp.eq.s32.totalorder %v10416_v17, %v11005_v48  ;;  %v7651_v4 = vsel %vm12247_vm4, 1.0, %v19757_v16  ;;  %v18849_v2 = vand.u32 4294901760, %v12241_v19 }
 0x130   :  { %20114 = vst [vmem:[#allocation171_spill] sm:$0xff] %v12253_v31  ;;  %vm12265_vm0 = vmor %vm756_vm8, %vm20115_vm12  ;;  %v12275_v29 = vsub.f32 %v7650_v62, %v7650_v62  ;;  %vm20119_vm8 = vcmp.eq.s32.totalorder %v10427_v38, %v11005_v48  ;;  %v18854_v30 = vand.u32 4294901760, %v12253_v31  ;;  %v12291_v7 = vsub.f32 %v7651_v4, %v7651_v4  ;;  %9567 = vset.pattern.permute.xlu1 %v19632_v46  ;;  %v12361_v8 = vpop.permute.xlu1 %658 }
 0x131   :  { %vm12286_vm11 = vmor %vm757_vm7, %vm20119_vm8  ;;  %v2545_v43 = vsub.f32 %v12241_v19, %v18849_v2  ;;  %v868_v62 = vadd.s32 100, %v596_v15  ;;  %vm20125_vm6 = vcmp.eq.s32.totalorder %v10433_v54, %v11005_v48  ;;  %vm20129_vm2 = vcmp.eq.s32.totalorder %v10416_v17, %v12026_v40  ;;  %v12346_v2 = vpop.permute.xlu0 %655 }
 0x132   :  { %20118 = vst [vmem:[#allocation172_spill] sm:$0xff] %v12275_v29  ;;  %20122 = vst [vmem:[#allocation173_spill] sm:$0xff] %v12291_v7  ;;  %v18857_v55 = vand.u32 4294901760, %v12275_v29  ;;  %v2539_v4 = vsub.f32 %v12253_v31, %v18854_v30  ;;  %v98_v9 = vmul.f32 0.54444444, %v7575_v58  ;;  %vm1399_vm8 = vcmp.eq.s32.totalorder %v10433_v54, %v12026_v40 }
 0x133   :  { %vm12303_vm7 = vmor %vm758_vm15, %vm1014_vm9  ;;  %vm1397_vm9 = vcmp.eq.s32.totalorder %v10427_v38, %v12026_v40  ;;  %v2546_v48 = vand.u32 4294901760, %v2545_v43  ;;  %v20132_v43 = vld [vmem:[#allocation98_spill] sm:$0xff]  ;;  %941 = vperm.xlu1 %9567, %v868_v62   ;;  %v7607_v58 = vadd.f32 180.0, %v12177_v3  ;;  %v20145_v3 = vmov 0 }
 0x134   :  { %vm12317_vm12 = vmor %vm759_vm3, %vm20125_vm6  ;;  %v5143_v26 = vsub.f32 %v12275_v29, %v18857_v55  ;;  %vm20128_vm6 = vcmp.eq.s32.totalorder %v10416_v17, %v12107_v0  ;;  %v2540_v19 = vand.u32 4294901760, %v2539_v4  ;;  %v20133_v55 = vand.u32 4294901760, %v12291_v7 }
 0x135   :  { %vm12342_vm13 = vmor %vm20129_vm2, %vm20128_vm6  ;;  %vm20134_vm3 = vcmp.eq.s32.totalorder %v10427_v38, %v12107_v0  ;;  %vm20137_vm2 = vcmp.gt.s32.totalorder %v192_v22, 0  ;;  %vm20142_vm6 = vcmp.eq.s32.totalorder %v10433_v54, %v12107_v0  ;;  %v130_v49 = vfloor.f32 %v98_v9  ;;  %v12439_v9 = vpop.permute.xlu1 %914 }
 0x136   :  { %v5137_v29 = vsub.f32 %v12291_v7, %v20133_v55  ;;  %vm12356_vm15 = vmor %vm1397_vm9, %vm20134_vm3  ;;  %v246_v60 = vsel %vm20137_vm2, %v192_v22, 0  ;;  %v5144_v55 = vand.u32 4294901760, %v5143_v26  ;;  %vm20138_vm9 = vcmp.eq.s32.totalorder %v10430_v18, %v12107_v0  ;;  %2541 = vmatprep.mubr.f32.mxu1 %v2540_v19  ;;  %v12406_v0 = vpop.permute.xlu0 %664 }
 0x137   :  { %vm20139_vm3 = vcmp.eq.s32.totalorder %v10430_v18, %v12026_v40  ;;  %vm12384_vm5 = vmor %vm1399_vm8, %vm20142_vm6  ;;  %v1508_v40 = vadd.s32 300, %v596_v15  ;;  %2547 = vmatmul.mubr.f32.gmra.mrb[16].mxu1 %v2546_v48  ;;  %vm761_vm8 = vcmp.eq.s32.totalorder %v10427_v38, %v12346_v2  ;;  %vm762_vm6 = vcmp.eq.s32.totalorder %v10430_v18, %v12346_v2  ;;  %9568 = vset.pattern.permute.xlu1 %v19622_v44 }
 0x138   :  { %vm12374_vm4 = vmor %vm20139_vm3, %vm20138_vm9  ;;  %v5138_v22 = vand.u32 4294901760, %v5137_v29  ;;  %vm309_vm10 = vcmp.lt.s32.totalorder %v246_v60, 99  ;;  %v20148_v19 = vmov 0  ;;  %vm1017_vm3 = vcmp.eq.s32.totalorder %v10427_v38, %v12197_v45 }
 0x139   :  { %vm12396_vm2 = vmor %vm12265_vm0, %vm12342_vm13  ;;  %vm1016_vm0 = vcmp.eq.s32.totalorder %v10416_v17, %v12197_v45  ;;  %v20151_v31 = vmov 0  ;;  %v386_v30 = vmul.f32 0.27222222, %v7607_v58  ;;  %v20155_v13 = vmov 0  ;;  %1581 = vperm.xlu1 %9568, %v1508_v40  }
 0x13a   :  { %v20146_v3 = vsel %vm12396_vm2, 4294967295, %v20145_v3  ;;  %5139 = vmatprep.mubr.f32.mxu0 %v5138_v22  ;;  %vm12412_vm13 = vmor %vm12286_vm11, %vm12356_vm15  ;;  %v7652_v15 = vsel %vm12396_vm2, 1.0, %v19757_v16  ;;  %vm1018_vm15 = vcmp.eq.s32.totalorder %v10430_v18, %v12197_v45  ;;  %vm1400_vm9 = vcmp.eq.s32.totalorder %v10416_v17, %v12278_v14  ;;  %v12478_v22 = vld [vmem:[%s18537_s0 + $0xd0] sm:$0xff] }
 0x13b   :  { %20147 = vst [vmem:[#allocation98_spill] sm:$0xff] %v20146_v3  ;;  %v20149_v19 = vsel %vm12412_vm13, 4294967295, %v20148_v19  ;;  %5145 = vmatmul.mubr.f32.gmra.mrb[16].mxu0 %v5144_v55  ;;  %vm12427_vm11 = vmor %vm12303_vm7, %vm12374_vm4  ;;  %v7653_v29 = vsel %vm12412_vm13, 1.0, %v19757_v16  ;;  %v12436_v23 = vsub.f32 %v7652_v15, %v7652_v15  ;;  %vm1019_vm7 = vcmp.eq.s32.totalorder %v10433_v54, %v12197_v45 }
 0x13c   :  { %20150 = vst [vmem:[#allocation174_spill] sm:$0xff] %v20149_v19  ;;  %v20152_v31 = vsel %vm12427_vm11, 4294967295, %v20151_v31  ;;  %vm12445_vm4 = vmor %vm12317_vm12, %vm12384_vm5  ;;  %v12451_v62 = vsub.f32 %v7653_v29, %v7653_v29  ;;  %v7654_v48 = vsel %vm12427_vm11, 1.0, %v19757_v16  ;;  %v310_v55 = vsel %vm309_vm10, %v246_v60, 99 }
 0x13d   :  { %20153 = vst [vmem:[#allocation175_spill] sm:$0xff] %v20152_v31  ;;  %20154 = vst [vmem:[#allocation176_spill] sm:$0xff] %v12436_v23  ;;  %v20156_v13 = vsel %vm12445_vm4, 4294967295, %v20155_v13  ;;  %vm20159_vm5 = vcmp.eq.s32.totalorder %v10416_v17, %v12346_v2  ;;  %v7655_v4 = vsel %vm12445_vm4, 1.0, %v19757_v16  ;;  %v18882_v58 = vand.u32 4294901760, %v12436_v23  ;;  %9569 = vset.pattern.permute.xlu1 %v19621_v41 }
 0x13e   :  { %20157 = vst [vmem:[#allocation177_spill] sm:$0xff] %v20156_v13  ;;  %20158 = vst [vmem:[#allocation178_spill] sm:$0xff] %v12451_v62  ;;  %v12473_v60 = vsub.f32 %v7654_v48, %v7654_v48  ;;  %v12493_v15 = vsub.f32 %v7655_v4, %v7655_v4  ;;  %v9422_v29 = vtrunc.f32 %v130_v49  ;;  %v12511_v49 = vpop.permute.xlu0 %673  ;;  %v418_v7 = vfloor.f32 %v386_v30  ;;  %v12528_v4 = vpop.permute.xlu1 %1554  ;;  %688 = vperm.xlu1 %9569, %v310_v55  }
 0x13f   :  { %vm12463_vm12 = vmor %vm20159_vm5, %vm1016_vm0  ;;  %vm1401_vm0 = vcmp.eq.s32.totalorder %v10427_v38, %v12278_v14  ;;  %v2560_v40 = vsub.f32 %v12436_v23, %v18882_v58  ;;  %v20171_v31 = vand.u32 4294901760, %v12451_v62  ;;  %v7578_v45 = vadd.f32 90.0, %v12478_v22 }
 0x140   :  { %20162 = vst [vmem:[#allocation179_spill] sm:$0xff] %v12473_v60  ;;  %vm12486_vm10 = vmor %vm761_vm8, %vm1017_vm3  ;;  %vm20168_vm8 = vcmp.eq.s32.totalorder %v10433_v54, %v12346_v2  ;;  %v9423_v30 = vcvt.f32.s32 %v9422_v29  ;;  %v12532_v23 = vadd.s32 100, %v11390_v5  ;;  %v20175_v29 = vand.u32 4294901760, %v12473_v60  ;;  %v20176_v5 = vld [vmem:[#allocation99_spill] sm:$0xff] }
 0x141   :  { %20165 = vst [vmem:[#allocation180_spill] sm:$0xff] %v12493_v15  ;;  %vm12501_vm5 = vmor %vm762_vm6, %vm1018_vm15  ;;  %v2554_v3 = vsub.f32 %v12451_v62, %v20171_v31  ;;  %v2561_v31 = vand.u32 4294901760, %v2560_v40  ;;  %vm20177_vm15 = vcmp.eq.s32.totalorder %v10427_v38, %v20132_v43  ;;  %v20180_v40 = vand.u32 4294901760, %v12493_v15 }
 0x142   :  { %vm12519_vm6 = vmor %vm20168_vm8, %vm1019_vm7  ;;  %vm20172_vm7 = vcmp.eq.s32.totalorder %v10416_v17, %v20132_v43  ;;  %v5158_v58 = vsub.f32 %v12473_v60, %v20175_v29  ;;  %v1253_v29 = vadd.s32 200, %v310_v55  ;;  %vm20181_vm3 = vcmp.eq.s32.totalorder %v10430_v18, %v20132_v43  ;;  %9571 = vset.pattern.permute.xlu1 %v19639_v63 }
 0x143   :  { %vm12542_vm8 = vmor %vm1400_vm9, %vm20172_vm7  ;;  %v2555_v13 = vand.u32 4294901760, %v2554_v3  ;;  %v5152_v42 = vsub.f32 %v12493_v15, %v20180_v40  ;;  %v194_v19 = vadd.s32 1, %v9423_v30  ;;  %v9486_v40 = vtrunc.f32 %v418_v7  ;;  %v12615_v7 = vpop.permute.xlu0 %682 }
 0x144   :  { %vm12557_vm11 = vmor %vm1401_vm0, %vm20177_vm15  ;;  %vm20182_vm0 = vcmp.eq.s32.totalorder %v10430_v18, %v12278_v14  ;;  %v5159_v3 = vand.u32 4294901760, %v5158_v58  ;;  %v12578_v15 = vmul.f32 0.54444444, %v7578_v45  ;;  %vm20185_vm7 = vcmp.eq.s32.totalorder %v10433_v54, %v20132_v43  ;;  %1328 = vperm.xlu1 %9571, %v1253_v29  }
 0x145   :  { %vm12574_vm15 = vmor %vm20182_vm0, %vm20181_vm3  ;;  %vm20186_vm2 = vcmp.eq.s32.totalorder %v10433_v54, %v12278_v14  ;;  %2556 = vmatprep.mubr.f32.mxu1 %v2555_v13  ;;  %v5153_v52 = vand.u32 4294901760, %v5152_v42  ;;  %v20189_v14 = vmov 0  ;;  %vm1021_vm0 = vcmp.eq.s32.totalorder %v10427_v38, %v12439_v9  ;;  %v12613_v42 = vpop.permute.xlu1 %661 }
 0x146   :  { %vm12588_vm4 = vmor %vm20186_vm2, %vm20185_vm7  ;;  %2562 = vmatmul.mubr.f32.gmra.mrb[18].mxu1 %v2561_v31  ;;  %vm1020_vm7 = vcmp.eq.s32.totalorder %v10416_v17, %v12439_v9  ;;  %vm249_vm13 = vcmp.gt.s32.totalorder %v194_v19, 0  ;;  %v9487_v43 = vcvt.f32.s32 %v9486_v40  ;;  %v20192_v13 = vmov 0 }
 0x147   :  { %vm12604_vm2 = vmor %vm12463_vm12, %vm12542_vm8  ;;  %5154 = vmatprep.mubr.f32.mxu0 %v5153_v52  ;;  %vm1022_vm8 = vcmp.eq.s32.totalorder %v10430_v18, %v12439_v9  ;;  %vm1023_vm9 = vcmp.eq.s32.totalorder %v10433_v54, %v12439_v9  ;;  %vm1660_vm3 = vcmp.eq.s32.totalorder %v10416_v17, %v12528_v4  ;;  %v20195_v52 = vmov 0  ;;  %v12722_v55 = vpop.permute.xlu0 %691 }
 0x148   :  { %v20190_v14 = vsel %vm12604_vm2, 4294967295, %v20189_v14  ;;  %vm12621_vm12 = vmor %vm12486_vm10, %vm12557_vm11  ;;  %v7656_v21 = vsel %vm12604_vm2, 1.0, %v19757_v16  ;;  %5160 = vmatmul.mubr.f32.gmra.mrb[18].mxu0 %v5159_v3  ;;  %v250_v26 = vsel %vm249_vm13, %v194_v19, 0  ;;  %v133_v30 = vfloor.f32 %v12578_v15  ;;  %v12664_v19 = vld [vmem:[%s18537_s0 + $0xe8] sm:$0xff]  ;;  %9572 = vset.pattern.permute.xlu1 %v19622_v44 }
 0x149   :  { %20191 = vst [vmem:[#allocation99_spill] sm:$0xff] %v20190_v14  ;;  %v20193_v13 = vsel %vm12621_vm12, 4294967295, %v20192_v13  ;;  %vm12638_vm11 = vmor %vm12501_vm5, %vm12574_vm15  ;;  %v7657_v62 = vsel %vm12621_vm12, 1.0, %v19757_v16  ;;  %v12645_v58 = vsub.f32 %v7656_v21, %v7656_v21  ;;  %v20199_v60 = vmov 0  ;;  %v12700_v21 = vpop.permute.xlu1 %1301  ;;  %1584 = vperm.xlu1 %9572, %v11341_v10   ;;  %v12728_v14 = vld [vmem:[%s18537_s0 + $0xc0] sm:$0xff] }
 0x14a   :  { %20194 = vst [vmem:[#allocation181_spill] sm:$0xff] %v20193_v13  ;;  %v20196_v52 = vsel %vm12638_vm11, 4294967295, %v20195_v52  ;;  %vm12652_vm10 = vmor %vm12519_vm6, %vm12588_vm4  ;;  %v12656_v48 = vsub.f32 %v7657_v62, %v7657_v62  ;;  %v7658_v45 = vsel %vm12638_vm11, 1.0, %v19757_v16  ;;  %vm313_vm5 = vcmp.lt.s32.totalorder %v250_v26, 99 }
 0x14b   :  { %20197 = vst [vmem:[#allocation182_spill] sm:$0xff] %v20196_v52  ;;  %20198 = vst [vmem:[#allocation183_spill] sm:$0xff] %v12645_v58  ;;  %v20200_v60 = vsel %vm12652_vm10, 4294967295, %v20199_v60  ;;  %v482_v2 = vadd.s32 1, %v9487_v43  ;;  %vm20203_vm13 = vcmp.eq.s32.totalorder %v10416_v17, %v12361_v8  ;;  %v7659_v15 = vsel %vm12652_vm10, 1.0, %v19757_v16 }
 0x14c   :  { %20201 = vst [vmem:[#allocation184_spill] sm:$0xff] %v20200_v60  ;;  %20202 = vst [vmem:[#allocation185_spill] sm:$0xff] %v12656_v48  ;;  %v18911_v31 = vand.u32 4294901760, %v12645_v58  ;;  %v12680_v29 = vsub.f32 %v7658_v45, %v7658_v45  ;;  %v12682_v3 = vsel %vm313_vm5, %v250_v26, 99  ;;  %vm20207_vm15 = vcmp.eq.s32.totalorder %v10427_v38, %v12361_v8 }
 0x14d   :  { %vm12672_vm4 = vmor %vm20203_vm13, %vm1020_vm7  ;;  %v12697_v43 = vsub.f32 %v7659_v15, %v7659_v15  ;;  %v1255_v62 = vadd.s32 200, %v12682_v3  ;;  %v7581_v52 = vadd.f32 90.0, %v12664_v19  ;;  %vm20224_vm5 = vcmp.eq.s32.totalorder %v10427_v38, %v12528_v4  ;;  %9573 = vset.pattern.permute.xlu1 %v19632_v46 }
 0x14e   :  { %20206 = vst [vmem:[#allocation186_spill] sm:$0xff] %v12680_v29  ;;  %vm12692_vm7 = vmor %vm20207_vm15, %vm1021_vm0  ;;  %vm20211_vm0 = vcmp.eq.s32.totalorder %v10430_v18, %v12361_v8  ;;  %v2575_v45 = vsub.f32 %v12645_v58, %v18911_v31  ;;  %v20217_v31 = vand.u32 4294901760, %v12656_v48  ;;  %v20218_v9 = vand.u32 4294901760, %v12680_v29  ;;  %947 = vperm.xlu1 %9573, %v12532_v23  }
 0x14f   :  { %20210 = vst [vmem:[#allocation187_spill] sm:$0xff] %v12697_v43  ;;  %vm12711_vm15 = vmor %vm20211_vm0, %vm1022_vm8  ;;  %vm20214_vm0 = vcmp.eq.s32.totalorder %v10433_v54, %v12361_v8  ;;  %1334 = vperm.xlu0 %9592, %v1255_v62   ;;  %vm20222_vm8 = vcmp.gt.s32.totalorder %v482_v2, 0  ;;  %v9428_v58 = vtrunc.f32 %v133_v30  ;;  %vm20225_vm6 = vcmp.eq.s32.totalorder %v10427_v38, %v20176_v5 }
 0x150   :  { %vm12738_vm13 = vmor %vm20214_vm0, %vm1023_vm9  ;;  %v2569_v15 = vsub.f32 %v12656_v48, %v20217_v31  ;;  %v2576_v8 = vand.u32 4294901760, %v2575_v45  ;;  %v5173_v60 = vsub.f32 %v12680_v29, %v20218_v9  ;;  %vm20219_vm9 = vcmp.eq.s32.totalorder %v10416_v17, %v20176_v5 }
 0x151   :  { %vm12761_vm0 = vmor %vm20219_vm9, %vm1660_vm3  ;;  %v538_v62 = vsel %vm20222_vm8, %v482_v2, 0  ;;  %v20223_v45 = vand.u32 4294901760, %v12697_v43  ;;  %v12780_v29 = vadd.f32 180.0, %v12478_v22  ;;  %v7608_v30 = vadd.f32 180.0, %v12728_v14 }
 0x152   :  { %v2570_v48 = vand.u32 4294901760, %v2569_v15  ;;  %vm12775_vm11 = vmor %vm20225_vm6, %vm20224_vm5  ;;  %v5174_v2 = vand.u32 4294901760, %v5173_v60  ;;  %vm20228_vm3 = vcmp.eq.s32.totalorder %v10430_v18, %v12528_v4  ;;  %vm20229_vm8 = vcmp.eq.s32.totalorder %v10430_v18, %v20176_v5  ;;  %9574 = vset.pattern.permute.xlu1 %v19639_v63 }
 0x153   :  { %v5167_v13 = vsub.f32 %v12697_v43, %v20223_v45  ;;  %vm12789_vm9 = vmor %vm20229_vm8, %vm20228_vm3  ;;  %v12794_v45 = vpop.permute.xlu1 %1557  ;;  %v9429_v22 = vcvt.f32.s32 %v9428_v58  ;;  %v104_v43 = vmul.f32 0.54444444, %v7581_v52  ;;  %vm20232_vm5 = vcmp.eq.s32.totalorder %v10433_v54, %v12528_v4  ;;  %1331 = vperm.xlu1 %9574, %v12165_v11  }
 0x154   :  { %2571 = vmatprep.mubr.f32.mxu1 %v2570_v48  ;;  %vm20233_vm2 = vcmp.eq.s32.totalorder %v10433_v54, %v20176_v5  ;;  %vm768_vm3 = vcmp.eq.s32.totalorder %v10416_v17, %v12613_v42  ;;  %v20236_v4 = vmov 0  ;;  %v12825_v5 = vpop.permute.xlu0 %700  ;;  %vm12831_vm6 = vmor %vm12692_vm7, %vm12775_vm11  ;;  %v20239_v23 = vmov 0 }
 0x155   :  { %v5168_v33 = vand.u32 4294901760, %v5167_v13  ;;  %vm12802_vm10 = vmor %vm20233_vm2, %vm20232_vm5  ;;  %2577 = vmatmul.mubr.f32.gmra.mrb[20].mxu1 %v2576_v8  ;;  %vm771_vm5 = vcmp.eq.s32.totalorder %v10433_v54, %v12613_v42  ;;  %v197_v13 = vadd.s32 1, %v9429_v22  ;;  %v136_v52 = vfloor.f32 %v104_v43 }
 0x156   :  { %vm12817_vm2 = vmor %vm12672_vm4, %vm12761_vm0  ;;  %v20240_v23 = vsel %vm12831_vm6, 4294967295, %v20239_v23  ;;  %vm20242_vm0 = vcmp.lt.s32.totalorder %v538_v62, 99  ;;  %v387_v57 = vmul.f32 0.27222222, %v7608_v30  ;;  %v7661_v40 = vsel %vm12831_vm6, 1.0, %v19757_v16 }
 0x157   :  { %v20237_v4 = vsel %vm12817_vm2, 4294967295, %v20236_v4  ;;  %5169 = vmatprep.mubr.f32.mxu0 %v5168_v33  ;;  %20241 = vst [vmem:[#allocation189_spill] sm:$0xff] %v20240_v23  ;;  %v7660_v58 = vsel %vm12817_vm2, 1.0, %v19757_v16  ;;  %v12841_v48 = vsel %vm20242_vm0, %v538_v62, 99  ;;  %vm12847_vm11 = vmor %vm12711_vm15, %vm12789_vm9  ;;  %v20243_v33 = vmov 0  ;;  %v12872_v62 = vpop.permute.xlu1 %920  ;;  %9575 = vset.pattern.permute.xlu1 %v19621_v41 }
 0x158   :  { %20238 = vst [vmem:[#allocation188_spill] sm:$0xff] %v20237_v4  ;;  %5175 = vmatmul.mubr.f32.gmra.mrb[20].mxu0 %v5174_v2  ;;  %v20244_v33 = vsel %vm12847_vm11, 4294967295, %v20243_v33  ;;  %v12854_v43 = vsub.f32 %v7660_v58, %v7660_v58  ;;  %vm255_vm0 = vcmp.gt.s32.totalorder %v197_v13, 0  ;;  %vm12862_vm4 = vmor %vm12738_vm13, %vm12802_vm10  ;;  %v20247_v26 = vmov 0  ;;  %694 = vperm.xlu1 %9575, %v12682_v3  }
 0x159   :  { %20245 = vst [vmem:[#allocation190_spill] sm:$0xff] %v20244_v33  ;;  %v20248_v26 = vsel %vm12862_vm4, 4294967295, %v20247_v26  ;;  %v12866_v8 = vsub.f32 %v7661_v40, %v7661_v40  ;;  %v7662_v31 = vsel %vm12847_vm11, 1.0, %v19757_v16  ;;  %v256_v9 = vsel %vm255_vm0, %v197_v13, 0 }
 0x15a   :  { %20246 = vst [vmem:[#allocation191_spill] sm:$0xff] %v12854_v43  ;;  %20249 = vst [vmem:[#allocation192_spill] sm:$0xff] %v20248_v26  ;;  %v9434_v30 = vtrunc.f32 %v136_v52  ;;  %vm20251_vm15 = vcmp.eq.s32.totalorder %v10416_v17, %v11092_v51  ;;  %v7663_v2 = vsel %vm12862_vm4, 1.0, %v19757_v16  ;;  %v18932_v15 = vand.u32 4294901760, %v12854_v43 }
 0x15b   :  { %20250 = vst [vmem:[#allocation193_spill] sm:$0xff] %v12866_v8  ;;  %vm12880_vm10 = vmor %vm768_vm3, %vm20251_vm15  ;;  %v12888_v22 = vsub.f32 %v7662_v31, %v7662_v31  ;;  %v419_v60 = vfloor.f32 %v387_v57  ;;  %vm20255_vm9 = vcmp.eq.s32.totalorder %v10427_v38, %v11092_v51  ;;  %vm20256_vm3 = vcmp.eq.s32.totalorder %v10427_v38, %v12613_v42  ;;  %v12928_v31 = vpop.permute.xlu0 %1560 }
 0x15c   :  { %vm12899_vm0 = vmor %vm20256_vm3, %vm20255_vm9  ;;  %v18939_v52 = vand.u32 4294901760, %v12866_v8  ;;  %v12904_v58 = vsub.f32 %v7663_v2, %v7663_v2  ;;  %vm20260_vm7 = vcmp.eq.s32.totalorder %v10430_v18, %v11092_v51  ;;  %vm20261_vm9 = vcmp.eq.s32.totalorder %v10430_v18, %v12613_v42  ;;  %9576 = vset.pattern.permute.xlu1 %v19632_v46 }
 0x15d   :  { %20254 = vst [vmem:[#allocation194_spill] sm:$0xff] %v12888_v22  ;;  %vm12918_vm3 = vmor %vm20261_vm9, %vm20260_vm7  ;;  %v2590_v57 = vsub.f32 %v12854_v43, %v18932_v15  ;;  %vm319_vm8 = vcmp.lt.s32.totalorder %v256_v9, 99  ;;  %vm20264_vm7 = vcmp.eq.s32.totalorder %v10433_v54, %v11092_v51  ;;  %v9435_v33 = vcvt.f32.s32 %v9434_v30 }
 0x15e   :  { %20259 = vst [vmem:[#allocation195_spill] sm:$0xff] %v12904_v58  ;;  %vm12938_vm9 = vmor %vm771_vm5, %vm20264_vm7  ;;  %v2584_v15 = vsub.f32 %v12866_v8, %v18939_v52  ;;  %v18952_v40 = vand.u32 4294901760, %v12904_v58  ;;  %v12946_v43 = vsel %vm319_vm8, %v256_v9, 99  ;;  %v20267_v4 = vand.u32 4294901760, %v12888_v22  ;;  %v12964_v9 = vpop.permute.xlu1 %1304 }
 0x15f   :  { %v2591_v51 = vand.u32 4294901760, %v2590_v57  ;;  %vm20268_vm5 = vcmp.eq.s32.totalorder %v10416_v17, %v12794_v45  ;;  %vm20269_vm7 = vcmp.eq.s32.totalorder %v10416_v17, %v12700_v21  ;;  %v1258_v30 = vadd.s32 200, %v12946_v43 }
 0x160   :  { %v5188_v42 = vsub.f32 %v12888_v22, %v20267_v4  ;;  %vm12959_vm13 = vmor %vm20269_vm7, %vm20268_vm5  ;;  %v9488_v57 = vtrunc.f32 %v419_v60  ;;  %vm1410_vm8 = vcmp.eq.s32.totalorder %v10430_v18, %v12700_v21  ;;  %v2585_v4 = vand.u32 4294901760, %v2584_v15 }
 0x161   :  { %v5182_v22 = vsub.f32 %v12904_v58, %v18952_v40  ;;  %vm20272_vm5 = vcmp.eq.s32.totalorder %v10427_v38, %v12794_v45  ;;  %vm20273_vm7 = vcmp.eq.s32.totalorder %v10427_v38, %v12700_v21  ;;  %vm1411_vm2 = vcmp.eq.s32.totalorder %v10433_v54, %v12700_v21  ;;  %1343 = vperm.xlu0 %9592, %v1258_v30  }
 0x162   :  { %vm12978_vm15 = vmor %vm20273_vm7, %vm20272_vm5  ;;  %v5189_v15 = vand.u32 4294901760, %v5188_v42  ;;  %vm20276_vm4 = vcmp.eq.s32.totalorder %v10430_v18, %v12794_v45  ;;  %v871_v40 = vadd.s32 100, %v12841_v48  ;;  %v200_v3 = vadd.s32 1, %v9435_v33  ;;  %2586 = vmatprep.mubr.f32.mxu1 %v2585_v4  ;;  %v13039_v10 = vpop.permute.xlu1 %667 }
 0x163   :  { %vm12990_vm6 = vmor %vm1410_vm8, %vm20276_vm4  ;;  %v5183_v58 = vand.u32 4294901760, %v5182_v22  ;;  %vm20279_vm7 = vcmp.eq.s32.totalorder %v10433_v54, %v12794_v45  ;;  %v13007_v42 = vmul.f32 0.27222222, %v12780_v29  ;;  %v9489_v26 = vcvt.f32.s32 %v9488_v57  ;;  %2592 = vmatmul.mubr.f32.gmra.mrb[22].mxu1 %v2591_v51 }
 0x164   :  { %vm13000_vm11 = vmor %vm1411_vm2, %vm20279_vm7  ;;  %v7576_v23 = vadd.f32 90.0, %v12728_v14  ;;  %v20282_v45 = vmov 0  ;;  %vm1028_vm2 = vcmp.eq.s32.totalorder %v10416_v17, %v12872_v62  ;;  %vm1029_vm7 = vcmp.eq.s32.totalorder %v10427_v38, %v12872_v62  ;;  %950 = vperm.xlu1 %9576, %v871_v40  }
 0x165   :  { %vm13014_vm8 = vmor %vm12880_vm10, %vm12959_vm13  ;;  %vm261_vm5 = vcmp.gt.s32.totalorder %v200_v3, 0  ;;  %v1511_v14 = vadd.s32 300, %v12841_v48  ;;  %5184 = vmatprep.mubr.f32.mxu0 %v5183_v58  ;;  %v20285_v29 = vmov 0  ;;  %vm1030_vm13 = vcmp.eq.s32.totalorder %v10430_v18, %v12872_v62 }
 0x166   :  { %v20283_v45 = vsel %vm13014_vm8, 4294967295, %v20282_v45  ;;  %vm13029_vm10 = vmor %vm12899_vm0, %vm12978_vm15  ;;  %v7664_v33 = vsel %vm13014_vm8, 1.0, %v19757_v16  ;;  %v262_v48 = vsel %vm261_vm5, %v200_v3, 0  ;;  %v483_v22 = vadd.s32 1, %v9489_v26  ;;  %5190 = vmatmul.mubr.f32.gmra.mrb[22].mxu0 %v5189_v15 }
 0x167   :  { %20284 = vst [vmem:[#allocation196_spill] sm:$0xff] %v20283_v45  ;;  %v20286_v29 = vsel %vm13029_vm10, 4294967295, %v20285_v29  ;;  %vm13045_vm0 = vmor %vm12918_vm3, %vm12990_vm6  ;;  %v20288_v8 = vmov 0  ;;  %v7665_v26 = vsel %vm13029_vm10, 1.0, %v19757_v16  ;;  %v13056_v13 = vsub.f32 %v7664_v33, %v7664_v33 }
 0x168   :  { %20287 = vst [vmem:[#allocation197_spill] sm:$0xff] %v20286_v29  ;;  %v20289_v8 = vsel %vm13045_vm0, 4294967295, %v20288_v8  ;;  %vm13062_vm6 = vmor %vm12938_vm9, %vm13000_vm11  ;;  %v20292_v52 = vmov 0  ;;  %v13068_v58 = vsub.f32 %v7665_v26, %v7665_v26  ;;  %v7666_v11 = vsel %vm13045_vm0, 1.0, %v19757_v16  ;;  %9577 = vset.pattern.permute.xlu1 %v19622_v44  ;;  %v13120_v26 = vpop.permute.xlu1 %923  ;;  %v20711_v29 = vld [vmem:[#allocation24_spill] sm:$0xff] }
 0x169   :  { %20290 = vst [vmem:[#allocation198_spill] sm:$0xff] %v20289_v8  ;;  %20291 = vst [vmem:[#allocation199_spill] sm:$0xff] %v13056_v13  ;;  %v20293_v52 = vsel %vm13062_vm6, 4294967295, %v20292_v52  ;;  %v99_v40 = vmul.f32 0.54444444, %v7576_v23  ;;  %vm20296_vm5 = vcmp.eq.s32.totalorder %v10416_v17, %v12406_v0  ;;  %v7667_v51 = vsel %vm13062_vm6, 1.0, %v19757_v16  ;;  %1590 = vperm.xlu1 %9577, %v1511_v14  }
 0x16a   :  { %20294 = vst [vmem:[#allocation200_spill] sm:$0xff] %v20293_v52  ;;  %20295 = vst [vmem:[#allocation201_spill] sm:$0xff] %v13068_v58  ;;  %v18959_v30 = vand.u32 4294901760, %v13056_v13  ;;  %v13087_v57 = vsub.f32 %v7666_v11, %v7666_v11  ;;  %vm325_vm9 = vcmp.lt.s32.totalorder %v262_v48, 99  ;;  %vm20300_vm3 = vcmp.eq.s32.totalorder %v10427_v38, %v12406_v0  ;;  %v13160_v14 = vld [vmem:[%s18537_s0 + $0xd8] sm:$0xff] }
 0x16b   :  { %vm13079_vm11 = vmor %vm20296_vm5, %vm1028_vm2  ;;  %v18962_v4 = vand.u32 4294901760, %v13068_v58  ;;  %v13100_v15 = vsub.f32 %v7667_v51, %v7667_v51  ;;  %v13102_v60 = vsel %vm325_vm9, %v262_v48, 99  ;;  %vm539_vm2 = vcmp.gt.s32.totalorder %v483_v22, 0 }
 0x16c   :  { %20299 = vst [vmem:[#allocation202_spill] sm:$0xff] %v13087_v57  ;;  %vm13095_vm4 = vmor %vm20300_vm3, %vm1029_vm7  ;;  %vm20304_vm5 = vcmp.eq.s32.totalorder %v10430_v18, %v12406_v0  ;;  %v2605_v21 = vsub.f32 %v13056_v13, %v18959_v30  ;;  %v18967_v33 = vand.u32 4294901760, %v13087_v57  ;;  %v1261_v48 = vadd.s32 200, %v13102_v60  ;;  %v13210_v8 = vpop.permute.xlu1 %1563 }
 0x16d   :  { %20303 = vst [vmem:[#allocation203_spill] sm:$0xff] %v13100_v15  ;;  %vm13110_vm15 = vmor %vm20304_vm5, %vm1030_vm13  ;;  %v540_v11 = vsel %vm539_vm2, %v483_v22, 0  ;;  %vm20307_vm7 = vcmp.eq.s32.totalorder %v10433_v54, %v12872_v62  ;;  %vm20308_vm13 = vcmp.eq.s32.totalorder %v10433_v54, %v12406_v0  ;;  %v2599_v22 = vsub.f32 %v13068_v58, %v18962_v4  ;;  %v20315_v4 = vld [vmem:[#allocation100_spill] sm:$0xff]  ;;  %9578 = vset.pattern.permute.xlu1 %v19621_v41 }
 0x16e   :  { %vm13128_vm3 = vmor %vm20308_vm13, %vm20307_vm7  ;;  %v18976_v30 = vand.u32 4294901760, %v13100_v15  ;;  %vm20311_vm2 = vcmp.eq.s32.totalorder %v10416_v17, %v12928_v31  ;;  %vm20312_vm7 = vcmp.eq.s32.totalorder %v10416_v17, %v12964_v9  ;;  %v2606_v62 = vand.u32 4294901760, %v2605_v21  ;;  %1352 = vperm.xlu0 %9592, %v1261_v48  }
 0x16f   :  { %vm13146_vm13 = vmor %vm20312_vm7, %vm20311_vm2  ;;  %v5203_v13 = vsub.f32 %v13087_v57, %v18967_v33  ;;  %vm20316_vm7 = vcmp.eq.s32.totalorder %v10427_v38, %v12928_v31  ;;  %vm20317_vm0 = vcmp.eq.s32.totalorder %v10427_v38, %v12964_v9  ;;  %v2600_v33 = vand.u32 4294901760, %v2599_v22 }
 0x170   :  { %vm13170_vm8 = vmor %vm20317_vm0, %vm20316_vm7  ;;  %v5197_v48 = vsub.f32 %v13100_v15, %v18976_v30  ;;  %vm603_vm5 = vcmp.lt.s32.totalorder %v540_v11, 99  ;;  %v131_v57 = vfloor.f32 %v99_v40  ;;  %vm20320_vm6 = vcmp.eq.s32.totalorder %v10430_v18, %v12928_v31 }
 0x171   :  { %vm20321_vm0 = vcmp.eq.s32.totalorder %v10430_v18, %v12964_v9  ;;  %v5204_v58 = vand.u32 4294901760, %v5203_v13  ;;  %v13193_v30 = vsel %vm603_vm5, %v540_v11, 99  ;;  %v421_v40 = vfloor.f32 %v13007_v42  ;;  %2601 = vmatprep.mubr.f32.mxu1 %v2600_v33 }
 0x172   :  { %vm13187_vm7 = vmor %vm20321_vm0, %vm20320_vm6  ;;  %vm20324_vm9 = vcmp.eq.s32.totalorder %v10433_v54, %v12928_v31  ;;  %vm20325_vm6 = vcmp.eq.s32.totalorder %v10433_v54, %v12964_v9  ;;  %v5198_v13 = vand.u32 4294901760, %v5197_v48  ;;  %v872_v11 = vadd.s32 100, %v13193_v30  ;;  %2607 = vmatmul.mubr.f32.gmra.mrb[24].mxu1 %v2606_v62  ;;  %9595 = vset.pattern.permute.xlu0 %v19632_v46 }
 0x173   :  { %vm13204_vm0 = vmor %vm20325_vm6, %vm20324_vm9  ;;  %v9424_v42 = vtrunc.f32 %v131_v57  ;;  %v7611_v45 = vadd.f32 180.0, %v13160_v14  ;;  %v20328_v31 = vmov 0  ;;  %vm1032_vm6 = vcmp.eq.s32.totalorder %v10416_v17, %v13120_v26 }
 0x174   :  { %vm13219_vm9 = vmor %vm13079_vm11, %vm13146_vm13  ;;  %vm1033_vm2 = vcmp.eq.s32.totalorder %v10427_v38, %v13120_v26  ;;  %vm1034_vm10 = vcmp.eq.s32.totalorder %v10430_v18, %v13120_v26  ;;  %v9492_v9 = vtrunc.f32 %v421_v40  ;;  %v20331_v2 = vmov 0  ;;  %5199 = vmatprep.mubr.f32.mxu0 %v5198_v13  ;;  %953 = vperm.xlu0 %9595, %v872_v11   ;;  %v13291_v11 = vpop.permute.xlu1 %670 }
 0x175   :  { %v20329_v31 = vsel %vm13219_vm9, 4294967295, %v20328_v31  ;;  %vm13234_vm11 = vmor %vm13095_vm4, %vm13170_vm8  ;;  %vm1035_vm13 = vcmp.eq.s32.totalorder %v10433_v54, %v13120_v26  ;;  %v9425_v57 = vcvt.f32.s32 %v9424_v42  ;;  %v7668_v33 = vsel %vm13219_vm9, 1.0, %v19757_v16  ;;  %5205 = vmatmul.mubr.f32.gmra.mrb[24].mxu0 %v5204_v58 }
 0x176   :  { %20330 = vst [vmem:[#allocation100_spill] sm:$0xff] %v20329_v31  ;;  %v20332_v2 = vsel %vm13234_vm11, 4294967295, %v20331_v2  ;;  %vm13249_vm4 = vmor %vm13110_vm15, %vm13187_vm7  ;;  %v20334_v23 = vmov 0  ;;  %v7669_v0 = vsel %vm13234_vm11, 1.0, %v19757_v16  ;;  %v13256_v62 = vsub.f32 %v7668_v33, %v7668_v33 }
 0x177   :  { %20333 = vst [vmem:[#allocation204_spill] sm:$0xff] %v20332_v2  ;;  %v20335_v23 = vsel %vm13249_vm4, 4294967295, %v20334_v23  ;;  %vm13266_vm15 = vmor %vm13128_vm3, %vm13204_vm0  ;;  %v20338_v3 = vmov 0  ;;  %v195_v58 = vadd.s32 1, %v9425_v57  ;;  %v13270_v21 = vsub.f32 %v7669_v0, %v7669_v0 }
 0x178   :  { %20336 = vst [vmem:[#allocation205_spill] sm:$0xff] %v20335_v23  ;;  %20337 = vst [vmem:[#allocation206_spill] sm:$0xff] %v13256_v62  ;;  %v20339_v3 = vsel %vm13266_vm15, 4294967295, %v20338_v3  ;;  %v7670_v48 = vsel %vm13249_vm4, 1.0, %v19757_v16  ;;  %v390_v22 = vmul.f32 0.27222222, %v7611_v45  ;;  %vm20342_vm7 = vcmp.eq.s32.totalorder %v10416_v17, %v13039_v10 }
 0x179   :  { %20340 = vst [vmem:[#allocation207_spill] sm:$0xff] %v20339_v3  ;;  %20341 = vst [vmem:[#allocation208_spill] sm:$0xff] %v13270_v21  ;;  %v7671_v51 = vsel %vm13266_vm15, 1.0, %v19757_v16  ;;  %v18985_v40 = vand.u32 4294901760, %v13256_v62  ;;  %v13289_v13 = vsub.f32 %v7670_v48, %v7670_v48  ;;  %v9493_v45 = vcvt.f32.s32 %v9492_v9  ;;  %v9609_v9 = vld [vmem:[%s18537_s0 + $0xe0] sm:$0xff] }
 0x17a   :  { %vm13281_vm5 = vmor %vm20342_vm7, %vm1032_vm6  ;;  %vm20346_vm0 = vcmp.eq.s32.totalorder %v10427_v38, %v13039_v10  ;;  %vm251_vm7 = vcmp.gt.s32.totalorder %v195_v58, 0  ;;  %v13306_v33 = vsub.f32 %v7671_v51, %v7671_v51  ;;  %v7579_v57 = vadd.f32 90.0, %v13160_v14 }
 0x17b   :  { %20345 = vst [vmem:[#allocation209_spill] sm:$0xff] %v13289_v13  ;;  %vm13301_vm6 = vmor %vm20346_vm0, %vm1033_vm2  ;;  %vm20350_vm2 = vcmp.eq.s32.totalorder %v10430_v18, %v13039_v10  ;;  %v252_v0 = vsel %vm251_vm7, %v195_v58, 0  ;;  %v2620_v48 = vsub.f32 %v13256_v62, %v18985_v40  ;;  %v20356_v58 = vand.u32 4294901760, %v13270_v21 }
 0x17c   :  { %20349 = vst [vmem:[#allocation210_spill] sm:$0xff] %v13306_v33  ;;  %vm13318_vm0 = vmor %vm20350_vm2, %vm1034_vm10  ;;  %vm20353_vm10 = vcmp.eq.s32.totalorder %v10433_v54, %v13039_v10  ;;  %vm315_vm7 = vcmp.lt.s32.totalorder %v252_v0, 99  ;;  %v422_v51 = vfloor.f32 %v390_v22  ;;  %v20357_v31 = vand.u32 4294901760, %v13289_v13 }
 0x17d   :  { %vm13335_vm2 = vmor %vm20353_vm10, %vm1035_vm13  ;;  %v2614_v40 = vsub.f32 %v13270_v21, %v20356_v58  ;;  %v316_v62 = vsel %vm315_vm7, %v252_v0, 99  ;;  %v2621_v26 = vand.u32 4294901760, %v2620_v48  ;;  %vm20358_vm13 = vcmp.eq.s32.totalorder %v10416_v17, %v13210_v8 }
 0x17e   :  { %v5218_v10 = vsub.f32 %v13289_v13, %v20357_v31  ;;  %vm20359_vm10 = vcmp.eq.s32.totalorder %v10416_v17, %v20315_v4  ;;  %v13358_v22 = vadd.s32 1, %v9493_v45  ;;  %v13361_v14 = vadd.s32 100, %v11876_v37  ;;  %697 = vperm.xlu1 %9578, %v316_v62   ;;  %v13379_v37 = vpop.permute.xlu1 %1310 }
 0x17f   :  { %vm13354_vm8 = vmor %vm20359_vm10, %vm20358_vm13  ;;  %v13364_v0 = vadd.f32 180.0, %v12664_v19  ;;  %v2615_v31 = vand.u32 4294901760, %v2614_v40  ;;  %v20362_v48 = vand.u32 4294901760, %v13306_v33  ;;  %vm20363_vm7 = vcmp.eq.s32.totalorder %v10427_v38, %v13210_v8 }
 0x180   :  { %vm20364_vm13 = vcmp.eq.s32.totalorder %v10427_v38, %v20315_v4  ;;  %v1512_v19 = vadd.s32 300, %v13193_v30  ;;  %v1256_v21 = vadd.s32 200, %v316_v62  ;;  %v5219_v40 = vand.u32 4294901760, %v5218_v10 }
 0x181   :  { %v5212_v13 = vsub.f32 %v13306_v33, %v20362_v48  ;;  %vm13375_vm10 = vmor %vm20364_vm13, %vm20363_vm7  ;;  %vm20367_vm3 = vcmp.eq.s32.totalorder %v10430_v18, %v13210_v8  ;;  %vm20368_vm4 = vcmp.eq.s32.totalorder %v10430_v18, %v20315_v4  ;;  %2616 = vmatprep.mubr.f32.mxu1 %v2615_v31  ;;  %vm20371_vm13 = vcmp.eq.s32.totalorder %v10433_v54, %v13210_v8 }
 0x182   :  { %vm13388_vm9 = vmor %vm20368_vm4, %vm20367_vm3  ;;  %vm20372_vm15 = vcmp.eq.s32.totalorder %v10433_v54, %v20315_v4  ;;  %v9494_v62 = vtrunc.f32 %v422_v51  ;;  %2622 = vmatmul.mubr.f32.gmra.mrb[26].mxu1 %v2621_v26  ;;  %v20375_v8 = vmov 0  ;;  %v102_v4 = vmul.f32 0.54444444, %v7579_v57  ;;  %9579 = vset.pattern.permute.xlu1 %v19639_v63 }
 0x183   :  { %v5213_v33 = vand.u32 4294901760, %v5212_v13  ;;  %vm13400_vm11 = vmor %vm20372_vm15, %vm20371_vm13  ;;  %v13411_v13 = vld [vmem:[%s18537_s0 + $0xf0] sm:$0xff]  ;;  %vm783_vm13 = vcmp.eq.s32.totalorder %v10433_v54, %v13291_v11  ;;  %v20378_v15 = vmov 0  ;;  %v20381_v42 = vmov 0  ;;  %1337 = vperm.xlu1 %9579, %v1256_v21  }
 0x184   :  { %vm13417_vm15 = vmor %vm13281_vm5, %vm13354_vm8  ;;  %v7614_v10 = vadd.f32 180.0, %v13411_v13  ;;  %v7580_v58 = vadd.f32 90.0, %v9609_v9  ;;  %v20385_v21 = vmov 0  ;;  %vm20394_vm8 = vcmp.eq.s32.totalorder %v10427_v38, %v11171_v20 }
 0x185   :  { %v20376_v8 = vsel %vm13417_vm15, 4294967295, %v20375_v8  ;;  %5214 = vmatprep.mubr.f32.mxu0 %v5213_v33  ;;  %vm13430_vm7 = vmor %vm13301_vm6, %vm13375_vm10  ;;  %v7672_v57 = vsel %vm13417_vm15, 1.0, %v19757_v16  ;;  %v9495_v33 = vcvt.f32.s32 %v9494_v62  ;;  %v134_v62 = vfloor.f32 %v102_v4 }
 0x186   :  { %20377 = vst [vmem:[#allocation211_spill] sm:$0xff] %v20376_v8  ;;  %v20379_v15 = vsel %vm13430_vm7, 4294967295, %v20378_v15  ;;  %5220 = vmatmul.mubr.f32.gmra.mrb[26].mxu0 %v5219_v40  ;;  %vm13446_vm6 = vmor %vm13318_vm0, %vm13388_vm9  ;;  %v7673_v51 = vsel %vm13430_vm7, 1.0, %v19757_v16  ;;  %v13455_v26 = vsub.f32 %v7672_v57, %v7672_v57  ;;  %v1567_v40 = vpop.permute.xlu1 %1566  ;;  %vm20389_vm0 = vcmp.eq.s32.totalorder %v10416_v17, %v11171_v20 }
 0x187   :  { %20380 = vst [vmem:[#allocation212_spill] sm:$0xff] %v20379_v15  ;;  %v20382_v42 = vsel %vm13446_vm6, 4294967295, %v20381_v42  ;;  %vm13465_vm9 = vmor %vm13335_vm2, %vm13400_vm11  ;;  %v13469_v31 = vsub.f32 %v7673_v51, %v7673_v51  ;;  %v7674_v45 = vsel %vm13446_vm6, 1.0, %v19757_v16  ;;  %v486_v48 = vadd.s32 1, %v9495_v33  ;;  %9580 = vset.pattern.permute.xlu1 %v19622_v44 }
 0x188   :  { %20383 = vst [vmem:[#allocation213_spill] sm:$0xff] %v20382_v42  ;;  %20384 = vst [vmem:[#allocation214_spill] sm:$0xff] %v13455_v26  ;;  %v20386_v21 = vsel %vm13465_vm9, 4294967295, %v20385_v21  ;;  %vm20390_vm10 = vcmp.eq.s32.totalorder %v10416_v17, %v13291_v11  ;;  %v7675_v30 = vsel %vm13465_vm9, 1.0, %v19757_v16  ;;  %v19006_v57 = vand.u32 4294901760, %v13455_v26  ;;  %1593 = vperm.xlu1 %9580, %v1512_v19  }
 0x189   :  { %20387 = vst [vmem:[#allocation215_spill] sm:$0xff] %v20386_v21  ;;  %20388 = vst [vmem:[#allocation216_spill] sm:$0xff] %v13469_v31  ;;  %v13488_v51 = vsub.f32 %v7674_v45, %v7674_v45  ;;  %v13504_v9 = vsub.f32 %v7675_v30, %v7675_v30  ;;  %vm20399_vm11 = vcmp.eq.s32.totalorder %v10430_v18, %v11171_v20  ;;  %vm545_vm3 = vcmp.gt.s32.totalorder %v486_v48, 0 }
 0x18a   :  { %vm13480_vm4 = vmor %vm20390_vm10, %vm20389_vm0  ;;  %vm20395_vm10 = vcmp.eq.s32.totalorder %v10427_v38, %v13291_v11  ;;  %v2635_v30 = vsub.f32 %v13455_v26, %v19006_v57  ;;  %v20406_v57 = vand.u32 4294901760, %v13469_v31  ;;  %v546_v8 = vsel %vm545_vm3, %v486_v48, 0 }
 0x18b   :  { %20393 = vst [vmem:[#allocation217_spill] sm:$0xff] %v13488_v51  ;;  %vm13499_vm0 = vmor %vm20395_vm10, %vm20394_vm8  ;;  %vm20400_vm8 = vcmp.eq.s32.totalorder %v10430_v18, %v13291_v11  ;;  %v19027_v26 = vand.u32 4294901760, %v13504_v9  ;;  %v9430_v21 = vtrunc.f32 %v134_v62  ;;  %v20407_v15 = vand.u32 4294901760, %v13488_v51 }
 0x18c   :  { %20398 = vst [vmem:[#allocation218_spill] sm:$0xff] %v13504_v9  ;;  %vm13516_vm10 = vmor %vm20400_vm8, %vm20399_vm11  ;;  %vm20403_vm11 = vcmp.eq.s32.totalorder %v10433_v54, %v11171_v20  ;;  %v2629_v33 = vsub.f32 %v13469_v31, %v20406_v57  ;;  %v2636_v20 = vand.u32 4294901760, %v2635_v30  ;;  %v13556_v57 = vpop.permute.xlu0 %1569  ;;  %vm609_vm3 = vcmp.lt.s32.totalorder %v546_v8, 99  ;;  %9582 = vset.pattern.permute.xlu1 %v19632_v46 }
 0x18d   :  { %vm13534_vm8 = vmor %vm783_vm13, %vm20403_vm11  ;;  %v5233_v11 = vsub.f32 %v13488_v51, %v20407_v15  ;;  %vm20408_vm13 = vcmp.eq.s32.totalorder %v10416_v17, %v1567_v40  ;;  %vm20409_vm11 = vcmp.eq.s32.totalorder %v10416_v17, %v13379_v37  ;;  %v393_v48 = vmul.f32 0.27222222, %v7614_v10  ;;  %956 = vperm.xlu1 %9582, %v13361_v14  }
 0x18e   :  { %vm13552_vm2 = vmor %vm20409_vm11, %vm20408_vm13  ;;  %v2630_v62 = vand.u32 4294901760, %v2629_v33  ;;  %v5227_v30 = vsub.f32 %v13504_v9, %v19027_v26  ;;  %vm20412_vm5 = vcmp.eq.s32.totalorder %v10427_v38, %v1567_v40  ;;  %vm20413_vm6 = vcmp.eq.s32.totalorder %v10427_v38, %v13379_v37  ;;  %v930_v33 = vpop.permute.xlu1 %929 }
 0x18f   :  { %vm13566_vm15 = vmor %vm20413_vm6, %vm20412_vm5  ;;  %v13570_v51 = vsel %vm609_vm3, %v546_v8, 99  ;;  %v9431_v31 = vcvt.f32.s32 %v9430_v21  ;;  %v5234_v3 = vand.u32 4294901760, %v5233_v11  ;;  %vm20416_vm13 = vcmp.eq.s32.totalorder %v10430_v18, %v1567_v40 }
 0x190   :  { %vm20417_vm11 = vcmp.eq.s32.totalorder %v10430_v18, %v13379_v37  ;;  %vm20420_vm5 = vcmp.gt.s32.totalorder %v13358_v22, 0  ;;  %v875_v9 = vadd.s32 100, %v13570_v51  ;;  %v425_v8 = vfloor.f32 %v393_v48  ;;  %2631 = vmatprep.mubr.f32.mxu1 %v2630_v62  ;;  %vm13616_vm7 = vmor %vm13499_vm0, %vm13566_vm15 }
 0x191   :  { %vm13577_vm9 = vmor %vm20417_vm11, %vm20416_vm13  ;;  %v544_v26 = vsel %vm20420_vm5, %v13358_v22, 0  ;;  %v5228_v21 = vand.u32 4294901760, %v5227_v30  ;;  %vm20421_vm6 = vcmp.eq.s32.totalorder %v10433_v54, %v1567_v40  ;;  %vm20422_vm3 = vcmp.eq.s32.totalorder %v10433_v54, %v13379_v37  ;;  %2637 = vmatmul.mubr.f32.gmra.mrb[28].mxu1 %v2636_v20  ;;  %9583 = vset.pattern.permute.xlu1 %v19639_v63 }
 0x192   :  { %vm13591_vm13 = vmor %vm20422_vm3, %vm20421_vm6  ;;  %v20425_v22 = vmov 0  ;;  %v198_v37 = vadd.s32 1, %v9431_v31  ;;  %v9500_v40 = vtrunc.f32 %v425_v8  ;;  %v103_v48 = vmul.f32 0.54444444, %v7580_v58  ;;  %962 = vperm.xlu0 %9595, %v875_v9   ;;  %v1314_v9 = vpop.permute.xlu1 %1313  ;;  %1340 = vperm.xlu1 %9583, %v12180_v56  }
 0x193   :  { %vm13606_vm6 = vmor %vm13480_vm4, %vm13552_vm2  ;;  %5229 = vmatprep.mubr.f32.mxu0 %v5228_v21  ;;  %v20428_v14 = vmov 0  ;;  %vm1040_vm4 = vcmp.eq.s32.totalorder %v10416_v17, %v930_v33  ;;  %vm1041_vm2 = vcmp.eq.s32.totalorder %v10427_v38, %v930_v33  ;;  %vm607_vm5 = vcmp.lt.s32.totalorder %v544_v26, 99 }
 0x194   :  { %v20426_v22 = vsel %vm13606_vm6, 4294967295, %v20425_v22  ;;  %v20429_v14 = vsel %vm13616_vm7, 4294967295, %v20428_v14  ;;  %v7676_v31 = vsel %vm13606_vm6, 1.0, %v19757_v16  ;;  %5235 = vmatmul.mubr.f32.gmra.mrb[28].mxu0 %v5234_v3  ;;  %vm13629_vm3 = vmor %vm13516_vm10, %vm13577_vm9  ;;  %v20431_v58 = vmov 0 }
 0x195   :  { %20427 = vst [vmem:[#allocation219_spill] sm:$0xff] %v20426_v22  ;;  %20430 = vst [vmem:[#allocation220_spill] sm:$0xff] %v20429_v14  ;;  %v20432_v58 = vsel %vm13629_vm3, 4294967295, %v20431_v58  ;;  %v7677_v23 = vsel %vm13616_vm7, 1.0, %v19757_v16  ;;  %v13636_v4 = vsub.f32 %v7676_v31, %v7676_v31  ;;  %vm257_vm15 = vcmp.gt.s32.totalorder %v198_v37, 0 }
 0x196   :  { %20433 = vst [vmem:[#allocation221_spill] sm:$0xff] %v20432_v58  ;;  %v9501_v20 = vcvt.f32.s32 %v9500_v40  ;;  %vm13642_vm0 = vmor %vm13534_vm8, %vm13591_vm13  ;;  %v20435_v3 = vmov 0  ;;  %v13647_v45 = vsub.f32 %v7677_v23, %v7677_v23  ;;  %v7678_v19 = vsel %vm13629_vm3, 1.0, %v19757_v16  ;;  %9584 = vset.pattern.permute.xlu1 %v19621_v41 }
 0x197   :  { %20434 = vst [vmem:[#allocation222_spill] sm:$0xff] %v13636_v4  ;;  %v20436_v3 = vsel %vm13642_vm0, 4294967295, %v20435_v3  ;;  %v135_v62 = vfloor.f32 %v103_v48  ;;  %vm20439_vm8 = vcmp.eq.s32.totalorder %v10416_v17, %v12511_v49  ;;  %v608_v30 = vsel %vm607_vm5, %v544_v26, 99  ;;  %703 = vperm.xlu1 %9584, %v12946_v43  }
 0x198   :  { %20437 = vst [vmem:[#allocation223_spill] sm:$0xff] %v20436_v3  ;;  %20438 = vst [vmem:[#allocation224_spill] sm:$0xff] %v13647_v45  ;;  %v13665_v15 = vsel %vm257_vm15, %v198_v37, 0  ;;  %vm20442_vm10 = vcmp.eq.s32.totalorder %v10427_v38, %v12511_v49  ;;  %v19037_v8 = vand.u32 4294901760, %v13647_v45  ;;  %v7679_v21 = vsel %vm13642_vm0, 1.0, %v19757_v16 }
 0x199   :  { %vm13659_vm13 = vmor %vm20439_vm8, %vm1040_vm4  ;;  %v19032_v26 = vand.u32 4294901760, %v13636_v4  ;;  %v13682_v11 = vsub.f32 %v7678_v19, %v7678_v19  ;;  %vm20446_vm5 = vcmp.eq.s32.totalorder %v10430_v18, %v930_v33  ;;  %vm20447_vm4 = vcmp.eq.s32.totalorder %v10430_v18, %v12511_v49 }
 0x19a   :  { %vm13673_vm9 = vmor %vm20442_vm10, %vm1041_vm2  ;;  %v13694_v37 = vsub.f32 %v7679_v21, %v7679_v21  ;;  %v489_v40 = vadd.s32 1, %v9501_v20  ;;  %v9432_v48 = vtrunc.f32 %v135_v62  ;;  %vm20451_vm10 = vcmp.eq.s32.totalorder %v10433_v54, %v930_v33  ;;  %v13724_v62 = vpop.permute.xlu1 %676 }
 0x19b   :  { %20445 = vst [vmem:[#allocation225_spill] sm:$0xff] %v13682_v11  ;;  %vm13689_vm15 = vmor %vm20447_vm4, %vm20446_vm5  ;;  %vm20452_vm8 = vcmp.eq.s32.totalorder %v10433_v54, %v12511_v49  ;;  %v2644_v23 = vsub.f32 %v13647_v45, %v19037_v8  ;;  %v2650_v20 = vsub.f32 %v13636_v4, %v19032_v26  ;;  %v20459_v26 = vld [vmem:[#allocation101_spill] sm:$0xff]  ;;  %vm20460_vm4 = vcmp.eq.s32.totalorder %v10427_v38, %v13556_v57 }
 0x19c   :  { %20450 = vst [vmem:[#allocation226_spill] sm:$0xff] %v13694_v37  ;;  %vm13701_vm11 = vmor %vm20452_vm8, %vm20451_vm10  ;;  %vm20455_vm10 = vcmp.eq.s32.totalorder %v10416_v17, %v13556_v57  ;;  %vm20456_vm8 = vcmp.eq.s32.totalorder %v10416_v17, %v1314_v9  ;;  %v9433_v21 = vcvt.f32.s32 %v9432_v48  ;;  %vm20461_vm6 = vcmp.eq.s32.totalorder %v10427_v38, %v1314_v9  ;;  %9585 = vset.pattern.permute.xlu1 %v19632_v46 }
 0x19d   :  { %vm13719_vm2 = vmor %vm20456_vm8, %vm20455_vm10  ;;  %v2645_v19 = vand.u32 4294901760, %v2644_v23  ;;  %v2651_v33 = vand.u32 4294901760, %v2650_v20  ;;  %v20464_v4 = vand.u32 4294901760, %v13682_v11  ;;  %v13744_v45 = vmul.f32 0.27222222, %v13364_v0 }
 0x19e   :  { %vm13734_vm10 = vmor %vm20461_vm6, %vm20460_vm4  ;;  %vm20465_vm6 = vcmp.eq.s32.totalorder %v10430_v18, %v13556_v57  ;;  %vm20466_vm4 = vcmp.eq.s32.totalorder %v10430_v18, %v1314_v9  ;;  %v874_v20 = vadd.s32 100, %v608_v30  ;;  %v1514_v58 = vadd.s32 300, %v608_v30  ;;  %v933_v42 = vpop.permute.xlu1 %932 }
 0x19f   :  { %v5248_v48 = vsub.f32 %v13682_v11, %v20464_v4  ;;  %vm13752_vm3 = vmor %vm20466_vm4, %vm20465_vm6  ;;  %v20469_v4 = vand.u32 4294901760, %v13694_v37  ;;  %vm20470_vm5 = vcmp.eq.s32.totalorder %v10433_v54, %v13556_v57  ;;  %vm20471_vm0 = vcmp.eq.s32.totalorder %v10433_v54, %v1314_v9  ;;  %2646 = vmatprep.mubr.f32.mxu1 %v2645_v19 }
 0x1a0   :  { %vm13766_vm7 = vmor %vm20471_vm0, %vm20470_vm5  ;;  %vm20474_vm4 = vcmp.gt.s32.totalorder %v489_v40, 0  ;;  %v20475_v57 = vmov 0  ;;  %2652 = vmatmul.mubr.f32.gmra.mrb[30].mxu1 %v2651_v33  ;;  %vm788_vm0 = vcmp.eq.s32.totalorder %v10416_v17, %v13724_v62  ;;  %vm789_vm5 = vcmp.eq.s32.totalorder %v10427_v38, %v13724_v62  ;;  %959 = vperm.xlu1 %9585, %v874_v20  }
 0x1a1   :  { %v5242_v11 = vsub.f32 %v13694_v37, %v20469_v4  ;;  %v5249_v0 = vand.u32 4294901760, %v5248_v48  ;;  %v552_v22 = vsel %vm20474_vm4, %v489_v40, 0  ;;  %v199_v4 = vadd.s32 1, %v9433_v21  ;;  %vm13778_vm8 = vmor %vm13659_vm13, %vm13719_vm2 }
 0x1a2   :  { %v20476_v57 = vsel %vm13778_vm8, 4294967295, %v20475_v57  ;;  %vm615_vm4 = vcmp.lt.s32.totalorder %v552_v22, 99  ;;  %vm13790_vm12 = vmor %vm13673_vm9, %vm13734_vm10  ;;  %v20478_v30 = vmov 0  ;;  %vm790_vm13 = vcmp.eq.s32.totalorder %v10430_v18, %v13724_v62 }
 0x1a3   :  { %20477 = vst [vmem:[#allocation101_spill] sm:$0xff] %v20476_v57  ;;  %v5243_v9 = vand.u32 4294901760, %v5242_v11  ;;  %v20479_v30 = vsel %vm13790_vm12, 4294967295, %v20478_v30  ;;  %v7680_v11 = vsel %vm13778_vm8, 1.0, %v19757_v16  ;;  %v13801_v40 = vsel %vm615_vm4, %v552_v22, 99  ;;  %vm13807_vm9 = vmor %vm13689_vm15, %vm13752_vm3 }
 0x1a4   :  { %20480 = vst [vmem:[#allocation227_spill] sm:$0xff] %v20479_v30  ;;  %v20481_v10 = vmov 0  ;;  %vm1044_vm10 = vcmp.eq.s32.totalorder %v10416_v17, %v933_v42  ;;  %vm1045_vm6 = vcmp.eq.s32.totalorder %v10427_v38, %v933_v42  ;;  %v7681_v22 = vsel %vm13790_vm12, 1.0, %v19757_v16  ;;  %vm13821_vm3 = vmor %vm13701_vm11, %vm13766_vm7  ;;  %9586 = vset.pattern.permute.xlu1 %v19622_v44 }
 0x1a5   :  { %v20482_v10 = vsel %vm13807_vm9, 4294967295, %v20481_v10  ;;  %5244 = vmatprep.mubr.f32.mxu0 %v5243_v9  ;;  %vm259_vm4 = vcmp.gt.s32.totalorder %v199_v4, 0  ;;  %v20484_v8 = vmov 0  ;;  %vm1046_vm15 = vcmp.eq.s32.totalorder %v10430_v18, %v933_v42  ;;  %vm13837_vm7 = vmor %vm788_vm0, %vm1044_vm10  ;;  %1599 = vperm.xlu1 %9586, %v1514_v58   ;;  %v42_v58 = vld [vmem:[%s18537_s0 + $0xf8] sm:$0xff] }
 0x1a6   :  { %20483 = vst [vmem:[#allocation228_spill] sm:$0xff] %v20482_v10  ;;  %v20485_v8 = vsel %vm13821_vm3, 4294967295, %v20484_v8  ;;  %5250 = vmatmul.mubr.f32.gmra.mrb[30].mxu0 %v5249_v0  ;;  %v13826_v56 = vsub.f32 %v7681_v22, %v7681_v22  ;;  %v13828_v19 = vsub.f32 %v7680_v11, %v7680_v11  ;;  %v7682_v49 = vsel %vm13807_vm9, 1.0, %v19757_v16  ;;  %vm13852_vm11 = vmor %vm789_vm5, %vm1045_vm6 }
 0x1a7   :  { %20486 = vst [vmem:[#allocation229_spill] sm:$0xff] %v20485_v8  ;;  %vm1047_vm2 = vcmp.eq.s32.totalorder %v10433_v54, %v933_v42  ;;  %v7683_v33 = vsel %vm13821_vm3, 1.0, %v19757_v16  ;;  %v13844_v21 = vsub.f32 %v7682_v49, %v7682_v49  ;;  %v878_v48 = vadd.s32 100, %v13801_v40  ;;  %vm13864_vm0 = vmor %vm790_vm13, %vm1046_vm15  ;;  %v1573_v49 = vpop.permute.xlu1 %1572  ;;  %v20591_v8 = vld [vmem:[#allocation7_spill] sm:$0xff] }
 0x1a8   :  { %20487 = vst [vmem:[#allocation230_spill] sm:$0xff] %v13826_v56  ;;  %20488 = vst [vmem:[#allocation231_spill] sm:$0xff] %v13828_v19  ;;  %v13857_v43 = vsub.f32 %v7683_v33, %v7683_v33  ;;  %v260_v9 = vsel %vm259_vm4, %v199_v4, 0  ;;  %v424_v20 = vfloor.f32 %v13744_v45  ;;  %v7582_v33 = vadd.f32 90.0, %v13411_v13 }
 0x1a9   :  { %20491 = vst [vmem:[#allocation232_spill] sm:$0xff] %v13844_v21  ;;  %971 = vperm.xlu0 %9595, %v878_v48   ;;  %vm20497_vm5 = vcmp.eq.s32.totalorder %v10433_v54, %v13724_v62  ;;  %v20500_v22 = vand.u32 4294901760, %v13826_v56  ;;  %v20501_v45 = vand.u32 4294901760, %v13828_v19  ;;  %vm1684_vm10 = vcmp.eq.s32.totalorder %v10416_v17, %v1573_v49  ;;  %9587 = vset.pattern.permute.xlu1 %v19621_v41 }
 0x1aa   :  { %20494 = vst [vmem:[#allocation233_spill] sm:$0xff] %v13857_v43  ;;  %vm13877_vm13 = vmor %vm20497_vm5, %vm1047_vm2  ;;  %v19068_v0 = vand.u32 4294901760, %v13857_v43  ;;  %v20502_v42 = vand.u32 4294901760, %v13844_v21  ;;  %vm1685_vm2 = vcmp.eq.s32.totalorder %v10427_v38, %v1573_v49  ;;  %vm1686_vm4 = vcmp.eq.s32.totalorder %v10430_v18, %v1573_v49 }
 0x1ab   :  { %v2659_v48 = vsub.f32 %v13826_v56, %v20500_v22  ;;  %v2665_v13 = vsub.f32 %v13828_v19, %v20501_v45  ;;  %vm20503_vm5 = vcmp.eq.s32.totalorder %v10416_v17, %v20459_v26  ;;  %vm20506_vm15 = vcmp.eq.s32.totalorder %v10427_v38, %v20459_v26 }
 0x1ac   :  { %v5263_v62 = vsub.f32 %v13844_v21, %v20502_v42  ;;  %vm13898_vm6 = vmor %vm20503_vm5, %vm1684_vm10  ;;  %v5257_v42 = vsub.f32 %v13857_v43, %v19068_v0  ;;  %vm20509_vm10 = vcmp.lt.s32.totalorder %v260_v9, 99  ;;  %vm20510_vm5 = vcmp.lt.s32.totalorder %v13665_v15, 99  ;;  %v13929_v0 = vpop.permute.xlu0 %1578 }
 0x1ad   :  { %v2660_v45 = vand.u32 4294901760, %v2659_v48  ;;  %v2666_v21 = vand.u32 4294901760, %v2665_v13  ;;  %vm13911_vm9 = vmor %vm20506_vm15, %vm1685_vm2  ;;  %v13916_v56 = vsel %vm20509_vm10, %v260_v9, 99  ;;  %v322_v37 = vsel %vm20510_vm5, %v13665_v15, 99  ;;  %9598 = vset.pattern.permute.xlu0 %v19621_v41 }
 0x1ae   :  { %v5264_v48 = vand.u32 4294901760, %v5263_v62  ;;  %vm20511_vm8 = vcmp.eq.s32.totalorder %v10430_v18, %v20459_v26  ;;  %v9498_v43 = vtrunc.f32 %v424_v20  ;;  %v105_v10 = vmul.f32 0.54444444, %v7582_v33  ;;  %v680_v62 = vpop.permute.xlu1 %679  ;;  %709 = vperm.xlu0 %9598, %v13916_v56   ;;  %706 = vperm.xlu1 %9587, %v322_v37   ;;  %vm13962_vm5 = vmor %vm13852_vm11, %vm13911_vm9 }
 0x1af   :  { %vm13924_vm3 = vmor %vm20511_vm8, %vm1686_vm4  ;;  %2661 = vmatprep.mubr.f32.mxu1 %v2660_v45  ;;  %v5258_v9 = vand.u32 4294901760, %v5257_v42  ;;  %vm20514_vm2 = vcmp.eq.s32.totalorder %v10433_v54, %v1573_v49  ;;  %vm20515_vm15 = vcmp.eq.s32.totalorder %v10433_v54, %v20459_v26  ;;  %v7583_v57 = vadd.f32 90.0, %v42_v58 }
 0x1b0   :  { %vm13936_vm10 = vmor %vm20515_vm15, %vm20514_vm2  ;;  %vm1048_vm8 = vcmp.eq.s32.totalorder %v10416_v17, %v11238_v47  ;;  %vm1049_vm4 = vcmp.eq.s32.totalorder %v10427_v38, %v11238_v47  ;;  %2667 = vmatmul.mubr.f32.gmra.mrb[32].mxu1 %v2666_v21  ;;  %v20518_v26 = vmov 0  ;;  %v9499_v20 = vcvt.f32.s32 %v9498_v43 }
 0x1b1   :  { %vm13952_vm2 = vmor %vm13837_vm7, %vm13898_vm6  ;;  %v1259_v49 = vadd.s32 200, %v322_v37  ;;  %5259 = vmatprep.mubr.f32.mxu0 %v5258_v9  ;;  %v20521_v21 = vmov 0  ;;  %v137_v33 = vfloor.f32 %v105_v10  ;;  %v20524_v37 = vmov 0  ;;  %v14002_v9 = vpop.permute.xlu0 %1587 }
 0x1b2   :  { %v20519_v26 = vsel %vm13952_vm2, 4294967295, %v20518_v26  ;;  %v20522_v21 = vsel %vm13962_vm5, 4294967295, %v20521_v21  ;;  %v7684_v31 = vsel %vm13952_vm2, 1.0, %v19757_v16  ;;  %5265 = vmatmul.mubr.f32.gmra.mrb[32].mxu0 %v5264_v48  ;;  %vm13973_vm7 = vmor %vm13864_vm0, %vm13924_vm3  ;;  %v7685_v19 = vsel %vm13962_vm5, 1.0, %v19757_v16  ;;  %v1320_v48 = vpop.permute.xlu1 %1319  ;;  %9588 = vset.pattern.permute.xlu1 %v19639_v63 }
 0x1b3   :  { %20520 = vst [vmem:[#allocation234_spill] sm:$0xff] %v20519_v26  ;;  %20523 = vst [vmem:[#allocation235_spill] sm:$0xff] %v20522_v21  ;;  %v20525_v37 = vsel %vm13973_vm7, 4294967295, %v20524_v37  ;;  %v13980_v23 = vsub.f32 %v7684_v31, %v7684_v31  ;;  %v488_v43 = vadd.s32 1, %v9499_v20  ;;  %v7615_v22 = vadd.f32 180.0, %v42_v58  ;;  %1346 = vperm.xlu1 %9588, %v1259_v49  }
 0x1b4   :  { %20526 = vst [vmem:[#allocation236_spill] sm:$0xff] %v20525_v37  ;;  %vm13986_vm9 = vmor %vm13877_vm13, %vm13936_vm10  ;;  %v20528_v10 = vmov 0  ;;  %vm792_vm3 = vcmp.eq.s32.totalorder %v10416_v17, %v680_v62  ;;  %v13991_v11 = vsub.f32 %v7685_v19, %v7685_v19  ;;  %v7686_v45 = vsel %vm13973_vm7, 1.0, %v19757_v16 }
 0x1b5   :  { %20527 = vst [vmem:[#allocation237_spill] sm:$0xff] %v13980_v23  ;;  %v20529_v10 = vsel %vm13986_vm9, 4294967295, %v20528_v10  ;;  %v106_v42 = vmul.f32 0.54444444, %v7583_v57  ;;  %v7687_v58 = vsel %vm13986_vm9, 1.0, %v19757_v16  ;;  %v19075_v4 = vand.u32 4294901760, %v13980_v23  ;;  %vm14024_vm10 = vmor %vm792_vm3, %vm1048_vm8 }
 0x1b6   :  { %20530 = vst [vmem:[#allocation238_spill] sm:$0xff] %v20529_v10  ;;  %20531 = vst [vmem:[#allocation239_spill] sm:$0xff] %v13991_v11  ;;  %v14000_v13 = vsub.f32 %v7686_v45, %v7686_v45  ;;  %vm549_vm11 = vcmp.gt.s32.totalorder %v488_v43, 0  ;;  %v14005_v15 = vadd.s32 100, %v12090_v24  ;;  %vm793_vm0 = vcmp.eq.s32.totalorder %v10427_v38, %v680_v62  ;;  %v1576_v45 = vpop.permute.xlu1 %1575 }
 0x1b7   :  { %v9436_v57 = vtrunc.f32 %v137_v33  ;;  %v19080_v20 = vand.u32 4294901760, %v13991_v11  ;;  %v14011_v31 = vsub.f32 %v7687_v58, %v7687_v58  ;;  %v2680_v19 = vsub.f32 %v13980_v23, %v19075_v4  ;;  %vm14035_vm6 = vmor %vm793_vm0, %vm1049_vm4  ;;  %9589 = vset.pattern.permute.xlu1 %v19622_v44 }
 0x1b8   :  { %20532 = vst [vmem:[#allocation240_spill] sm:$0xff] %v14000_v13  ;;  %v1515_v24 = vadd.s32 300, %v13570_v51  ;;  %v550_v33 = vsel %vm549_vm11, %v488_v43, 0  ;;  %v14028_v58 = vmul.f32 0.27222222, %v7615_v22  ;;  %v20538_v43 = vand.u32 4294901760, %v14000_v13 }
 0x1b9   :  { %20533 = vst [vmem:[#allocation241_spill] sm:$0xff] %v14011_v31  ;;  %v2674_v4 = vsub.f32 %v13991_v11, %v19080_v20  ;;  %v138_v23 = vfloor.f32 %v106_v42  ;;  %vm20539_vm8 = vcmp.eq.s32.totalorder %v10430_v18, %v11238_v47  ;;  %vm20540_vm3 = vcmp.eq.s32.totalorder %v10430_v18, %v680_v62 }
 0x1ba   :  { %v5278_v22 = vsub.f32 %v14000_v13, %v20538_v43  ;;  %vm14051_vm4 = vmor %vm20540_vm3, %vm20539_vm8  ;;  %vm1432_vm11 = vcmp.eq.s32.totalorder %v10416_v17, %v1320_v48  ;;  %v2681_v20 = vand.u32 4294901760, %v2680_v19  ;;  %vm20543_vm13 = vcmp.eq.s32.totalorder %v10433_v54, %v11238_v47  ;;  %v14071_v19 = vpop.permute.xlu0 %1596  ;;  %1602 = vperm.xlu1 %9589, %v1515_v24  }
 0x1bb   :  { %vm20544_vm7 = vcmp.eq.s32.totalorder %v10433_v54, %v680_v62  ;;  %v2675_v43 = vand.u32 4294901760, %v2674_v4  ;;  %v20547_v13 = vand.u32 4294901760, %v14011_v31  ;;  %vm1688_vm8 = vcmp.eq.s32.totalorder %v10416_v17, %v1576_v45 }
 0x1bc   :  { %vm14062_vm2 = vmor %vm20544_vm7, %vm20543_vm13  ;;  %v9437_v26 = vcvt.f32.s32 %v9436_v57  ;;  %v5279_v47 = vand.u32 4294901760, %v5278_v22  ;;  %vm1689_vm3 = vcmp.eq.s32.totalorder %v10427_v38, %v1576_v45  ;;  %vm1690_vm7 = vcmp.eq.s32.totalorder %v10430_v18, %v1576_v45  ;;  %v20556_v22 = vld [vmem:[#allocation2_spill] sm:$0xff] }
 0x1bd   :  { %v5272_v11 = vsub.f32 %v14011_v31, %v20547_v13  ;;  %vm14078_vm15 = vmor %vm1432_vm11, %vm1688_vm8  ;;  %vm1434_vm0 = vcmp.eq.s32.totalorder %v10430_v18, %v1320_v48  ;;  %2676 = vmatprep.mubr.f32.mxu1 %v2675_v43  ;;  %vm20550_vm9 = vcmp.eq.s32.totalorder %v10427_v38, %v1320_v48  ;;  %vm20553_vm12 = vcmp.lt.s32.totalorder %v550_v33, 99 }
 0x1be   :  { %vm14085_vm5 = vmor %vm20550_vm9, %vm1689_vm3  ;;  %v614_v57 = vsel %vm20553_vm12, %v550_v33, 99  ;;  %v9438_v24 = vtrunc.f32 %v138_v23  ;;  %vm797_vm13 = vcmp.eq.s32.totalorder %v10427_v38, %v12615_v7  ;;  %vm1435_vm8 = vcmp.eq.s32.totalorder %v10433_v54, %v1320_v48  ;;  %2682 = vmatmul.mubr.f32.gmra.mrb[34].mxu1 %v2681_v20  ;;  %v939_v33 = vpop.permute.xlu1 %938  ;;  %9590 = vset.pattern.permute.xlu1 %v19632_v46 }
 0x1bf   :  { %v5273_v4 = vand.u32 4294901760, %v5272_v11  ;;  %vm14095_vm14 = vmor %vm1434_vm0, %vm1690_vm7  ;;  %vm20557_vm12 = vcmp.eq.s32.totalorder %v10433_v54, %v1576_v45  ;;  %v1260_v48 = vadd.s32 200, %v13916_v56  ;;  %v20560_v20 = vmov 0  ;;  %965 = vperm.xlu1 %9590, %v14005_v15  }
 0x1c0   :  { %vm14104_vm3 = vmor %vm1435_vm8, %vm20557_vm12  ;;  %v14126_v45 = vadd.s32 100, %v614_v57  ;;  %v201_v43 = vadd.s32 1, %v9437_v26  ;;  %v20563_v56 = vmov 0  ;;  %v9439_v62 = vcvt.f32.s32 %v9438_v24 }
 0x1c1   :  { %5274 = vmatprep.mubr.f32.mxu0 %v5273_v4  ;;  %vm14120_vm8 = vmor %vm14024_vm10, %vm14078_vm15  ;;  %v14128_v4 = vadd.s32 300, %v614_v57  ;;  %vm1052_vm15 = vcmp.eq.s32.totalorder %v10416_v17, %v939_v33  ;;  %v426_v26 = vfloor.f32 %v14028_v58  ;;  %v20566_v15 = vmov 0 }
 0x1c2   :  { %5280 = vmatmul.mubr.f32.gmra.mrb[34].mxu0 %v5279_v47  ;;  %v20561_v20 = vsel %vm14120_vm8, 4294967295, %v20560_v20  ;;  %vm14135_vm7 = vmor %vm14035_vm6, %vm14085_vm5  ;;  %v7688_v49 = vsel %vm14120_vm8, 1.0, %v19757_v16  ;;  %v14143_v47 = vpop.permute.xlu0 %1605  ;;  %vm1053_vm5 = vcmp.eq.s32.totalorder %v10427_v38, %v939_v33  ;;  %v20570_v57 = vand.u32 4294901760, %v20556_v22  ;;  %v1323_v23 = vpop.permute.xlu1 %1322 }
 0x1c3   :  { %20562 = vst [vmem:[#allocation2_spill] sm:$0xff] %v20561_v20  ;;  %v20564_v56 = vsel %vm14135_vm7, 4294967295, %v20563_v56  ;;  %vm14150_vm10 = vmor %vm14051_vm4, %vm14095_vm14  ;;  %v7689_v51 = vsel %vm14135_vm7, 1.0, %v19757_v16  ;;  %v14158_v13 = vsub.f32 %v7688_v49, %v7688_v49  ;;  %v20571_v37 = vmov 0  ;;  %v20575_v49 = vld [vmem:[#allocation4_spill] sm:$0xff]  ;;  %9591 = vset.pattern.permute.xlu1 %v19639_v63 }
 0x1c4   :  { %20565 = vst [vmem:[#allocation242_spill] sm:$0xff] %v20564_v56  ;;  %v20567_v15 = vsel %vm14150_vm10, 4294967295, %v20566_v15  ;;  %v14163_v58 = vsub.f32 %v20556_v22, %v20570_v57  ;;  %vm14169_vm14 = vmor %vm14062_vm2, %vm14104_vm3  ;;  %vm1054_vm6 = vcmp.eq.s32.totalorder %v10430_v18, %v939_v33  ;;  %v14174_v24 = vsub.f32 %v7689_v51, %v7689_v51  ;;  %1349 = vperm.xlu1 %9591, %v1260_v48  }
 0x1c5   :  { %20568 = vst [vmem:[#allocation243_spill] sm:$0xff] %v20567_v15  ;;  %20569 = vst [vmem:[#allocation244_spill] sm:$0xff] %v14158_v13  ;;  %v20572_v37 = vsel %vm14169_vm14, 4294967295, %v20571_v37  ;;  %v7690_v11 = vsel %vm14150_vm10, 1.0, %v19757_v16  ;;  %vm1055_vm4 = vcmp.eq.s32.totalorder %v10433_v54, %v939_v33  ;;  %vm20576_vm2 = vcmp.eq.s32.totalorder %v10416_v17, %v12615_v7 }
 0x1c6   :  { %20573 = vst [vmem:[#allocation245_spill] sm:$0xff] %v20572_v37  ;;  %20574 = vst [vmem:[#allocation246_spill] sm:$0xff] %v14174_v24  ;;  %v7691_v51 = vsel %vm14169_vm14, 1.0, %v19757_v16  ;;  %v14194_v15 = vsub.f32 %v7690_v11, %v7690_v11  ;;  %vm1437_vm12 = vcmp.eq.s32.totalorder %v10427_v38, %v1323_v23  ;;  %v202_v20 = vadd.s32 1, %v9439_v62  ;;  %v14234_v57 = vpop.permute.xlu0 %1325  ;;  %v14265_v2 = vpop.permute.xlu1 %685 }
 0x1c7   :  { %vm14186_vm3 = vmor %vm20576_vm2, %vm1052_vm15  ;;  %vm1436_vm2 = vcmp.eq.s32.totalorder %v10416_v17, %v1323_v23  ;;  %vm20582_vm11 = vcmp.eq.s32.totalorder %v10430_v18, %v12615_v7  ;;  %v14218_v37 = vsub.f32 %v7691_v51, %v7691_v51  ;;  %v20586_v56 = vand.u32 4294901760, %v14158_v13  ;;  %v20590_v51 = vld [vmem:[#allocation6_spill] sm:$0xff] }
 0x1c8   :  { %20579 = vst [vmem:[#allocation4_spill] sm:$0xff] %v14194_v15  ;;  %vm14202_vm15 = vmor %vm797_vm13, %vm1053_vm5  ;;  %vm20587_vm13 = vcmp.eq.s32.totalorder %v10433_v54, %v12615_v7  ;;  %vm20593_vm0 = vcmp.eq.s32.totalorder %v10416_v17, %v13929_v0  ;;  %v20596_v33 = vand.u32 4294901760, %v14174_v24  ;;  %v20597_v30 = vand.u32 4294901760, %v14194_v15  ;;  %9593 = vset.pattern.permute.xlu1 %v19621_v41 }
 0x1c9   :  { %vm14213_vm9 = vmor %vm20582_vm11, %vm1054_vm6  ;;  %20585 = vst [vmem:[#allocation247_spill] sm:$0xff] %v14218_v37  ;;  %v2695_v10 = vsub.f32 %v14158_v13, %v20586_v56  ;;  %v20592_v56 = vld [vmem:[#allocation9_spill] sm:$0xff]  ;;  %v9502_v21 = vtrunc.f32 %v426_v26  ;;  %vm20602_vm11 = vcmp.eq.s32.totalorder %v10430_v18, %v13929_v0  ;;  %vm20603_vm10 = vcmp.eq.s32.totalorder %v10430_v18, %v1323_v23  ;;  %712 = vperm.xlu1 %9593, %v13102_v60  }
 0x1ca   :  { %vm14229_vm5 = vmor %vm20587_vm13, %vm1055_vm4  ;;  %v2689_v62 = vsub.f32 %v14174_v24, %v20596_v33  ;;  %v5293_v13 = vsub.f32 %v14194_v15, %v20597_v30  ;;  %vm20598_vm13 = vcmp.eq.s32.totalorder %v10427_v38, %v13929_v0  ;;  %v2902_v26 = vand.u32 4294901760, %v14163_v58 }
 0x1cb   :  { %vm14245_vm4 = vmor %vm1436_vm2, %vm20593_vm0  ;;  %v2696_v14 = vand.u32 4294901760, %v2695_v10  ;;  %vm20601_vm0 = vcmp.gt.s32.totalorder %v201_v43, 0  ;;  %vm265_vm2 = vcmp.gt.s32.totalorder %v202_v20, 0  ;;  %v20606_v10 = vand.u32 4294901760, %v14218_v37 }
 0x1cc   :  { %vm14261_vm6 = vmor %vm1437_vm12, %vm20598_vm13  ;;  %v14268_v33 = vsel %vm20601_vm0, %v201_v43, 0  ;;  %v2690_v15 = vand.u32 4294901760, %v2689_v62  ;;  %v5294_v43 = vand.u32 4294901760, %v5293_v13  ;;  %vm20607_vm13 = vcmp.eq.s32.totalorder %v10433_v54, %v13929_v0 }
 0x1cd   :  { %vm14276_vm8 = vmor %vm20603_vm10, %vm20602_vm11  ;;  %v5287_v24 = vsub.f32 %v14218_v37, %v20606_v10  ;;  %vm20608_vm10 = vcmp.eq.s32.totalorder %v10433_v54, %v1323_v23  ;;  %vm800_vm0 = vcmp.eq.s32.totalorder %v10416_v17, %v14265_v2  ;;  %v266_v60 = vsel %vm265_vm2, %v202_v20, 0  ;;  %v942_v23 = vpop.permute.xlu1 %941  ;;  %9594 = vset.pattern.permute.xlu1 %v19632_v46 }
 0x1ce   :  { %vm14292_vm11 = vmor %vm20608_vm10, %vm20607_vm13  ;;  %v20611_v0 = vmov 0  ;;  %2691 = vmatprep.mubr.f32.mxu1 %v2690_v15  ;;  %vm803_vm10 = vcmp.eq.s32.totalorder %v10433_v54, %v14265_v2  ;;  %vm329_vm7 = vcmp.lt.s32.totalorder %v266_v60, 99  ;;  %v9503_v20 = vcvt.f32.s32 %v9502_v21  ;;  %968 = vperm.xlu1 %9594, %v14126_v45  }
 0x1cf   :  { %vm14308_vm13 = vmor %vm14186_vm3, %vm14245_vm4  ;;  %v5288_v13 = vand.u32 4294901760, %v5287_v24  ;;  %v20614_v58 = vmov 0  ;;  %2697 = vmatmul.mubr.f32.gmra.mrb[36].mxu1 %v2696_v14  ;;  %v14330_v24 = vsel %vm329_vm7, %v266_v60, 99  ;;  %v20617_v21 = vand.u32 4294901760, %v20575_v49 }
 0x1d0   :  { %v20612_v0 = vsel %vm14308_vm13, 4294967295, %v20611_v0  ;;  %vm14321_vm3 = vmor %vm14202_vm15, %vm14261_vm6  ;;  %v7692_v15 = vsel %vm14308_vm13, 1.0, %v19757_v16  ;;  %v20618_v31 = vand.u32 4294901760, %v20590_v51  ;;  %v20619_v14 = vmov 0  ;;  %718 = vperm.xlu0 %9598, %v14330_v24  }
 0x1d1   :  { %20613 = vst [vmem:[#allocation6_spill] sm:$0xff] %v20612_v0  ;;  %v20615_v58 = vsel %vm14321_vm3, 4294967295, %v20614_v58  ;;  %v2908_v3 = vsub.f32 %v20575_v49, %v20617_v21  ;;  %vm14344_vm15 = vmor %vm14213_vm9, %vm14276_vm8  ;;  %5289 = vmatprep.mubr.f32.mxu0 %v5288_v13  ;;  %v7693_v62 = vsel %vm14321_vm3, 1.0, %v19757_v16  ;;  %v14351_v7 = vsub.f32 %v7692_v15, %v7692_v15 }
 0x1d2   :  { %20616 = vst [vmem:[#allocation7_spill] sm:$0xff] %v20615_v58  ;;  %v14338_v42 = vsub.f32 %v20590_v51, %v20618_v31  ;;  %v20620_v14 = vsel %vm14344_vm15, 4294967295, %v20619_v14  ;;  %v490_v10 = vadd.s32 1, %v9503_v20  ;;  %v20623_v60 = vand.u32 4294901760, %v20591_v8  ;;  %vm14361_vm9 = vmor %vm14229_vm5, %vm14292_vm11  ;;  %5295 = vmatmul.mubr.f32.gmra.mrb[36].mxu0 %v5294_v43  ;;  %9596 = vset.pattern.permute.xlu1 %v19622_v44 }
 0x1d3   :  { %20621 = vst [vmem:[#allocation9_spill] sm:$0xff] %v20620_v14  ;;  %20622 = vst [vmem:[#allocation248_spill] sm:$0xff] %v14351_v7  ;;  %v20624_v11 = vmov 0  ;;  %vm1056_vm7 = vcmp.eq.s32.totalorder %v10416_v17, %v942_v23  ;;  %vm1057_vm8 = vcmp.eq.s32.totalorder %v10427_v38, %v942_v23  ;;  %vm1058_vm6 = vcmp.eq.s32.totalorder %v10430_v18, %v942_v23  ;;  %v1582_v14 = vpop.permute.xlu1 %1581  ;;  %1608 = vperm.xlu1 %9596, %v14128_v4  }
 0x1d4   :  { %v5506_v30 = vsub.f32 %v20591_v8, %v20623_v60  ;;  %v20625_v11 = vsel %vm14361_vm9, 4294967295, %v20624_v11  ;;  %v7694_v13 = vsel %vm14344_vm15, 1.0, %v19757_v16  ;;  %vm1059_vm5 = vcmp.eq.s32.totalorder %v10433_v54, %v942_v23  ;;  %vm14383_vm2 = vmor %vm800_vm0, %vm1056_vm7  ;;  %9603 = vset.pattern.permute.xlu0 %v19622_v44 }
 0x1d5   :  { %20626 = vst [vmem:[#allocation249_spill] sm:$0xff] %v20625_v11  ;;  %v14374_v52 = vsub.f32 %v7693_v62, %v7693_v62  ;;  %v7695_v48 = vsel %vm14361_vm9, 1.0, %v19757_v16  ;;  %v19143_v43 = vand.u32 4294901760, %v14351_v7  ;;  %v14389_v45 = vsub.f32 %v7694_v13, %v7694_v13  ;;  %v20659_v11 = vld [vmem:[#allocation12_spill] sm:$0xff] }
 0x1d6   :  { %v14387_v15 = vsub.f32 %v7695_v48, %v7695_v48  ;;  %vm553_vm11 = vcmp.gt.s32.totalorder %v490_v10, 0  ;;  %v2909_v21 = vand.u32 4294901760, %v2908_v3  ;;  %vm20632_vm4 = vcmp.eq.s32.totalorder %v10427_v38, %v14265_v2 }
 0x1d7   :  { %20627 = vst [vmem:[#allocation250_spill] sm:$0xff] %v14374_v52  ;;  %20631 = vst [vmem:[#allocation252_spill] sm:$0xff] %v14389_v45  ;;  %v2710_v60 = vsub.f32 %v14351_v7, %v19143_v43  ;;  %v554_v37 = vsel %vm553_vm11, %v490_v10, 0  ;;  %v5500_v13 = vand.u32 4294901760, %v14338_v42  ;;  %vm20635_vm0 = vcmp.eq.s32.totalorder %v10430_v18, %v14265_v2  ;;  %9597 = vset.pattern.permute.xlu1 %v19621_v41 }
 0x1d8   :  { %20630 = vst [vmem:[#allocation251_spill] sm:$0xff] %v14387_v15  ;;  %vm14394_vm12 = vmor %vm20632_vm4, %vm1057_vm8  ;;  %v19150_v62 = vand.u32 4294901760, %v14389_v45  ;;  %v8177_v10 = vpack.c.bf16 %v2909_v21, %v2902_v26  ;;  %v20640_v43 = vand.u32 4294901760, %v14374_v52  ;;  %vm1697_vm11 = vcmp.eq.s32.totalorder %v10427_v38, %v1582_v14 }
 0x1d9   :  { %vm14409_vm4 = vmor %vm20635_vm0, %vm1058_vm6  ;;  %v2711_v7 = vand.u32 4294901760, %v2710_v60  ;;  %vm1696_vm6 = vcmp.eq.s32.totalorder %v10416_v17, %v1582_v14  ;;  %v20641_v26 = vand.u32 4294901760, %v14387_v15  ;;  %vm20642_vm0 = vcmp.eq.s32.totalorder %v10416_v17, %v14234_v57 }
 0x1da   :  { %vm14421_vm8 = vmor %vm803_vm10, %vm1059_vm5  ;;  %v2704_v48 = vsub.f32 %v14374_v52, %v20640_v43  ;;  %v5308_v2 = vsub.f32 %v14389_v45, %v19150_v62  ;;  %vm1698_vm10 = vcmp.eq.s32.totalorder %v10430_v18, %v1582_v14  ;;  %vm1699_vm5 = vcmp.eq.s32.totalorder %v10433_v54, %v1582_v14  ;;  %8178 = vmatpush1.bf16.msra.mxu1 %v8177_v10 }
 0x1db   :  { %v5302_v23 = vsub.f32 %v14387_v15, %v20641_v26  ;;  %vm14442_vm14 = vmor %vm20642_vm0, %vm1696_vm6  ;;  %vm20645_vm7 = vcmp.eq.s32.totalorder %v10427_v38, %v14234_v57  ;;  %vm20648_vm13 = vcmp.lt.s32.totalorder %v554_v37, 99  ;;  %v5507_v26 = vand.u32 4294901760, %v5506_v30 }
 0x1dc   :  { %v2705_v4 = vand.u32 4294901760, %v2704_v48  ;;  %vm14449_vm15 = vmor %vm20645_vm7, %vm1697_vm11  ;;  %v618_v60 = vsel %vm20648_vm13, %v554_v37, 99  ;;  %v20649_v62 = vand.u32 4294901760, %v20592_v56  ;;  %vm20650_vm0 = vcmp.lt.s32.totalorder %v14268_v33, 99 }
 0x1dd   :  { %v328_v48 = vsel %vm20650_vm0, %v14268_v33, 99  ;;  %v5303_v15 = vand.u32 4294901760, %v5302_v23  ;;  %v5309_v52 = vand.u32 4294901760, %v5308_v2  ;;  %vm20651_vm7 = vcmp.eq.s32.totalorder %v10430_v18, %v14234_v57  ;;  %v20658_v2 = vld [vmem:[#allocation10_spill] sm:$0xff] }
 0x1de   :  { %v14457_v45 = vsub.f32 %v20592_v56, %v20649_v62  ;;  %vm14467_vm13 = vmor %vm20651_vm7, %vm1698_vm10  ;;  %v1519_v30 = vadd.s32 300, %v618_v60  ;;  %v20654_v10 = vmov 0.0|0.0   ;;  %vm1061_vm11 = vcmp.eq.s32.totalorder %v10427_v38, %v11288_v59  ;;  %2706 = vmatprep.mubr.f32.mxu1 %v2705_v4  ;;  %v14483_v62 = vpop.permute.xlu1 %688  ;;  %715 = vperm.xlu1 %9597, %v328_v48  }
 0x1df   :  { %8179 = vmatprep.subr.bf16.mxu1 %v20654_v10  ;;  %vm20655_vm0 = vcmp.eq.s32.totalorder %v10433_v54, %v14234_v57  ;;  %v8465_v23 = vpack.c.bf16 %v5507_v26, %v5500_v13  ;;  %v19164_v0 = vand.u32 4294901760, %v20658_v2  ;;  %vm1062_vm10 = vcmp.eq.s32.totalorder %v10430_v18, %v11288_v59  ;;  %5304 = vmatprep.mubr.f32.mxu0 %v5303_v15  ;;  %v20663_v26 = vld [vmem:[#allocation13_spill] sm:$0xff] }
 0x1e0   :  { %vm14479_vm6 = vmor %vm20655_vm0, %vm1699_vm5  ;;  %v14490_v4 = vadd.s32 300, %v13801_v40  ;;  %v1262_v57 = vadd.s32 200, %v328_v48  ;;  %v20660_v14 = vmov 0  ;;  %v2916_v13 = vand.u32 4294901760, %v14457_v45  ;;  %2712 = vmatmul.mubr.f32.gmra.mrb[38].mxu1 %v2711_v7  ;;  %5310 = vmatmul.mubr.f32.gmra.mrb[38].mxu0 %v5309_v52  ;;  %v20672_v52 = vld [vmem:[#allocation14_spill] sm:$0xff]  ;;  %v20682_v48 = vld [vmem:[#allocation16_spill] sm:$0xff] }
 0x1e1   :  { %vm14497_vm5 = vmor %vm14383_vm2, %vm14442_vm14  ;;  %v19163_v58 = vand.u32 4294901760, %v20663_v26  ;;  %v20664_v41 = vmov 0  ;;  %vm804_vm14 = vcmp.eq.s32.totalorder %v10416_v17, %v14483_v62  ;;  %v2922_v20 = vsub.f32 %v20658_v2, %v19164_v0  ;;  %1614 = vperm.xlu0 %9603, %v1519_v30   ;;  %8466 = vmatpush1.bf16.msra.mxu0 %v8465_v23 }
 0x1e2   :  { %v20661_v14 = vsel %vm14497_vm5, 4294967295, %v20660_v14  ;;  %vm14509_vm0 = vmor %vm14394_vm12, %vm14449_vm15  ;;  %v7696_v40 = vsel %vm14497_vm5, 1.0, %v19757_v16  ;;  %v20667_v7 = vand.u32 4294901760, %v20659_v11  ;;  %v20668_v45 = vmov 0  ;;  %8467 = vmatprep.subr.bf16.mxu0 %v20654_v10  ;;  %9599 = vset.pattern.permute.xlu1 %v19639_v63 }
 0x1e3   :  { %20662 = vst [vmem:[#allocation10_spill] sm:$0xff] %v20661_v14  ;;  %v20665_v41 = vsel %vm14509_vm0, 4294967295, %v20664_v41  ;;  %vm14528_vm12 = vmor %vm14409_vm4, %vm14467_vm13  ;;  %v7697_v31 = vsel %vm14509_vm0, 1.0, %v19757_v16  ;;  %v14535_v43 = vsub.f32 %v7696_v40, %v7696_v40  ;;  %v5520_v21 = vsub.f32 %v20663_v26, %v19163_v58  ;;  %v14554_v58 = vpop.permute.xlu1 %1328  ;;  %1355 = vperm.xlu1 %9599, %v1262_v57   ;;  %v20692_v14 = vld [vmem:[#allocation19_spill] sm:$0xff] }
 0x1e4   :  { %20666 = vst [vmem:[#allocation12_spill] sm:$0xff] %v20665_v41  ;;  %v5513_v15 = vsub.f32 %v20659_v11, %v20667_v7  ;;  %v20669_v45 = vsel %vm14528_vm12, 4294967295, %v20668_v45  ;;  %vm14545_vm15 = vmor %vm14421_vm8, %vm14479_vm6  ;;  %v20673_v3 = vmov 0  ;;  %v14549_v37 = vsub.f32 %v7697_v31, %v7697_v31 }
 0x1e5   :  { %20670 = vst [vmem:[#allocation13_spill] sm:$0xff] %v20669_v45  ;;  %20671 = vst [vmem:[#allocation253_spill] sm:$0xff] %v14535_v43  ;;  %v20674_v3 = vsel %vm14545_vm15, 4294967295, %v20673_v3  ;;  %v7698_v30 = vsel %vm14528_vm12, 1.0, %v19757_v16  ;;  %v2923_v40 = vand.u32 4294901760, %v2922_v20  ;;  %v7699_v33 = vsel %vm14545_vm15, 1.0, %v19757_v16 }
 0x1e6   :  { %20675 = vst [vmem:[#allocation14_spill] sm:$0xff] %v20674_v3  ;;  %20676 = vst [vmem:[#allocation254_spill] sm:$0xff] %v14549_v37  ;;  %v5514_v7 = vand.u32 4294901760, %v5513_v15  ;;  %v19165_v42 = vand.u32 4294901760, %v14535_v43  ;;  %v14560_v0 = vsub.f32 %v7698_v30, %v7698_v30  ;;  %v5521_v31 = vand.u32 4294901760, %v5520_v21 }
 0x1e7   :  { %vm805_vm2 = vcmp.eq.s32.totalorder %v10427_v38, %v14483_v62  ;;  %vm806_vm4 = vcmp.eq.s32.totalorder %v10430_v18, %v14483_v62  ;;  %v14570_v23 = vadd.s32 100, %v618_v60  ;;  %v14573_v15 = vsub.f32 %v7699_v33, %v7699_v33  ;;  %9600 = vset.pattern.permute.xlu1 %v19622_v44 }
 0x1e8   :  { %20677 = vst [vmem:[#allocation255_spill] sm:$0xff] %v14560_v0  ;;  %v2725_v21 = vsub.f32 %v14535_v43, %v19165_v42  ;;  %vm20679_vm6 = vcmp.eq.s32.totalorder %v10416_v17, %v11288_v59  ;;  %v8180_v57 = vpack.c.bf16 %v2923_v40, %v2916_v13  ;;  %v8468_v33 = vpack.c.bf16 %v5521_v31, %v5514_v7 }
 0x1e9   :  { %20678 = vst [vmem:[#allocation256_spill] sm:$0xff] %v14573_v15  ;;  %vm14585_vm13 = vmor %vm804_vm14, %vm20679_vm6  ;;  %v20685_v30 = vand.u32 4294901760, %v14549_v37  ;;  %v20686_v7 = vand.u32 4294901760, %v14560_v0  ;;  %v20687_v20 = vand.u32 4294901760, %v20672_v52  ;;  %v19193_v3 = vand.u32 4294901760, %v20692_v14  ;;  %1611 = vperm.xlu1 %9600, %v14490_v4  }
 0x1ea   :  { %vm14600_vm14 = vmor %vm805_vm2, %vm1061_vm11  ;;  %v2726_v40 = vand.u32 4294901760, %v2725_v21  ;;  %8181 = vmatpush1.bf16.msra.mxu1 %v8180_v57  ;;  %8469 = vmatpush1.bf16.msra.mxu0 %v8468_v33  ;;  %v20697_v33 = vand.u32 4294901760, %v14573_v15  ;;  %vm20698_vm12 = vcmp.eq.s32.totalorder %v10416_v17, %v14554_v58  ;;  %vm1447_vm0 = vcmp.eq.s32.totalorder %v10433_v54, %v14554_v58 }
 0x1eb   :  { %v2719_v13 = vsub.f32 %v14549_v37, %v20685_v30  ;;  %v5323_v31 = vsub.f32 %v14560_v0, %v20686_v7  ;;  %v2929_v43 = vsub.f32 %v20672_v52, %v20687_v20  ;;  %vm14622_vm2 = vmor %vm806_vm4, %vm1062_vm10  ;;  %v1585_v37 = vpop.permute.xlu1 %1584  ;;  %v20690_v7 = vand.u32 4294901760, %v20682_v48  ;;  %v20691_v0 = vld [vmem:[#allocation18_spill] sm:$0xff]  ;;  %8182 = vmatprep.subr.bf16.mxu1 %v20654_v10  ;;  %8470 = vmatprep.subr.bf16.mxu0 %v20654_v10 }
 0x1ec   :  { %v19192_v45 = vand.u32 4294901760, %v20691_v0  ;;  %vm20693_vm10 = vcmp.eq.s32.totalorder %v10433_v54, %v11288_v59  ;;  %vm20694_vm4 = vcmp.eq.s32.totalorder %v10433_v54, %v14483_v62  ;;  %vm1700_vm6 = vcmp.eq.s32.totalorder %v10416_v17, %v1585_v37 }
 0x1ed   :  { %v2936_v20 = vsub.f32 %v20682_v48, %v20690_v7  ;;  %vm14639_vm11 = vmor %vm20694_vm4, %vm20693_vm10  ;;  %v2720_v57 = vand.u32 4294901760, %v2719_v13  ;;  %v5317_v7 = vsub.f32 %v14573_v15, %v20697_v33  ;;  %v5324_v59 = vand.u32 4294901760, %v5323_v31  ;;  %v20706_v15 = vld [vmem:[#allocation20_spill] sm:$0xff]  ;;  %9601 = vset.pattern.permute.xlu1 %v19632_v46 }
 0x1ee   :  { %vm1701_vm4 = vcmp.eq.s32.totalorder %v10427_v38, %v1585_v37  ;;  %vm1702_vm8 = vcmp.eq.s32.totalorder %v10430_v18, %v1585_v37  ;;  %vm14660_vm5 = vmor %vm20698_vm12, %vm1700_vm6  ;;  %vm1446_vm10 = vcmp.eq.s32.totalorder %v10430_v18, %v14554_v58  ;;  %vm20701_vm7 = vcmp.eq.s32.totalorder %v10427_v38, %v14554_v58  ;;  %974 = vperm.xlu1 %9601, %v14570_v23  }
 0x1ef   :  { %2721 = vmatprep.mubr.f32.mxu1 %v2720_v57  ;;  %v5318_v62 = vand.u32 4294901760, %v5317_v7  ;;  %vm14673_vm9 = vmor %vm20701_vm7, %vm1701_vm4  ;;  %v2930_v13 = vand.u32 4294901760, %v2929_v43  ;;  %v2937_v57 = vand.u32 4294901760, %v2936_v20  ;;  %v5527_v33 = vsub.f32 %v20691_v0, %v19192_v45  ;;  %v948_v20 = vpop.permute.xlu1 %947  ;;  %v20710_v45 = vld [vmem:[#allocation22_spill] sm:$0xff] }
 0x1f0   :  { %2727 = vmatmul.mubr.f32.gmra.mrb[40].mxu1 %v2726_v40  ;;  %vm14680_vm6 = vmor %vm1446_vm10, %vm1702_vm8  ;;  %v5534_v7 = vsub.f32 %v20692_v14, %v19193_v3  ;;  %v1263_v43 = vadd.s32 200, %v14330_v24  ;;  %vm20707_vm8 = vcmp.eq.s32.totalorder %v10433_v54, %v1585_v37  ;;  %v19201_v3 = vand.u32 4294901760, %v20710_v45  ;;  %v20716_v37 = vld [vmem:[#allocation26_spill] sm:$0xff] }
 0x1f1   :  { %5319 = vmatprep.mubr.f32.mxu0 %v5318_v62  ;;  %vm14699_vm10 = vmor %vm1447_vm0, %vm20707_vm8  ;;  %v19200_v41 = vand.u32 4294901760, %v20711_v29  ;;  %v19203_v32 = vand.u32 4294901760, %v20712_v27  ;;  %v20713_v58 = vmov 0  ;;  %vm1064_vm8 = vcmp.eq.s32.totalorder %v10416_v17, %v948_v20 }
 0x1f2   :  { %5325 = vmatmul.mubr.f32.gmra.mrb[40].mxu0 %v5324_v59  ;;  %vm14713_vm0 = vmor %vm14585_vm13, %vm14660_vm5  ;;  %vm1065_vm7 = vcmp.eq.s32.totalorder %v10427_v38, %v948_v20  ;;  %v5528_v24 = vand.u32 4294901760, %v5527_v33  ;;  %v20717_v46 = vmov 0  ;;  %vm1066_vm5 = vcmp.eq.s32.totalorder %v10430_v18, %v948_v20  ;;  %9602 = vset.pattern.permute.xlu1 %v19639_v63 }
 0x1f3   :  { %v20714_v58 = vsel %vm14713_vm0, 4294967295, %v20713_v58  ;;  %vm14725_vm4 = vmor %vm14600_vm14, %vm14673_vm9  ;;  %v7700_v60 = vsel %vm14713_vm0, 1.0, %v19757_v16  ;;  %v8183_v59 = vpack.c.bf16 %v2937_v57, %v2930_v13  ;;  %v5535_v44 = vand.u32 4294901760, %v5534_v7  ;;  %v1332_v40 = vpop.permute.xlu1 %1331  ;;  %1358 = vperm.xlu1 %9602, %v1263_v43  }
 0x1f4   :  { %20715 = vst [vmem:[#allocation16_spill] sm:$0xff] %v20714_v58  ;;  %v20718_v46 = vsel %vm14725_vm4, 4294967295, %v20717_v46  ;;  %vm14737_vm13 = vmor %vm14622_vm2, %vm14680_vm6  ;;  %v20720_v23 = vmov 0  ;;  %v7701_v42 = vsel %vm14725_vm4, 1.0, %v19757_v16  ;;  %v14745_v4 = vsub.f32 %v7700_v60, %v7700_v60 }
 0x1f5   :  { %20719 = vst [vmem:[#allocation18_spill] sm:$0xff] %v20718_v46  ;;  %v20721_v23 = vsel %vm14737_vm13, 4294967295, %v20720_v23  ;;  %v20724_v33 = vand.u32 4294901760, %v20706_v15  ;;  %vm14754_vm14 = vmor %vm14639_vm11, %vm14699_vm10  ;;  %v20725_v30 = vmov 0  ;;  %v14758_v31 = vsub.f32 %v7701_v42, %v7701_v42  ;;  %8184 = vmatpush1.bf16.msra.mxu1 %v8183_v59  ;;  %v20751_v46 = vld [vmem:[#allocation27_spill] sm:$0xff] }
 0x1f6   :  { %20722 = vst [vmem:[#allocation19_spill] sm:$0xff] %v20721_v23  ;;  %20723 = vst [vmem:[#allocation20_spill] sm:$0xff] %v14745_v4  ;;  %v20726_v30 = vsel %vm14754_vm14, 4294967295, %v20725_v30  ;;  %v7702_v57 = vsel %vm14737_vm13, 1.0, %v19757_v16  ;;  %v8471_v7 = vpack.c.bf16 %v5535_v44, %v5528_v24  ;;  %v2950_v60 = vsub.f32 %v20710_v45, %v19201_v3  ;;  %8185 = vmatprep.subr.bf16.mxu1 %v20654_v10  ;;  %v20766_v23 = vld [vmem:[#allocation28_spill] sm:$0xff] }
 0x1f7   :  { %v2943_v13 = vsub.f32 %v20706_v15, %v20724_v33  ;;  %20727 = vst [vmem:[#allocation22_spill] sm:$0xff] %v20726_v30  ;;  %20728 = vst [vmem:[#allocation257_spill] sm:$0xff] %v14758_v31  ;;  %vm20729_vm11 = vcmp.eq.s32.totalorder %v10416_v17, %v12722_v55  ;;  %v7703_v42 = vsel %vm14754_vm14, 1.0, %v19757_v16  ;;  %v19202_v24 = vand.u32 4294901760, %v14745_v4  ;;  %v14858_v30 = vpop.permute.xlu1 %694 }
 0x1f8   :  { %vm14771_vm2 = vmor %vm20729_vm11, %vm1064_vm8  ;;  %v14779_v59 = vsub.f32 %v7702_v57, %v7702_v57  ;;  %v5541_v44 = vsub.f32 %v20711_v29, %v19200_v41  ;;  %vm20733_vm6 = vcmp.eq.s32.totalorder %v10427_v38, %v12722_v55  ;;  %vm1448_vm8 = vcmp.eq.s32.totalorder %v10416_v17, %v1332_v40  ;;  %8472 = vmatpush1.bf16.msra.mxu0 %v8471_v7 }
 0x1f9   :  { %vm14791_vm10 = vmor %vm20733_vm6, %vm1065_vm7  ;;  %vm1449_vm11 = vcmp.eq.s32.totalorder %v10427_v38, %v1332_v40  ;;  %vm1450_vm12 = vcmp.eq.s32.totalorder %v10430_v18, %v1332_v40  ;;  %v2944_v57 = vand.u32 4294901760, %v2943_v13  ;;  %vm20736_vm15 = vcmp.eq.s32.totalorder %v10430_v18, %v12722_v55  ;;  %8473 = vmatprep.subr.bf16.mxu0 %v20654_v10 }
 0x1fa   :  { %20732 = vst [vmem:[#allocation258_spill] sm:$0xff] %v14779_v59  ;;  %vm14803_vm9 = vmor %vm20736_vm15, %vm1066_vm5  ;;  %v19212_v41 = vand.u32 4294901760, %v14758_v31  ;;  %v14808_v3 = vsub.f32 %v7703_v42, %v7703_v42  ;;  %v2740_v62 = vsub.f32 %v14745_v4, %v19202_v24  ;;  %v19221_v13 = vand.u32 4294901760, %v14779_v59 }
 0x1fb   :  { %vm20740_vm7 = vcmp.eq.s32.totalorder %v10433_v54, %v948_v20  ;;  %vm20741_vm6 = vcmp.eq.s32.totalorder %v10433_v54, %v12722_v55  ;;  %v2951_v42 = vand.u32 4294901760, %v2950_v60  ;;  %v5548_v24 = vsub.f32 %v20712_v27, %v19203_v32  ;;  %v951_v33 = vpop.permute.xlu1 %950  ;;  %v20771_v55 = vld [vmem:[#allocation31_spill] sm:$0xff] }
 0x1fc   :  { %20739 = vst [vmem:[#allocation259_spill] sm:$0xff] %v14808_v3  ;;  %vm14819_vm15 = vmor %vm20741_vm6, %vm20740_vm7  ;;  %v20744_v7 = vand.u32 4294901760, %v20716_v37  ;;  %vm20745_vm7 = vcmp.eq.s32.totalorder %v10416_v17, %v14002_v9  ;;  %v2734_v60 = vsub.f32 %v14758_v31, %v19212_v41  ;;  %v5542_v4 = vand.u32 4294901760, %v5541_v44  ;;  %v14860_v41 = vpop.permute.xlu0 %1334 }
 0x1fd   :  { %vm14838_vm6 = vmor %vm1448_vm8, %vm20745_vm7  ;;  %vm20748_vm5 = vcmp.eq.s32.totalorder %v10427_v38, %v14002_v9  ;;  %v2741_v58 = vand.u32 4294901760, %v2740_v62  ;;  %v8186_v32 = vpack.c.bf16 %v2951_v42, %v2944_v57  ;;  %v5549_v31 = vand.u32 4294901760, %v5548_v24 }
 0x1fe   :  { %v14831_v20 = vsub.f32 %v20716_v37, %v20744_v7  ;;  %v5338_v7 = vsub.f32 %v14779_v59, %v19221_v13  ;;  %vm14854_vm8 = vmor %vm1449_vm11, %vm20748_vm5  ;;  %v19228_v6 = vand.u32 4294901760, %v20751_v46  ;;  %vm20752_vm7 = vcmp.eq.s32.totalorder %v10430_v18, %v14002_v9 }
 0x1ff   :  { %vm14868_vm13 = vmor %vm1450_vm12, %vm20752_vm7  ;;  %v2735_v13 = vand.u32 4294901760, %v2734_v60  ;;  %v20755_v62 = vand.u32 4294901760, %v14808_v3  ;;  %vm20756_vm11 = vcmp.eq.s32.totalorder %v10433_v54, %v14002_v9  ;;  %vm20757_vm5 = vcmp.eq.s32.totalorder %v10433_v54, %v1332_v40  ;;  %8187 = vmatpush1.bf16.msra.mxu1 %v8186_v32 }
 0x200   :  { %vm14880_vm0 = vmor %vm20757_vm5, %vm20756_vm11  ;;  %v5339_v57 = vand.u32 4294901760, %v5338_v7  ;;  %v2958_v42 = vand.u32 4294901760, %v14831_v20  ;;  %v20760_v9 = vmov 0  ;;  %vm812_vm11 = vcmp.eq.s32.totalorder %v10416_v17, %v14858_v30  ;;  %8188 = vmatprep.subr.bf16.mxu1 %v20654_v10  ;;  %v14951_v7 = vpop.permute.xlu0 %1343 }
 0x201   :  { %v5332_v59 = vsub.f32 %v14808_v3, %v20755_v62  ;;  %vm14893_vm14 = vmor %vm14771_vm2, %vm14838_vm6  ;;  %2736 = vmatprep.mubr.f32.mxu1 %v2735_v13  ;;  %vm813_vm5 = vcmp.eq.s32.totalorder %v10427_v38, %v14858_v30  ;;  %vm814_vm7 = vcmp.eq.s32.totalorder %v10430_v18, %v14858_v30  ;;  %v20763_v32 = vmov 0 }
 0x202   :  { %v20761_v9 = vsel %vm14893_vm14, 4294967295, %v20760_v9  ;;  %vm14910_vm2 = vmor %vm14791_vm10, %vm14854_vm8  ;;  %2742 = vmatmul.mubr.f32.gmra.mrb[42].mxu1 %v2741_v58  ;;  %v7704_v21 = vsel %vm14893_vm14, 1.0, %v19757_v16  ;;  %v2964_v13 = vsub.f32 %v20751_v46, %v19228_v6  ;;  %v19229_v20 = vand.u32 4294901760, %v20766_v23 }
 0x203   :  { %20762 = vst [vmem:[#allocation260_spill] sm:$0xff] %v20761_v9  ;;  %v5333_v40 = vand.u32 4294901760, %v5332_v59  ;;  %v20764_v32 = vsel %vm14910_vm2, 4294967295, %v20763_v32  ;;  %v8474_v59 = vpack.c.bf16 %v5549_v31, %v5542_v4  ;;  %vm14927_vm10 = vmor %vm14803_vm9, %vm14868_vm13  ;;  %v20767_v58 = vmov 0 }
 0x204   :  { %20765 = vst [vmem:[#allocation261_spill] sm:$0xff] %v20764_v32  ;;  %v20768_v58 = vsel %vm14927_vm10, 4294967295, %v20767_v58  ;;  %v7705_v4 = vsel %vm14910_vm2, 1.0, %v19757_v16  ;;  %v14936_v31 = vsub.f32 %v7704_v21, %v7704_v21  ;;  %v19241_v60 = vand.u32 4294901760, %v20771_v55  ;;  %vm14943_vm13 = vmor %vm14819_vm15, %vm14880_vm0 }
 0x205   :  { %20769 = vst [vmem:[#allocation262_spill] sm:$0xff] %v20768_v58  ;;  %5334 = vmatprep.mubr.f32.mxu0 %v5333_v40  ;;  %v20772_v63 = vmov 0  ;;  %vm1068_vm9 = vcmp.eq.s32.totalorder %v10416_v17, %v951_v33  ;;  %vm1069_vm6 = vcmp.eq.s32.totalorder %v10427_v38, %v951_v33  ;;  %vm1070_vm12 = vcmp.eq.s32.totalorder %v10430_v18, %v951_v33 }
 0x206   :  { %20770 = vst [vmem:[#allocation263_spill] sm:$0xff] %v14936_v31  ;;  %v20773_v63 = vsel %vm14943_vm13, 4294967295, %v20772_v63  ;;  %5340 = vmatmul.mubr.f32.gmra.mrb[42].mxu0 %v5339_v57  ;;  %vm1071_vm8 = vcmp.eq.s32.totalorder %v10433_v54, %v951_v33  ;;  %v14953_v44 = vsub.f32 %v7705_v4, %v7705_v4  ;;  %v7707_v43 = vsel %vm14943_vm13, 1.0, %v19757_v16  ;;  %vm14965_vm0 = vmor %vm812_vm11, %vm1068_vm9  ;;  %v20813_v57 = vld [vmem:[#allocation40_spill] sm:$0xff] }
 0x207   :  { %20774 = vst [vmem:[#allocation264_spill] sm:$0xff] %v20773_v63  ;;  %v19236_v62 = vand.u32 4294901760, %v14936_v31  ;;  %v7706_v24 = vsel %vm14927_vm10, 1.0, %v19757_v16  ;;  %8475 = vmatpush1.bf16.msra.mxu0 %v8474_v59  ;;  %v14969_v40 = vsub.f32 %v7707_v43, %v7707_v43  ;;  %v2965_v4 = vand.u32 4294901760, %v2964_v13  ;;  %vm14982_vm15 = vmor %vm813_vm5, %vm1069_vm6 }
 0x208   :  { %20775 = vst [vmem:[#allocation265_spill] sm:$0xff] %v14953_v44  ;;  %v14971_v21 = vsub.f32 %v7706_v24, %v7706_v24  ;;  %8476 = vmatprep.subr.bf16.mxu0 %v20654_v10  ;;  %v5555_v6 = vsub.f32 %v20766_v23, %v19229_v20  ;;  %v5562_v13 = vsub.f32 %v20771_v55, %v19241_v60  ;;  %v20782_v20 = vld [vmem:[#allocation32_spill] sm:$0xff]  ;;  %vm14999_vm11 = vmor %vm814_vm7, %vm1070_vm12  ;;  %v20788_v3 = vand.u32 4294901760, %v14953_v44  ;;  %v21017_v55 = vld [vmem:[#allocation87_spill] sm:$0xff] }
 0x209   :  { %20778 = vst [vmem:[#allocation266_spill] sm:$0xff] %v14969_v40  ;;  %v2755_v24 = vsub.f32 %v14936_v31, %v19236_v62  ;;  %v19253_v43 = vand.u32 4294901760, %v14969_v40  ;;  %v1591_v62 = vpop.permute.xlu1 %1590  ;;  %v8189_v31 = vpack.c.bf16 %v2965_v4, %v2958_v42  ;;  %vm20785_vm5 = vcmp.eq.s32.totalorder %v10433_v54, %v14858_v30  ;;  %v15034_v42 = vpop.permute.xlu0 %1352  ;;  %v21022_v23 = vld [vmem:[#allocation90_spill] sm:$0xff] }
 0x20a   :  { %20779 = vst [vmem:[#allocation267_spill] sm:$0xff] %v14971_v21  ;;  %v19252_v9 = vand.u32 4294901760, %v14971_v21  ;;  %v5556_v63 = vand.u32 4294901760, %v5555_v6  ;;  %vm15010_vm6 = vmor %vm20785_vm5, %vm1071_vm8  ;;  %v2749_v32 = vsub.f32 %v14953_v44, %v20788_v3  ;;  %vm1708_vm12 = vcmp.eq.s32.totalorder %v10416_v17, %v1591_v62  ;;  %v20804_v44 = vld [vmem:[#allocation36_spill] sm:$0xff]  ;;  %v20812_v3 = vld [vmem:[#allocation39_spill] sm:$0xff] }
 0x20b   :  { %v2756_v35 = vand.u32 4294901760, %v2755_v24  ;;  %vm1709_vm7 = vcmp.eq.s32.totalorder %v10427_v38, %v1591_v62  ;;  %v5347_v6 = vsub.f32 %v14969_v40, %v19253_v43  ;;  %vm1710_vm8 = vcmp.eq.s32.totalorder %v10430_v18, %v1591_v62  ;;  %8190 = vmatpush1.bf16.msra.mxu1 %v8189_v31  ;;  %v20802_v40 = vld [vmem:[#allocation33_spill] sm:$0xff] }
 0x20c   :  { %v5353_v30 = vsub.f32 %v14971_v21, %v19252_v9  ;;  %vm1711_vm9 = vcmp.eq.s32.totalorder %v10433_v54, %v1591_v62  ;;  %vm20789_vm5 = vcmp.eq.s32.totalorder %v10416_v17, %v14860_v41  ;;  %v2750_v33 = vand.u32 4294901760, %v2749_v32  ;;  %8191 = vmatprep.subr.bf16.mxu1 %v20654_v10 }
 0x20d   :  { %vm15030_vm10 = vmor %vm20789_vm5, %vm1708_vm12  ;;  %vm20792_vm14 = vcmp.eq.s32.totalorder %v10427_v38, %v14860_v41  ;;  %v20795_v62 = vand.u32 4294901760, %v20782_v20  ;;  %v5348_v9 = vand.u32 4294901760, %v5347_v6  ;;  %vm20796_vm12 = vcmp.eq.s32.totalorder %v10430_v18, %v14860_v41  ;;  %v20803_v6 = vld [vmem:[#allocation34_spill] sm:$0xff]  ;;  %v15091_v59 = vpop.permute.xlu0 %953 }
 0x20e   :  { %vm15039_vm13 = vmor %vm20792_vm14, %vm1709_vm7  ;;  %v5354_v43 = vand.u32 4294901760, %v5353_v30  ;;  %v5563_v31 = vand.u32 4294901760, %v5562_v13  ;;  %2751 = vmatprep.mubr.f32.mxu1 %v2750_v33  ;;  %vm20799_vm14 = vcmp.eq.s32.totalorder %v10433_v54, %v14860_v41  ;;  %v20805_v13 = vmov 0 }
 0x20f   :  { %v2971_v24 = vsub.f32 %v20782_v20, %v20795_v62  ;;  %vm15050_vm5 = vmor %vm20796_vm12, %vm1710_vm8  ;;  %5349 = vmatprep.mubr.f32.mxu0 %v5348_v9  ;;  %2757 = vmatmul.mubr.f32.gmra.mrb[44].mxu1 %v2756_v35  ;;  %v20808_v33 = vmov 0  ;;  %v20811_v35 = vld [vmem:[#allocation38_spill] sm:$0xff]  ;;  %v20818_v58 = vand.u32 4294901760, %v20803_v6  ;;  %v20819_v62 = vmov 0 }
 0x210   :  { %vm15057_vm7 = vmor %vm20799_vm14, %vm1711_vm9  ;;  %v8477_v41 = vpack.c.bf16 %v5563_v31, %v5556_v63  ;;  %5355 = vmatmul.mubr.f32.gmra.mrb[44].mxu0 %v5354_v43  ;;  %v20814_v63 = vmov 0 }
 0x211   :  { %vm15068_vm8 = vmor %vm14965_vm0, %vm15030_vm10  ;;  %v2972_v9 = vand.u32 4294901760, %v2971_v24  ;;  %v20817_v24 = vand.u32 4294901760, %v20802_v40  ;;  %v5569_v31 = vsub.f32 %v20803_v6, %v20818_v58  ;;  %vm1072_vm0 = vcmp.eq.s32.totalorder %v10416_v17, %v15091_v59 }
 0x212   :  { %v20806_v13 = vsel %vm15068_vm8, 4294967295, %v20805_v13  ;;  %vm15076_vm9 = vmor %vm14982_vm15, %vm15039_vm13  ;;  %v7708_v4 = vsel %vm15068_vm8, 1.0, %v19757_v16  ;;  %8478 = vmatpush1.bf16.msra.mxu0 %v8477_v41  ;;  %vm1073_vm15 = vcmp.eq.s32.totalorder %v10427_v38, %v15091_v59 }
 0x213   :  { %20807 = vst [vmem:[#allocation268_spill] sm:$0xff] %v20806_v13  ;;  %v20809_v33 = vsel %vm15076_vm9, 4294967295, %v20808_v33  ;;  %vm15087_vm10 = vmor %vm14999_vm11, %vm15050_vm5  ;;  %v7709_v43 = vsel %vm15076_vm9, 1.0, %v19757_v16  ;;  %v2978_v32 = vsub.f32 %v20802_v40, %v20817_v24  ;;  %v15115_v39 = vsub.f32 %v7708_v4, %v7708_v4  ;;  %8479 = vmatprep.subr.bf16.mxu0 %v20654_v10 }
 0x214   :  { %20810 = vst [vmem:[#allocation269_spill] sm:$0xff] %v20809_v33  ;;  %v20815_v63 = vsel %vm15087_vm10, 4294967295, %v20814_v63  ;;  %vm15109_vm13 = vmor %vm15010_vm6, %vm15057_vm7  ;;  %v15113_v30 = vsub.f32 %v7709_v43, %v7709_v43  ;;  %v7710_v41 = vsel %vm15087_vm10, 1.0, %v19757_v16  ;;  %v20824_v24 = vand.u32 4294901760, %v20804_v44 }
 0x215   :  { %20816 = vst [vmem:[#allocation270_spill] sm:$0xff] %v20815_v63  ;;  %v20820_v62 = vsel %vm15109_vm13, 4294967295, %v20819_v62  ;;  %20823 = vst [vmem:[#allocation273_spill] sm:$0xff] %v15115_v39  ;;  %v7711_v60 = vsel %vm15109_vm13, 1.0, %v19757_v16  ;;  %v15127_v58 = vsub.f32 %v7710_v41, %v7710_v41  ;;  %v2979_v43 = vand.u32 4294901760, %v2978_v32 }
 0x216   :  { %20821 = vst [vmem:[#allocation271_spill] sm:$0xff] %v20820_v62  ;;  %20822 = vst [vmem:[#allocation272_spill] sm:$0xff] %v15113_v30  ;;  %v5576_v21 = vsub.f32 %v20804_v44, %v20824_v24  ;;  %v5570_v13 = vand.u32 4294901760, %v5569_v31  ;;  %v19281_v4 = vand.u32 4294901760, %v15113_v30  ;;  %v15132_v63 = vsub.f32 %v7711_v60, %v7711_v60  ;;  %v20835_v44 = vld [vmem:[#allocation47_spill] sm:$0xff] }
 0x217   :  { %20825 = vst [vmem:[#allocation274_spill] sm:$0xff] %v15127_v58  ;;  %v19280_v33 = vand.u32 4294901760, %v15115_v39  ;;  %v8192_v1 = vpack.c.bf16 %v2979_v43, %v2972_v9  ;;  %v20827_v62 = vand.u32 4294901760, %v20811_v35  ;;  %v20828_v32 = vand.u32 4294901760, %v20812_v3  ;;  %v698_v9 = vpop.permute.xlu1 %697 }
 0x218   :  { %20826 = vst [vmem:[#allocation275_spill] sm:$0xff] %v15132_v63  ;;  %v5577_v28 = vand.u32 4294901760, %v5576_v21  ;;  %v2764_v34 = vsub.f32 %v15113_v30, %v19281_v4  ;;  %v19290_v60 = vand.u32 4294901760, %v15132_v63  ;;  %v20829_v43 = vand.u32 4294901760, %v15127_v58  ;;  %v20832_v4 = vld [vmem:[#allocation42_spill] sm:$0xff] }
 0x219   :  { %v2985_v41 = vsub.f32 %v20811_v35, %v20827_v62  ;;  %v2992_v31 = vsub.f32 %v20812_v3, %v20828_v32  ;;  %v2770_v21 = vsub.f32 %v15115_v39, %v19280_v33  ;;  %8193 = vmatpush1.bf16.msra.mxu1 %v8192_v1  ;;  %v20830_v32 = vand.u32 4294901760, %v20813_v57  ;;  %v20834_v30 = vld [vmem:[#allocation46_spill] sm:$0xff] }
 0x21a   :  { %v8480_v24 = vpack.c.bf16 %v5577_v28, %v5570_v13  ;;  %v5368_v62 = vsub.f32 %v15127_v58, %v20829_v43  ;;  %vm1074_vm11 = vcmp.eq.s32.totalorder %v10430_v18, %v15091_v59  ;;  %vm816_vm12 = vcmp.eq.s32.totalorder %v10416_v17, %v698_v9  ;;  %8194 = vmatprep.subr.bf16.mxu1 %v20654_v10 }
 0x21b   :  { %v2986_v35 = vand.u32 4294901760, %v2985_v41  ;;  %v2993_v53 = vand.u32 4294901760, %v2992_v31  ;;  %v5583_v3 = vsub.f32 %v20813_v57, %v20830_v32  ;;  %v2765_v28 = vand.u32 4294901760, %v2764_v34  ;;  %v20831_v32 = vld [vmem:[#allocation41_spill] sm:$0xff]  ;;  %vm15198_vm7 = vmor %vm816_vm12, %vm1072_vm0 }
 0x21c   :  { %8481 = vmatpush1.bf16.msra.mxu0 %v8480_v24  ;;  %v5362_v1 = vsub.f32 %v15132_v63, %v19290_v60  ;;  %v2771_v13 = vand.u32 4294901760, %v2770_v21  ;;  %v5369_v41 = vand.u32 4294901760, %v5368_v62  ;;  %v19291_v33 = vand.u32 4294901760, %v20831_v32  ;;  %v20833_v24 = vld [vmem:[#allocation45_spill] sm:$0xff]  ;;  %v15172_v21 = vpop.permute.xlu1 %1337 }
 0x21d   :  { %8482 = vmatprep.subr.bf16.mxu0 %v20654_v10  ;;  %v8195_v31 = vpack.c.bf16 %v2993_v53, %v2986_v35  ;;  %v5584_v43 = vand.u32 4294901760, %v5583_v3  ;;  %v19292_v58 = vand.u32 4294901760, %v20832_v4  ;;  %2766 = vmatprep.mubr.f32.mxu1 %v2765_v28  ;;  %v19294_v34 = vand.u32 4294901760, %v20833_v24  ;;  %v20836_v3 = vld [vmem:[#allocation49_spill] sm:$0xff]  ;;  %v20837_v28 = vld [vmem:[#allocation51_spill] sm:$0xff] }
 0x21e   :  { %v5363_v39 = vand.u32 4294901760, %v5362_v1  ;;  %v19293_v57 = vand.u32 4294901760, %v20834_v30  ;;  %v19297_v60 = vand.u32 4294901760, %v20835_v44  ;;  %2772 = vmatmul.mubr.f32.gmra.mrb[46].mxu1 %v2771_v13  ;;  %v5590_v53 = vsub.f32 %v20831_v32, %v19291_v33 }
 0x21f   :  { %v2999_v35 = vsub.f32 %v20832_v4, %v19292_v58  ;;  %vm817_vm5 = vcmp.eq.s32.totalorder %v10427_v38, %v698_v9  ;;  %vm818_vm14 = vcmp.eq.s32.totalorder %v10430_v18, %v698_v9  ;;  %8196 = vmatpush1.bf16.msra.mxu1 %v8195_v31  ;;  %v3006_v58 = vsub.f32 %v20833_v24, %v19294_v34  ;;  %v20845_v24 = vld [vmem:[#allocation54_spill] sm:$0xff] }
 0x220   :  { %5364 = vmatprep.mubr.f32.mxu0 %v5363_v39  ;;  %v5591_v13 = vand.u32 4294901760, %v5590_v53  ;;  %v5597_v1 = vsub.f32 %v20834_v30, %v19293_v57  ;;  %8197 = vmatprep.subr.bf16.mxu1 %v20654_v10  ;;  %v5604_v39 = vsub.f32 %v20835_v44, %v19297_v60  ;;  %v20841_v53 = vand.u32 4294901760, %v20837_v28  ;;  %v20842_v57 = vld [vmem:[#allocation52_spill] sm:$0xff]  ;;  %vm15218_vm0 = vmor %vm817_vm5, %vm1073_vm15  ;;  %v1594_v34 = vpop.permute.xlu1 %1593 }
 0x221   :  { %5370 = vmatmul.mubr.f32.gmra.mrb[46].mxu0 %v5369_v41  ;;  %v3000_v33 = vand.u32 4294901760, %v2999_v35  ;;  %v20840_v41 = vand.u32 4294901760, %v20836_v3  ;;  %v3007_v44 = vand.u32 4294901760, %v3006_v58  ;;  %vm15228_vm12 = vmor %vm818_vm14, %vm1074_vm11  ;;  %v20848_v32 = vand.u32 4294901760, %v20842_v57 }
 0x222   :  { %v3020_v35 = vsub.f32 %v20837_v28, %v20841_v53  ;;  %v8483_v60 = vpack.c.bf16 %v5591_v13, %v5584_v43  ;;  %v5598_v30 = vand.u32 4294901760, %v5597_v1  ;;  %v5605_v28 = vand.u32 4294901760, %v5604_v39  ;;  %v20858_v13 = vld [vmem:[#allocation56_spill] sm:$0xff] }
 0x223   :  { %v3013_v31 = vsub.f32 %v20836_v3, %v20840_v41  ;;  %v19315_v41 = vand.u32 4294901760, %v20845_v24  ;;  %v5611_v58 = vsub.f32 %v20842_v57, %v20848_v32  ;;  %vm20849_vm5 = vcmp.eq.s32.totalorder %v10433_v54, %v15091_v59 }
 0x224   :  { %v3021_v4 = vand.u32 4294901760, %v3020_v35  ;;  %vm20850_vm6 = vcmp.eq.s32.totalorder %v10433_v54, %v698_v9  ;;  %vm1457_vm14 = vcmp.eq.s32.totalorder %v10427_v38, %v15172_v21  ;;  %vm1712_vm10 = vcmp.eq.s32.totalorder %v10416_v17, %v1594_v34  ;;  %8484 = vmatpush1.bf16.msra.mxu0 %v8483_v60  ;;  %v957_v35 = vpop.permute.xlu1 %956 }
 0x225   :  { %v3014_v3 = vand.u32 4294901760, %v3013_v31  ;;  %vm15242_vm11 = vmor %vm20850_vm6, %vm20849_vm5  ;;  %vm1713_vm8 = vcmp.eq.s32.totalorder %v10427_v38, %v1594_v34  ;;  %vm1715_vm6 = vcmp.eq.s32.totalorder %v10433_v54, %v1594_v34  ;;  %vm20853_vm5 = vcmp.eq.s32.totalorder %v10416_v17, %v15172_v21  ;;  %8485 = vmatprep.subr.bf16.mxu0 %v20654_v10  ;;  %v20859_v31 = vld [vmem:[#allocation57_spill] sm:$0xff] }
 0x226   :  { %vm15259_vm2 = vmor %vm20853_vm5, %vm1712_vm10  ;;  %v8198_v9 = vpack.c.bf16 %v3007_v44, %v3000_v33  ;;  %v8486_v32 = vpack.c.bf16 %v5605_v28, %v5598_v30  ;;  %v5618_v1 = vsub.f32 %v20845_v24, %v19315_v41  ;;  %v19316_v39 = vand.u32 4294901760, %v20858_v13  ;;  %v20860_v44 = vld [vmem:[#allocation59_spill] sm:$0xff] }
 0x227   :  { %vm15268_vm9 = vmor %vm1457_vm14, %vm1713_vm8  ;;  %vm1459_vm8 = vcmp.eq.s32.totalorder %v10433_v54, %v15172_v21  ;;  %vm20861_vm14 = vcmp.eq.s32.totalorder %v10430_v18, %v1594_v34  ;;  %vm20862_vm15 = vcmp.eq.s32.totalorder %v10430_v18, %v15172_v21  ;;  %v8201_v28 = vpack.c.bf16 %v3021_v4, %v3014_v3 }
 0x228   :  { %vm15289_vm13 = vmor %vm20862_vm15, %vm20861_vm14  ;;  %8199 = vmatpush1.bf16.msra.mxu1 %v8198_v9  ;;  %v5612_v41 = vand.u32 4294901760, %v5611_v58  ;;  %8487 = vmatpush1.bf16.msra.mxu0 %v8486_v32  ;;  %v5619_v21 = vand.u32 4294901760, %v5618_v1  ;;  %v3027_v9 = vsub.f32 %v20858_v13, %v19316_v39  ;;  %v20867_v4 = vand.u32 4294901760, %v20859_v31  ;;  %v20871_v58 = vld [vmem:[#allocation60_spill] sm:$0xff]  ;;  %v20872_v1 = vld [vmem:[#allocation62_spill] sm:$0xff]  ;;  %v1341_v43 = vpop.permute.xlu1 %1340 }
 0x229   :  { %vm15297_vm5 = vmor %vm1459_vm8, %vm1715_vm6  ;;  %8200 = vmatprep.subr.bf16.mxu1 %v20654_v10  ;;  %v20868_v34 = vmov 0  ;;  %8488 = vmatprep.subr.bf16.mxu0 %v20654_v10  ;;  %v20873_v13 = vld [vmem:[#allocation64_spill] sm:$0xff]  ;;  %v20875_v62 = vmov 0  ;;  %v20878_v24 = vand.u32 4294901760, %v20860_v44  ;;  %v20879_v63 = vmov 0 }
 0x22a   :  { %v3034_v3 = vsub.f32 %v20859_v31, %v20867_v4  ;;  %vm15314_vm6 = vmor %vm15198_vm7, %vm15259_vm2  ;;  %v20874_v4 = vld [vmem:[#allocation66_spill] sm:$0xff]  ;;  %vm1076_vm2 = vcmp.eq.s32.totalorder %v10416_v17, %v957_v35  ;;  %vm1077_vm7 = vcmp.eq.s32.totalorder %v10427_v38, %v957_v35  ;;  %v8489_v32 = vpack.c.bf16 %v5619_v21, %v5612_v41 }
 0x22b   :  { %v20869_v34 = vsel %vm15314_vm6, 4294967295, %v20868_v34  ;;  %vm15327_vm8 = vmor %vm15218_vm0, %vm15268_vm9  ;;  %v7712_v59 = vsel %vm15314_vm6, 1.0, %v19757_v16  ;;  %v5625_v31 = vsub.f32 %v20860_v44, %v20878_v24  ;;  %vm1078_vm0 = vcmp.eq.s32.totalorder %v10430_v18, %v957_v35 }
 0x22c   :  { %20870 = vst [vmem:[#allocation276_spill] sm:$0xff] %v20869_v34  ;;  %v20876_v62 = vsel %vm15327_vm8, 4294967295, %v20875_v62  ;;  %vm15343_vm9 = vmor %vm15228_vm12, %vm15289_vm13  ;;  %v7713_v60 = vsel %vm15327_vm8, 1.0, %v19757_v16  ;;  %v15351_v39 = vsub.f32 %v7712_v59, %v7712_v59  ;;  %8202 = vmatpush1.bf16.msra.mxu1 %v8201_v28  ;;  %v20883_v24 = vmov 0  ;;  %8490 = vmatpush1.bf16.msra.mxu0 %v8489_v32  ;;  %v15583_v32 = vpop.permute.xlu0 %962 }
 0x22d   :  { %20877 = vst [vmem:[#allocation277_spill] sm:$0xff] %v20876_v62  ;;  %v20880_v63 = vsel %vm15343_vm9, 4294967295, %v20879_v63  ;;  %vm15357_vm14 = vmor %vm15242_vm11, %vm15297_vm5  ;;  %v15361_v53 = vsub.f32 %v7713_v60, %v7713_v60  ;;  %v7714_v33 = vsel %vm15343_vm9, 1.0, %v19757_v16  ;;  %8203 = vmatprep.subr.bf16.mxu1 %v20654_v10  ;;  %v3028_v59 = vand.u32 4294901760, %v3027_v9  ;;  %8491 = vmatprep.subr.bf16.mxu0 %v20654_v10 }
 0x22e   :  { %20881 = vst [vmem:[#allocation278_spill] sm:$0xff] %v20880_v63  ;;  %20882 = vst [vmem:[#allocation279_spill] sm:$0xff] %v15351_v39  ;;  %v20884_v24 = vsel %vm15357_vm14, 4294967295, %v20883_v24  ;;  %v3035_v34 = vand.u32 4294901760, %v3034_v3  ;;  %vm20887_vm12 = vcmp.eq.s32.totalorder %v10416_v17, %v12825_v5  ;;  %v7715_v30 = vsel %vm15357_vm14, 1.0, %v19757_v16 }
 0x22f   :  { %20885 = vst [vmem:[#allocation280_spill] sm:$0xff] %v20884_v24  ;;  %20886 = vst [vmem:[#allocation281_spill] sm:$0xff] %v15361_v53  ;;  %v19331_v28 = vand.u32 4294901760, %v15351_v39  ;;  %v15381_v21 = vsub.f32 %v7714_v33, %v7714_v33  ;;  %vm20891_vm5 = vcmp.eq.s32.totalorder %v10427_v38, %v12825_v5  ;;  %v5626_v3 = vand.u32 4294901760, %v5625_v31 }
 0x230   :  { %vm15373_vm11 = vmor %vm20887_vm12, %vm1076_vm2  ;;  %vm1460_vm2 = vcmp.eq.s32.totalorder %v10416_v17, %v1341_v43  ;;  %vm1461_vm12 = vcmp.eq.s32.totalorder %v10427_v38, %v1341_v43  ;;  %vm20894_vm13 = vcmp.eq.s32.totalorder %v10430_v18, %v12825_v5  ;;  %v15406_v33 = vsub.f32 %v7715_v30, %v7715_v30 }
 0x231   :  { %20890 = vst [vmem:[#allocation282_spill] sm:$0xff] %v15381_v21  ;;  %vm15388_vm15 = vmor %vm20891_vm5, %vm1077_vm7  ;;  %v2785_v63 = vsub.f32 %v15351_v39, %v19331_v28  ;;  %vm20898_vm7 = vcmp.eq.s32.totalorder %v10433_v54, %v957_v35  ;;  %vm20899_vm5 = vcmp.eq.s32.totalorder %v10433_v54, %v12825_v5  ;;  %v8204_v62 = vpack.c.bf16 %v3035_v34, %v3028_v59 }
 0x232   :  { %vm15401_vm9 = vmor %vm20894_vm13, %vm1078_vm0  ;;  %20897 = vst [vmem:[#allocation283_spill] sm:$0xff] %v15406_v33  ;;  %v20902_v60 = vand.u32 4294901760, %v20871_v58  ;;  %v20903_v44 = vand.u32 4294901760, %v20872_v1  ;;  %v20904_v24 = vand.u32 4294901760, %v20873_v13  ;;  %vm20905_vm13 = vcmp.eq.s32.totalorder %v10416_v17, %v14071_v19 }
 0x233   :  { %vm15417_vm10 = vmor %vm20899_vm5, %vm20898_vm7  ;;  %v20908_v34 = vand.u32 4294901760, %v15361_v53  ;;  %vm20910_vm5 = vcmp.eq.s32.totalorder %v10427_v38, %v14071_v19  ;;  %8205 = vmatpush1.bf16.msra.mxu1 %v8204_v62  ;;  %vm20914_vm6 = vcmp.eq.s32.totalorder %v10430_v18, %v1341_v43  ;;  %v20927_v5 = vmov 0 }
 0x234   :  { %v5632_v30 = vsub.f32 %v20871_v58, %v20902_v60  ;;  %v3041_v28 = vsub.f32 %v20872_v1, %v20903_v44  ;;  %v3048_v35 = vsub.f32 %v20873_v13, %v20904_v24  ;;  %vm15436_vm7 = vmor %vm1460_vm2, %vm20905_vm13  ;;  %v20909_v60 = vand.u32 4294901760, %v15381_v21  ;;  %v15456_v1 = vpop.permute.xlu1 %703  ;;  %8206 = vmatprep.subr.bf16.mxu1 %v20654_v10 }
 0x235   :  { %v2779_v59 = vsub.f32 %v15361_v53, %v20908_v34  ;;  %vm15452_vm0 = vmor %vm1461_vm12, %vm20910_vm5  ;;  %v2786_v13 = vand.u32 4294901760, %v2785_v63  ;;  %vm20913_vm13 = vcmp.eq.s32.totalorder %v10430_v18, %v14071_v19  ;;  %v20917_v63 = vand.u32 4294901760, %v15406_v33 }
 0x236   :  { %v5383_v24 = vsub.f32 %v15381_v21, %v20909_v60  ;;  %v5633_v34 = vand.u32 4294901760, %v5632_v30  ;;  %v3042_v53 = vand.u32 4294901760, %v3041_v28  ;;  %v3049_v44 = vand.u32 4294901760, %v3048_v35  ;;  %vm15465_vm14 = vmor %vm20914_vm6, %vm20913_vm13 }
 0x237   :  { %v2780_v21 = vand.u32 4294901760, %v2779_v59  ;;  %v5377_v62 = vsub.f32 %v15406_v33, %v20917_v63  ;;  %vm20918_vm5 = vcmp.eq.s32.totalorder %v10433_v54, %v14071_v19  ;;  %vm20919_vm2 = vcmp.eq.s32.totalorder %v10433_v54, %v1341_v43  ;;  %vm15495_vm13 = vmor %vm15373_vm11, %vm15436_vm7 }
 0x238   :  { %vm15480_vm8 = vmor %vm20919_vm2, %vm20918_vm5  ;;  %v5384_v30 = vand.u32 4294901760, %v5383_v24  ;;  %v8492_v35 = vpack.c.bf16 %v5633_v34, %v5626_v3  ;;  %v20922_v59 = vand.u32 4294901760, %v20874_v4  ;;  %v20923_v19 = vmov 0  ;;  %v20926_v3 = vld [vmem:[#allocation67_spill] sm:$0xff] }
 0x239   :  { %v20924_v19 = vsel %vm15495_vm13, 4294967295, %v20923_v19  ;;  %2781 = vmatprep.mubr.f32.mxu1 %v2780_v21  ;;  %v5378_v43 = vand.u32 4294901760, %v5377_v62  ;;  %v8207_v24 = vpack.c.bf16 %v3049_v44, %v3042_v53  ;;  %v19346_v34 = vand.u32 4294901760, %v20926_v3  ;;  %vm15506_vm5 = vmor %vm15388_vm15, %vm15452_vm0  ;;  %v960_v53 = vpop.permute.xlu1 %959  ;;  %v20934_v44 = vld [vmem:[#allocation68_spill] sm:$0xff] }
 0x23a   :  { %v15487_v63 = vsub.f32 %v20874_v4, %v20922_v59  ;;  %20925 = vst [vmem:[#allocation284_spill] sm:$0xff] %v20924_v19  ;;  %v20928_v5 = vsel %vm15506_vm5, 4294967295, %v20927_v5  ;;  %2787 = vmatmul.mubr.f32.gmra.mrb[48].mxu1 %v2786_v13  ;;  %vm824_vm11 = vcmp.eq.s32.totalorder %v10416_v17, %v15456_v1  ;;  %vm825_vm7 = vcmp.eq.s32.totalorder %v10427_v38, %v15456_v1  ;;  %vm15523_vm15 = vmor %vm15401_vm9, %vm15465_vm14 }
 0x23b   :  { %20929 = vst [vmem:[#allocation285_spill] sm:$0xff] %v20928_v5  ;;  %vm826_vm6 = vcmp.eq.s32.totalorder %v10430_v18, %v15456_v1  ;;  %v7716_v39 = vsel %vm15495_vm13, 1.0, %v19757_v16  ;;  %8493 = vmatpush1.bf16.msra.mxu0 %v8492_v35  ;;  %v20930_v13 = vmov 0  ;;  %5379 = vmatprep.mubr.f32.mxu0 %v5378_v43  ;;  %v7717_v41 = vsel %vm15506_vm5, 1.0, %v19757_v16  ;;  %vm15541_vm9 = vmor %vm15417_vm10, %vm15480_vm8 }
 0x23c   :  { %v20931_v13 = vsel %vm15523_vm15, 4294967295, %v20930_v13  ;;  %v15530_v21 = vsub.f32 %v7716_v39, %v7716_v39  ;;  %8494 = vmatprep.subr.bf16.mxu0 %v20654_v10  ;;  %v5646_v9 = vsub.f32 %v20926_v3, %v19346_v34  ;;  %v20935_v60 = vmov 0  ;;  %5385 = vmatmul.mubr.f32.gmra.mrb[48].mxu0 %v5384_v30  ;;  %v20943_v39 = vld [vmem:[#allocation70_spill] sm:$0xff]  ;;  %v20964_v3 = vld [vmem:[#allocation73_spill] sm:$0xff] }
 0x23d   :  { %20932 = vst [vmem:[#allocation286_spill] sm:$0xff] %v20931_v13  ;;  %v20936_v60 = vsel %vm15541_vm9, 4294967295, %v20935_v60  ;;  %vm1080_vm14 = vcmp.eq.s32.totalorder %v10416_v17, %v960_v53  ;;  %vm1081_vm0 = vcmp.eq.s32.totalorder %v10427_v38, %v960_v53  ;;  %vm1082_vm2 = vcmp.eq.s32.totalorder %v10430_v18, %v960_v53  ;;  %8208 = vmatpush1.bf16.msra.mxu1 %v8207_v24  ;;  %v20949_v13 = vld [vmem:[#allocation72_spill] sm:$0xff] }
 0x23e   :  { %20933 = vst [vmem:[#allocation287_spill] sm:$0xff] %v15530_v21  ;;  %20937 = vst [vmem:[#allocation288_spill] sm:$0xff] %v20936_v60  ;;  %v5640_v62 = vand.u32 4294901760, %v15487_v63  ;;  %v15549_v35 = vsub.f32 %v7717_v41, %v7717_v41  ;;  %v7719_v28 = vsel %vm15541_vm9, 1.0, %v19757_v16  ;;  %v19349_v31 = vand.u32 4294901760, %v15530_v21  ;;  %8209 = vmatprep.subr.bf16.mxu1 %v20654_v10 }
 0x23f   :  { %v7718_v30 = vsel %vm15523_vm15, 1.0, %v19757_v16  ;;  %vm1083_vm10 = vcmp.eq.s32.totalorder %v10433_v54, %v960_v53  ;;  %vm15562_vm8 = vmor %vm824_vm11, %vm1080_vm14  ;;  %v15566_v63 = vsub.f32 %v7719_v28, %v7719_v28  ;;  %v20946_v33 = vand.u32 4294901760, %v20934_v44 }
 0x240   :  { %20938 = vst [vmem:[#allocation289_spill] sm:$0xff] %v15549_v35  ;;  %v15568_v43 = vsub.f32 %v7718_v30, %v7718_v30  ;;  %vm15575_vm12 = vmor %vm825_vm7, %vm1081_vm0  ;;  %v2800_v28 = vsub.f32 %v15530_v21, %v19349_v31  ;;  %v5647_v30 = vand.u32 4294901760, %v5646_v9  ;;  %vm827_vm11 = vcmp.eq.s32.totalorder %v10433_v54, %v15456_v1  ;;  %v1600_v21 = vpop.permute.xlu1 %1599 }
 0x241   :  { %20941 = vst [vmem:[#allocation290_spill] sm:$0xff] %v15566_v63  ;;  %v3055_v41 = vsub.f32 %v20934_v44, %v20946_v33  ;;  %vm15595_vm7 = vmor %vm826_vm6, %vm1082_vm2  ;;  %v19368_v31 = vand.u32 4294901760, %v15566_v63  ;;  %v20952_v60 = vand.u32 4294901760, %v15549_v35  ;;  %vm1720_vm6 = vcmp.eq.s32.totalorder %v10416_v17, %v1600_v21 }
 0x242   :  { %20942 = vst [vmem:[#allocation291_spill] sm:$0xff] %v15568_v43  ;;  %vm15604_vm14 = vmor %vm827_vm11, %vm1083_vm10  ;;  %v2801_v5 = vand.u32 4294901760, %v2800_v28  ;;  %vm1721_vm2 = vcmp.eq.s32.totalorder %v10427_v38, %v1600_v21  ;;  %v20953_v19 = vand.u32 4294901760, %v15568_v43  ;;  %vm1722_vm0 = vcmp.eq.s32.totalorder %v10430_v18, %v1600_v21 }
 0x243   :  { %v2794_v1 = vsub.f32 %v15549_v35, %v20952_v60  ;;  %v5392_v9 = vsub.f32 %v15566_v63, %v19368_v31  ;;  %vm1723_vm10 = vcmp.eq.s32.totalorder %v10433_v54, %v1600_v21  ;;  %vm20954_vm11 = vcmp.eq.s32.totalorder %v10416_v17, %v14951_v7 }
 0x244   :  { %v5398_v53 = vsub.f32 %v15568_v43, %v20953_v19  ;;  %vm15624_vm15 = vmor %vm20954_vm11, %vm1720_vm6  ;;  %vm20957_vm9 = vcmp.eq.s32.totalorder %v10427_v38, %v14951_v7  ;;  %v8495_v31 = vpack.c.bf16 %v5647_v30, %v5640_v62  ;;  %v3056_v21 = vand.u32 4294901760, %v3055_v41  ;;  %v15663_v41 = vpop.permute.xlu0 %971 }
 0x245   :  { %v2795_v28 = vand.u32 4294901760, %v2794_v1  ;;  %vm15633_vm5 = vmor %vm20957_vm9, %vm1721_vm2  ;;  %v20960_v43 = vand.u32 4294901760, %v20943_v39  ;;  %v5393_v35 = vand.u32 4294901760, %v5392_v9  ;;  %vm20961_vm6 = vcmp.eq.s32.totalorder %v10430_v18, %v14951_v7 }
 0x246   :  { %v5399_v44 = vand.u32 4294901760, %v5398_v53  ;;  %vm15643_vm11 = vmor %vm20961_vm6, %vm1722_vm0  ;;  %vm1085_vm9 = vcmp.eq.s32.totalorder %v10427_v38, %v15583_v32  ;;  %v19380_v4 = vand.u32 4294901760, %v20964_v3  ;;  %vm20965_vm2 = vcmp.eq.s32.totalorder %v10433_v54, %v14951_v7  ;;  %8496 = vmatpush1.bf16.msra.mxu0 %v8495_v31  ;;  %v20972_v31 = vld [vmem:[#allocation75_spill] sm:$0xff] }
 0x247   :  { %v3062_v63 = vsub.f32 %v20943_v39, %v20960_v43  ;;  %2796 = vmatprep.mubr.f32.mxu1 %v2795_v28  ;;  %vm15653_vm13 = vmor %vm20965_vm2, %vm1723_vm10  ;;  %vm1086_vm4 = vcmp.eq.s32.totalorder %v10430_v18, %v15583_v32  ;;  %v15661_v43 = vpop.permute.xlu1 %706  ;;  %v20968_v9 = vand.u32 4294901760, %v20949_v13  ;;  %5394 = vmatprep.mubr.f32.mxu0 %v5393_v35  ;;  %v20969_v53 = vmov 0 }
 0x248   :  { %2802 = vmatmul.mubr.f32.gmra.mrb[50].mxu1 %v2801_v5  ;;  %vm15672_vm10 = vmor %vm15562_vm8, %vm15624_vm15  ;;  %vm828_vm6 = vcmp.eq.s32.totalorder %v10416_v17, %v15661_v43  ;;  %vm829_vm2 = vcmp.eq.s32.totalorder %v10427_v38, %v15661_v43  ;;  %v19381_v35 = vand.u32 4294901760, %v20972_v31  ;;  %5400 = vmatmul.mubr.f32.gmra.mrb[50].mxu0 %v5399_v44  ;;  %v20973_v5 = vmov 0 }
 0x249   :  { %v3063_v30 = vand.u32 4294901760, %v3062_v63  ;;  %v5653_v7 = vsub.f32 %v20949_v13, %v20968_v9  ;;  %v20970_v53 = vsel %vm15672_vm10, 4294967295, %v20969_v53  ;;  %vm15687_vm15 = vmor %vm15575_vm12, %vm15633_vm5  ;;  %vm831_vm8 = vcmp.eq.s32.totalorder %v10433_v54, %v15661_v43  ;;  %8497 = vmatprep.subr.bf16.mxu0 %v20654_v10  ;;  %v20984_v9 = vld [vmem:[#allocation76_spill] sm:$0xff] }
 0x24a   :  { %20971 = vst [vmem:[#allocation292_spill] sm:$0xff] %v20970_v53  ;;  %v20974_v5 = vsel %vm15687_vm15, 4294967295, %v20973_v5  ;;  %v7720_v59 = vsel %vm15672_vm10, 1.0, %v19757_v16  ;;  %vm15701_vm0 = vmor %vm15595_vm7, %vm15643_vm11  ;;  %v20976_v44 = vmov 0  ;;  %v7721_v24 = vsel %vm15687_vm15, 1.0, %v19757_v16 }
 0x24b   :  { %20975 = vst [vmem:[#allocation293_spill] sm:$0xff] %v20974_v5  ;;  %v8210_v63 = vpack.c.bf16 %v3063_v30, %v3056_v21  ;;  %v5654_v60 = vand.u32 4294901760, %v5653_v7  ;;  %v20977_v44 = vsel %vm15701_vm0, 4294967295, %v20976_v44  ;;  %v15708_v28 = vsub.f32 %v7720_v59, %v7720_v59  ;;  %vm15720_vm12 = vmor %vm15604_vm14, %vm15653_vm13  ;;  %v20985_v59 = vld [vmem:[#allocation78_spill] sm:$0xff] }
 0x24c   :  { %20978 = vst [vmem:[#allocation294_spill] sm:$0xff] %v20977_v44  ;;  %v5660_v19 = vsub.f32 %v20964_v3, %v19380_v4  ;;  %v3069_v21 = vsub.f32 %v20972_v31, %v19381_v35  ;;  %v20980_v34 = vmov 0  ;;  %v15724_v1 = vsub.f32 %v7721_v24, %v7721_v24  ;;  %v1347_v35 = vpop.permute.xlu1 %1346 }
 0x24d   :  { %20979 = vst [vmem:[#allocation295_spill] sm:$0xff] %v15708_v28  ;;  %v20981_v34 = vsel %vm15720_vm12, 4294967295, %v20980_v34  ;;  %v7722_v30 = vsel %vm15701_vm0, 1.0, %v19757_v16  ;;  %8211 = vmatpush1.bf16.msra.mxu1 %v8210_v63  ;;  %v7723_v33 = vsel %vm15720_vm12, 1.0, %v19757_v16  ;;  %v19390_v62 = vand.u32 4294901760, %v15708_v28  ;;  %v15742_v63 = vpop.permute.xlu0 %709 }
 0x24e   :  { %20982 = vst [vmem:[#allocation296_spill] sm:$0xff] %v20981_v34  ;;  %20983 = vst [vmem:[#allocation297_spill] sm:$0xff] %v15724_v1  ;;  %v15735_v53 = vsub.f32 %v7722_v30, %v7722_v30  ;;  %v5661_v24 = vand.u32 4294901760, %v5660_v19  ;;  %8212 = vmatprep.subr.bf16.mxu1 %v20654_v10  ;;  %vm1468_vm13 = vcmp.eq.s32.totalorder %v10416_v17, %v1347_v35  ;;  %v3070_v4 = vand.u32 4294901760, %v3069_v21 }
 0x24f   :  { %v15745_v7 = vsub.f32 %v7723_v33, %v7723_v33  ;;  %v2815_v19 = vsub.f32 %v15708_v28, %v19390_v62  ;;  %vm20988_vm11 = vcmp.eq.s32.totalorder %v10416_v17, %v15583_v32  ;;  %v20991_v33 = vand.u32 4294901760, %v20984_v9 }
 0x250   :  { %20986 = vst [vmem:[#allocation298_spill] sm:$0xff] %v15735_v53  ;;  %vm15757_vm7 = vmor %vm828_vm6, %vm20988_vm11  ;;  %v8498_v34 = vpack.c.bf16 %v5661_v24, %v5654_v60  ;;  %v20992_v62 = vand.u32 4294901760, %v20985_v59  ;;  %v20995_v60 = vand.u32 4294901760, %v15724_v1  ;;  %v20996_v3 = vand.u32 4294901760, %v15735_v53  ;;  %v21000_v24 = vld [vmem:[#allocation79_spill] sm:$0xff] }
 0x251   :  { %20987 = vst [vmem:[#allocation299_spill] sm:$0xff] %v15745_v7  ;;  %v3076_v5 = vsub.f32 %v20984_v9, %v20991_v33  ;;  %vm15773_vm6 = vmor %vm829_vm2, %vm1085_vm9  ;;  %v2816_v33 = vand.u32 4294901760, %v2815_v19  ;;  %vm20997_vm9 = vcmp.eq.s32.totalorder %v10430_v18, %v15661_v43  ;;  %vm21002_vm11 = vcmp.eq.s32.totalorder %v10433_v54, %v15583_v32 }
 0x252   :  { %v5667_v30 = vsub.f32 %v20985_v59, %v20992_v62  ;;  %v2809_v21 = vsub.f32 %v15724_v1, %v20995_v60  ;;  %v5413_v62 = vsub.f32 %v15735_v53, %v20996_v3  ;;  %vm15792_vm2 = vmor %vm20997_vm9, %vm1086_vm4  ;;  %v1603_v60 = vpop.permute.xlu1 %1602  ;;  %8499 = vmatpush1.bf16.msra.mxu0 %v8498_v34  ;;  %v19415_v53 = vand.u32 4294901760, %v21000_v24  ;;  %v21001_v1 = vld [vmem:[#allocation81_spill] sm:$0xff] }
 0x253   :  { %v3077_v19 = vand.u32 4294901760, %v3076_v5  ;;  %v19417_v39 = vand.u32 4294901760, %v21001_v1  ;;  %vm15806_vm4 = vmor %vm831_vm8, %vm21002_vm11  ;;  %v21005_v6 = vand.u32 4294901760, %v15745_v7  ;;  %vm1724_vm9 = vcmp.eq.s32.totalorder %v10416_v17, %v1603_v60  ;;  %8500 = vmatprep.subr.bf16.mxu0 %v20654_v10 }
 0x254   :  { %v5668_v3 = vand.u32 4294901760, %v5667_v30  ;;  %v2810_v57 = vand.u32 4294901760, %v2809_v21  ;;  %v5414_v34 = vand.u32 4294901760, %v5413_v62  ;;  %vm1725_vm5 = vcmp.eq.s32.totalorder %v10427_v38, %v1603_v60  ;;  %vm15822_vm0 = vmor %vm1468_vm13, %vm1724_vm9 }
 0x255   :  { %v5407_v5 = vsub.f32 %v15745_v7, %v21005_v6  ;;  %vm1726_vm8 = vcmp.eq.s32.totalorder %v10430_v18, %v1603_v60  ;;  %vm1727_vm11 = vcmp.eq.s32.totalorder %v10433_v54, %v1603_v60  ;;  %v8213_v6 = vpack.c.bf16 %v3077_v19, %v3070_v4  ;;  %v21011_v7 = vld [vmem:[#allocation82_spill] sm:$0xff]  ;;  %v21015_v4 = vld [vmem:[#allocation83_spill] sm:$0xff] }
 0x256   :  { %2811 = vmatprep.mubr.f32.mxu1 %v2810_v57  ;;  %vm21008_vm14 = vcmp.eq.s32.totalorder %v10427_v38, %v1347_v35  ;;  %v5674_v21 = vsub.f32 %v21000_v24, %v19415_v53  ;;  %v3083_v62 = vsub.f32 %v21001_v1, %v19417_v39  ;;  %v19421_v40 = vand.u32 4294901760, %v21011_v7  ;;  %v21018_v53 = vld [vmem:[#allocation88_spill] sm:$0xff]  ;;  %v966_v39 = vpop.permute.xlu1 %965 }
 0x257   :  { %v5408_v43 = vand.u32 4294901760, %v5407_v5  ;;  %vm15830_vm12 = vmor %vm21008_vm14, %vm1725_vm5  ;;  %2817 = vmatmul.mubr.f32.gmra.mrb[52].mxu1 %v2816_v33  ;;  %vm21012_vm13 = vcmp.eq.s32.totalorder %v10430_v18, %v1347_v35  ;;  %v21016_v5 = vld [vmem:[#allocation85_spill] sm:$0xff]  ;;  %vm21019_vm14 = vcmp.eq.s32.totalorder %v10433_v54, %v1347_v35  ;;  %v21023_v35 = vmov 0 }
 0x258   :  { %vm15843_vm9 = vmor %vm21012_vm13, %vm1726_vm8  ;;  %8214 = vmatpush1.bf16.msra.mxu1 %v8213_v6  ;;  %v5675_v19 = vand.u32 4294901760, %v5674_v21  ;;  %v3084_v20 = vand.u32 4294901760, %v3083_v62  ;;  %v3090_v46 = vsub.f32 %v21011_v7, %v19421_v40  ;;  %vm1090_vm5 = vcmp.eq.s32.totalorder %v10430_v18, %v966_v39 }
 0x259   :  { %5409 = vmatprep.mubr.f32.mxu0 %v5408_v43  ;;  %vm15857_vm8 = vmor %vm21019_vm14, %vm1727_vm11  ;;  %vm1088_vm11 = vcmp.eq.s32.totalorder %v10416_v17, %v966_v39  ;;  %vm1089_vm14 = vcmp.eq.s32.totalorder %v10427_v38, %v966_v39  ;;  %v21026_v60 = vmov 0  ;;  %8215 = vmatprep.subr.bf16.mxu1 %v20654_v10  ;;  %v21029_v6 = vand.u32 4294901760, %v21015_v4 }
 0x25a   :  { %5415 = vmatmul.mubr.f32.gmra.mrb[52].mxu0 %v5414_v34  ;;  %vm15869_vm13 = vmor %vm15757_vm7, %vm15822_vm0  ;;  %v8501_v34 = vpack.c.bf16 %v5675_v19, %v5668_v3  ;;  %v3091_v32 = vand.u32 4294901760, %v3090_v46  ;;  %v21030_v28 = vmov 0  ;;  %v21034_v46 = vand.u32 4294901760, %v21016_v5  ;;  %v1350_v33 = vpop.permute.xlu1 %1349 }
 0x25b   :  { %v21024_v35 = vsel %vm15869_vm13, 4294967295, %v21023_v35  ;;  %vm15881_vm15 = vmor %vm15773_vm6, %vm15830_vm12  ;;  %v7724_v44 = vsel %vm15869_vm13, 1.0, %v19757_v16  ;;  %v5681_v43 = vsub.f32 %v21015_v4, %v21029_v6  ;;  %v21035_v62 = vand.u32 4294901760, %v21017_v55 }
 0x25c   :  { %21025 = vst [vmem:[#allocation300_spill] sm:$0xff] %v21024_v35  ;;  %v21027_v60 = vsel %vm15881_vm15, 4294967295, %v21026_v60  ;;  %vm15896_vm0 = vmor %vm15792_vm2, %vm15843_vm9  ;;  %v7725_v30 = vsel %vm15881_vm15, 1.0, %v19757_v16  ;;  %v15903_v3 = vsub.f32 %v7724_v44, %v7724_v44  ;;  %v5688_v21 = vsub.f32 %v21016_v5, %v21034_v46  ;;  %8502 = vmatpush1.bf16.msra.mxu0 %v8501_v34  ;;  %v21074_v35 = vld [vmem:[#allocation93_spill] sm:$0xff] }
 0x25d   :  { %21028 = vst [vmem:[#allocation301_spill] sm:$0xff] %v21027_v60  ;;  %v21031_v28 = vsel %vm15896_vm0, 4294967295, %v21030_v28  ;;  %v3097_v57 = vsub.f32 %v21017_v55, %v21035_v62  ;;  %vm15915_vm12 = vmor %vm15806_vm4, %vm15857_vm8  ;;  %v21036_v13 = vmov 0  ;;  %v15919_v19 = vsub.f32 %v7725_v30, %v7725_v30  ;;  %8503 = vmatprep.subr.bf16.mxu0 %v20654_v10 }
 0x25e   :  { %21032 = vst [vmem:[#allocation302_spill] sm:$0xff] %v21031_v28  ;;  %21033 = vst [vmem:[#allocation303_spill] sm:$0xff] %v15903_v3  ;;  %v21037_v13 = vsel %vm15915_vm12, 4294967295, %v21036_v13  ;;  %v7726_v44 = vsel %vm15896_vm0, 1.0, %v19757_v16  ;;  %v8216_v6 = vpack.c.bf16 %v3091_v32, %v3084_v20  ;;  %v5682_v46 = vand.u32 4294901760, %v5681_v43 }
 0x25f   :  { %21038 = vst [vmem:[#allocation304_spill] sm:$0xff] %v21037_v13  ;;  %21039 = vst [vmem:[#allocation305_spill] sm:$0xff] %v15919_v19  ;;  %vm21040_vm7 = vcmp.eq.s32.totalorder %v10416_v17, %v15742_v63  ;;  %v7727_v30 = vsel %vm15915_vm12, 1.0, %v19757_v16  ;;  %v19424_v62 = vand.u32 4294901760, %v15903_v3  ;;  %v15937_v40 = vsub.f32 %v7726_v44, %v7726_v44 }
 0x260   :  { %vm15929_vm6 = vmor %vm21040_vm7, %vm1088_vm11  ;;  %v5689_v20 = vand.u32 4294901760, %v5688_v21  ;;  %vm21044_vm4 = vcmp.eq.s32.totalorder %v10427_v38, %v15742_v63  ;;  %vm1472_vm8 = vcmp.eq.s32.totalorder %v10416_v17, %v1350_v33  ;;  %8217 = vmatpush1.bf16.msra.mxu1 %v8216_v6  ;;  %vm21047_vm2 = vcmp.eq.s32.totalorder %v10430_v18, %v15742_v63 }
 0x261   :  { %21043 = vst [vmem:[#allocation306_spill] sm:$0xff] %v15937_v40  ;;  %vm15947_vm9 = vmor %vm21044_vm4, %vm1089_vm14  ;;  %v15964_v21 = vsub.f32 %v7727_v30, %v7727_v30  ;;  %v2830_v44 = vsub.f32 %v15903_v3, %v19424_v62  ;;  %8218 = vmatprep.subr.bf16.mxu1 %v20654_v10  ;;  %vm21051_vm14 = vcmp.eq.s32.totalorder %v10433_v54, %v966_v39  ;;  %v3098_v43 = vand.u32 4294901760, %v3097_v57 }
 0x262   :  { %vm15959_vm10 = vmor %vm21047_vm2, %vm1090_vm5  ;;  %vm21052_vm5 = vcmp.eq.s32.totalorder %v10433_v54, %v15742_v63  ;;  %v8504_v30 = vpack.c.bf16 %v5689_v20, %v5682_v46  ;;  %v21055_v28 = vand.u32 4294901760, %v21018_v53  ;;  %vm21056_vm7 = vcmp.eq.s32.totalorder %v10416_v17, %v14143_v47 }
 0x263   :  { %21050 = vst [vmem:[#allocation307_spill] sm:$0xff] %v15964_v21  ;;  %vm15976_vm2 = vmor %vm21052_vm5, %vm21051_vm14  ;;  %v21059_v63 = vand.u32 4294901760, %v15919_v19  ;;  %v21060_v57 = vand.u32 4294901760, %v15937_v40  ;;  %vm21063_vm14 = vcmp.eq.s32.totalorder %v10427_v38, %v1350_v33  ;;  %v2831_v46 = vand.u32 4294901760, %v2830_v44 }
 0x264   :  { %v3104_v62 = vsub.f32 %v21018_v53, %v21055_v28  ;;  %vm15989_vm11 = vmor %vm1472_vm8, %vm21056_vm7  ;;  %v21061_v28 = vand.u32 4294901760, %v21022_v23  ;;  %vm1730_vm8 = vcmp.eq.s32.totalorder %v10430_v18, %v14143_v47  ;;  %vm21062_vm7 = vcmp.eq.s32.totalorder %v10427_v38, %v14143_v47  ;;  %8505 = vmatpush1.bf16.msra.mxu0 %v8504_v30 }
 0x265   :  { %v2824_v37 = vsub.f32 %v15919_v19, %v21059_v63  ;;  %v5428_v20 = vsub.f32 %v15937_v40, %v21060_v57  ;;  %vm16010_vm5 = vmor %vm21063_vm14, %vm21062_vm7  ;;  %v16014_v19 = vpop.permute.xlu1 %712  ;;  %v21066_v40 = vld [vmem:[#allocation91_spill] sm:$0xff]  ;;  %vm1731_vm4 = vcmp.eq.s32.totalorder %v10433_v54, %v14143_v47  ;;  %vm21067_vm0 = vcmp.eq.s32.totalorder %v10430_v18, %v1350_v33  ;;  %8506 = vmatprep.subr.bf16.mxu0 %v20654_v10 }
 0x266   :  { %v5695_v3 = vsub.f32 %v21022_v23, %v21061_v28  ;;  %v3105_v57 = vand.u32 4294901760, %v3104_v62  ;;  %vm16021_vm13 = vmor %vm21067_vm0, %vm1730_vm8  ;;  %v21070_v60 = vand.u32 4294901760, %v15964_v21  ;;  %vm21071_vm7 = vcmp.eq.s32.totalorder %v10433_v54, %v1350_v33 }
 0x267   :  { %v2825_v13 = vand.u32 4294901760, %v2824_v37  ;;  %vm16031_vm14 = vmor %vm21071_vm7, %vm1731_vm4  ;;  %v5429_v47 = vand.u32 4294901760, %v5428_v20  ;;  %v19443_v61 = vand.u32 4294901760, %v21074_v35  ;;  %v21075_v37 = vmov 0 }
 0x268   :  { %v5422_v44 = vsub.f32 %v15964_v21, %v21070_v60  ;;  %v8219_v30 = vpack.c.bf16 %v3105_v57, %v3098_v43  ;;  %vm16042_vm8 = vmor %vm15929_vm6, %vm15989_vm11  ;;  %v5696_v33 = vand.u32 4294901760, %v5695_v3  ;;  %v21078_v43 = vand.u32 4294901760, %v21066_v40  ;;  %v21086_v57 = vld [vmem:[#allocation94_spill] sm:$0xff] }
 0x269   :  { %v21076_v37 = vsel %vm16042_vm8, 4294967295, %v21075_v37  ;;  %2826 = vmatprep.mubr.f32.mxu1 %v2825_v13  ;;  %vm16057_vm6 = vmor %vm15947_vm9, %vm16010_vm5  ;;  %v21079_v58 = vmov 0  ;;  %vm837_vm11 = vcmp.eq.s32.totalorder %v10427_v38, %v16014_v19  ;;  %v7728_v3 = vsel %vm16042_vm8, 1.0, %v19757_v16  ;;  %v969_v34 = vpop.permute.xlu1 %968 }
 0x26a   :  { %21077 = vst [vmem:[#allocation308_spill] sm:$0xff] %v21076_v37  ;;  %v5423_v60 = vand.u32 4294901760, %v5422_v44  ;;  %v5702_v20 = vsub.f32 %v21066_v40, %v21078_v43  ;;  %v21080_v58 = vsel %vm16057_vm6, 4294967295, %v21079_v58  ;;  %2832 = vmatmul.mubr.f32.gmra.mrb[54].mxu1 %v2831_v46  ;;  %vm16076_vm5 = vmor %vm15959_vm10, %vm16021_vm13  ;;  %v21082_v13 = vmov 0  ;;  %v21103_v37 = vld [vmem:[#allocation97_spill] sm:$0xff] }
 0x26b   :  { %21081 = vst [vmem:[#allocation309_spill] sm:$0xff] %v21080_v58  ;;  %v21083_v13 = vsel %vm16076_vm5, 4294967295, %v21082_v13  ;;  %v7729_v39 = vsel %vm16057_vm6, 1.0, %v19757_v16  ;;  %v16083_v46 = vsub.f32 %v7728_v3, %v7728_v3  ;;  %8220 = vmatpush1.bf16.msra.mxu1 %v8219_v30  ;;  %vm16090_vm10 = vmor %vm15976_vm2, %vm16031_vm14  ;;  %v21087_v32 = vmov 0 }
 0x26c   :  { %21084 = vst [vmem:[#allocation310_spill] sm:$0xff] %v21083_v13  ;;  %5424 = vmatprep.mubr.f32.mxu0 %v5423_v60  ;;  %v5703_v63 = vand.u32 4294901760, %v5702_v20  ;;  %v21088_v32 = vsel %vm16090_vm10, 4294967295, %v21087_v32  ;;  %vm1092_vm13 = vcmp.eq.s32.totalorder %v10416_v17, %v969_v34  ;;  %vm1093_vm9 = vcmp.eq.s32.totalorder %v10427_v38, %v969_v34  ;;  %8221 = vmatprep.subr.bf16.mxu1 %v20654_v10 }
 0x26d   :  { %21085 = vst [vmem:[#allocation311_spill] sm:$0xff] %v16083_v46  ;;  %21089 = vst [vmem:[#allocation312_spill] sm:$0xff] %v21088_v32  ;;  %5430 = vmatmul.mubr.f32.gmra.mrb[54].mxu0 %v5429_v47  ;;  %vm1094_vm7 = vcmp.eq.s32.totalorder %v10430_v18, %v969_v34  ;;  %v3111_v28 = vsub.f32 %v21074_v35, %v19443_v61  ;;  %v16100_v30 = vsub.f32 %v7729_v39, %v7729_v39 }
 0x26e   :  { %v7731_v6 = vsel %vm16090_vm10, 1.0, %v19757_v16  ;;  %v19448_v62 = vand.u32 4294901760, %v16083_v46  ;;  %v7730_v47 = vsel %vm16076_vm5, 1.0, %v19757_v16  ;;  %vm1095_vm2 = vcmp.eq.s32.totalorder %v10433_v54, %v969_v34  ;;  %vm16125_vm0 = vmor %vm837_vm11, %vm1093_vm9 }
 0x26f   :  { %21090 = vst [vmem:[#allocation313_spill] sm:$0xff] %v16100_v30  ;;  %vm21091_vm14 = vcmp.eq.s32.totalorder %v10416_v17, %v16014_v19  ;;  %v16118_v43 = vsub.f32 %v7731_v6, %v7731_v6  ;;  %v16120_v20 = vsub.f32 %v7730_v47, %v7730_v47  ;;  %v8507_v3 = vpack.c.bf16 %v5703_v63, %v5696_v33  ;;  %v21099_v47 = vld [vmem:[#allocation95_spill] sm:$0xff] }
 0x270   :  { %vm16114_vm4 = vmor %vm21091_vm14, %vm1092_vm13  ;;  %v2845_v44 = vsub.f32 %v16083_v46, %v19448_v62  ;;  %v21098_v21 = vand.u32 4294901760, %v21086_v57  ;;  %vm21100_vm11 = vcmp.eq.s32.totalorder %v10430_v18, %v16014_v19  ;;  %v1609_v62 = vpop.permute.xlu1 %1608  ;;  %v3112_v46 = vand.u32 4294901760, %v3111_v28 }
 0x271   :  { %21094 = vst [vmem:[#allocation314_spill] sm:$0xff] %v16118_v43  ;;  %21095 = vst [vmem:[#allocation315_spill] sm:$0xff] %v16120_v20  ;;  %v19465_v61 = vand.u32 4294901760, %v16120_v20  ;;  %8508 = vmatpush1.bf16.msra.mxu0 %v8507_v3  ;;  %vm21104_vm13 = vcmp.eq.s32.totalorder %v10433_v54, %v16014_v19  ;;  %v21107_v32 = vand.u32 4294901760, %v16100_v30  ;;  %v21108_v34 = vand.u32 4294901760, %v16118_v43 }
 0x272   :  { %v3118_v6 = vsub.f32 %v21086_v57, %v21098_v21  ;;  %vm16142_vm9 = vmor %vm21100_vm11, %vm1094_vm7  ;;  %v19494_v21 = vand.u32 4294901760, %v21103_v37  ;;  %v2846_v58 = vand.u32 4294901760, %v2845_v44  ;;  %vm1732_vm7 = vcmp.eq.s32.totalorder %v10416_v17, %v1609_v62  ;;  %8509 = vmatprep.subr.bf16.mxu0 %v20654_v10 }
 0x273   :  { %vm16154_vm14 = vmor %vm21104_vm13, %vm1095_vm2  ;;  %v2839_v63 = vsub.f32 %v16100_v30, %v21107_v32  ;;  %vm1733_vm11 = vcmp.eq.s32.totalorder %v10427_v38, %v1609_v62  ;;  %v5437_v28 = vsub.f32 %v16118_v43, %v21108_v34  ;;  %v5443_v19 = vsub.f32 %v16120_v20, %v19465_v61 }
 0x274   :  { %vm1734_vm2 = vcmp.eq.s32.totalorder %v10430_v18, %v1609_v62  ;;  %vm1735_vm13 = vcmp.eq.s32.totalorder %v10433_v54, %v1609_v62  ;;  %vm21109_vm5 = vcmp.eq.s32.totalorder %v10416_v17, %v15034_v42  ;;  %vm21112_vm10 = vcmp.eq.s32.totalorder %v10427_v38, %v15034_v42  ;;  %v716_v30 = vpop.permute.xlu1 %715 }
 0x275   :  { %vm16175_vm8 = vmor %vm21109_vm5, %vm1732_vm7  ;;  %v2840_v32 = vand.u32 4294901760, %v2839_v63  ;;  %v3119_v34 = vand.u32 4294901760, %v3118_v6  ;;  %v21115_v61 = vand.u32 4294901760, %v21099_v47  ;;  %v5716_v20 = vsub.f32 %v21103_v37, %v19494_v21 }
 0x276   :  { %vm16182_vm6 = vmor %vm21112_vm10, %vm1733_vm11  ;;  %vm1479_vm5 = vcmp.eq.s32.totalorder %v10433_v54, %v15034_v42  ;;  %v5438_v63 = vand.u32 4294901760, %v5437_v28  ;;  %v5444_v43 = vand.u32 4294901760, %v5443_v19  ;;  %vm21116_vm10 = vcmp.eq.s32.totalorder %v10430_v18, %v15034_v42 }
 0x277   :  { %v5709_v62 = vsub.f32 %v21099_v47, %v21115_v61  ;;  %vm1862_vm7 = vmor %vm21116_vm10, %vm1734_vm2  ;;  %2841 = vmatprep.mubr.f32.mxu1 %v2840_v32  ;;  %v8222_v61 = vpack.c.bf16 %v3119_v34, %v3112_v46  ;;  %v5717_v29 = vand.u32 4294901760, %v5716_v20  ;;  %v21119_v28 = vmov 0 }
 0x278   :  { %vm16197_vm11 = vmor %vm1479_vm5, %vm1735_vm13  ;;  %5439 = vmatprep.mubr.f32.mxu0 %v5438_v63  ;;  %2847 = vmatmul.mubr.f32.gmra.mrb[56].mxu1 %v2846_v58  ;;  %v21122_v42 = vmov 0  ;;  %v21125_v46 = vmov 0  ;;  %v21129_v20 = vmov 0  ;;  %v1356_v44 = vpop.permute.xlu1 %1355  ;;  %vm1097_vm13 = vcmp.eq.s32.totalorder %v10427_v38, %v15663_v41 }
 0x279   :  { %v5710_v27 = vand.u32 4294901760, %v5709_v62  ;;  %vm16205_vm12 = vmor %vm16114_vm4, %vm16175_vm8  ;;  %5445 = vmatmul.mubr.f32.gmra.mrb[56].mxu0 %v5444_v43  ;;  %8223 = vmatpush1.bf16.msra.mxu1 %v8222_v61  ;;  %vm840_vm4 = vcmp.eq.s32.totalorder %v10416_v17, %v716_v30  ;;  %vm843_vm5 = vcmp.eq.s32.totalorder %v10433_v54, %v716_v30  ;;  %vm1483_vm15 = vcmp.eq.s32.totalorder %v10433_v54, %v1356_v44 }
 0x27a   :  { %v21120_v28 = vsel %vm16205_vm12, 4294967295, %v21119_v28  ;;  %vm16213_vm2 = vmor %vm16125_vm0, %vm16182_vm6  ;;  %v7732_v58 = vsel %vm16205_vm12, 1.0, %v19757_v16  ;;  %8224 = vmatprep.subr.bf16.mxu1 %v20654_v10  ;;  %vm1096_vm6 = vcmp.eq.s32.totalorder %v10416_v17, %v15663_v41  ;;  %v21155_v6 = vmov 0 }
 0x27b   :  { %21121 = vst [vmem:[#allocation316_spill] sm:$0xff] %v21120_v28  ;;  %v21123_v42 = vsel %vm16213_vm2, 4294967295, %v21122_v42  ;;  %vm16222_vm8 = vmor %vm16142_vm9, %vm1862_vm7  ;;  %v7733_v60 = vsel %vm16213_vm2, 1.0, %v19757_v16  ;;  %v16229_v43 = vsub.f32 %v7732_v58, %v7732_v58  ;;  %v8510_v19 = vpack.c.bf16 %v5717_v29, %v5710_v27 }
 0x27c   :  { %21124 = vst [vmem:[#allocation317_spill] sm:$0xff] %v21123_v42  ;;  %v21126_v46 = vsel %vm16222_vm8, 4294967295, %v21125_v46  ;;  %vm16236_vm0 = vmor %vm16154_vm14, %vm16197_vm11  ;;  %v16240_v39 = vsub.f32 %v7733_v60, %v7733_v60  ;;  %v7734_v33 = vsel %vm16222_vm8, 1.0, %v19757_v16  ;;  %vm841_vm9 = vcmp.eq.s32.totalorder %v10427_v38, %v716_v30 }
 0x27d   :  { %21127 = vst [vmem:[#allocation318_spill] sm:$0xff] %v21126_v46  ;;  %21128 = vst [vmem:[#allocation319_spill] sm:$0xff] %v16229_v43  ;;  %v21130_v20 = vsel %vm16236_vm0, 4294967295, %v21129_v20  ;;  %v7735_v32 = vsel %vm16236_vm0, 1.0, %v19757_v16  ;;  %v19476_v13 = vand.u32 4294901760, %v16229_v43  ;;  %v16250_v3 = vsub.f32 %v7734_v33, %v7734_v33  ;;  %8511 = vmatpush1.bf16.msra.mxu0 %v8510_v19 }
 0x27e   :  { %21131 = vst [vmem:[#allocation320_spill] sm:$0xff] %v21130_v20  ;;  %21132 = vst [vmem:[#allocation321_spill] sm:$0xff] %v16240_v39  ;;  %vm842_vm14 = vcmp.eq.s32.totalorder %v10430_v18, %v716_v30  ;;  %v19484_v27 = vand.u32 4294901760, %v16240_v39  ;;  %v16257_v29 = vsub.f32 %v7735_v32, %v7735_v32  ;;  %8512 = vmatprep.subr.bf16.mxu0 %v20654_v10  ;;  %v1612_v32 = vpop.permute.xlu1 %1611 }
 0x27f   :  { %21133 = vst [vmem:[#allocation322_spill] sm:$0xff] %v16250_v3  ;;  %v2860_v34 = vsub.f32 %v16229_v43, %v19476_v13  ;;  %v19479_v62 = vand.u32 4294901760, %v16250_v3  ;;  %vm16269_vm10 = vmor %vm840_vm4, %vm1096_vm6  ;;  %vm1098_vm7 = vcmp.eq.s32.totalorder %v10430_v18, %v15663_v41  ;;  %vm1099_vm4 = vcmp.eq.s32.totalorder %v10433_v54, %v15663_v41 }
 0x280   :  { %21134 = vst [vmem:[#allocation323_spill] sm:$0xff] %v16257_v29  ;;  %vm16275_vm11 = vmor %vm841_vm9, %vm1097_vm13  ;;  %v2854_v61 = vsub.f32 %v16240_v39, %v19484_v27  ;;  %v19493_v58 = vand.u32 4294901760, %v16257_v29  ;;  %vm1480_vm9 = vcmp.eq.s32.totalorder %v10416_v17, %v1356_v44  ;;  %vm1481_vm8 = vcmp.eq.s32.totalorder %v10427_v38, %v1356_v44 }
 0x281   :  { %v5458_v60 = vsub.f32 %v16250_v3, %v19479_v62  ;;  %vm16290_vm6 = vmor %vm842_vm14, %vm1098_vm7  ;;  %v2861_v19 = vand.u32 4294901760, %v2860_v34  ;;  %vm1736_vm14 = vcmp.eq.s32.totalorder %v10416_v17, %v1612_v32  ;;  %vm1737_vm7 = vcmp.eq.s32.totalorder %v10427_v38, %v1612_v32 }
 0x282   :  { %vm16295_vm13 = vmor %vm843_vm5, %vm1099_vm4  ;;  %v2855_v62 = vand.u32 4294901760, %v2854_v61  ;;  %v5452_v41 = vsub.f32 %v16257_v29, %v19493_v58  ;;  %vm1738_vm12 = vcmp.eq.s32.totalorder %v10430_v18, %v1612_v32  ;;  %vm1739_vm0 = vcmp.eq.s32.totalorder %v10433_v54, %v1612_v32  ;;  %v719_v61 = vpop.permute.xlu0 %718  ;;  %v975_v58 = vpop.permute.xlu1 %974 }
 0x283   :  { %v5459_v30 = vand.u32 4294901760, %v5458_v60  ;;  %vm16307_vm5 = vmor %vm1480_vm9, %vm1736_vm14  ;;  %vm1482_vm4 = vcmp.eq.s32.totalorder %v10430_v18, %v1356_v44  ;;  %vm844_vm9 = vcmp.eq.s32.totalorder %v10416_v17, %v719_v61  ;;  %v21149_v44 = vmov 0 }
 0x284   :  { %2856 = vmatprep.mubr.f32.mxu1 %v2855_v62  ;;  %v5453_v27 = vand.u32 4294901760, %v5452_v41  ;;  %vm1865_vm2 = vmor %vm1481_vm8, %vm1737_vm7  ;;  %vm845_vm8 = vcmp.eq.s32.totalorder %v10427_v38, %v719_v61  ;;  %vm1100_vm14 = vcmp.eq.s32.totalorder %v10416_v17, %v975_v58  ;;  %v21159_v34 = vmov 0 }
 0x285   :  { %2862 = vmatmul.mubr.f32.gmra.mrb[58].mxu1 %v2861_v19  ;;  %vm16313_vm3 = vmor %vm1482_vm4, %vm1738_vm12 }
 0x286   :  { %5454 = vmatprep.mubr.f32.mxu0 %v5453_v27  ;;  %vm16317_vm1 = vmor %vm1483_vm15, %vm1739_vm0  ;;  %vm846_vm15 = vcmp.eq.s32.totalorder %v10430_v18, %v719_v61  ;;  %v21152_v27 = vmov 0  ;;  %v1615_v19 = vpop.permute.xlu0 %1614  ;;  %v1359_v13 = vpop.permute.xlu1 %1358 }
 0x287   :  { %5460 = vmatmul.mubr.f32.gmra.mrb[58].mxu0 %v5459_v30  ;;  %vm16329_vm12 = vmor %vm16269_vm10, %vm16307_vm5 }
 0x288   :  { %v21150_v44 = vsel %vm16329_vm12, 4294967295, %v21149_v44  ;;  %vm16336_vm0 = vmor %vm16275_vm11, %vm1865_vm2  ;;  %v7736_v62 = vsel %vm16329_vm12, 1.0, %v19757_v16  ;;  %vm1101_vm2 = vcmp.eq.s32.totalorder %v10427_v38, %v975_v58 }
 0x289   :  { %21151 = vst [vmem:[#allocation324_spill] sm:$0xff] %v21150_v44  ;;  %v21153_v27 = vsel %vm16336_vm0, 4294967295, %v21152_v27  ;;  %vm16351_vm7 = vmor %vm16290_vm6, %vm16313_vm3  ;;  %v7737_v41 = vsel %vm16336_vm0, 1.0, %v19757_v16  ;;  %v16359_v30 = vsub.f32 %v7736_v62, %v7736_v62  ;;  %vm1102_vm3 = vcmp.eq.s32.totalorder %v10430_v18, %v975_v58 }
 0x28a   :  { %21154 = vst [vmem:[#allocation325_spill] sm:$0xff] %v21153_v27  ;;  %v21156_v6 = vsel %vm16351_vm7, 4294967295, %v21155_v6  ;;  %vm16365_vm11 = vmor %vm16295_vm13, %vm16317_vm1  ;;  %vm1103_vm6 = vcmp.eq.s32.totalorder %v10433_v54, %v975_v58  ;;  %v16371_v33 = vsub.f32 %v7737_v41, %v7737_v41  ;;  %v7738_v60 = vsel %vm16351_vm7, 1.0, %v19757_v16  ;;  %v21476_v27 = vld [vmem:[#allocation123_spill] sm:$0xff] }
 0x28b   :  { %21157 = vst [vmem:[#allocation326_spill] sm:$0xff] %v21156_v6  ;;  %21158 = vst [vmem:[#allocation327_spill] sm:$0xff] %v16359_v30  ;;  %v21160_v34 = vsel %vm16365_vm11, 4294967295, %v21159_v34  ;;  %v7739_v62 = vsel %vm16365_vm11, 1.0, %v19757_v16  ;;  %v16386_v21 = vsub.f32 %v7738_v60, %v7738_v60  ;;  %vm1740_vm1 = vcmp.eq.s32.totalorder %v10416_v17, %v1615_v19 }
 0x28c   :  { %21161 = vst [vmem:[#allocation328_spill] sm:$0xff] %v21160_v34  ;;  %21162 = vst [vmem:[#allocation329_spill] sm:$0xff] %v16371_v33  ;;  %v19511_v41 = vand.u32 4294901760, %v16371_v33  ;;  %v16411_v63 = vsub.f32 %v7739_v62, %v7739_v62  ;;  %v21170_v43 = vand.u32 4294901760, %v16359_v30  ;;  %vm1487_vm13 = vcmp.eq.s32.totalorder %v10433_v54, %v1359_v13 }
 0x28d   :  { %vm16378_vm5 = vmor %vm844_vm9, %vm1100_vm14  ;;  %21165 = vst [vmem:[#allocation330_spill] sm:$0xff] %v16386_v21  ;;  %vm1484_vm9 = vcmp.eq.s32.totalorder %v10416_v17, %v1359_v13  ;;  %v19512_v39 = vand.u32 4294901760, %v16386_v21  ;;  %vm1486_vm14 = vcmp.eq.s32.totalorder %v10430_v18, %v1359_v13  ;;  %v21176_v62 = vmov 0 }
 0x28e   :  { %vm16396_vm4 = vmor %vm845_vm8, %vm1101_vm2  ;;  %v2875_v29 = vsub.f32 %v16359_v30, %v21170_v43  ;;  %vm1742_vm8 = vcmp.eq.s32.totalorder %v10430_v18, %v1615_v19  ;;  %vm1743_vm2 = vcmp.eq.s32.totalorder %v10433_v54, %v1615_v19  ;;  %v2869_v43 = vsub.f32 %v16371_v33, %v19511_v41 }
 0x28f   :  { %vm16406_vm10 = vmor %vm846_vm15, %vm1102_vm3  ;;  %vm21171_vm15 = vcmp.eq.s32.totalorder %v10433_v54, %v719_v61  ;;  %v19513_v58 = vand.u32 4294901760, %v16411_v63  ;;  %v5473_v61 = vsub.f32 %v16386_v21, %v19512_v39  ;;  %v21207_v21 = vld [vmem:[#allocation105_spill] sm:$0xff] }
 0x290   :  { %vm16423_vm3 = vmor %vm21171_vm15, %vm1103_vm6  ;;  %vm21174_vm6 = vcmp.eq.s32.totalorder %v10427_v38, %v1615_v19  ;;  %vm21175_vm15 = vcmp.eq.s32.totalorder %v10427_v38, %v1359_v13  ;;  %v2876_v18 = vand.u32 4294901760, %v2875_v29  ;;  %v2870_v54 = vand.u32 4294901760, %v2869_v43 }
 0x291   :  { %vm1868_vm7 = vmor %vm1484_vm9, %vm1740_vm1  ;;  %v5467_v17 = vsub.f32 %v16411_v63, %v19513_v58  ;;  %v5474_v41 = vand.u32 4294901760, %v5473_v61  ;;  %v21179_v29 = vmov 0  ;;  %v21182_v13 = vmov 0 }
 0x292   :  { %vm1869_vm12 = vmor %vm21175_vm15, %vm21174_vm6  ;;  %2871 = vmatprep.mubr.f32.mxu1 %v2870_v54  ;;  %vm21206_vm6 = vnez %v19830_v12  ;;  %vm21208_vm15 = vnez %v21207_v21  ;;  %v21212_v21 = vld [vmem:[#allocation104_spill] sm:$0xff] }
 0x293   :  { %vm1870_vm11 = vmor %vm1486_vm14, %vm1742_vm8  ;;  %v5468_v19 = vand.u32 4294901760, %v5467_v17  ;;  %2877 = vmatmul.mubr.f32.gmra.mrb[60].mxu1 %v2876_v18  ;;  %v21186_v18 = vmov 0  ;;  %vm21201_vm8 = vnez %v19825_v50 }
 0x294   :  { %vm1871_vm1 = vmor %vm1487_vm13, %vm1743_vm2 }
 0x295   :  { %vm16449_vm9 = vmor %vm16378_vm5, %vm1868_vm7  ;;  %5469 = vmatprep.mubr.f32.mxu0 %v5468_v19 }
 0x296   :  { %v21177_v62 = vsel %vm16449_vm9, 4294967295, %v21176_v62  ;;  %vm16457_vm14 = vmor %vm16396_vm4, %vm1869_vm12  ;;  %v7740_v32 = vsel %vm16449_vm9, 1.0, %v19757_v16  ;;  %5475 = vmatmul.mubr.f32.gmra.mrb[60].mxu0 %v5474_v41 }
 0x297   :  { %21178 = vst [vmem:[#allocation331_spill] sm:$0xff] %v21177_v62  ;;  %v21180_v29 = vsel %vm16457_vm14, 4294967295, %v21179_v29  ;;  %vm16466_vm7 = vmor %vm16406_vm10, %vm1870_vm11  ;;  %v7741_v3 = vsel %vm16457_vm14, 1.0, %v19757_v16  ;;  %v16473_v43 = vsub.f32 %v7740_v32, %v7740_v32  ;;  %v21475_v62 = vld [vmem:[#allocation5_spill] sm:$0xff] }
 0x298   :  { %21181 = vst [vmem:[#allocation332_spill] sm:$0xff] %v21180_v29  ;;  %v21183_v13 = vsel %vm16466_vm7, 4294967295, %v21182_v13  ;;  %vm16479_vm12 = vmor %vm16423_vm3, %vm1871_vm1  ;;  %v16483_v60 = vsub.f32 %v7741_v3, %v7741_v3  ;;  %v7742_v54 = vsel %vm16466_vm7, 1.0, %v19757_v16  ;;  %v21470_v29 = vld [vmem:[#allocation115_spill] sm:$0xff] }
 0x299   :  { %21184 = vst [vmem:[#allocation333_spill] sm:$0xff] %v21183_v13  ;;  %21185 = vst [vmem:[#allocation334_spill] sm:$0xff] %v16473_v43  ;;  %v21187_v18 = vsel %vm16479_vm12, 4294967295, %v21186_v18  ;;  %v7743_v17 = vsel %vm16479_vm12, 1.0, %v19757_v16  ;;  %v19514_v19 = vand.u32 4294901760, %v16473_v43  ;;  %v16492_v32 = vsub.f32 %v7742_v54, %v7742_v54  ;;  %v21479_v13 = vld [vmem:[#allocation8_spill] sm:$0xff] }
 0x29a   :  { %21188 = vst [vmem:[#allocation335_spill] sm:$0xff] %v21187_v18  ;;  %21189 = vst [vmem:[#allocation336_spill] sm:$0xff] %v16483_v60  ;;  %v19519_v6 = vand.u32 4294901760, %v16483_v60  ;;  %v16495_v39 = vsub.f32 %v7743_v17, %v7743_v17  ;;  %v8519_v17 = vpack.c.bf16 %v20692_v14, %v20691_v0  ;;  %v21474_v18 = vld [vmem:[#allocation116_spill] sm:$0xff] }
 0x29b   :  { %v2890_v41 = vsub.f32 %v16473_v43, %v19514_v19  ;;  %v19522_v3 = vand.u32 4294901760, %v16492_v32 }
 0x29c   :  { %21190 = vst [vmem:[#allocation337_spill] sm:$0xff] %v16495_v39  ;;  %v2884_v58 = vsub.f32 %v16483_v60, %v19519_v6  ;;  %v19523_v16 = vand.u32 4294901760, %v16495_v39  ;;  %v21191_v60 = vld [vmem:[#allocation108_spill] sm:$0xff] }
 0x29d   :  { %v2891_v61 = vand.u32 4294901760, %v2890_v41  ;;  %v5488_v54 = vsub.f32 %v16492_v32, %v19522_v3  ;;  %v19550_v41 = vmov 1.0   ;;  %vm21192_vm10 = vnez %v21191_v60  ;;  %v21193_v3 = vld [vmem:[#allocation111_spill] sm:$0xff]  ;;  %v21240_v60 = vld [vmem:[#allocation36_spill] sm:$0xff] }
 0x29e   :  { %v2885_v38 = vand.u32 4294901760, %v2884_v58  ;;  %v5482_v19 = vsub.f32 %v16495_v39, %v19523_v16  ;;  %v8225_v58 = vpack.c.bf16 %v20575_v49, %v20556_v22  ;;  %vm21194_vm11 = vnez %v21193_v3  ;;  %v21204_v16 = vld [vmem:[#allocation103_spill] sm:$0xff] }
 0x29f   :  { %v5489_v43 = vand.u32 4294901760, %v5488_v54  ;;  %v8513_v54 = vpack.c.bf16 %v20591_v8, %v20590_v51  ;;  %vm21205_vm3 = vnez %v21204_v16  ;;  %v21209_v16 = vld [vmem:[#allocation102_spill] sm:$0xff] }
 0x2a0   :  { %2886 = vmatprep.mubr.f32.mxu1 %v2885_v38  ;;  %v5483_v6 = vand.u32 4294901760, %v5482_v19  ;;  %v21195_v38 = vld [vmem:[#allocation107_spill] sm:$0xff]  ;;  %v8228_v19 = vpack.c.bf16 %v20658_v2, %v20592_v56  ;;  %vm21210_vm1 = vnez %v21209_v16  ;;  %v21216_v16 = vld [vmem:[#allocation25_spill] sm:$0xff] }
 0x2a1   :  { %2892 = vmatmul.mubr.f32.gmra.mrb[62].mxu1 %v2891_v61  ;;  %vm21196_vm5 = vnez %v21195_v38  ;;  %v21197_v61 = vld [vmem:[#allocation119_spill] sm:$0xff]  ;;  %v21234_v38 = vld [vmem:[#allocation33_spill] sm:$0xff] }
 0x2a2   :  { %5484 = vmatprep.mubr.f32.mxu0 %v5483_v6  ;;  %7744 = vmatprep.mubr.msk.f32.mxu1 %vm21192_vm10, %v19550_v41  ;;  %vm21198_vm13 = vnez %v21197_v61  ;;  %v8516_v6 = vpack.c.bf16 %v20663_v26, %v20659_v11 }
 0x2a3   :  { %5490 = vmatmul.mubr.f32.gmra.mrb[62].mxu0 %v5489_v43  ;;  %v21199_v43 = vld [vmem:[#allocation109_spill] sm:$0xff] }
 0x2a4   :  { %7936 = vmatprep.mubr.msk.f32.mxu0 %vm21194_vm11, %v19550_v41  ;;  %vm21200_vm4 = vnez %v21199_v43  ;;  %v21228_v43 = vld [vmem:[#allocation31_spill] sm:$0xff] }
 0x2a5   :  { %7745 = vmatmul.mubr.msk.f32.vlgmr.msra.gmra.mrb[0].mxu1 %vm21196_vm5, %v19550_v41 }
 0x2a6   :  { %8226 = vmatpush1.bf16.msra.mxu1 %v8225_v58  ;;  %7746 = vmatprep.mubr.msk.f32.mxu1 %vm21198_vm13, %v19550_v41  ;;  %v21202_v58 = vld [vmem:[#allocation118_spill] sm:$0xff] }
 0x2a7   :  { %7937 = vmatmul.mubr.msk.f32.vlgmr.msra.gmra.mrb[0].mxu0 %vm21200_vm4, %v19550_v41  ;;  %8227 = vmatprep.subr.bf16.mxu1 %v20654_v10  ;;  %vm21203_vm2 = vnez %v21202_v58  ;;  %v21222_v58 = vld [vmem:[#allocation27_spill] sm:$0xff] }
 0x2a8   :  { %8514 = vmatpush1.bf16.msra.mxu0 %v8513_v54  ;;  %7938 = vmatprep.mubr.msk.f32.mxu0 %vm21201_vm8, %v19550_v41  ;;  %v8231_v54 = vpack.c.bf16 %v20682_v48, %v20672_v52 }
 0x2a9   :  { %7747 = vmatmul.mubr.msk.f32.gmra.mrb[2].mxu1 %vm21203_vm2, %v19550_v41  ;;  %8515 = vmatprep.subr.bf16.mxu0 %v20654_v10 }
 0x2aa   :  { %7748 = vmatprep.mubr.msk.f32.mxu1 %vm21205_vm3, %v19550_v41  ;;  %8229 = vmatpush1.bf16.msra.mxu1 %v8228_v19  ;;  %vm21211_vm3 = vnez %v19861_v25  ;;  %v8234_v19 = vpack.c.bf16 %v20710_v45, %v20706_v15  ;;  %v21217_v25 = vld [vmem:[#allocation127_spill] sm:$0xff] }
 0x2ab   :  { %7939 = vmatmul.mubr.msk.f32.gmra.mrb[2].mxu0 %vm21206_vm6, %v19550_v41  ;;  %8230 = vmatprep.subr.bf16.mxu1 %v20654_v10  ;;  %vm21214_vm6 = vnez %v19868_v36  ;;  %v21223_v36 = vld [vmem:[#allocation129_spill] sm:$0xff] }
 0x2ac   :  { %7940 = vmatprep.mubr.msk.f32.mxu0 %vm21208_vm15, %v19550_v41  ;;  %8517 = vmatpush1.bf16.msra.mxu0 %v8516_v6  ;;  %vm21213_vm15 = vnez %v21212_v21  ;;  %v21215_v6 = vld [vmem:[#allocation24_spill] sm:$0xff]  ;;  %v21221_v21 = vld [vmem:[#allocation26_spill] sm:$0xff] }
 0x2ad   :  { %7749 = vmatmul.mubr.msk.f32.gmra.mrb[4].mxu1 %vm21210_vm1, %v19550_v41  ;;  %8518 = vmatprep.subr.bf16.mxu0 %v20654_v10  ;;  %v8522_v12 = vpack.c.bf16 %v21216_v16, %v21215_v6  ;;  %v8237_v50 = vpack.c.bf16 %v21222_v58, %v21221_v21 }
 0x2ae   :  { %7750 = vmatprep.mubr.msk.f32.mxu1 %vm21211_vm3, %v19550_v41  ;;  %8232 = vmatpush1.bf16.msra.mxu1 %v8231_v54  ;;  %vm21218_vm3 = vnez %v21217_v25  ;;  %v21219_v54 = vld [vmem:[#allocation143_spill] sm:$0xff]  ;;  %v21227_v25 = vld [vmem:[#allocation28_spill] sm:$0xff] }
 0x2af   :  { %7941 = vmatmul.mubr.msk.f32.gmra.mrb[4].mxu0 %vm21213_vm15, %v19550_v41  ;;  %8233 = vmatprep.subr.bf16.mxu1 %v20654_v10  ;;  %vm21220_vm1 = vnez %v21219_v54  ;;  %v8525_v61 = vpack.c.bf16 %v21228_v43, %v21227_v25  ;;  %v21229_v54 = vld [vmem:[#allocation142_spill] sm:$0xff] }
 0x2b0   :  { %7942 = vmatprep.mubr.msk.f32.mxu0 %vm21214_vm6, %v19550_v41  ;;  %8520 = vmatpush1.bf16.msra.mxu0 %v8519_v17  ;;  %vm21224_vm6 = vnez %v21223_v36  ;;  %v21225_v17 = vld [vmem:[#allocation146_spill] sm:$0xff]  ;;  %v21233_v36 = vld [vmem:[#allocation32_spill] sm:$0xff] }
 0x2b1   :  { %7751 = vmatmul.mubr.msk.f32.gmra.mrb[6].mxu1 %vm21218_vm3, %v19550_v41  ;;  %8521 = vmatprep.subr.bf16.mxu0 %v20654_v10  ;;  %vm21226_vm15 = vnez %v21225_v17  ;;  %v8240_v3 = vpack.c.bf16 %v21234_v38, %v21233_v36  ;;  %v21235_v17 = vld [vmem:[#allocation144_spill] sm:$0xff]  ;;  %v21246_v38 = vld [vmem:[#allocation39_spill] sm:$0xff] }
 0x2b2   :  { %7752 = vmatprep.mubr.msk.f32.mxu1 %vm21220_vm1, %v19550_v41  ;;  %8235 = vmatpush1.bf16.msra.mxu1 %v8234_v19  ;;  %vm21230_vm1 = vnez %v21229_v54  ;;  %v21231_v19 = vld [vmem:[#allocation134_spill] sm:$0xff] }
 0x2b3   :  { %7943 = vmatmul.mubr.msk.f32.gmra.mrb[6].mxu0 %vm21224_vm6, %v19550_v41  ;;  %8236 = vmatprep.subr.bf16.mxu1 %v20654_v10  ;;  %vm21232_vm3 = vnez %v21231_v19  ;;  %v21239_v54 = vld [vmem:[#allocation34_spill] sm:$0xff]  ;;  %v21241_v19 = vld [vmem:[#allocation136_spill] sm:$0xff] }
 0x2b4   :  { %7944 = vmatprep.mubr.msk.f32.mxu0 %vm21226_vm15, %v19550_v41  ;;  %8523 = vmatpush1.bf16.msra.mxu0 %v8522_v12  ;;  %vm21236_vm15 = vnez %v21235_v17  ;;  %v21237_v12 = vld [vmem:[#allocation135_spill] sm:$0xff]  ;;  %v8528_v43 = vpack.c.bf16 %v21240_v60, %v21239_v54  ;;  %v21245_v17 = vld [vmem:[#allocation38_spill] sm:$0xff]  ;;  %v21252_v60 = vld [vmem:[#allocation41_spill] sm:$0xff] }
 0x2b5   :  { %7753 = vmatmul.mubr.msk.f32.gmra.mrb[8].mxu1 %vm21230_vm1, %v19550_v41  ;;  %8524 = vmatprep.subr.bf16.mxu0 %v20654_v10  ;;  %vm21238_vm6 = vnez %v21237_v12  ;;  %v8243_v36 = vpack.c.bf16 %v21246_v38, %v21245_v17  ;;  %v21247_v12 = vld [vmem:[#allocation137_spill] sm:$0xff] }
 0x2b6   :  { %7754 = vmatprep.mubr.msk.f32.mxu1 %vm21232_vm3, %v19550_v41  ;;  %8238 = vmatpush1.bf16.msra.mxu1 %v8237_v50  ;;  %vm21242_vm3 = vnez %v21241_v19  ;;  %v21243_v50 = vld [vmem:[#allocation151_spill] sm:$0xff]  ;;  %v21251_v19 = vld [vmem:[#allocation40_spill] sm:$0xff]  ;;  %v21258_v38 = vld [vmem:[#allocation45_spill] sm:$0xff] }
 0x2b7   :  { %7945 = vmatmul.mubr.msk.f32.gmra.mrb[8].mxu0 %vm21236_vm15, %v19550_v41  ;;  %8239 = vmatprep.subr.bf16.mxu1 %v20654_v10  ;;  %vm21244_vm1 = vnez %v21243_v50  ;;  %v8531_v54 = vpack.c.bf16 %v21252_v60, %v21251_v19  ;;  %v21253_v50 = vld [vmem:[#allocation150_spill] sm:$0xff]  ;;  %v21264_v60 = vld [vmem:[#allocation47_spill] sm:$0xff] }
 0x2b8   :  { %7946 = vmatprep.mubr.msk.f32.mxu0 %vm21238_vm6, %v19550_v41  ;;  %8526 = vmatpush1.bf16.msra.mxu0 %v8525_v61  ;;  %vm21248_vm6 = vnez %v21247_v12  ;;  %v21249_v61 = vld [vmem:[#allocation154_spill] sm:$0xff] }
 0x2b9   :  { %7755 = vmatmul.mubr.msk.f32.gmra.mrb[10].mxu1 %vm21242_vm3, %v19550_v41  ;;  %8527 = vmatprep.subr.bf16.mxu0 %v20654_v10  ;;  %vm21250_vm15 = vnez %v21249_v61  ;;  %v21257_v12 = vld [vmem:[#allocation42_spill] sm:$0xff]  ;;  %v21259_v61 = vld [vmem:[#allocation152_spill] sm:$0xff] }
 0x2ba   :  { %7756 = vmatprep.mubr.msk.f32.mxu1 %vm21244_vm1, %v19550_v41  ;;  %8241 = vmatpush1.bf16.msra.mxu1 %v8240_v3  ;;  %vm21254_vm1 = vnez %v21253_v50  ;;  %v21255_v3 = vld [vmem:[#allocation159_spill] sm:$0xff]  ;;  %v8246_v17 = vpack.c.bf16 %v21258_v38, %v21257_v12  ;;  %v21263_v50 = vld [vmem:[#allocation46_spill] sm:$0xff] }
 0x2bb   :  { %7947 = vmatmul.mubr.msk.f32.gmra.mrb[10].mxu0 %vm21248_vm6, %v19550_v41  ;;  %8242 = vmatprep.subr.bf16.mxu1 %v20654_v10  ;;  %vm21256_vm3 = vnez %v21255_v3  ;;  %v8534_v19 = vpack.c.bf16 %v21264_v60, %v21263_v50  ;;  %v21265_v3 = vld [vmem:[#allocation158_spill] sm:$0xff]  ;;  %v21270_v38 = vld [vmem:[#allocation51_spill] sm:$0xff] }
 0x2bc   :  { %7948 = vmatprep.mubr.msk.f32.mxu0 %vm21250_vm15, %v19550_v41  ;;  %8529 = vmatpush1.bf16.msra.mxu0 %v8528_v43  ;;  %vm21260_vm15 = vnez %v21259_v61  ;;  %v21261_v43 = vld [vmem:[#allocation162_spill] sm:$0xff]  ;;  %v21269_v61 = vld [vmem:[#allocation49_spill] sm:$0xff] }
 0x2bd   :  { %7757 = vmatmul.mubr.msk.f32.gmra.mrb[12].mxu1 %vm21254_vm1, %v19550_v41  ;;  %8530 = vmatprep.subr.bf16.mxu0 %v20654_v10  ;;  %vm21262_vm6 = vnez %v21261_v43  ;;  %v8249_v12 = vpack.c.bf16 %v21270_v38, %v21269_v61  ;;  %v21271_v43 = vld [vmem:[#allocation160_spill] sm:$0xff]  ;;  %v21276_v60 = vld [vmem:[#allocation54_spill] sm:$0xff]  ;;  %v21282_v38 = vld [vmem:[#allocation57_spill] sm:$0xff] }
 0x2be   :  { %7758 = vmatprep.mubr.msk.f32.mxu1 %vm21256_vm3, %v19550_v41  ;;  %8244 = vmatpush1.bf16.msra.mxu1 %v8243_v36  ;;  %vm21266_vm3 = vnez %v21265_v3  ;;  %v21267_v36 = vld [vmem:[#allocation167_spill] sm:$0xff]  ;;  %v21275_v3 = vld [vmem:[#allocation52_spill] sm:$0xff] }
 0x2bf   :  { %7949 = vmatmul.mubr.msk.f32.gmra.mrb[12].mxu0 %vm21260_vm15, %v19550_v41  ;;  %8245 = vmatprep.subr.bf16.mxu1 %v20654_v10  ;;  %vm21268_vm1 = vnez %v21267_v36  ;;  %v8537_v50 = vpack.c.bf16 %v21276_v60, %v21275_v3  ;;  %v21277_v36 = vld [vmem:[#allocation166_spill] sm:$0xff]  ;;  %v21288_v60 = vld [vmem:[#allocation60_spill] sm:$0xff] }
 0x2c0   :  { %7950 = vmatprep.mubr.msk.f32.mxu0 %vm21262_vm6, %v19550_v41  ;;  %8532 = vmatpush1.bf16.msra.mxu0 %v8531_v54  ;;  %vm21272_vm6 = vnez %v21271_v43  ;;  %v21273_v54 = vld [vmem:[#allocation170_spill] sm:$0xff]  ;;  %v21281_v43 = vld [vmem:[#allocation56_spill] sm:$0xff] }
 0x2c1   :  { %7759 = vmatmul.mubr.msk.f32.gmra.mrb[14].mxu1 %vm21266_vm3, %v19550_v41  ;;  %8533 = vmatprep.subr.bf16.mxu0 %v20654_v10  ;;  %vm21274_vm15 = vnez %v21273_v54  ;;  %v8252_v61 = vpack.c.bf16 %v21282_v38, %v21281_v43  ;;  %v21283_v54 = vld [vmem:[#allocation168_spill] sm:$0xff] }
 0x2c2   :  { %7760 = vmatprep.mubr.msk.f32.mxu1 %vm21268_vm1, %v19550_v41  ;;  %8247 = vmatpush1.bf16.msra.mxu1 %v8246_v17  ;;  %vm21278_vm1 = vnez %v21277_v36  ;;  %v21279_v17 = vld [vmem:[#allocation174_spill] sm:$0xff]  ;;  %v21287_v36 = vld [vmem:[#allocation59_spill] sm:$0xff]  ;;  %v21294_v38 = vld [vmem:[#allocation64_spill] sm:$0xff] }
 0x2c3   :  { %7951 = vmatmul.mubr.msk.f32.gmra.mrb[14].mxu0 %vm21272_vm6, %v19550_v41  ;;  %8248 = vmatprep.subr.bf16.mxu1 %v20654_v10  ;;  %vm21280_vm3 = vnez %v21279_v17  ;;  %v8540_v3 = vpack.c.bf16 %v21288_v60, %v21287_v36  ;;  %v21289_v17 = vld [vmem:[#allocation98_spill] sm:$0xff]  ;;  %v21300_v60 = vld [vmem:[#allocation67_spill] sm:$0xff] }
 0x2c4   :  { %7952 = vmatprep.mubr.msk.f32.mxu0 %vm21274_vm15, %v19550_v41  ;;  %8535 = vmatpush1.bf16.msra.mxu0 %v8534_v19  ;;  %vm21284_vm15 = vnez %v21283_v54  ;;  %v21285_v19 = vld [vmem:[#allocation177_spill] sm:$0xff]  ;;  %v21293_v54 = vld [vmem:[#allocation62_spill] sm:$0xff] }
 0x2c5   :  { %7761 = vmatmul.mubr.msk.f32.gmra.mrb[16].mxu1 %vm21278_vm1, %v19550_v41  ;;  %8536 = vmatprep.subr.bf16.mxu0 %v20654_v10  ;;  %vm21286_vm6 = vnez %v21285_v19  ;;  %v8255_v43 = vpack.c.bf16 %v21294_v38, %v21293_v54  ;;  %v21295_v19 = vld [vmem:[#allocation175_spill] sm:$0xff]  ;;  %v21306_v38 = vld [vmem:[#allocation70_spill] sm:$0xff] }
 0x2c6   :  { %7762 = vmatprep.mubr.msk.f32.mxu1 %vm21280_vm3, %v19550_v41  ;;  %8250 = vmatpush1.bf16.msra.mxu1 %v8249_v12  ;;  %vm21290_vm3 = vnez %v21289_v17  ;;  %v21291_v12 = vld [vmem:[#allocation181_spill] sm:$0xff]  ;;  %v21299_v17 = vld [vmem:[#allocation66_spill] sm:$0xff] }
 0x2c7   :  { %7953 = vmatmul.mubr.msk.f32.gmra.mrb[16].mxu0 %vm21284_vm15, %v19550_v41  ;;  %8251 = vmatprep.subr.bf16.mxu1 %v20654_v10  ;;  %vm21292_vm1 = vnez %v21291_v12  ;;  %v8543_v36 = vpack.c.bf16 %v21300_v60, %v21299_v17  ;;  %v21301_v12 = vld [vmem:[#allocation99_spill] sm:$0xff]  ;;  %v21312_v60 = vld [vmem:[#allocation73_spill] sm:$0xff] }
 0x2c8   :  { %7954 = vmatprep.mubr.msk.f32.mxu0 %vm21286_vm6, %v19550_v41  ;;  %8538 = vmatpush1.bf16.msra.mxu0 %v8537_v50  ;;  %vm21296_vm6 = vnez %v21295_v19  ;;  %v21297_v50 = vld [vmem:[#allocation184_spill] sm:$0xff] }
 0x2c9   :  { %7763 = vmatmul.mubr.msk.f32.gmra.mrb[18].mxu1 %vm21290_vm3, %v19550_v41  ;;  %8539 = vmatprep.subr.bf16.mxu0 %v20654_v10  ;;  %vm21298_vm15 = vnez %v21297_v50  ;;  %v21305_v19 = vld [vmem:[#allocation68_spill] sm:$0xff]  ;;  %v21307_v50 = vld [vmem:[#allocation182_spill] sm:$0xff] }
 0x2ca   :  { %7764 = vmatprep.mubr.msk.f32.mxu1 %vm21292_vm1, %v19550_v41  ;;  %8253 = vmatpush1.bf16.msra.mxu1 %v8252_v61  ;;  %vm21302_vm1 = vnez %v21301_v12  ;;  %v21303_v61 = vld [vmem:[#allocation189_spill] sm:$0xff]  ;;  %v8258_v54 = vpack.c.bf16 %v21306_v38, %v21305_v19  ;;  %v21311_v12 = vld [vmem:[#allocation72_spill] sm:$0xff] }
 0x2cb   :  { %7955 = vmatmul.mubr.msk.f32.gmra.mrb[18].mxu0 %vm21296_vm6, %v19550_v41  ;;  %8254 = vmatprep.subr.bf16.mxu1 %v20654_v10  ;;  %vm21304_vm3 = vnez %v21303_v61  ;;  %v8546_v17 = vpack.c.bf16 %v21312_v60, %v21311_v12  ;;  %v21313_v61 = vld [vmem:[#allocation188_spill] sm:$0xff]  ;;  %v21518_v12 = vld [vmem:[#allocation50_spill] sm:$0xff]  ;;  %v21519_v38 = vld [vmem:[#allocation169_spill] sm:$0xff] }
 0x2cc   :  { %7956 = vmatprep.mubr.msk.f32.mxu0 %vm21298_vm15, %v19550_v41  ;;  %8541 = vmatpush1.bf16.msra.mxu0 %v8540_v3  ;;  %vm21308_vm15 = vnez %v21307_v50  ;;  %v21309_v3 = vld [vmem:[#allocation192_spill] sm:$0xff]  ;;  %v21317_v50 = vld [vmem:[#allocation190_spill] sm:$0xff]  ;;  %v21521_v19 = vld [vmem:[#allocation53_spill] sm:$0xff] }
 0x2cd   :  { %7765 = vmatmul.mubr.msk.f32.gmra.mrb[20].mxu1 %vm21302_vm1, %v19550_v41  ;;  %8542 = vmatprep.subr.bf16.mxu0 %v20654_v10  ;;  %vm21310_vm6 = vnez %v21309_v3  ;;  %v21487_v3 = vld [vmem:[#allocation131_spill] sm:$0xff]  ;;  %v21516_v60 = vld [vmem:[#allocation164_spill] sm:$0xff] }
 0x2ce   :  { %7766 = vmatprep.mubr.msk.f32.mxu1 %vm21304_vm3, %v19550_v41  ;;  %8256 = vmatpush1.bf16.msra.mxu1 %v8255_v43  ;;  %vm21314_vm3 = vnez %v21313_v61  ;;  %v21315_v43 = vld [vmem:[#allocation197_spill] sm:$0xff]  ;;  %v21321_v61 = vld [vmem:[#allocation196_spill] sm:$0xff] }
 0x2cf   :  { %7957 = vmatmul.mubr.msk.f32.gmra.mrb[20].mxu0 %vm21308_vm15, %v19550_v41  ;;  %8257 = vmatprep.subr.bf16.mxu1 %v20654_v10  ;;  %vm21316_vm1 = vnez %v21315_v43  ;;  %vm21318_vm15 = vnez %v21317_v50  ;;  %v21323_v43 = vld [vmem:[#allocation204_spill] sm:$0xff]  ;;  %v21326_v50 = vld [vmem:[#allocation198_spill] sm:$0xff] }
 0x2d0   :  { %7958 = vmatprep.mubr.msk.f32.mxu0 %vm21310_vm6, %v19550_v41  ;;  %8544 = vmatpush1.bf16.msra.mxu0 %v8543_v36  ;;  %v21319_v36 = vld [vmem:[#allocation200_spill] sm:$0xff] }
 0x2d1   :  { %7767 = vmatmul.mubr.msk.f32.gmra.mrb[22].mxu1 %vm21314_vm3, %v19550_v41  ;;  %8545 = vmatprep.subr.bf16.mxu0 %v20654_v10  ;;  %vm21320_vm6 = vnez %v21319_v36  ;;  %vm21322_vm3 = vnez %v21321_v61  ;;  %v21330_v61 = vpack.c.bf16 %v21000_v24, %v20985_v59  ;;  %v21373_v36 = vld [vmem:[#allocation236_spill] sm:$0xff] }
 0x2d2   :  { %7768 = vmatprep.mubr.msk.f32.mxu1 %vm21316_vm1, %v19550_v41  ;;  %8259 = vmatpush1.bf16.msra.mxu1 %v8258_v54  ;;  %vm21324_vm1 = vnez %v21323_v43  ;;  %v21325_v54 = vpack.c.bf16 %v20984_v9, %v20972_v31  ;;  %v21331_v43 = vld [vmem:[#allocation100_spill] sm:$0xff]  ;;  %vm21374_vm8 = vnez %v21373_v36  ;;  %v21385_v36 = vld [vmem:[#allocation6_spill] sm:$0xff]  ;;  %v21513_v9 = vld [vmem:[#allocation161_spill] sm:$0xff] }
 0x2d3   :  { %7959 = vmatmul.mubr.msk.f32.gmra.mrb[22].mxu0 %vm21318_vm15, %v19550_v41  ;;  %8260 = vmatprep.subr.bf16.mxu1 %v20654_v10  ;;  %vm21327_vm15 = vnez %v21326_v50  ;;  %v21335_v50 = vpack.c.bf16 %v21011_v7, %v21001_v1  ;;  %v21507_v7 = vld [vmem:[#allocation153_spill] sm:$0xff]  ;;  %v21509_v1 = vld [vmem:[#allocation43_spill] sm:$0xff]  ;;  %v21510_v24 = vld [vmem:[#allocation156_spill] sm:$0xff] }
 0x2d4   :  { %7960 = vmatprep.mubr.msk.f32.mxu0 %vm21320_vm6, %v19550_v41  ;;  %8547 = vmatpush1.bf16.msra.mxu0 %v8546_v17  ;;  %v21328_v17 = vld [vmem:[#allocation207_spill] sm:$0xff]  ;;  %v21512_v59 = vld [vmem:[#allocation44_spill] sm:$0xff] }
 0x2d5   :  { %7769 = vmatmul.mubr.msk.f32.gmra.mrb[24].mxu1 %vm21322_vm3, %v19550_v41  ;;  %8548 = vmatprep.subr.bf16.mxu0 %v20654_v10  ;;  %vm21329_vm6 = vnez %v21328_v17  ;;  %v21336_v17 = vld [vmem:[#allocation205_spill] sm:$0xff]  ;;  %v21515_v31 = vld [vmem:[#allocation48_spill] sm:$0xff] }
 0x2d6   :  { %7770 = vmatprep.mubr.msk.f32.mxu1 %vm21324_vm1, %v19550_v41  ;;  %8262 = vmatpush1.bf16.msra.mxu1 %v21325_v54  ;;  %vm21332_vm1 = vnez %v21331_v43  ;;  %v21333_v54 = vld [vmem:[#allocation212_spill] sm:$0xff]  ;;  %v21340_v43 = vpack.c.bf16 %v21016_v5, %v21015_v4  ;;  %v21504_v5 = vld [vmem:[#allocation141_spill] sm:$0xff] }
 0x2d7   :  { %7961 = vmatmul.mubr.msk.f32.gmra.mrb[24].mxu0 %vm21327_vm15, %v19550_v41  ;;  %8263 = vmatprep.subr.bf16.mxu1 %v20654_v10  ;;  %vm21334_vm3 = vnez %v21333_v54  ;;  %v21341_v54 = vld [vmem:[#allocation211_spill] sm:$0xff]  ;;  %v21506_v4 = vld [vmem:[#allocation37_spill] sm:$0xff] }
 0x2d8   :  { %7962 = vmatprep.mubr.msk.f32.mxu0 %vm21329_vm6, %v19550_v41  ;;  %8550 = vmatpush1.bf16.msra.mxu0 %v21330_v61  ;;  %vm21337_vm6 = vnez %v21336_v17  ;;  %v21338_v61 = vld [vmem:[#allocation215_spill] sm:$0xff]  ;;  %v21345_v17 = vpack.c.bf16 %v21018_v53, %v21017_v55  ;;  %v21501_v53 = vld [vmem:[#allocation140_spill] sm:$0xff] }
 0x2d9   :  { %7771 = vmatmul.mubr.msk.f32.gmra.mrb[26].mxu1 %vm21332_vm1, %v19550_v41  ;;  %8551 = vmatprep.subr.bf16.mxu0 %v20654_v10  ;;  %vm21339_vm15 = vnez %v21338_v61  ;;  %v21346_v61 = vld [vmem:[#allocation213_spill] sm:$0xff]  ;;  %v21503_v55 = vld [vmem:[#allocation35_spill] sm:$0xff] }
 0x2da   :  { %7772 = vmatprep.mubr.msk.f32.mxu1 %vm21334_vm3, %v19550_v41  ;;  %8265 = vmatpush1.bf16.msra.mxu1 %v21335_v50  ;;  %vm21342_vm3 = vnez %v21341_v54  ;;  %v21343_v50 = vld [vmem:[#allocation220_spill] sm:$0xff]  ;;  %v21350_v54 = vpack.c.bf16 %v21066_v40, %v21022_v23  ;;  %v21500_v23 = vld [vmem:[#allocation30_spill] sm:$0xff] }
 0x2db   :  { %7963 = vmatmul.mubr.msk.f32.gmra.mrb[26].mxu0 %vm21337_vm6, %v19550_v41  ;;  %8266 = vmatprep.subr.bf16.mxu1 %v20654_v10  ;;  %vm21344_vm1 = vnez %v21343_v50  ;;  %v21351_v50 = vld [vmem:[#allocation219_spill] sm:$0xff]  ;;  %v21498_v40 = vld [vmem:[#allocation148_spill] sm:$0xff] }
 0x2dc   :  { %7964 = vmatprep.mubr.msk.f32.mxu0 %vm21339_vm15, %v19550_v41  ;;  %8553 = vmatpush1.bf16.msra.mxu0 %v21340_v43  ;;  %vm21347_vm15 = vnez %v21346_v61  ;;  %v21348_v43 = vld [vmem:[#allocation223_spill] sm:$0xff]  ;;  %v21355_v61 = vpack.c.bf16 %v21086_v57, %v21074_v35  ;;  %v21495_v57 = vld [vmem:[#allocation145_spill] sm:$0xff] }
 0x2dd   :  { %7773 = vmatmul.mubr.msk.f32.gmra.mrb[28].mxu1 %vm21342_vm3, %v19550_v41  ;;  %8554 = vmatprep.subr.bf16.mxu0 %v20654_v10  ;;  %vm21349_vm6 = vnez %v21348_v43  ;;  %v21356_v43 = vld [vmem:[#allocation221_spill] sm:$0xff] }
 0x2de   :  { %7774 = vmatprep.mubr.msk.f32.mxu1 %vm21344_vm1, %v19550_v41  ;;  %8268 = vmatpush1.bf16.msra.mxu1 %v21345_v17  ;;  %vm21352_vm1 = vnez %v21351_v50  ;;  %v21353_v17 = vld [vmem:[#allocation227_spill] sm:$0xff]  ;;  %v21360_v50 = vpack.c.bf16 %v21103_v37, %v21099_v47  ;;  %v21492_v37 = vld [vmem:[#allocation133_spill] sm:$0xff] }
 0x2df   :  { %7965 = vmatmul.mubr.msk.f32.gmra.mrb[28].mxu0 %vm21347_vm15, %v19550_v41  ;;  %8269 = vmatprep.subr.bf16.mxu1 %v20654_v10  ;;  %vm21354_vm3 = vnez %v21353_v17  ;;  %v21361_v17 = vld [vmem:[#allocation101_spill] sm:$0xff]  ;;  %v21494_v47 = vld [vmem:[#allocation23_spill] sm:$0xff] }
 0x2e0   :  { %7966 = vmatprep.mubr.msk.f32.mxu0 %vm21349_vm6, %v19550_v41  ;;  %8556 = vmatpush1.bf16.msra.mxu0 %v21350_v54  ;;  %vm21357_vm6 = vnez %v21356_v43  ;;  %v21358_v54 = vld [vmem:[#allocation229_spill] sm:$0xff]  ;;  %v21365_v43 = vld [vmem:[#allocation228_spill] sm:$0xff] }
 0x2e1   :  { %7775 = vmatmul.mubr.msk.f32.gmra.mrb[30].mxu1 %vm21352_vm1, %v19550_v41  ;;  %8557 = vmatprep.subr.bf16.mxu0 %v20654_v10  ;;  %vm21359_vm15 = vnez %v21358_v54  ;;  %v21367_v54 = vld [vmem:[#allocation238_spill] sm:$0xff]  ;;  %v21497_v35 = vld [vmem:[#allocation29_spill] sm:$0xff] }
 0x2e2   :  { %7776 = vmatprep.mubr.msk.f32.mxu1 %vm21354_vm3, %v19550_v41  ;;  %8271 = vmatpush1.bf16.msra.mxu1 %v21355_v61  ;;  %vm21362_vm3 = vnez %v21361_v17  ;;  %v21363_v61 = vld [vmem:[#allocation235_spill] sm:$0xff]  ;;  %v21371_v17 = vld [vmem:[#allocation242_spill] sm:$0xff] }
 0x2e3   :  { %7967 = vmatmul.mubr.msk.f32.gmra.mrb[30].mxu0 %vm21357_vm6, %v19550_v41  ;;  %8272 = vmatprep.subr.bf16.mxu1 %v20654_v10  ;;  %vm21364_vm1 = vnez %v21363_v61  ;;  %vm21366_vm6 = vnez %v21365_v43  ;;  %v21375_v61 = vld [vmem:[#allocation245_spill] sm:$0xff]  ;;  %v21377_v43 = vld [vmem:[#allocation2_spill] sm:$0xff] }
 0x2e4   :  { %7968 = vmatprep.mubr.msk.f32.mxu0 %vm21359_vm15, %v19550_v41  ;;  %8559 = vmatpush1.bf16.msra.mxu0 %v21360_v50  ;;  %vm21368_vm15 = vnez %v21367_v54  ;;  %v21369_v50 = vld [vmem:[#allocation234_spill] sm:$0xff]  ;;  %v21379_v54 = vld [vmem:[#allocation7_spill] sm:$0xff] }
 0x2e5   :  { %7777 = vmatmul.mubr.msk.f32.gmra.mrb[32].mxu1 %vm21362_vm3, %v19550_v41  ;;  %8560 = vmatprep.subr.bf16.mxu0 %v20654_v10  ;;  %vm21370_vm2 = vnez %v21369_v50  ;;  %vm21372_vm3 = vnez %v21371_v17  ;;  %v21381_v50 = vld [vmem:[#allocation243_spill] sm:$0xff]  ;;  %v21383_v17 = vld [vmem:[#allocation249_spill] sm:$0xff] }
 0x2e6   :  { %7778 = vmatprep.mubr.msk.f32.mxu1 %vm21364_vm1, %v19550_v41  ;;  %vm21376_vm1 = vnez %v21375_v61  ;;  %v21387_v61 = vld [vmem:[#allocation12_spill] sm:$0xff] }
 0x2e7   :  { %7969 = vmatmul.mubr.msk.f32.gmra.mrb[32].mxu0 %vm21366_vm6, %v19550_v41  ;;  %vm21378_vm6 = vnez %v21377_v43  ;;  %v21389_v43 = vld [vmem:[#allocation9_spill] sm:$0xff] }
 0x2e8   :  { %7970 = vmatprep.mubr.msk.f32.mxu0 %vm21368_vm15, %v19550_v41  ;;  %vm21380_vm15 = vnez %v21379_v54  ;;  %v21391_v54 = vld [vmem:[#allocation14_spill] sm:$0xff] }
 0x2e9   :  { %7779 = vmatmul.mubr.msk.f32.gmra.mrb[34].mxu1 %vm21370_vm2, %v19550_v41  ;;  %vm21382_vm2 = vnez %v21381_v50  ;;  %v21393_v50 = vld [vmem:[#allocation10_spill] sm:$0xff] }
 0x2ea   :  { %7780 = vmatprep.mubr.msk.f32.mxu1 %vm21372_vm3, %v19550_v41  ;;  %vm21384_vm3 = vnez %v21383_v17  ;;  %v21395_v17 = vld [vmem:[#allocation18_spill] sm:$0xff] }
 0x2eb   :  { %7971 = vmatmul.mubr.msk.f32.gmra.mrb[34].mxu0 %vm21374_vm8, %v19550_v41  ;;  %vm21386_vm8 = vnez %v21385_v36  ;;  %v21397_v36 = vld [vmem:[#allocation13_spill] sm:$0xff] }
 0x2ec   :  { %7972 = vmatprep.mubr.msk.f32.mxu0 %vm21376_vm1, %v19550_v41  ;;  %vm21388_vm1 = vnez %v21387_v61  ;;  %v21399_v61 = vld [vmem:[#allocation22_spill] sm:$0xff] }
 0x2ed   :  { %7781 = vmatmul.mubr.msk.f32.gmra.mrb[36].mxu1 %vm21378_vm6, %v19550_v41  ;;  %vm21390_vm6 = vnez %v21389_v43  ;;  %v21401_v43 = vld [vmem:[#allocation16_spill] sm:$0xff] }
 0x2ee   :  { %7782 = vmatprep.mubr.msk.f32.mxu1 %vm21380_vm15, %v19550_v41  ;;  %vm21392_vm15 = vnez %v21391_v54  ;;  %v21403_v54 = vld [vmem:[#allocation261_spill] sm:$0xff] }
 0x2ef   :  { %7973 = vmatmul.mubr.msk.f32.gmra.mrb[36].mxu0 %vm21382_vm2, %v19550_v41  ;;  %vm21394_vm2 = vnez %v21393_v50  ;;  %v21405_v50 = vld [vmem:[#allocation19_spill] sm:$0xff] }
 0x2f0   :  { %7974 = vmatprep.mubr.msk.f32.mxu0 %vm21384_vm3, %v19550_v41  ;;  %vm21396_vm3 = vnez %v21395_v17  ;;  %v21407_v17 = vld [vmem:[#allocation264_spill] sm:$0xff] }
 0x2f1   :  { %7783 = vmatmul.mubr.msk.f32.gmra.mrb[38].mxu1 %vm21386_vm8, %v19550_v41  ;;  %vm21398_vm8 = vnez %v21397_v36  ;;  %v21409_v36 = vld [vmem:[#allocation260_spill] sm:$0xff] }
 0x2f2   :  { %7784 = vmatprep.mubr.msk.f32.mxu1 %vm21388_vm1, %v19550_v41  ;;  %vm21400_vm1 = vnez %v21399_v61  ;;  %v21411_v61 = vld [vmem:[#allocation269_spill] sm:$0xff] }
 0x2f3   :  { %7975 = vmatmul.mubr.msk.f32.gmra.mrb[38].mxu0 %vm21390_vm6, %v19550_v41  ;;  %vm21402_vm6 = vnez %v21401_v43  ;;  %v21413_v43 = vld [vmem:[#allocation262_spill] sm:$0xff] }
 0x2f4   :  { %7976 = vmatprep.mubr.msk.f32.mxu0 %vm21392_vm15, %v19550_v41  ;;  %vm21404_vm15 = vnez %v21403_v54  ;;  %v21415_v54 = vld [vmem:[#allocation271_spill] sm:$0xff] }
 0x2f5   :  { %7785 = vmatmul.mubr.msk.f32.gmra.mrb[40].mxu1 %vm21394_vm2, %v19550_v41  ;;  %vm21406_vm2 = vnez %v21405_v50  ;;  %v21417_v50 = vld [vmem:[#allocation268_spill] sm:$0xff] }
 0x2f6   :  { %7786 = vmatprep.mubr.msk.f32.mxu1 %vm21396_vm3, %v19550_v41  ;;  %vm21408_vm3 = vnez %v21407_v17  ;;  %v21419_v17 = vld [vmem:[#allocation277_spill] sm:$0xff] }
 0x2f7   :  { %7977 = vmatmul.mubr.msk.f32.gmra.mrb[40].mxu0 %vm21398_vm8, %v19550_v41  ;;  %vm21410_vm8 = vnez %v21409_v36  ;;  %v21421_v36 = vld [vmem:[#allocation270_spill] sm:$0xff] }
 0x2f8   :  { %7978 = vmatprep.mubr.msk.f32.mxu0 %vm21400_vm1, %v19550_v41  ;;  %vm21412_vm1 = vnez %v21411_v61  ;;  %v21423_v61 = vld [vmem:[#allocation280_spill] sm:$0xff] }
 0x2f9   :  { %7787 = vmatmul.mubr.msk.f32.gmra.mrb[42].mxu1 %vm21402_vm6, %v19550_v41  ;;  %vm21414_vm6 = vnez %v21413_v43  ;;  %v21425_v43 = vld [vmem:[#allocation276_spill] sm:$0xff] }
 0x2fa   :  { %7788 = vmatprep.mubr.msk.f32.mxu1 %vm21404_vm15, %v19550_v41  ;;  %vm21416_vm15 = vnez %v21415_v54  ;;  %v21427_v54 = vld [vmem:[#allocation285_spill] sm:$0xff] }
 0x2fb   :  { %7979 = vmatmul.mubr.msk.f32.gmra.mrb[42].mxu0 %vm21406_vm2, %v19550_v41  ;;  %vm21418_vm2 = vnez %v21417_v50  ;;  %v21429_v50 = vld [vmem:[#allocation278_spill] sm:$0xff] }
 0x2fc   :  { %7980 = vmatprep.mubr.msk.f32.mxu0 %vm21408_vm3, %v19550_v41  ;;  %vm21420_vm3 = vnez %v21419_v17  ;;  %v21431_v17 = vld [vmem:[#allocation288_spill] sm:$0xff] }
 0x2fd   :  { %7789 = vmatmul.mubr.msk.f32.gmra.mrb[44].mxu1 %vm21410_vm8, %v19550_v41  ;;  %vm21422_vm8 = vnez %v21421_v36  ;;  %v21433_v36 = vld [vmem:[#allocation284_spill] sm:$0xff] }
 0x2fe   :  { %7790 = vmatprep.mubr.msk.f32.mxu1 %vm21412_vm1, %v19550_v41  ;;  %vm21424_vm1 = vnez %v21423_v61  ;;  %v21435_v61 = vld [vmem:[#allocation293_spill] sm:$0xff] }
 0x2ff   :  { %7981 = vmatmul.mubr.msk.f32.gmra.mrb[44].mxu0 %vm21414_vm6, %v19550_v41  ;;  %vm21426_vm6 = vnez %v21425_v43  ;;  %v21437_v43 = vld [vmem:[#allocation286_spill] sm:$0xff] }
 0x300   :  { %7982 = vmatprep.mubr.msk.f32.mxu0 %vm21416_vm15, %v19550_v41  ;;  %vm21428_vm15 = vnez %v21427_v54  ;;  %v21439_v54 = vld [vmem:[#allocation296_spill] sm:$0xff] }
 0x301   :  { %7791 = vmatmul.mubr.msk.f32.gmra.mrb[46].mxu1 %vm21418_vm2, %v19550_v41  ;;  %vm21430_vm2 = vnez %v21429_v50  ;;  %v21441_v50 = vld [vmem:[#allocation292_spill] sm:$0xff] }
 0x302   :  { %7792 = vmatprep.mubr.msk.f32.mxu1 %vm21420_vm3, %v19550_v41  ;;  %vm21432_vm3 = vnez %v21431_v17  ;;  %v21443_v17 = vld [vmem:[#allocation301_spill] sm:$0xff] }
 0x303   :  { %7983 = vmatmul.mubr.msk.f32.gmra.mrb[46].mxu0 %vm21422_vm8, %v19550_v41  ;;  %vm21434_vm8 = vnez %v21433_v36  ;;  %v21445_v36 = vld [vmem:[#allocation294_spill] sm:$0xff] }
 0x304   :  { %7984 = vmatprep.mubr.msk.f32.mxu0 %vm21424_vm1, %v19550_v41  ;;  %vm21436_vm1 = vnez %v21435_v61  ;;  %v21447_v61 = vld [vmem:[#allocation304_spill] sm:$0xff] }
 0x305   :  { %7793 = vmatmul.mubr.msk.f32.gmra.mrb[48].mxu1 %vm21426_vm6, %v19550_v41  ;;  %vm21438_vm6 = vnez %v21437_v43  ;;  %v21449_v43 = vld [vmem:[#allocation300_spill] sm:$0xff] }
 0x306   :  { %7794 = vmatprep.mubr.msk.f32.mxu1 %vm21428_vm15, %v19550_v41  ;;  %vm21440_vm15 = vnez %v21439_v54  ;;  %v21451_v54 = vld [vmem:[#allocation309_spill] sm:$0xff] }
 0x307   :  { %7985 = vmatmul.mubr.msk.f32.gmra.mrb[48].mxu0 %vm21430_vm2, %v19550_v41  ;;  %vm21442_vm2 = vnez %v21441_v50  ;;  %v21453_v50 = vld [vmem:[#allocation302_spill] sm:$0xff] }
 0x308   :  { %7986 = vmatprep.mubr.msk.f32.mxu0 %vm21432_vm3, %v19550_v41  ;;  %vm21444_vm3 = vnez %v21443_v17  ;;  %v21455_v17 = vld [vmem:[#allocation312_spill] sm:$0xff] }
 0x309   :  { %7795 = vmatmul.mubr.msk.f32.gmra.mrb[50].mxu1 %vm21434_vm8, %v19550_v41  ;;  %vm21446_vm8 = vnez %v21445_v36  ;;  %v21457_v36 = vld [vmem:[#allocation308_spill] sm:$0xff] }
 0x30a   :  { %7796 = vmatprep.mubr.msk.f32.mxu1 %vm21436_vm1, %v19550_v41  ;;  %vm21448_vm1 = vnez %v21447_v61  ;;  %v21486_v61 = vld [vmem:[#allocation117_spill] sm:$0xff] }
 0x30b   :  { %7987 = vmatmul.mubr.msk.f32.gmra.mrb[50].mxu0 %vm21438_vm6, %v19550_v41  ;;  %vm21450_vm6 = vnez %v21449_v43  ;;  %v21460_v43 = vld [vmem:[#allocation310_spill] sm:$0xff] }
 0x30c   :  { %7988 = vmatprep.mubr.msk.f32.mxu0 %vm21440_vm15, %v19550_v41  ;;  %vm21452_vm15 = vnez %v21451_v54  ;;  %v21485_v54 = vld [vmem:[#allocation15_spill] sm:$0xff] }
 0x30d   :  { %7797 = vmatmul.mubr.msk.f32.gmra.mrb[52].mxu1 %vm21442_vm2, %v19550_v41  ;;  %vm21454_vm2 = vnez %v21453_v50  ;;  %v21484_v50 = vld [vmem:[#allocation130_spill] sm:$0xff] }
 0x30e   :  { %7798 = vmatprep.mubr.msk.f32.mxu1 %vm21444_vm3, %v19550_v41  ;;  %vm21456_vm3 = vnez %v21455_v17  ;;  %v21483_v17 = vld [vmem:[#allocation110_spill] sm:$0xff] }
 0x30f   :  { %7989 = vmatmul.mubr.msk.f32.gmra.mrb[52].mxu0 %vm21446_vm8, %v19550_v41  ;;  %vm21458_vm8 = vnez %v21457_v36  ;;  %v21482_v36 = vld [vmem:[#allocation11_spill] sm:$0xff] }
 0x310   :  { %7990 = vmatprep.mubr.msk.f32.mxu0 %vm21448_vm1, %v19550_v41  ;;  %vm21459_vm1 = vnez %v21123_v42  ;;  %v21481_v42 = vld [vmem:[#allocation112_spill] sm:$0xff] }
 0x311   :  { %7799 = vmatmul.mubr.msk.f32.gmra.mrb[54].mxu1 %vm21450_vm6, %v19550_v41  ;;  %vm21461_vm6 = vnez %v21460_v43  ;;  %v21480_v43 = vld [vmem:[#allocation125_spill] sm:$0xff] }
 0x312   :  { %7800 = vmatprep.mubr.msk.f32.mxu1 %vm21452_vm15, %v19550_v41  ;;  %vm21462_vm15 = vnez %v21130_v20  ;;  %v21477_v20 = vld [vmem:[#allocation124_spill] sm:$0xff] }
 0x313   :  { %7991 = vmatmul.mubr.msk.f32.gmra.mrb[54].mxu0 %vm21454_vm2, %v19550_v41  ;;  %vm21463_vm2 = vnez %v21120_v28  ;;  %v21467_v28 = vld [vmem:[#allocation326_spill] sm:$0xff] }
 0x314   :  { %7992 = vmatprep.mubr.msk.f32.mxu0 %vm21456_vm3, %v19550_v41 }
 0x315   :  { %7801 = vmatmul.mubr.msk.f32.gmra.mrb[56].mxu1 %vm21458_vm8, %v19550_v41  ;;  %vm21464_vm8 = vnez %v21126_v46  ;;  %v21473_v46 = vld [vmem:[#allocation122_spill] sm:$0xff] }
 0x316   :  { %7802 = vmatprep.mubr.msk.f32.mxu1 %vm21459_vm1, %v19550_v41  ;;  %vm21465_vm1 = vnez %v21160_v34  ;;  %v21469_v34 = vld [vmem:[#allocation114_spill] sm:$0xff] }
 0x317   :  { %7993 = vmatmul.mubr.msk.f32.gmra.mrb[56].mxu0 %vm21461_vm6, %v19550_v41  ;;  %vm21466_vm6 = vnez %v21150_v44  ;;  %v21471_v44 = vld [vmem:[#allocation113_spill] sm:$0xff] }
 0x318   :  { %7994 = vmatprep.mubr.msk.f32.mxu0 %vm21462_vm15, %v19550_v41 }
 0x319   :  { %7803 = vmatmul.mubr.msk.f32.gmra.mrb[58].mxu1 %vm21463_vm2, %v19550_v41  ;;  %vm21468_vm2 = vnez %v21467_v28  ;;  %v21472_v28 = vld [vmem:[#allocation3_spill] sm:$0xff] }
 0x31a   :  { %7804 = vmatprep.mubr.msk.f32.mxu1 %vm16336_vm0, %v19550_v41 }
 0x31b   :  { %7995 = vmatmul.mubr.msk.f32.gmra.mrb[58].mxu0 %vm21464_vm8, %v19550_v41 }
 0x31c   :  { %7996 = vmatprep.mubr.msk.f32.mxu0 %vm21465_vm1, %v19550_v41 }
 0x31d   :  { %7805 = vmatmul.mubr.msk.f32.gmra.mrb[60].mxu1 %vm21466_vm6, %v19550_v41 }
 0x31e   :  { %7806 = vmatprep.mubr.msk.f32.mxu1 %vm16457_vm14, %v19550_v41 }
 0x31f   :  { %7997 = vmatmul.mubr.msk.f32.gmra.mrb[60].mxu0 %vm21468_vm2, %v19550_v41 }
 0x320   :  { %7998 = vmatprep.mubr.msk.f32.mxu0 %vm16479_vm12, %v19550_v41 }
 0x321   :  { %7807 = vmatmul.mubr.msk.f32.gmra.mrb[62].mxu1 %vm16449_vm9, %v19550_v41 }
 0x322   :  { %3476 = vmatprep.mubr.f32.mxu1 %v21469_v34 }
 0x323   :  { %7999 = vmatmul.mubr.msk.f32.gmra.mrb[62].mxu0 %vm16466_vm7, %v19550_v41  ;;  %v21478_v41 = vld [vmem:[#allocation106_spill] sm:$0xff] }
 0x324   :  { %6074 = vmatprep.mubr.f32.mxu0 %v21470_v29 }
 0x325   :  { %3479 = vmatmul.mubr.f32.vlgmr.msra.gmra.mrb[0].mxu1 %v21471_v44 }
 0x326   :  { %8274 = vmatpush1.bf16.msra.mxu1 %v21472_v28  ;;  %3485 = vmatprep.mubr.f32.mxu1 %v21473_v46  ;;  %v21491_v28 = vld [vmem:[#allocation21_spill] sm:$0xff] }
 0x327   :  { %6077 = vmatmul.mubr.f32.vlgmr.msra.gmra.mrb[0].mxu0 %v21474_v18  ;;  %8275 = vmatprep.subr.bf16.mxu1 %v20654_v10 }
 0x328   :  { %8562 = vmatpush1.bf16.msra.mxu0 %v21475_v62  ;;  %6083 = vmatprep.mubr.f32.mxu0 %v21476_v27  ;;  %v21489_v62 = vld [vmem:[#allocation132_spill] sm:$0xff] }
 0x329   :  { %3488 = vmatmul.mubr.f32.gmra.mrb[2].mxu1 %v21477_v20  ;;  %8563 = vmatprep.subr.bf16.mxu0 %v20654_v10 }
 0x32a   :  { %3494 = vmatprep.mubr.f32.mxu1 %v21478_v41  ;;  %8277 = vmatpush1.bf16.msra.mxu1 %v21479_v13  ;;  %v21488_v13 = vld [vmem:[#allocation17_spill] sm:$0xff] }
 0x32b   :  { %6086 = vmatmul.mubr.f32.gmra.mrb[2].mxu0 %v21480_v43  ;;  %8278 = vmatprep.subr.bf16.mxu1 %v20654_v10 }
 0x32c   :  { %6092 = vmatprep.mubr.f32.mxu0 %v21481_v42  ;;  %8565 = vmatpush1.bf16.msra.mxu0 %v21482_v36  ;;  %v21490_v36 = vld [vmem:[#allocation147_spill] sm:$0xff] }
 0x32d   :  { %3497 = vmatmul.mubr.f32.gmra.mrb[4].mxu1 %v21483_v17  ;;  %8566 = vmatprep.subr.bf16.mxu0 %v20654_v10 }
 0x32e   :  { %3503 = vmatprep.mubr.f32.mxu1 %v21484_v50  ;;  %8280 = vmatpush1.bf16.msra.mxu1 %v21485_v54  ;;  %v21493_v54 = vld [vmem:[#allocation149_spill] sm:$0xff] }
 0x32f   :  { %6095 = vmatmul.mubr.f32.gmra.mrb[4].mxu0 %v21486_v61  ;;  %8281 = vmatprep.subr.bf16.mxu1 %v20654_v10 }
 0x330   :  { %6101 = vmatprep.mubr.f32.mxu0 %v21487_v3  ;;  %8568 = vmatpush1.bf16.msra.mxu0 %v21488_v13  ;;  %v21496_v13 = vld [vmem:[#allocation138_spill] sm:$0xff] }
 0x331   :  { %3506 = vmatmul.mubr.f32.gmra.mrb[6].mxu1 %v21489_v62  ;;  %8569 = vmatprep.subr.bf16.mxu0 %v20654_v10 }
 0x332   :  { %3512 = vmatprep.mubr.f32.mxu1 %v21490_v36  ;;  %8283 = vmatpush1.bf16.msra.mxu1 %v21491_v28  ;;  %v21499_v28 = vld [vmem:[#allocation139_spill] sm:$0xff] }
 0x333   :  { %6104 = vmatmul.mubr.f32.gmra.mrb[6].mxu0 %v21492_v37  ;;  %8284 = vmatprep.subr.bf16.mxu1 %v20654_v10 }
 0x334   :  { %6110 = vmatprep.mubr.f32.mxu0 %v21493_v54  ;;  %8571 = vmatpush1.bf16.msra.mxu0 %v21494_v47  ;;  %v21502_v47 = vld [vmem:[#allocation155_spill] sm:$0xff] }
 0x335   :  { %3515 = vmatmul.mubr.f32.gmra.mrb[8].mxu1 %v21495_v57  ;;  %8572 = vmatprep.subr.bf16.mxu0 %v20654_v10 }
 0x336   :  { %3521 = vmatprep.mubr.f32.mxu1 %v21496_v13  ;;  %8286 = vmatpush1.bf16.msra.mxu1 %v21497_v35  ;;  %v21505_v35 = vld [vmem:[#allocation157_spill] sm:$0xff] }
 0x337   :  { %6113 = vmatmul.mubr.f32.gmra.mrb[8].mxu0 %v21498_v40  ;;  %8287 = vmatprep.subr.bf16.mxu1 %v20654_v10 }
 0x338   :  { %6119 = vmatprep.mubr.f32.mxu0 %v21499_v28  ;;  %8574 = vmatpush1.bf16.msra.mxu0 %v21500_v23  ;;  %v21508_v23 = vld [vmem:[#allocation163_spill] sm:$0xff] }
 0x339   :  { %3524 = vmatmul.mubr.f32.gmra.mrb[10].mxu1 %v21501_v53  ;;  %8575 = vmatprep.subr.bf16.mxu0 %v20654_v10 }
 0x33a   :  { %3530 = vmatprep.mubr.f32.mxu1 %v21502_v47  ;;  %8289 = vmatpush1.bf16.msra.mxu1 %v21503_v55  ;;  %v21511_v55 = vld [vmem:[#allocation165_spill] sm:$0xff] }
 0x33b   :  { %6122 = vmatmul.mubr.f32.gmra.mrb[10].mxu0 %v21504_v5  ;;  %8290 = vmatprep.subr.bf16.mxu1 %v20654_v10 }
 0x33c   :  { %6128 = vmatprep.mubr.f32.mxu0 %v21505_v35  ;;  %8577 = vmatpush1.bf16.msra.mxu0 %v21506_v4  ;;  %v21514_v4 = vld [vmem:[#allocation171_spill] sm:$0xff] }
 0x33d   :  { %3533 = vmatmul.mubr.f32.gmra.mrb[12].mxu1 %v21507_v7  ;;  %8578 = vmatprep.subr.bf16.mxu0 %v20654_v10 }
 0x33e   :  { %3539 = vmatprep.mubr.f32.mxu1 %v21508_v23  ;;  %8292 = vmatpush1.bf16.msra.mxu1 %v21509_v1  ;;  %v21517_v1 = vld [vmem:[#allocation173_spill] sm:$0xff] }
 0x33f   :  { %6131 = vmatmul.mubr.f32.gmra.mrb[12].mxu0 %v21510_v24  ;;  %8293 = vmatprep.subr.bf16.mxu1 %v20654_v10  ;;  %v21578_v24 = vld [vmem:[#allocation251_spill] sm:$0xff] }
 0x340   :  { %6137 = vmatprep.mubr.f32.mxu0 %v21511_v55  ;;  %8580 = vmatpush1.bf16.msra.mxu0 %v21512_v59  ;;  %v21520_v59 = vld [vmem:[#allocation178_spill] sm:$0xff]  ;;  %v21574_v55 = vld [vmem:[#allocation247_spill] sm:$0xff] }
 0x341   :  { %3542 = vmatmul.mubr.f32.gmra.mrb[14].mxu1 %v21513_v9  ;;  %8581 = vmatprep.subr.bf16.mxu0 %v20654_v10  ;;  %v21522_v9 = vld [vmem:[#allocation172_spill] sm:$0xff] }
 0x342   :  { %3548 = vmatprep.mubr.f32.mxu1 %v21514_v4  ;;  %8295 = vmatpush1.bf16.msra.mxu1 %v21515_v31  ;;  %v21523_v31 = vld [vmem:[#allocation180_spill] sm:$0xff] }
 0x343   :  { %6140 = vmatmul.mubr.f32.gmra.mrb[14].mxu0 %v21516_v60  ;;  %8296 = vmatprep.subr.bf16.mxu1 %v20654_v10  ;;  %v21524_v60 = vld [vmem:[#allocation55_spill] sm:$0xff]  ;;  %v21525_v4 = vld [vmem:[#allocation176_spill] sm:$0xff] }
 0x344   :  { %6146 = vmatprep.mubr.f32.mxu0 %v21517_v1  ;;  %8583 = vmatpush1.bf16.msra.mxu0 %v21518_v12  ;;  %v21526_v12 = vld [vmem:[#allocation185_spill] sm:$0xff]  ;;  %v21528_v1 = vld [vmem:[#allocation179_spill] sm:$0xff] }
 0x345   :  { %3551 = vmatmul.mubr.f32.gmra.mrb[16].mxu1 %v21519_v38  ;;  %8584 = vmatprep.subr.bf16.mxu0 %v20654_v10  ;;  %v21527_v38 = vld [vmem:[#allocation58_spill] sm:$0xff] }
 0x346   :  { %3557 = vmatprep.mubr.f32.mxu1 %v21520_v59  ;;  %8298 = vmatpush1.bf16.msra.mxu1 %v21521_v19  ;;  %v21529_v19 = vld [vmem:[#allocation187_spill] sm:$0xff] }
 0x347   :  { %6149 = vmatmul.mubr.f32.gmra.mrb[16].mxu0 %v21522_v9  ;;  %8299 = vmatprep.subr.bf16.mxu1 %v20654_v10  ;;  %v21530_v9 = vld [vmem:[#allocation61_spill] sm:$0xff]  ;;  %v21531_v59 = vld [vmem:[#allocation183_spill] sm:$0xff] }
 0x348   :  { %6155 = vmatprep.mubr.f32.mxu0 %v21523_v31  ;;  %8586 = vmatpush1.bf16.msra.mxu0 %v21524_v60  ;;  %v21532_v60 = vld [vmem:[#allocation193_spill] sm:$0xff]  ;;  %v21534_v31 = vld [vmem:[#allocation186_spill] sm:$0xff] }
 0x349   :  { %3560 = vmatmul.mubr.f32.gmra.mrb[18].mxu1 %v21525_v4  ;;  %8587 = vmatprep.subr.bf16.mxu0 %v20654_v10  ;;  %v21533_v4 = vld [vmem:[#allocation63_spill] sm:$0xff] }
 0x34a   :  { %3566 = vmatprep.mubr.f32.mxu1 %v21526_v12  ;;  %8301 = vmatpush1.bf16.msra.mxu1 %v21527_v38  ;;  %v21535_v38 = vld [vmem:[#allocation195_spill] sm:$0xff] }
 0x34b   :  { %6158 = vmatmul.mubr.f32.gmra.mrb[18].mxu0 %v21528_v1  ;;  %8302 = vmatprep.subr.bf16.mxu1 %v20654_v10  ;;  %v21536_v1 = vld [vmem:[#allocation65_spill] sm:$0xff]  ;;  %v21537_v12 = vld [vmem:[#allocation191_spill] sm:$0xff] }
 0x34c   :  { %6164 = vmatprep.mubr.f32.mxu0 %v21529_v19  ;;  %8589 = vmatpush1.bf16.msra.mxu0 %v21530_v9  ;;  %v21538_v9 = vld [vmem:[#allocation201_spill] sm:$0xff]  ;;  %v21540_v19 = vld [vmem:[#allocation194_spill] sm:$0xff] }
 0x34d   :  { %3569 = vmatmul.mubr.f32.gmra.mrb[20].mxu1 %v21531_v59  ;;  %8590 = vmatprep.subr.bf16.mxu0 %v20654_v10  ;;  %v21539_v59 = vld [vmem:[#allocation69_spill] sm:$0xff] }
 0x34e   :  { %3575 = vmatprep.mubr.f32.mxu1 %v21532_v60  ;;  %8304 = vmatpush1.bf16.msra.mxu1 %v21533_v4  ;;  %v21541_v4 = vld [vmem:[#allocation203_spill] sm:$0xff] }
 0x34f   :  { %6167 = vmatmul.mubr.f32.gmra.mrb[20].mxu0 %v21534_v31  ;;  %8305 = vmatprep.subr.bf16.mxu1 %v20654_v10  ;;  %v21542_v31 = vld [vmem:[#allocation71_spill] sm:$0xff] }
 0x350   :  { %6173 = vmatprep.mubr.f32.mxu0 %v21535_v38  ;;  %8592 = vmatpush1.bf16.msra.mxu0 %v21536_v1  ;;  %v21543_v60 = vld [vmem:[#allocation199_spill] sm:$0xff]  ;;  %v21544_v1 = vld [vmem:[#allocation208_spill] sm:$0xff]  ;;  %v21546_v38 = vld [vmem:[#allocation202_spill] sm:$0xff] }
 0x351   :  { %3578 = vmatmul.mubr.f32.gmra.mrb[22].mxu1 %v21537_v12  ;;  %8593 = vmatprep.subr.bf16.mxu0 %v20654_v10  ;;  %v21545_v12 = vld [vmem:[#allocation74_spill] sm:$0xff] }
 0x352   :  { %3584 = vmatprep.mubr.f32.mxu1 %v21538_v9  ;;  %8307 = vmatpush1.bf16.msra.mxu1 %v21539_v59  ;;  %v21547_v59 = vld [vmem:[#allocation210_spill] sm:$0xff] }
 0x353   :  { %6176 = vmatmul.mubr.f32.gmra.mrb[22].mxu0 %v21540_v19  ;;  %8308 = vmatprep.subr.bf16.mxu1 %v20654_v10  ;;  %v21548_v19 = vld [vmem:[#allocation77_spill] sm:$0xff]  ;;  %v21549_v9 = vld [vmem:[#allocation206_spill] sm:$0xff] }
 0x354   :  { %6182 = vmatprep.mubr.f32.mxu0 %v21541_v4  ;;  %8595 = vmatpush1.bf16.msra.mxu0 %v21542_v31  ;;  %v21550_v31 = vld [vmem:[#allocation216_spill] sm:$0xff]  ;;  %v21552_v4 = vld [vmem:[#allocation209_spill] sm:$0xff] }
 0x355   :  { %3587 = vmatmul.mubr.f32.gmra.mrb[24].mxu1 %v21543_v60  ;;  %8596 = vmatprep.subr.bf16.mxu0 %v20654_v10  ;;  %v21551_v60 = vld [vmem:[#allocation80_spill] sm:$0xff] }
 0x356   :  { %3593 = vmatprep.mubr.f32.mxu1 %v21544_v1  ;;  %8310 = vmatpush1.bf16.msra.mxu1 %v21545_v12  ;;  %v21553_v12 = vld [vmem:[#allocation218_spill] sm:$0xff] }
 0x357   :  { %6185 = vmatmul.mubr.f32.gmra.mrb[24].mxu0 %v21546_v38  ;;  %8311 = vmatprep.subr.bf16.mxu1 %v20654_v10  ;;  %v21554_v38 = vld [vmem:[#allocation84_spill] sm:$0xff]  ;;  %v21555_v1 = vld [vmem:[#allocation214_spill] sm:$0xff] }
 0x358   :  { %6191 = vmatprep.mubr.f32.mxu0 %v21547_v59  ;;  %8598 = vmatpush1.bf16.msra.mxu0 %v21548_v19  ;;  %v21556_v19 = vld [vmem:[#allocation224_spill] sm:$0xff]  ;;  %v21558_v59 = vld [vmem:[#allocation217_spill] sm:$0xff] }
 0x359   :  { %3596 = vmatmul.mubr.f32.gmra.mrb[26].mxu1 %v21549_v9  ;;  %8599 = vmatprep.subr.bf16.mxu0 %v20654_v10  ;;  %v21557_v9 = vld [vmem:[#allocation86_spill] sm:$0xff] }
 0x35a   :  { %3602 = vmatprep.mubr.f32.mxu1 %v21550_v31  ;;  %8313 = vmatpush1.bf16.msra.mxu1 %v21551_v60  ;;  %v21559_v60 = vld [vmem:[#allocation226_spill] sm:$0xff] }
 0x35b   :  { %6194 = vmatmul.mubr.f32.gmra.mrb[26].mxu0 %v21552_v4  ;;  %8314 = vmatprep.subr.bf16.mxu1 %v20654_v10  ;;  %v21560_v4 = vld [vmem:[#allocation89_spill] sm:$0xff]  ;;  %v21561_v31 = vld [vmem:[#allocation222_spill] sm:$0xff] }
 0x35c   :  { %6200 = vmatprep.mubr.f32.mxu0 %v21553_v12  ;;  %8601 = vmatpush1.bf16.msra.mxu0 %v21554_v38  ;;  %v21562_v38 = vld [vmem:[#allocation230_spill] sm:$0xff]  ;;  %v21564_v12 = vld [vmem:[#allocation225_spill] sm:$0xff] }
 0x35d   :  { %3605 = vmatmul.mubr.f32.gmra.mrb[28].mxu1 %v21555_v1  ;;  %8602 = vmatprep.subr.bf16.mxu0 %v20654_v10  ;;  %v21563_v1 = vld [vmem:[#allocation92_spill] sm:$0xff] }
 0x35e   :  { %3611 = vmatprep.mubr.f32.mxu1 %v21556_v19  ;;  %8316 = vmatpush1.bf16.msra.mxu1 %v21557_v9  ;;  %v21565_v9 = vld [vmem:[#allocation233_spill] sm:$0xff]  ;;  %v21567_v19 = vld [vmem:[#allocation231_spill] sm:$0xff] }
 0x35f   :  { %6203 = vmatmul.mubr.f32.gmra.mrb[28].mxu0 %v21558_v59  ;;  %8317 = vmatprep.subr.bf16.mxu1 %v20654_v10  ;;  %v21566_v59 = vld [vmem:[#allocation96_spill] sm:$0xff] }
 0x360   :  { %6209 = vmatprep.mubr.f32.mxu0 %v21559_v60  ;;  %8604 = vmatpush1.bf16.msra.mxu0 %v21560_v4  ;;  %v21568_v4 = vld [vmem:[#allocation239_spill] sm:$0xff]  ;;  %v21570_v60 = vld [vmem:[#allocation241_spill] sm:$0xff] }
 0x361   :  { %3614 = vmatmul.mubr.f32.gmra.mrb[30].mxu1 %v21561_v31  ;;  %8605 = vmatprep.subr.bf16.mxu0 %v20654_v10  ;;  %v21569_v31 = vld [vmem:[#allocation232_spill] sm:$0xff] }
 0x362   :  { %3620 = vmatprep.mubr.f32.mxu1 %v21562_v38  ;;  %8319 = vmatpush1.bf16.msra.mxu1 %v21563_v1  ;;  %v21571_v38 = vld [vmem:[#allocation237_spill] sm:$0xff]  ;;  %v21572_v1 = vld [vmem:[#allocation246_spill] sm:$0xff] }
 0x363   :  { %6212 = vmatmul.mubr.f32.gmra.mrb[30].mxu0 %v21564_v12  ;;  %8320 = vmatprep.subr.bf16.mxu1 %v20654_v10  ;;  %v21573_v12 = vld [vmem:[#allocation240_spill] sm:$0xff] }
 0x364   :  { %6218 = vmatprep.mubr.f32.mxu0 %v21565_v9  ;;  %8607 = vmatpush1.bf16.msra.mxu0 %v21566_v59  ;;  %v21575_v9 = vld [vmem:[#allocation244_spill] sm:$0xff]  ;;  %v21576_v59 = vld [vmem:[#allocation250_spill] sm:$0xff] }
 0x365   :  { %3623 = vmatmul.mubr.f32.gmra.mrb[32].mxu1 %v21567_v19  ;;  %8608 = vmatprep.subr.bf16.mxu0 %v20654_v10  ;;  %v21577_v19 = vld [vmem:[#allocation4_spill] sm:$0xff] }
 0x366   :  { %3629 = vmatprep.mubr.f32.mxu1 %v21568_v4  ;;  %v21579_v4 = vld [vmem:[#allocation248_spill] sm:$0xff] }
 0x367   :  { %6221 = vmatmul.mubr.f32.gmra.mrb[32].mxu0 %v21569_v31  ;;  %v21580_v31 = vld [vmem:[#allocation254_spill] sm:$0xff] }
 0x368   :  { %6227 = vmatprep.mubr.f32.mxu0 %v21570_v60  ;;  %v21581_v60 = vld [vmem:[#allocation252_spill] sm:$0xff] }
 0x369   :  { %3632 = vmatmul.mubr.f32.gmra.mrb[34].mxu1 %v21571_v38  ;;  %v21582_v38 = vld [vmem:[#allocation256_spill] sm:$0xff] }
 0x36a   :  { %3638 = vmatprep.mubr.f32.mxu1 %v21572_v1  ;;  %v21583_v1 = vld [vmem:[#allocation253_spill] sm:$0xff] }
 0x36b   :  { %6230 = vmatmul.mubr.f32.gmra.mrb[34].mxu0 %v21573_v12  ;;  %v21584_v12 = vld [vmem:[#allocation257_spill] sm:$0xff] }
 0x36c   :  { %6236 = vmatprep.mubr.f32.mxu0 %v21574_v55  ;;  %v21585_v55 = vld [vmem:[#allocation255_spill] sm:$0xff] }
 0x36d   :  { %3641 = vmatmul.mubr.f32.gmra.mrb[36].mxu1 %v21575_v9  ;;  %v21586_v9 = vld [vmem:[#allocation259_spill] sm:$0xff] }
 0x36e   :  { %3647 = vmatprep.mubr.f32.mxu1 %v21576_v59  ;;  %v21587_v59 = vld [vmem:[#allocation20_spill] sm:$0xff] }
 0x36f   :  { %6239 = vmatmul.mubr.f32.gmra.mrb[36].mxu0 %v21577_v19  ;;  %v21588_v19 = vld [vmem:[#allocation265_spill] sm:$0xff] }
 0x370   :  { %6245 = vmatprep.mubr.f32.mxu0 %v21578_v24  ;;  %v21589_v24 = vld [vmem:[#allocation258_spill] sm:$0xff] }
 0x371   :  { %3650 = vmatmul.mubr.f32.gmra.mrb[38].mxu1 %v21579_v4  ;;  %v21590_v4 = vld [vmem:[#allocation266_spill] sm:$0xff] }
 0x372   :  { %3656 = vmatprep.mubr.f32.mxu1 %v21580_v31  ;;  %v21591_v31 = vld [vmem:[#allocation263_spill] sm:$0xff] }
 0x373   :  { %6248 = vmatmul.mubr.f32.gmra.mrb[38].mxu0 %v21581_v60  ;;  %v21592_v60 = vld [vmem:[#allocation272_spill] sm:$0xff] }
 0x374   :  { %6254 = vmatprep.mubr.f32.mxu0 %v21582_v38  ;;  %v21593_v38 = vld [vmem:[#allocation267_spill] sm:$0xff] }
 0x375   :  { %3659 = vmatmul.mubr.f32.gmra.mrb[40].mxu1 %v21583_v1  ;;  %v21594_v1 = vld [vmem:[#allocation275_spill] sm:$0xff] }
 0x376   :  { %3665 = vmatprep.mubr.f32.mxu1 %v21584_v12  ;;  %v21595_v12 = vld [vmem:[#allocation273_spill] sm:$0xff] }
 0x377   :  { %6257 = vmatmul.mubr.f32.gmra.mrb[40].mxu0 %v21585_v55  ;;  %v21596_v55 = vld [vmem:[#allocation281_spill] sm:$0xff] }
 0x378   :  { %6263 = vmatprep.mubr.f32.mxu0 %v21586_v9  ;;  %v21597_v9 = vld [vmem:[#allocation274_spill] sm:$0xff] }
 0x379   :  { %3668 = vmatmul.mubr.f32.gmra.mrb[42].mxu1 %v21587_v59  ;;  %v21598_v59 = vld [vmem:[#allocation283_spill] sm:$0xff] }
 0x37a   :  { %3674 = vmatprep.mubr.f32.mxu1 %v21588_v19  ;;  %v21599_v19 = vld [vmem:[#allocation279_spill] sm:$0xff] }
 0x37b   :  { %6266 = vmatmul.mubr.f32.gmra.mrb[42].mxu0 %v21589_v24  ;;  %v21600_v24 = vld [vmem:[#allocation289_spill] sm:$0xff] }
 0x37c   :  { %6272 = vmatprep.mubr.f32.mxu0 %v21590_v4  ;;  %v21601_v4 = vld [vmem:[#allocation282_spill] sm:$0xff] }
 0x37d   :  { %3677 = vmatmul.mubr.f32.gmra.mrb[44].mxu1 %v21591_v31  ;;  %v21602_v31 = vld [vmem:[#allocation290_spill] sm:$0xff] }
 0x37e   :  { %3683 = vmatprep.mubr.f32.mxu1 %v21592_v60  ;;  %v21603_v60 = vld [vmem:[#allocation287_spill] sm:$0xff] }
 0x37f   :  { %6275 = vmatmul.mubr.f32.gmra.mrb[44].mxu0 %v21593_v38  ;;  %v21604_v38 = vld [vmem:[#allocation297_spill] sm:$0xff] }
 0x380   :  { %6281 = vmatprep.mubr.f32.mxu0 %v21594_v1  ;;  %v21605_v1 = vld [vmem:[#allocation291_spill] sm:$0xff] }
 0x381   :  { %3686 = vmatmul.mubr.f32.gmra.mrb[46].mxu1 %v21595_v12  ;;  %v21606_v12 = vld [vmem:[#allocation299_spill] sm:$0xff] }
 0x382   :  { %3692 = vmatprep.mubr.f32.mxu1 %v21596_v55  ;;  %v21607_v55 = vld [vmem:[#allocation295_spill] sm:$0xff] }
 0x383   :  { %6284 = vmatmul.mubr.f32.gmra.mrb[46].mxu0 %v21597_v9  ;;  %v21608_v9 = vld [vmem:[#allocation305_spill] sm:$0xff] }
 0x384   :  { %6290 = vmatprep.mubr.f32.mxu0 %v21598_v59  ;;  %v21609_v59 = vld [vmem:[#allocation298_spill] sm:$0xff] }
 0x385   :  { %3695 = vmatmul.mubr.f32.gmra.mrb[48].mxu1 %v21599_v19  ;;  %v21610_v19 = vld [vmem:[#allocation307_spill] sm:$0xff] }
 0x386   :  { %3701 = vmatprep.mubr.f32.mxu1 %v21600_v24  ;;  %v21611_v24 = vld [vmem:[#allocation303_spill] sm:$0xff] }
 0x387   :  { %6293 = vmatmul.mubr.f32.gmra.mrb[48].mxu0 %v21601_v4  ;;  %v21612_v4 = vld [vmem:[#allocation313_spill] sm:$0xff] }
 0x388   :  { %6299 = vmatprep.mubr.f32.mxu0 %v21602_v31  ;;  %v21613_v31 = vld [vmem:[#allocation306_spill] sm:$0xff] }
 0x389   :  { %3704 = vmatmul.mubr.f32.gmra.mrb[50].mxu1 %v21603_v60  ;;  %v21614_v60 = vld [vmem:[#allocation314_spill] sm:$0xff] }
 0x38a   :  { %3710 = vmatprep.mubr.f32.mxu1 %v21604_v38  ;;  %v21615_v38 = vld [vmem:[#allocation311_spill] sm:$0xff] }
 0x38b   :  { %6302 = vmatmul.mubr.f32.gmra.mrb[50].mxu0 %v21605_v1  ;;  %v21616_v1 = vld [vmem:[#allocation321_spill] sm:$0xff] }
 0x38c   :  { %6308 = vmatprep.mubr.f32.mxu0 %v21606_v12  ;;  %v21617_v12 = vld [vmem:[#allocation315_spill] sm:$0xff] }
 0x38d   :  { %3713 = vmatmul.mubr.f32.gmra.mrb[52].mxu1 %v21607_v55  ;;  %v21618_v55 = vld [vmem:[#allocation323_spill] sm:$0xff] }
 0x38e   :  { %3719 = vmatprep.mubr.f32.mxu1 %v21608_v9  ;;  %v21619_v9 = vld [vmem:[#allocation319_spill] sm:$0xff] }
 0x38f   :  { %6311 = vmatmul.mubr.f32.gmra.mrb[52].mxu0 %v21609_v59 }
 0x390   :  { %6317 = vmatprep.mubr.f32.mxu0 %v21610_v19  ;;  %v21620_v19 = vld [vmem:[#allocation322_spill] sm:$0xff] }
 0x391   :  { %3722 = vmatmul.mubr.f32.gmra.mrb[54].mxu1 %v21611_v24 }
 0x392   :  { %3728 = vmatprep.mubr.f32.mxu1 %v21612_v4 }
 0x393   :  { %6320 = vmatmul.mubr.f32.gmra.mrb[54].mxu0 %v21613_v31  ;;  %v21621_v31 = vld [vmem:[#allocation336_spill] sm:$0xff] }
 0x394   :  { %6326 = vmatprep.mubr.f32.mxu0 %v21614_v60  ;;  %v21622_v60 = vld [vmem:[#allocation330_spill] sm:$0xff] }
 0x395   :  { %3731 = vmatmul.mubr.f32.gmra.mrb[56].mxu1 %v21615_v38 }
 0x396   :  { %3737 = vmatprep.mubr.f32.mxu1 %v21616_v1  ;;  %v21623_v1 = vld [vmem:[#allocation334_spill] sm:$0xff] }
 0x397   :  { %6329 = vmatmul.mubr.f32.gmra.mrb[56].mxu0 %v21617_v12 }
 0x398   :  { %6335 = vmatprep.mubr.f32.mxu0 %v21618_v55  ;;  %v21624_v55 = vand.u32 4294901760, %v21469_v34  ;;  %v21634_v34 = vand.u32 4294901760, %v21474_v18  ;;  %v21650_v18 = vand.u32 4294901760, %v21486_v61 }
 0x399   :  { %3740 = vmatmul.mubr.f32.gmra.mrb[58].mxu1 %v21619_v9  ;;  %v21625_v9 = vand.u32 4294901760, %v20556_v22  ;;  %v21632_v22 = vand.u32 4294901760, %v20592_v56  ;;  %v21639_v56 = vand.u32 4294901760, %v21478_v41 }
 0x39a   :  { %3746 = vmatprep.mubr.f32.mxu1 %v16371_v33  ;;  %v21626_v33 = vand.u32 4294901760, %v20575_v49  ;;  %v21633_v49 = vand.u32 4294901760, %v20658_v2  ;;  %v21640_v2 = vand.u32 4294901760, %v20672_v52  ;;  %v21647_v52 = vand.u32 4294901760, %v21484_v50 }
 0x39b   :  { %6338 = vmatmul.mubr.f32.gmra.mrb[58].mxu0 %v21620_v19  ;;  %v21663_v50 = vand.u32 4294901760, %v21495_v57  ;;  %v21671_v57 = vld [vmem:[#allocation34_spill] sm:$0xff] }
 0x39c   :  { %6344 = vmatprep.mubr.f32.mxu0 %v16411_v63  ;;  %v8321_v19 = vpack.c.bf16 %v21626_v33, %v21625_v9  ;;  %v8324_v9 = vpack.c.bf16 %v21633_v49, %v21632_v22  ;;  %v21646_v33 = vand.u32 4294901760, %v21483_v17  ;;  %v21658_v17 = vand.u32 4294901760, %v21492_v37  ;;  %v21665_v37 = vld [vmem:[#allocation32_spill] sm:$0xff] }
 0x39d   :  { %3749 = vmatmul.mubr.f32.gmra.mrb[60].mxu1 %v16359_v30  ;;  %v21627_v30 = vand.u32 4294901760, %v21470_v29  ;;  %v21669_v49 = vand.u32 4294901760, %v21498_v40  ;;  %v21677_v40 = vld [vmem:[#allocation38_spill] sm:$0xff] }
 0x39e   :  { %3755 = vmatprep.mubr.f32.mxu1 %v21621_v31  ;;  %v21628_v31 = vand.u32 4294901760, %v20590_v51  ;;  %v21636_v51 = vand.u32 4294901760, %v20659_v11  ;;  %v21643_v11 = vand.u32 4294901760, %v21481_v42  ;;  %v21649_v42 = vand.u32 4294901760, %v20710_v45 }
 0x39f   :  { %6347 = vmatmul.mubr.f32.gmra.mrb[60].mxu0 %v21622_v60  ;;  %v21629_v60 = vand.u32 4294901760, %v20591_v8  ;;  %v21635_v8 = vand.u32 4294901760, %v21476_v27  ;;  %v21642_v27 = vand.u32 4294901760, %v21480_v43  ;;  %v21655_v45 = vand.u32 4294901760, %v21490_v36 }
 0x3a0   :  { %6353 = vmatprep.mubr.f32.mxu0 %v16495_v39 }
 0x3a1   :  { %3758 = vmatmul.mubr.f32.gmra.mrb[62].mxu1 %v21623_v1  ;;  %v8609_v39 = vpack.c.bf16 %v21629_v60, %v21628_v31  ;;  %v21630_v1 = vand.u32 4294901760, %v21471_v44  ;;  %v21637_v31 = vand.u32 4294901760, %v20663_v26  ;;  %v21644_v26 = vand.u32 4294901760, %v20691_v0 }
 0x3a2   :  { %3862 = vmatprep.mubr.f32.mxu1 %v21624_v55  ;;  %v21631_v55 = vand.u32 4294901760, %v21473_v46  ;;  %v21638_v46 = vand.u32 4294901760, %v21477_v20  ;;  %v21645_v20 = vand.u32 4294901760, %v20692_v14  ;;  %v21651_v0 = vand.u32 4294901760, %v21487_v3 }
 0x3a3   :  { %6356 = vmatmul.mubr.f32.gmra.mrb[62].mxu0 %v16492_v32  ;;  %v21652_v14 = vand.u32 4294901760, %v21215_v6  ;;  %v21653_v60 = vand.u32 4294901760, %v21216_v16  ;;  %v21657_v3 = vand.u32 4294901760, %v21222_v58  ;;  %v21659_v16 = vand.u32 4294901760, %v21493_v54  ;;  %v21661_v6 = vld [vmem:[#allocation31_spill] sm:$0xff] }
 0x3a4   :  { %6460 = vmatprep.mubr.f32.mxu0 %v21627_v30  ;;  %v8615_v30 = vpack.c.bf16 %v21645_v20, %v21644_v26  ;;  %v21662_v36 = vand.u32 4294901760, %v21661_v6  ;;  %v21666_v58 = vand.u32 4294901760, %v21665_v37  ;;  %v21687_v26 = vand.u32 4294901760, %v21507_v7  ;;  %v21697_v7 = vld [vmem:[#allocation46_spill] sm:$0xff]  ;;  %v21709_v6 = vld [vmem:[#allocation164_spill] sm:$0xff] }
 0x3a5   :  { %3866 = vmatmul.mubr.f32.vlgmr.msra.gmra.mrb[0].mxu1 %v21630_v1  ;;  %v8612_v1 = vpack.c.bf16 %v21637_v31, %v21636_v51  ;;  %v8618_v41 = vpack.c.bf16 %v21653_v60, %v21652_v14  ;;  %v21675_v51 = vand.u32 4294901760, %v21501_v53  ;;  %v21676_v31 = vand.u32 4294901760, %v21502_v47  ;;  %v21683_v53 = vld [vmem:[#allocation40_spill] sm:$0xff]  ;;  %v21699_v14 = vld [vmem:[#allocation47_spill] sm:$0xff] }
 0x3a6   :  { %8322 = vmatpush1.bf16.msra.mxu1 %v8321_v19  ;;  %3873 = vmatprep.mubr.f32.mxu1 %v21631_v55  ;;  %v21654_v19 = vand.u32 4294901760, %v21489_v62  ;;  %v21660_v62 = vand.u32 4294901760, %v21227_v25  ;;  %v21667_v55 = vld [vmem:[#allocation33_spill] sm:$0xff]  ;;  %v21670_v25 = vand.u32 4294901760, %v21499_v28  ;;  %v21688_v20 = vand.u32 4294901760, %v21508_v23 }
 0x3a7   :  { %6464 = vmatmul.mubr.f32.vlgmr.msra.gmra.mrb[0].mxu0 %v21634_v34  ;;  %8323 = vmatprep.subr.bf16.mxu1 %v20654_v10  ;;  %v21668_v54 = vand.u32 4294901760, %v21667_v55  ;;  %v21673_v34 = vld [vmem:[#allocation36_spill] sm:$0xff]  ;;  %v21700_v23 = vand.u32 4294901760, %v21699_v14 }
 0x3a8   :  { %8610 = vmatpush1.bf16.msra.mxu0 %v8609_v39  ;;  %6471 = vmatprep.mubr.f32.mxu0 %v21635_v8  ;;  %v21641_v39 = vand.u32 4294901760, %v20682_v48  ;;  %v21648_v48 = vand.u32 4294901760, %v20706_v15  ;;  %v21656_v15 = vand.u32 4294901760, %v21221_v21  ;;  %v8621_v61 = vpack.c.bf16 %v21662_v36, %v21660_v62 }
 0x3a9   :  { %3877 = vmatmul.mubr.f32.gmra.mrb[2].mxu1 %v21638_v46  ;;  %8611 = vmatprep.subr.bf16.mxu0 %v20654_v10  ;;  %v21664_v21 = vand.u32 4294901760, %v21496_v13  ;;  %v8336_v22 = vpack.c.bf16 %v21668_v54, %v21666_v58  ;;  %v21674_v13 = vand.u32 4294901760, %v21673_v34  ;;  %v21679_v46 = vld [vmem:[#allocation39_spill] sm:$0xff]  ;;  %v21710_v36 = vand.u32 4294901760, %v21709_v6  ;;  %v21715_v58 = vld [vmem:[#allocation54_spill] sm:$0xff] }
 0x3aa   :  { %3884 = vmatprep.mubr.f32.mxu1 %v21639_v56  ;;  %8325 = vmatpush1.bf16.msra.mxu1 %v8324_v9  ;;  %v8327_v44 = vpack.c.bf16 %v21641_v39, %v21640_v2  ;;  %v8330_v29 = vpack.c.bf16 %v21649_v42, %v21648_v48  ;;  %v8333_v43 = vpack.c.bf16 %v21657_v3, %v21656_v15  ;;  %v21672_v9 = vand.u32 4294901760, %v21671_v57  ;;  %v21693_v48 = vld [vmem:[#allocation156_spill] sm:$0xff]  ;;  %v21705_v3 = vld [vmem:[#allocation49_spill] sm:$0xff]  ;;  %v21759_v6 = vld [vmem:[#allocation195_spill] sm:$0xff] }
 0x3ab   :  { %6475 = vmatmul.mubr.f32.gmra.mrb[2].mxu0 %v21642_v27  ;;  %8326 = vmatprep.subr.bf16.mxu1 %v20654_v10  ;;  %v21680_v28 = vand.u32 4294901760, %v21679_v46  ;;  %v21681_v2 = vand.u32 4294901760, %v21504_v5  ;;  %v21682_v39 = vand.u32 4294901760, %v21505_v35  ;;  %v21685_v27 = vld [vmem:[#allocation41_spill] sm:$0xff]  ;;  %v21689_v5 = vld [vmem:[#allocation42_spill] sm:$0xff]  ;;  %v21694_v42 = vand.u32 4294901760, %v21693_v48 }
 0x3ac   :  { %6482 = vmatprep.mubr.f32.mxu0 %v21643_v11  ;;  %8613 = vmatpush1.bf16.msra.mxu0 %v8612_v1  ;;  %v8624_v8 = vpack.c.bf16 %v21674_v13, %v21672_v9  ;;  %v21678_v1 = vand.u32 4294901760, %v21677_v40  ;;  %v21686_v47 = vand.u32 4294901760, %v21685_v27  ;;  %v21716_v55 = vand.u32 4294901760, %v21715_v58  ;;  %v21721_v9 = vld [vmem:[#allocation56_spill] sm:$0xff]  ;;  %v21723_v13 = vld [vmem:[#allocation57_spill] sm:$0xff]  ;;  %v21743_v48 = vld [vmem:[#allocation187_spill] sm:$0xff] }
 0x3ad   :  { %3888 = vmatmul.mubr.f32.gmra.mrb[4].mxu1 %v21646_v33  ;;  %8614 = vmatprep.subr.bf16.mxu0 %v20654_v10  ;;  %v21691_v33 = vld [vmem:[#allocation45_spill] sm:$0xff]  ;;  %v21722_v34 = vand.u32 4294901760, %v21721_v9  ;;  %v21771_v9 = vld [vmem:[#allocation76_spill] sm:$0xff] }
 0x3ae   :  { %3895 = vmatprep.mubr.f32.mxu1 %v21647_v52  ;;  %8328 = vmatpush1.bf16.msra.mxu1 %v8327_v44  ;;  %v8339_v56 = vpack.c.bf16 %v21680_v28, %v21678_v1  ;;  %v21684_v44 = vand.u32 4294901760, %v21683_v53  ;;  %v21692_v35 = vand.u32 4294901760, %v21691_v33  ;;  %v21727_v1 = vld [vmem:[#allocation180_spill] sm:$0xff]  ;;  %v21729_v28 = vld [vmem:[#allocation59_spill] sm:$0xff] }
 0x3af   :  { %6486 = vmatmul.mubr.f32.gmra.mrb[4].mxu0 %v21650_v18  ;;  %8329 = vmatprep.subr.bf16.mxu1 %v20654_v10  ;;  %v21728_v46 = vand.u32 4294901760, %v21727_v1  ;;  %v21777_v1 = vld [vmem:[#allocation78_spill] sm:$0xff] }
 0x3b0   :  { %6493 = vmatprep.mubr.f32.mxu0 %v21651_v0  ;;  %8616 = vmatpush1.bf16.msra.mxu0 %v8615_v30  ;;  %v8627_v11 = vpack.c.bf16 %v21686_v47, %v21684_v44  ;;  %v21690_v30 = vand.u32 4294901760, %v21689_v5  ;;  %v21698_v0 = vand.u32 4294901760, %v21697_v7  ;;  %v21733_v44 = vld [vmem:[#allocation176_spill] sm:$0xff]  ;;  %v21735_v47 = vld [vmem:[#allocation185_spill] sm:$0xff]  ;;  %v21747_v7 = vld [vmem:[#allocation67_spill] sm:$0xff] }
 0x3b1   :  { %3899 = vmatmul.mubr.f32.gmra.mrb[6].mxu1 %v21654_v19  ;;  %8617 = vmatprep.subr.bf16.mxu0 %v20654_v10  ;;  %v21734_v27 = vand.u32 4294901760, %v21733_v44  ;;  %v21739_v5 = vld [vmem:[#allocation64_spill] sm:$0xff] }
 0x3b2   :  { %3906 = vmatprep.mubr.f32.mxu1 %v21655_v45  ;;  %8331 = vmatpush1.bf16.msra.mxu1 %v8330_v29  ;;  %v8342_v52 = vpack.c.bf16 %v21692_v35, %v21690_v30  ;;  %v21695_v29 = vld [vmem:[#allocation165_spill] sm:$0xff]  ;;  %v8630_v60 = vpack.c.bf16 %v21700_v23, %v21698_v0  ;;  %v21703_v45 = vld [vmem:[#allocation171_spill] sm:$0xff]  ;;  %v21740_v30 = vand.u32 4294901760, %v21739_v5  ;;  %v21748_v0 = vand.u32 4294901760, %v21747_v7  ;;  %v21783_v44 = vld [vmem:[#allocation208_spill] sm:$0xff] }
 0x3b3   :  { %6497 = vmatmul.mubr.f32.gmra.mrb[6].mxu0 %v21658_v17  ;;  %8332 = vmatprep.subr.bf16.mxu1 %v20654_v10  ;;  %v21696_v18 = vand.u32 4294901760, %v21695_v29  ;;  %v21704_v15 = vand.u32 4294901760, %v21703_v45  ;;  %v21707_v17 = vld [vmem:[#allocation51_spill] sm:$0xff]  ;;  %v21745_v29 = vld [vmem:[#allocation66_spill] sm:$0xff]  ;;  %v21753_v45 = vld [vmem:[#allocation68_spill] sm:$0xff] }
 0x3b4   :  { %6504 = vmatprep.mubr.f32.mxu0 %v21659_v16  ;;  %8619 = vmatpush1.bf16.msra.mxu0 %v8618_v41  ;;  %v21701_v41 = vld [vmem:[#allocation161_spill] sm:$0xff]  ;;  %v21708_v16 = vand.u32 4294901760, %v21707_v17  ;;  %v21741_v35 = vld [vmem:[#allocation179_spill] sm:$0xff] }
 0x3b5   :  { %3910 = vmatmul.mubr.f32.gmra.mrb[8].mxu1 %v21663_v50  ;;  %8620 = vmatprep.subr.bf16.mxu0 %v20654_v10  ;;  %v21702_v19 = vand.u32 4294901760, %v21701_v41  ;;  %v21749_v23 = vld [vmem:[#allocation183_spill] sm:$0xff]  ;;  %v21751_v41 = vld [vmem:[#allocation193_spill] sm:$0xff] }
 0x3b6   :  { %3917 = vmatprep.mubr.f32.mxu1 %v21664_v21  ;;  %8334 = vmatpush1.bf16.msra.mxu1 %v8333_v43  ;;  %v21706_v43 = vand.u32 4294901760, %v21705_v3  ;;  %v21713_v21 = vld [vmem:[#allocation52_spill] sm:$0xff]  ;;  %v21755_v3 = vld [vmem:[#allocation70_spill] sm:$0xff] }
 0x3b7   :  { %6508 = vmatmul.mubr.f32.gmra.mrb[8].mxu0 %v21669_v49  ;;  %8335 = vmatprep.subr.bf16.mxu1 %v20654_v10  ;;  %v21714_v37 = vand.u32 4294901760, %v21713_v21  ;;  %v21763_v21 = vld [vmem:[#allocation73_spill] sm:$0xff] }
 0x3b8   :  { %6515 = vmatprep.mubr.f32.mxu0 %v21670_v25  ;;  %8622 = vmatpush1.bf16.msra.mxu0 %v8621_v61  ;;  %v8345_v62 = vpack.c.bf16 %v21708_v16, %v21706_v43  ;;  %v21711_v61 = vld [vmem:[#allocation173_spill] sm:$0xff]  ;;  %v21719_v25 = vld [vmem:[#allocation178_spill] sm:$0xff]  ;;  %v21756_v43 = vand.u32 4294901760, %v21755_v3 }
 0x3b9   :  { %3921 = vmatmul.mubr.f32.gmra.mrb[10].mxu1 %v21675_v51  ;;  %8623 = vmatprep.subr.bf16.mxu0 %v20654_v10  ;;  %v21712_v50 = vand.u32 4294901760, %v21711_v61  ;;  %v8633_v54 = vpack.c.bf16 %v21716_v55, %v21714_v37  ;;  %v21720_v57 = vand.u32 4294901760, %v21719_v25  ;;  %v21757_v16 = vld [vmem:[#allocation186_spill] sm:$0xff]  ;;  %v21761_v61 = vld [vmem:[#allocation72_spill] sm:$0xff]  ;;  %v21764_v37 = vand.u32 4294901760, %v21763_v21  ;;  %v21765_v55 = vld [vmem:[#allocation191_spill] sm:$0xff] }
 0x3ba   :  { %3928 = vmatprep.mubr.f32.mxu1 %v21676_v31  ;;  %8337 = vmatpush1.bf16.msra.mxu1 %v8336_v22  ;;  %v21717_v22 = vld [vmem:[#allocation169_spill] sm:$0xff]  ;;  %v21725_v31 = vld [vmem:[#allocation172_spill] sm:$0xff]  ;;  %v21769_v25 = vld [vmem:[#allocation75_spill] sm:$0xff] }
 0x3bb   :  { %6519 = vmatmul.mubr.f32.gmra.mrb[10].mxu0 %v21681_v2  ;;  %8338 = vmatprep.subr.bf16.mxu1 %v20654_v10  ;;  %v21718_v49 = vand.u32 4294901760, %v21717_v22  ;;  %v21726_v40 = vand.u32 4294901760, %v21725_v31  ;;  %v21731_v2 = vld [vmem:[#allocation60_spill] sm:$0xff]  ;;  %v21767_v22 = vld [vmem:[#allocation201_spill] sm:$0xff]  ;;  %v21775_v31 = vld [vmem:[#allocation203_spill] sm:$0xff] }
 0x3bc   :  { %6526 = vmatprep.mubr.f32.mxu0 %v21682_v39  ;;  %8625 = vmatpush1.bf16.msra.mxu0 %v8624_v8  ;;  %v21724_v8 = vand.u32 4294901760, %v21723_v13  ;;  %v21732_v39 = vand.u32 4294901760, %v21731_v2 }
 0x3bd   :  { %3932 = vmatmul.mubr.f32.gmra.mrb[12].mxu1 %v21687_v26  ;;  %8626 = vmatprep.subr.bf16.mxu0 %v20654_v10  ;;  %v21737_v26 = vld [vmem:[#allocation62_spill] sm:$0xff] }
 0x3be   :  { %3939 = vmatprep.mubr.f32.mxu1 %v21688_v20  ;;  %8340 = vmatpush1.bf16.msra.mxu1 %v8339_v56  ;;  %v8348_v51 = vpack.c.bf16 %v21724_v8, %v21722_v34  ;;  %v21730_v56 = vand.u32 4294901760, %v21729_v28  ;;  %v21738_v20 = vand.u32 4294901760, %v21737_v26  ;;  %v21772_v34 = vand.u32 4294901760, %v21771_v9  ;;  %v21773_v8 = vld [vmem:[#allocation194_spill] sm:$0xff]  ;;  %v21779_v28 = vld [vmem:[#allocation79_spill] sm:$0xff] }
 0x3bf   :  { %6530 = vmatmul.mubr.f32.gmra.mrb[12].mxu0 %v21694_v42  ;;  %8341 = vmatprep.subr.bf16.mxu1 %v20654_v10  ;;  %v21744_v42 = vand.u32 4294901760, %v21743_v48  ;;  %v21787_v26 = vld [vmem:[#allocation82_spill] sm:$0xff]  ;;  %v21793_v48 = vld [vmem:[#allocation83_spill] sm:$0xff] }
 0x3c0   :  { %6537 = vmatprep.mubr.f32.mxu0 %v21696_v18  ;;  %8628 = vmatpush1.bf16.msra.mxu0 %v8627_v11  ;;  %v8636_v53 = vpack.c.bf16 %v21732_v39, %v21730_v56  ;;  %v21736_v11 = vand.u32 4294901760, %v21735_v47  ;;  %v8351_v33 = vpack.c.bf16 %v21740_v30, %v21738_v20  ;;  %v21746_v18 = vand.u32 4294901760, %v21745_v29  ;;  %v21781_v39 = vld [vmem:[#allocation199_spill] sm:$0xff]  ;;  %v21785_v47 = vld [vmem:[#allocation81_spill] sm:$0xff]  ;;  %v21789_v30 = vld [vmem:[#allocation202_spill] sm:$0xff] }
 0x3c1   :  { %3943 = vmatmul.mubr.f32.gmra.mrb[14].mxu1 %v21702_v19  ;;  %8629 = vmatprep.subr.bf16.mxu0 %v20654_v10  ;;  %v21752_v19 = vand.u32 4294901760, %v21751_v41  ;;  %v21780_v56 = vand.u32 4294901760, %v21779_v28  ;;  %v21788_v20 = vand.u32 4294901760, %v21787_v26  ;;  %v21795_v29 = vld [vmem:[#allocation85_spill] sm:$0xff]  ;;  %v21801_v41 = vld [vmem:[#allocation87_spill] sm:$0xff] }
 0x3c2   :  { %3950 = vmatprep.mubr.f32.mxu1 %v21704_v15  ;;  %8343 = vmatpush1.bf16.msra.mxu1 %v8342_v52  ;;  %v21742_v52 = vand.u32 4294901760, %v21741_v35  ;;  %v8639_v14 = vpack.c.bf16 %v21748_v0, %v21746_v18  ;;  %v21754_v15 = vand.u32 4294901760, %v21753_v45  ;;  %v21791_v35 = vld [vmem:[#allocation210_spill] sm:$0xff]  ;;  %v21796_v18 = vand.u32 4294901760, %v21795_v29  ;;  %v21803_v45 = vld [vmem:[#allocation88_spill] sm:$0xff]  ;;  %v21837_v26 = vld [vmem:[#allocation231_spill] sm:$0xff] }
 0x3c3   :  { %6541 = vmatmul.mubr.f32.gmra.mrb[14].mxu0 %v21710_v36  ;;  %8344 = vmatprep.subr.bf16.mxu1 %v20654_v10  ;;  %v21760_v36 = vand.u32 4294901760, %v21759_v6  ;;  %v21797_v0 = vld [vmem:[#allocation206_spill] sm:$0xff] }
 0x3c4   :  { %6548 = vmatprep.mubr.f32.mxu0 %v21712_v50  ;;  %8631 = vmatpush1.bf16.msra.mxu0 %v8630_v60  ;;  %v21750_v60 = vand.u32 4294901760, %v21749_v23  ;;  %v8354_v17 = vpack.c.bf16 %v21756_v43, %v21754_v15  ;;  %v21762_v50 = vand.u32 4294901760, %v21761_v61  ;;  %v21799_v23 = vld [vmem:[#allocation216_spill] sm:$0xff]  ;;  %v21804_v15 = vand.u32 4294901760, %v21803_v45  ;;  %v21805_v43 = vld [vmem:[#allocation209_spill] sm:$0xff]  ;;  %v21809_v6 = vld [vmem:[#allocation90_spill] sm:$0xff] }
 0x3c5   :  { %3954 = vmatmul.mubr.f32.gmra.mrb[16].mxu1 %v21718_v49  ;;  %8632 = vmatprep.subr.bf16.mxu0 %v20654_v10  ;;  %v21768_v49 = vand.u32 4294901760, %v21767_v22  ;;  %v21811_v61 = vld [vmem:[#allocation91_spill] sm:$0xff]  ;;  %v21817_v22 = vld [vmem:[#allocation93_spill] sm:$0xff]  ;;  %v21855_v45 = vld [vmem:[#allocation250_spill] sm:$0xff] }
 0x3c6   :  { %3961 = vmatprep.mubr.f32.mxu1 %v21720_v57  ;;  %8346 = vmatpush1.bf16.msra.mxu1 %v8345_v62  ;;  %v21758_v62 = vand.u32 4294901760, %v21757_v16  ;;  %v8642_v58 = vpack.c.bf16 %v21764_v37, %v21762_v50  ;;  %v21770_v57 = vand.u32 4294901760, %v21769_v25  ;;  %v21807_v16 = vld [vmem:[#allocation218_spill] sm:$0xff]  ;;  %v21812_v50 = vand.u32 4294901760, %v21811_v61 }
 0x3c7   :  { %6552 = vmatmul.mubr.f32.gmra.mrb[16].mxu0 %v21726_v40  ;;  %8347 = vmatprep.subr.bf16.mxu1 %v20654_v10  ;;  %v21776_v40 = vand.u32 4294901760, %v21775_v31  ;;  %v21813_v37 = vld [vmem:[#allocation214_spill] sm:$0xff]  ;;  %v21825_v31 = vld [vmem:[#allocation95_spill] sm:$0xff] }
 0x3c8   :  { %6559 = vmatprep.mubr.f32.mxu0 %v21728_v46  ;;  %8634 = vmatpush1.bf16.msra.mxu0 %v8633_v54  ;;  %v21766_v54 = vand.u32 4294901760, %v21765_v55  ;;  %v8357_v13 = vpack.c.bf16 %v21772_v34, %v21770_v57  ;;  %v21778_v46 = vand.u32 4294901760, %v21777_v1  ;;  %v21815_v55 = vld [vmem:[#allocation224_spill] sm:$0xff]  ;;  %v21819_v25 = vld [vmem:[#allocation94_spill] sm:$0xff]  ;;  %v21821_v34 = vld [vmem:[#allocation217_spill] sm:$0xff] }
 0x3c9   :  { %3965 = vmatmul.mubr.f32.gmra.mrb[18].mxu1 %v21734_v27  ;;  %8635 = vmatprep.subr.bf16.mxu0 %v20654_v10  ;;  %v21784_v27 = vand.u32 4294901760, %v21783_v44  ;;  %v21820_v57 = vand.u32 4294901760, %v21819_v25  ;;  %v21827_v1 = vld [vmem:[#allocation97_spill] sm:$0xff]  ;;  %v21873_v25 = vld [vmem:[#allocation255_spill] sm:$0xff] }
 0x3ca   :  { %3972 = vmatprep.mubr.f32.mxu1 %v21736_v11  ;;  %8349 = vmatpush1.bf16.msra.mxu1 %v8348_v51  ;;  %v21774_v51 = vand.u32 4294901760, %v21773_v8  ;;  %v8645_v2 = vpack.c.bf16 %v21780_v56, %v21778_v46  ;;  %v21786_v11 = vand.u32 4294901760, %v21785_v47  ;;  %v21823_v8 = vld [vmem:[#allocation226_spill] sm:$0xff]  ;;  %v21828_v46 = vand.u32 4294901760, %v21827_v1  ;;  %v21833_v44 = vld [vmem:[#allocation225_spill] sm:$0xff] }
 0x3cb   :  { %6563 = vmatmul.mubr.f32.gmra.mrb[18].mxu0 %v21742_v52  ;;  %8350 = vmatprep.subr.bf16.mxu1 %v20654_v10  ;;  %v21792_v52 = vand.u32 4294901760, %v21791_v35  ;;  %v21829_v56 = vld [vmem:[#allocation222_spill] sm:$0xff]  ;;  %v21835_v47 = vld [vmem:[#allocation233_spill] sm:$0xff] }
 0x3cc   :  { %6570 = vmatprep.mubr.f32.mxu0 %v21744_v42  ;;  %8637 = vmatpush1.bf16.msra.mxu0 %v8636_v53  ;;  %v21782_v53 = vand.u32 4294901760, %v21781_v39  ;;  %v8360_v5 = vpack.c.bf16 %v21788_v20, %v21786_v11  ;;  %v21794_v42 = vand.u32 4294901760, %v21793_v48  ;;  %v21831_v39 = vld [vmem:[#allocation230_spill] sm:$0xff]  ;;  %v21836_v11 = vand.u32 4294901760, %v21835_v47  ;;  %v21891_v47 = vld [vmem:[#allocation275_spill] sm:$0xff] }
 0x3cd   :  { %3976 = vmatmul.mubr.f32.gmra.mrb[20].mxu1 %v21750_v60  ;;  %8638 = vmatprep.subr.bf16.mxu0 %v20654_v10  ;;  %v21800_v60 = vand.u32 4294901760, %v21799_v23  ;;  %v21838_v20 = vand.u32 4294901760, %v21837_v26  ;;  %v21851_v23 = vld [vmem:[#allocation247_spill] sm:$0xff]  ;;  %v21893_v26 = vld [vmem:[#allocation273_spill] sm:$0xff] }
 0x3ce   :  { %3983 = vmatprep.mubr.f32.mxu1 %v21752_v19  ;;  %8352 = vmatpush1.bf16.msra.mxu1 %v8351_v33  ;;  %v21790_v33 = vand.u32 4294901760, %v21789_v30  ;;  %v8648_v7 = vpack.c.bf16 %v21796_v18, %v21794_v42  ;;  %v21802_v19 = vand.u32 4294901760, %v21801_v41  ;;  %v21845_v42 = vld [vmem:[#allocation237_spill] sm:$0xff]  ;;  %v21847_v18 = vld [vmem:[#allocation246_spill] sm:$0xff]  ;;  %v21853_v41 = vld [vmem:[#allocation244_spill] sm:$0xff] }
 0x3cf   :  { %6574 = vmatmul.mubr.f32.gmra.mrb[20].mxu0 %v21758_v62  ;;  %8353 = vmatprep.subr.bf16.mxu1 %v20654_v10  ;;  %v21808_v62 = vand.u32 4294901760, %v21807_v16  ;;  %v21846_v29 = vand.u32 4294901760, %v21845_v42  ;;  %v21901_v42 = vld [vmem:[#allocation279_spill] sm:$0xff] }
 0x3d0   :  { %6581 = vmatprep.mubr.f32.mxu0 %v21760_v36  ;;  %8640 = vmatpush1.bf16.msra.mxu0 %v8639_v14  ;;  %v21798_v14 = vand.u32 4294901760, %v21797_v0  ;;  %v8363_v3 = vpack.c.bf16 %v21804_v15, %v21802_v19  ;;  %v21810_v36 = vand.u32 4294901760, %v21809_v6  ;;  %v21849_v0 = vld [vmem:[#allocation240_spill] sm:$0xff]  ;;  %v21854_v19 = vand.u32 4294901760, %v21853_v41  ;;  %v21909_v41 = vld [vmem:[#allocation287_spill] sm:$0xff] }
 0x3d1   :  { %3987 = vmatmul.mubr.f32.gmra.mrb[22].mxu1 %v21766_v54  ;;  %8641 = vmatprep.subr.bf16.mxu0 %v20654_v10  ;;  %v21816_v54 = vand.u32 4294901760, %v21815_v55  ;;  %v21856_v15 = vand.u32 4294901760, %v21855_v45  ;;  %v21869_v55 = vld [vmem:[#allocation253_spill] sm:$0xff] }
 0x3d2   :  { %3994 = vmatprep.mubr.f32.mxu1 %v21768_v49  ;;  %8355 = vmatpush1.bf16.msra.mxu1 %v8354_v17  ;;  %v21806_v17 = vand.u32 4294901760, %v21805_v43  ;;  %v8651_v21 = vpack.c.bf16 %v21812_v50, %v21810_v36  ;;  %v21818_v49 = vand.u32 4294901760, %v21817_v22  ;;  %v21863_v36 = vld [vmem:[#allocation254_spill] sm:$0xff]  ;;  %v21865_v50 = vld [vmem:[#allocation252_spill] sm:$0xff]  ;;  %v21871_v22 = vld [vmem:[#allocation257_spill] sm:$0xff] }
 0x3d3   :  { %6585 = vmatmul.mubr.f32.gmra.mrb[22].mxu0 %v21774_v51  ;;  %8356 = vmatprep.subr.bf16.mxu1 %v20654_v10  ;;  %v21824_v51 = vand.u32 4294901760, %v21823_v8  ;;  %v21864_v61 = vand.u32 4294901760, %v21863_v36  ;;  %v21911_v45 = vld [vmem:[#allocation297_spill] sm:$0xff] }
 0x3d4   :  { %6592 = vmatprep.mubr.f32.mxu0 %v21776_v40  ;;  %8643 = vmatpush1.bf16.msra.mxu0 %v8642_v58  ;;  %v21814_v58 = vand.u32 4294901760, %v21813_v37  ;;  %v8366_v9 = vpack.c.bf16 %v21820_v57, %v21818_v49  ;;  %v21826_v40 = vand.u32 4294901760, %v21825_v31  ;;  %v21867_v37 = vld [vmem:[#allocation256_spill] sm:$0xff]  ;;  %v21872_v49 = vand.u32 4294901760, %v21871_v22  ;;  %v21919_v36 = vld [vmem:[#allocation305_spill] sm:$0xff] }
 0x3d5   :  { %3998 = vmatmul.mubr.f32.gmra.mrb[24].mxu1 %v21782_v53  ;;  %8644 = vmatprep.subr.bf16.mxu0 %v20654_v10  ;;  %v21832_v53 = vand.u32 4294901760, %v21831_v39  ;;  %v21874_v57 = vand.u32 4294901760, %v21873_v25  ;;  %v21887_v39 = vld [vmem:[#allocation272_spill] sm:$0xff] }
 0x3d6   :  { %4005 = vmatprep.mubr.f32.mxu1 %v21784_v27  ;;  %8358 = vmatpush1.bf16.msra.mxu1 %v8357_v13  ;;  %v21822_v13 = vand.u32 4294901760, %v21821_v34  ;;  %v8654_v28 = vpack.c.bf16 %v21828_v46, %v21826_v40  ;;  %v21834_v27 = vand.u32 4294901760, %v21833_v44  ;;  %v21881_v40 = vld [vmem:[#allocation258_spill] sm:$0xff]  ;;  %v21889_v44 = vld [vmem:[#allocation267_spill] sm:$0xff] }
 0x3d7   :  { %6596 = vmatmul.mubr.f32.gmra.mrb[24].mxu0 %v21790_v33  ;;  %8359 = vmatprep.subr.bf16.mxu1 %v20654_v10  ;;  %v21841_v33 = vld [vmem:[#allocation232_spill] sm:$0xff]  ;;  %v21882_v1 = vand.u32 4294901760, %v21881_v40  ;;  %v21883_v46 = vld [vmem:[#allocation266_spill] sm:$0xff] }
 0x3d8   :  { %6603 = vmatprep.mubr.f32.mxu0 %v21792_v52  ;;  %8646 = vmatpush1.bf16.msra.mxu0 %v8645_v2  ;;  %v21830_v2 = vand.u32 4294901760, %v21829_v56  ;;  %v21842_v35 = vand.u32 4294901760, %v21841_v33  ;;  %v21843_v52 = vld [vmem:[#allocation241_spill] sm:$0xff]  ;;  %v21885_v56 = vld [vmem:[#allocation263_spill] sm:$0xff]  ;;  %v21897_v33 = vld [vmem:[#allocation274_spill] sm:$0xff] }
 0x3d9   :  { %4009 = vmatmul.mubr.f32.gmra.mrb[26].mxu1 %v21798_v14  ;;  %8647 = vmatprep.subr.bf16.mxu0 %v20654_v10  ;;  %v21844_v48 = vand.u32 4294901760, %v21843_v52  ;;  %v21850_v14 = vand.u32 4294901760, %v21849_v0  ;;  %v21899_v52 = vld [vmem:[#allocation283_spill] sm:$0xff]  ;;  %v21905_v0 = vld [vmem:[#allocation282_spill] sm:$0xff] }
 0x3da   :  { %4016 = vmatprep.mubr.f32.mxu1 %v21800_v60  ;;  %8361 = vmatpush1.bf16.msra.mxu1 %v8360_v5  ;;  %v21839_v5 = vld [vmem:[#allocation239_spill] sm:$0xff]  ;;  %v21852_v60 = vand.u32 4294901760, %v21851_v23  ;;  %v21907_v23 = vld [vmem:[#allocation290_spill] sm:$0xff] }
 0x3db   :  { %6607 = vmatmul.mubr.f32.gmra.mrb[26].mxu0 %v21806_v17  ;;  %8362 = vmatprep.subr.bf16.mxu1 %v20654_v10  ;;  %v21840_v30 = vand.u32 4294901760, %v21839_v5  ;;  %v21859_v17 = vld [vmem:[#allocation251_spill] sm:$0xff]  ;;  %v21895_v5 = vld [vmem:[#allocation281_spill] sm:$0xff]  ;;  %v21940_v40 = vld [vmem:[#allocation322_spill] sm:$0xff] }
 0x3dc   :  { %6614 = vmatprep.mubr.f32.mxu0 %v21808_v62  ;;  %8649 = vmatpush1.bf16.msra.mxu0 %v8648_v7  ;;  %v21848_v7 = vand.u32 4294901760, %v21847_v18  ;;  %v21860_v16 = vand.u32 4294901760, %v21859_v17  ;;  %v21861_v62 = vld [vmem:[#allocation248_spill] sm:$0xff]  ;;  %v21903_v18 = vld [vmem:[#allocation289_spill] sm:$0xff]  ;;  %v21915_v17 = vld [vmem:[#allocation299_spill] sm:$0xff] }
 0x3dd   :  { %4020 = vmatmul.mubr.f32.gmra.mrb[28].mxu1 %v21814_v58  ;;  %8650 = vmatprep.subr.bf16.mxu0 %v20654_v10  ;;  %v21862_v6 = vand.u32 4294901760, %v21861_v62  ;;  %v21868_v58 = vand.u32 4294901760, %v21867_v37  ;;  %v21917_v62 = vld [vmem:[#allocation295_spill] sm:$0xff] }
 0x3de   :  { %4027 = vmatprep.mubr.f32.mxu1 %v21816_v54  ;;  %8364 = vmatpush1.bf16.msra.mxu1 %v8363_v3  ;;  %v21857_v3 = vld [vmem:[#allocation4_spill] sm:$0xff]  ;;  %v21870_v54 = vand.u32 4294901760, %v21869_v55  ;;  %v21925_v55 = vand.u32 4294901760, %v21612_v4  ;;  %v21936_v4 = vld [vmem:[#allocation319_spill] sm:$0xff] }
 0x3df   :  { %6618 = vmatmul.mubr.f32.gmra.mrb[28].mxu0 %v21822_v13  ;;  %8365 = vmatprep.subr.bf16.mxu1 %v20654_v10  ;;  %v21858_v43 = vand.u32 4294901760, %v21857_v3  ;;  %v21877_v13 = vld [vmem:[#allocation20_spill] sm:$0xff]  ;;  %v21913_v3 = vld [vmem:[#allocation291_spill] sm:$0xff] }
 0x3e0   :  { %6625 = vmatprep.mubr.f32.mxu0 %v21824_v51  ;;  %8652 = vmatpush1.bf16.msra.mxu0 %v8651_v21  ;;  %v21866_v21 = vand.u32 4294901760, %v21865_v50  ;;  %v21878_v8 = vand.u32 4294901760, %v21877_v13  ;;  %v21879_v51 = vld [vmem:[#allocation265_spill] sm:$0xff]  ;;  %v21921_v50 = vand.u32 4294901760, %v21609_v59 }
 0x3e1   :  { %4031 = vmatmul.mubr.f32.gmra.mrb[30].mxu1 %v21830_v2  ;;  %8653 = vmatprep.subr.bf16.mxu0 %v20654_v10  ;;  %v21880_v31 = vand.u32 4294901760, %v21879_v51  ;;  %v21886_v2 = vand.u32 4294901760, %v21885_v56  ;;  %v21931_v59 = vld [vmem:[#allocation321_spill] sm:$0xff] }
 0x3e2   :  { %4038 = vmatprep.mubr.f32.mxu1 %v21832_v53  ;;  %8367 = vmatpush1.bf16.msra.mxu1 %v8366_v9  ;;  %v21875_v9 = vld [vmem:[#allocation259_spill] sm:$0xff]  ;;  %v21888_v53 = vand.u32 4294901760, %v21887_v39  ;;  %v21938_v51 = vld [vmem:[#allocation329_spill] sm:$0xff] }
 0x3e3   :  { %6629 = vmatmul.mubr.f32.gmra.mrb[30].mxu0 %v21834_v27  ;;  %8368 = vmatprep.subr.bf16.mxu1 %v20654_v10  ;;  %v21876_v34 = vand.u32 4294901760, %v21875_v9  ;;  %v21890_v27 = vand.u32 4294901760, %v21889_v44  ;;  %v21932_v9 = vand.u32 4294901760, %v21931_v59  ;;  %v22016_v59 = vld [vmem:[#allocation159_spill] sm:$0xff] }
 0x3e4   :  { %6636 = vmatprep.mubr.f32.mxu0 %v21836_v11  ;;  %8655 = vmatpush1.bf16.msra.mxu0 %v8654_v28  ;;  %v21884_v28 = vand.u32 4294901760, %v21883_v46  ;;  %v21892_v11 = vand.u32 4294901760, %v21891_v47  ;;  %v21943_v46 = vld [vmem:[#allocation327_spill] sm:$0xff] }
 0x3e5   :  { %4042 = vmatmul.mubr.f32.gmra.mrb[32].mxu1 %v21838_v20  ;;  %8656 = vmatprep.subr.bf16.mxu0 %v20654_v10  ;;  %v21894_v20 = vand.u32 4294901760, %v21893_v26  ;;  %v21954_v26 = vld [vmem:[#allocation108_spill] sm:$0xff] }
 0x3e6   :  { %4049 = vmatprep.mubr.f32.mxu1 %v21840_v30  ;;  %v21896_v30 = vand.u32 4294901760, %v21895_v5  ;;  %v21957_v5 = vld [vmem:[#allocation107_spill] sm:$0xff] }
 0x3e7   :  { %6640 = vmatmul.mubr.f32.gmra.mrb[32].mxu0 %v21842_v35  ;;  %v21898_v35 = vand.u32 4294901760, %v21897_v33  ;;  %v21959_v33 = vld [vmem:[#allocation119_spill] sm:$0xff] }
 0x3e8   :  { %6647 = vmatprep.mubr.f32.mxu0 %v21844_v48  ;;  %v21900_v48 = vand.u32 4294901760, %v21899_v52  ;;  %v21962_v52 = vld [vmem:[#allocation120_spill] sm:$0xff] }
 0x3e9   :  { %4053 = vmatmul.mubr.f32.gmra.mrb[34].mxu1 %v21846_v29  ;;  %v21902_v29 = vand.u32 4294901760, %v21901_v42  ;;  %v21966_v42 = vld [vmem:[#allocation103_spill] sm:$0xff] }
 0x3ea   :  { %4060 = vmatprep.mubr.f32.mxu1 %v21848_v7  ;;  %v21904_v7 = vand.u32 4294901760, %v21903_v18  ;;  %v21969_v18 = vld [vmem:[#allocation121_spill] sm:$0xff] }
 0x3eb   :  { %6651 = vmatmul.mubr.f32.gmra.mrb[34].mxu0 %v21850_v14  ;;  %v21906_v14 = vand.u32 4294901760, %v21905_v0  ;;  %v21973_v0 = vld [vmem:[#allocation11_spill] sm:$0xff] }
 0x3ec   :  { %6658 = vmatprep.mubr.f32.mxu0 %v21852_v60  ;;  %v21908_v60 = vand.u32 4294901760, %v21907_v23  ;;  %v21976_v23 = vld [vmem:[#allocation126_spill] sm:$0xff] }
 0x3ed   :  { %4064 = vmatmul.mubr.f32.gmra.mrb[36].mxu1 %v21854_v19  ;;  %v21910_v19 = vand.u32 4294901760, %v21909_v41  ;;  %v21979_v41 = vld [vmem:[#allocation104_spill] sm:$0xff] }
 0x3ee   :  { %4071 = vmatprep.mubr.f32.mxu1 %v21856_v15  ;;  %v21912_v15 = vand.u32 4294901760, %v21911_v45  ;;  %v21983_v45 = vld [vmem:[#allocation17_spill] sm:$0xff] }
 0x3ef   :  { %6662 = vmatmul.mubr.f32.gmra.mrb[36].mxu0 %v21858_v43  ;;  %v21914_v43 = vand.u32 4294901760, %v21913_v3  ;;  %v21986_v3 = vld [vmem:[#allocation143_spill] sm:$0xff] }
 0x3f0   :  { %6669 = vmatprep.mubr.f32.mxu0 %v21860_v16  ;;  %v21916_v16 = vand.u32 4294901760, %v21915_v17  ;;  %v21989_v17 = vld [vmem:[#allocation129_spill] sm:$0xff] }
 0x3f1   :  { %4075 = vmatmul.mubr.f32.gmra.mrb[38].mxu1 %v21862_v6  ;;  %v21918_v6 = vand.u32 4294901760, %v21917_v62  ;;  %v21993_v62 = vld [vmem:[#allocation23_spill] sm:$0xff] }
 0x3f2   :  { %4082 = vmatprep.mubr.f32.mxu1 %v21864_v61  ;;  %v21920_v61 = vand.u32 4294901760, %v21919_v36  ;;  %v21996_v36 = vld [vmem:[#allocation134_spill] sm:$0xff] }
 0x3f3   :  { %6673 = vmatmul.mubr.f32.gmra.mrb[38].mxu0 %v21866_v21  ;;  %v21922_v21 = vld [vmem:[#allocation307_spill] sm:$0xff] }
 0x3f4   :  { %6680 = vmatprep.mubr.f32.mxu0 %v21868_v58  ;;  %v21923_v37 = vand.u32 4294901760, %v21922_v21  ;;  %v21924_v58 = vand.u32 4294901760, %v21611_v24  ;;  %v21934_v24 = vld [vmem:[#allocation323_spill] sm:$0xff] }
 0x3f5   :  { %4086 = vmatmul.mubr.f32.gmra.mrb[40].mxu1 %v21870_v54  ;;  %v21926_v54 = vld [vmem:[#allocation306_spill] sm:$0xff]  ;;  %v21935_v13 = vand.u32 4294901760, %v21934_v24  ;;  %v22001_v21 = vld [vmem:[#allocation135_spill] sm:$0xff] }
 0x3f6   :  { %4093 = vmatprep.mubr.f32.mxu1 %v21872_v49  ;;  %v21927_v22 = vand.u32 4294901760, %v21926_v54  ;;  %v21928_v49 = vld [vmem:[#allocation314_spill] sm:$0xff]  ;;  %v22008_v54 = vld [vmem:[#allocation35_spill] sm:$0xff] }
 0x3f7   :  { %6684 = vmatmul.mubr.f32.gmra.mrb[40].mxu0 %v21874_v57  ;;  %v21929_v25 = vand.u32 4294901760, %v21928_v49  ;;  %v21930_v57 = vand.u32 4294901760, %v21615_v38  ;;  %v21942_v38 = vand.u32 4294901760, %v16411_v63  ;;  %v21955_v63 = vand.u32 4294901760, %v16492_v32  ;;  %v21961_v32 = vld [vmem:[#allocation5_spill] sm:$0xff]  ;;  %v22011_v49 = vld [vmem:[#allocation154_spill] sm:$0xff] }
 0x3f8   :  { %6691 = vmatprep.mubr.f32.mxu0 %v21876_v34  ;;  %v21933_v34 = vand.u32 4294901760, %v21617_v12  ;;  %v21945_v12 = vld [vmem:[#allocation336_spill] sm:$0xff]  ;;  %v22021_v24 = vld [vmem:[#allocation162_spill] sm:$0xff] }
 0x3f9   :  { %4097 = vmatmul.mubr.f32.gmra.mrb[42].mxu1 %v21878_v8  ;;  %v21937_v8 = vand.u32 4294901760, %v21936_v4  ;;  %v21946_v56 = vand.u32 4294901760, %v21945_v12  ;;  %v22024_v4 = vld [vmem:[#allocation158_spill] sm:$0xff]  ;;  %v22039_v12 = vld [vmem:[#allocation168_spill] sm:$0xff] }
 0x3fa   :  { %4104 = vmatprep.mubr.f32.mxu1 %v21880_v31  ;;  %v21939_v31 = vand.u32 4294901760, %v21938_v51  ;;  %v22028_v51 = vld [vmem:[#allocation48_spill] sm:$0xff] }
 0x3fb   :  { %6695 = vmatmul.mubr.f32.gmra.mrb[42].mxu0 %v21882_v1  ;;  %v21941_v1 = vand.u32 4294901760, %v21940_v40  ;;  %v22031_v40 = vld [vmem:[#allocation170_spill] sm:$0xff] }
 0x3fc   :  { %6702 = vmatprep.mubr.f32.mxu0 %v21884_v28  ;;  %v21944_v28 = vand.u32 4294901760, %v21943_v46  ;;  %v22036_v46 = vld [vmem:[#allocation174_spill] sm:$0xff] }
 0x3fd   :  { %4108 = vmatmul.mubr.f32.gmra.mrb[44].mxu1 %v21886_v2  ;;  %v21947_v2 = vld [vmem:[#allocation330_spill] sm:$0xff] }
 0x3fe   :  { %4115 = vmatprep.mubr.f32.mxu1 %v21888_v53  ;;  %v21948_v39 = vand.u32 4294901760, %v21947_v2  ;;  %v21949_v53 = vld [vmem:[#allocation337_spill] sm:$0xff]  ;;  %v22043_v2 = vld [vmem:[#allocation55_spill] sm:$0xff] }
 0x3ff   :  { %6706 = vmatmul.mubr.f32.gmra.mrb[44].mxu0 %v21890_v27  ;;  %v21950_v44 = vand.u32 4294901760, %v21949_v53  ;;  %v21951_v27 = vld [vmem:[#allocation334_spill] sm:$0xff]  ;;  %v22046_v53 = vld [vmem:[#allocation181_spill] sm:$0xff] }
 0x400   :  { %6713 = vmatprep.mubr.f32.mxu0 %v21892_v11  ;;  %v21952_v47 = vand.u32 4294901760, %v21951_v27  ;;  %v21953_v11 = vmov 1.0   ;;  %v22049_v27 = vld [vmem:[#allocation175_spill] sm:$0xff] }
 0x401   :  { %4119 = vmatmul.mubr.f32.gmra.mrb[46].mxu1 %v21894_v20  ;;  %v21956_v20 = vld [vmem:[#allocation111_spill] sm:$0xff] }
 0x402   :  { %4126 = vmatprep.mubr.f32.mxu1 %v21896_v30  ;;  %v21958_v30 = vld [vmem:[#allocation3_spill] sm:$0xff] }
 0x403   :  { %6717 = vmatmul.mubr.f32.gmra.mrb[46].mxu0 %v21898_v35  ;;  %v21960_v35 = vld [vmem:[#allocation109_spill] sm:$0xff] }
 0x404   :  { %6724 = vmatprep.mubr.f32.mxu0 %v21900_v48  ;;  %v21964_v48 = vld [vmem:[#allocation118_spill] sm:$0xff] }
 0x405   :  { %4130 = vmatmul.mubr.f32.gmra.mrb[48].mxu1 %v21902_v29  ;;  %v21968_v29 = vld [vmem:[#allocation8_spill] sm:$0xff] }
 0x406   :  { %4137 = vmatprep.mubr.f32.mxu1 %v21904_v7  ;;  %v21971_v7 = vld [vmem:[#allocation105_spill] sm:$0xff] }
 0x407   :  { %6728 = vmatmul.mubr.f32.gmra.mrb[48].mxu0 %v21906_v14  ;;  %v21974_v14 = vld [vmem:[#allocation102_spill] sm:$0xff] }
 0x408   :  { %6735 = vmatprep.mubr.f32.mxu0 %v21908_v60  ;;  %v21978_v60 = vld [vmem:[#allocation15_spill] sm:$0xff] }
 0x409   :  { %4141 = vmatmul.mubr.f32.gmra.mrb[50].mxu1 %v21910_v19  ;;  %v21981_v19 = vld [vmem:[#allocation128_spill] sm:$0xff] }
 0x40a   :  { %4148 = vmatprep.mubr.f32.mxu1 %v21912_v15  ;;  %v21984_v15 = vld [vmem:[#allocation127_spill] sm:$0xff] }
 0x40b   :  { %6739 = vmatmul.mubr.f32.gmra.mrb[50].mxu0 %v21914_v43  ;;  %v21988_v43 = vld [vmem:[#allocation21_spill] sm:$0xff] }
 0x40c   :  { %6746 = vmatprep.mubr.f32.mxu0 %v21916_v16  ;;  %v21991_v16 = vld [vmem:[#allocation146_spill] sm:$0xff] }
 0x40d   :  { %4152 = vmatmul.mubr.f32.gmra.mrb[52].mxu1 %v21918_v6  ;;  %v21994_v6 = vld [vmem:[#allocation142_spill] sm:$0xff] }
 0x40e   :  { %4159 = vmatprep.mubr.f32.mxu1 %v21920_v61  ;;  %v21998_v61 = vld [vmem:[#allocation29_spill] sm:$0xff] }
 0x40f   :  { %6750 = vmatmul.mubr.f32.gmra.mrb[52].mxu0 %v21921_v50  ;;  %v21999_v50 = vld [vmem:[#allocation144_spill] sm:$0xff] }
 0x410   :  { %6757 = vmatprep.mubr.f32.mxu0 %v21923_v37  ;;  %v22003_v37 = vld [vmem:[#allocation30_spill] sm:$0xff] }
 0x411   :  { %4163 = vmatmul.mubr.f32.gmra.mrb[54].mxu1 %v21924_v58  ;;  %v22004_v58 = vld [vmem:[#allocation136_spill] sm:$0xff] }
 0x412   :  { %4170 = vmatprep.mubr.f32.mxu1 %v21925_v55  ;;  %v22006_v55 = vld [vmem:[#allocation151_spill] sm:$0xff] }
 0x413   :  { %6761 = vmatmul.mubr.f32.gmra.mrb[54].mxu0 %v21927_v22  ;;  %v22009_v22 = vld [vmem:[#allocation137_spill] sm:$0xff] }
 0x414   :  { %6768 = vmatprep.mubr.f32.mxu0 %v21929_v25  ;;  %v22013_v25 = vld [vmem:[#allocation37_spill] sm:$0xff] }
 0x415   :  { %4174 = vmatmul.mubr.f32.gmra.mrb[56].mxu1 %v21930_v57  ;;  %v22014_v57 = vld [vmem:[#allocation150_spill] sm:$0xff] }
 0x416   :  { %4181 = vmatprep.mubr.f32.mxu1 %v21932_v9  ;;  %v22018_v9 = vld [vmem:[#allocation43_spill] sm:$0xff] }
 0x417   :  { %6772 = vmatmul.mubr.f32.gmra.mrb[56].mxu0 %v21933_v34  ;;  %v22019_v34 = vld [vmem:[#allocation152_spill] sm:$0xff] }
 0x418   :  { %6779 = vmatprep.mubr.f32.mxu0 %v21935_v13  ;;  %v22023_v13 = vld [vmem:[#allocation44_spill] sm:$0xff] }
 0x419   :  { %4185 = vmatmul.mubr.f32.gmra.mrb[58].mxu1 %v21937_v8  ;;  %v22026_v8 = vld [vmem:[#allocation167_spill] sm:$0xff] }
 0x41a   :  { %4192 = vmatprep.mubr.f32.mxu1 %v21939_v31  ;;  %v22029_v31 = vld [vmem:[#allocation160_spill] sm:$0xff] }
 0x41b   :  { %6783 = vmatmul.mubr.f32.gmra.mrb[58].mxu0 %v21941_v1  ;;  %v22033_v1 = vld [vmem:[#allocation50_spill] sm:$0xff] }
 0x41c   :  { %6790 = vmatprep.mubr.f32.mxu0 %v21942_v38  ;;  %v22034_v38 = vld [vmem:[#allocation166_spill] sm:$0xff] }
 0x41d   :  { %4196 = vmatmul.mubr.f32.gmra.mrb[60].mxu1 %v21944_v28  ;;  %v22038_v28 = vld [vmem:[#allocation53_spill] sm:$0xff] }
 0x41e   :  { %4203 = vmatprep.mubr.f32.mxu1 %v21946_v56  ;;  %v22041_v56 = vld [vmem:[#allocation177_spill] sm:$0xff] }
 0x41f   :  { %6794 = vmatmul.mubr.f32.gmra.mrb[60].mxu0 %v21948_v39  ;;  %v22044_v39 = vld [vmem:[#allocation98_spill] sm:$0xff] }
 0x420   :  { %6801 = vmatprep.mubr.f32.mxu0 %v21950_v44  ;;  %v22048_v44 = vld [vmem:[#allocation58_spill] sm:$0xff] }
 0x421   :  { %4207 = vmatmul.mubr.f32.gmra.mrb[62].mxu1 %v21952_v47  ;;  %v22051_v47 = vld [vmem:[#allocation184_spill] sm:$0xff] }
 0x422   :  { %7808 = vmatprep.mubr.msk.f32.mxu1 %vm21192_vm10, %v21953_v11 }
 0x423   :  { %6805 = vmatmul.mubr.f32.gmra.mrb[62].mxu0 %v21955_v63  ;;  %v22053_v63 = vld [vmem:[#allocation61_spill] sm:$0xff] }
 0x424   :  { %8000 = vmatprep.mubr.msk.f32.mxu0 %vm21194_vm11, %v21953_v11  ;;  %vm21963_vm11 = vnez %v21962_v52 }
 0x425   :  { %7809 = vmatmul.mubr.msk.f32.vlgmr.msra.gmra.mrb[0].mxu1 %vm21196_vm5, %v21953_v11  ;;  %vm21965_vm5 = vnez %v21964_v48 }
 0x426   :  { %8370 = vmatpush1.bf16.msra.mxu1 %v21958_v30  ;;  %7810 = vmatprep.mubr.msk.f32.mxu1 %vm21198_vm13, %v21953_v11  ;;  %vm21967_vm13 = vnez %v21966_v42  ;;  %v22054_v30 = vld [vmem:[#allocation99_spill] sm:$0xff] }
 0x427   :  { %8001 = vmatmul.mubr.msk.f32.vlgmr.msra.gmra.mrb[0].mxu0 %vm21200_vm4, %v21953_v11  ;;  %8371 = vmatprep.subr.bf16.mxu1 %v20654_v10  ;;  %vm21970_vm4 = vnez %v21969_v18 }
 0x428   :  { %8658 = vmatpush1.bf16.msra.mxu0 %v21961_v32  ;;  %8002 = vmatprep.mubr.msk.f32.mxu0 %vm21963_vm11, %v21953_v11  ;;  %vm21972_vm11 = vnez %v21971_v7  ;;  %v22056_v32 = vld [vmem:[#allocation189_spill] sm:$0xff] }
 0x429   :  { %7811 = vmatmul.mubr.msk.f32.gmra.mrb[2].mxu1 %vm21965_vm5, %v21953_v11  ;;  %8659 = vmatprep.subr.bf16.mxu0 %v20654_v10  ;;  %vm21975_vm5 = vnez %v21974_v14 }
 0x42a   :  { %7812 = vmatprep.mubr.msk.f32.mxu1 %vm21967_vm13, %v21953_v11  ;;  %8373 = vmatpush1.bf16.msra.mxu1 %v21968_v29  ;;  %vm21977_vm13 = vnez %v21976_v23  ;;  %v22058_v29 = vld [vmem:[#allocation63_spill] sm:$0xff] }
 0x42b   :  { %8003 = vmatmul.mubr.msk.f32.gmra.mrb[2].mxu0 %vm21970_vm4, %v21953_v11  ;;  %8374 = vmatprep.subr.bf16.mxu1 %v20654_v10  ;;  %vm21980_vm4 = vnez %v21979_v41 }
 0x42c   :  { %8004 = vmatprep.mubr.msk.f32.mxu0 %vm21972_vm11, %v21953_v11  ;;  %8661 = vmatpush1.bf16.msra.mxu0 %v21973_v0  ;;  %vm21982_vm11 = vnez %v21981_v19  ;;  %v22059_v0 = vld [vmem:[#allocation182_spill] sm:$0xff] }
 0x42d   :  { %7813 = vmatmul.mubr.msk.f32.gmra.mrb[4].mxu1 %vm21975_vm5, %v21953_v11  ;;  %8662 = vmatprep.subr.bf16.mxu0 %v20654_v10  ;;  %vm21985_vm5 = vnez %v21984_v15 }
 0x42e   :  { %7814 = vmatprep.mubr.msk.f32.mxu1 %vm21977_vm13, %v21953_v11  ;;  %8376 = vmatpush1.bf16.msra.mxu1 %v21978_v60  ;;  %vm21987_vm13 = vnez %v21986_v3  ;;  %v22061_v60 = vld [vmem:[#allocation192_spill] sm:$0xff] }
 0x42f   :  { %8005 = vmatmul.mubr.msk.f32.gmra.mrb[4].mxu0 %vm21980_vm4, %v21953_v11  ;;  %8377 = vmatprep.subr.bf16.mxu1 %v20654_v10  ;;  %vm21990_vm4 = vnez %v21989_v17 }
 0x430   :  { %8006 = vmatprep.mubr.msk.f32.mxu0 %vm21982_vm11, %v21953_v11  ;;  %8664 = vmatpush1.bf16.msra.mxu0 %v21983_v45  ;;  %vm21992_vm11 = vnez %v21991_v16  ;;  %v22063_v45 = vld [vmem:[#allocation65_spill] sm:$0xff] }
 0x431   :  { %7815 = vmatmul.mubr.msk.f32.gmra.mrb[6].mxu1 %vm21985_vm5, %v21953_v11  ;;  %8665 = vmatprep.subr.bf16.mxu0 %v20654_v10  ;;  %vm21995_vm5 = vnez %v21994_v6 }
 0x432   :  { %7816 = vmatprep.mubr.msk.f32.mxu1 %vm21987_vm13, %v21953_v11  ;;  %8379 = vmatpush1.bf16.msra.mxu1 %v21988_v43  ;;  %vm21997_vm13 = vnez %v21996_v36  ;;  %v22064_v43 = vld [vmem:[#allocation188_spill] sm:$0xff] }
 0x433   :  { %8007 = vmatmul.mubr.msk.f32.gmra.mrb[6].mxu0 %vm21990_vm4, %v21953_v11  ;;  %8380 = vmatprep.subr.bf16.mxu1 %v20654_v10  ;;  %vm22000_vm4 = vnez %v21999_v50 }
 0x434   :  { %8008 = vmatprep.mubr.msk.f32.mxu0 %vm21992_vm11, %v21953_v11  ;;  %8667 = vmatpush1.bf16.msra.mxu0 %v21993_v62  ;;  %vm22002_vm11 = vnez %v22001_v21  ;;  %v22066_v62 = vld [vmem:[#allocation197_spill] sm:$0xff] }
 0x435   :  { %7817 = vmatmul.mubr.msk.f32.gmra.mrb[8].mxu1 %vm21995_vm5, %v21953_v11  ;;  %8668 = vmatprep.subr.bf16.mxu0 %v20654_v10  ;;  %vm22005_vm5 = vnez %v22004_v58 }
 0x436   :  { %7818 = vmatprep.mubr.msk.f32.mxu1 %vm21997_vm13, %v21953_v11  ;;  %8382 = vmatpush1.bf16.msra.mxu1 %v21998_v61  ;;  %vm22007_vm13 = vnez %v22006_v55  ;;  %v22068_v61 = vld [vmem:[#allocation69_spill] sm:$0xff] }
 0x437   :  { %8009 = vmatmul.mubr.msk.f32.gmra.mrb[8].mxu0 %vm22000_vm4, %v21953_v11  ;;  %8383 = vmatprep.subr.bf16.mxu1 %v20654_v10  ;;  %vm22010_vm4 = vnez %v22009_v22 }
 0x438   :  { %8010 = vmatprep.mubr.msk.f32.mxu0 %vm22002_vm11, %v21953_v11  ;;  %8670 = vmatpush1.bf16.msra.mxu0 %v22003_v37  ;;  %vm22012_vm11 = vnez %v22011_v49  ;;  %v22069_v37 = vld [vmem:[#allocation190_spill] sm:$0xff] }
 0x439   :  { %7819 = vmatmul.mubr.msk.f32.gmra.mrb[10].mxu1 %vm22005_vm5, %v21953_v11  ;;  %8671 = vmatprep.subr.bf16.mxu0 %v20654_v10  ;;  %vm22015_vm5 = vnez %v22014_v57 }
 0x43a   :  { %7820 = vmatprep.mubr.msk.f32.mxu1 %vm22007_vm13, %v21953_v11  ;;  %8385 = vmatpush1.bf16.msra.mxu1 %v22008_v54  ;;  %vm22017_vm13 = vnez %v22016_v59  ;;  %v22071_v54 = vld [vmem:[#allocation200_spill] sm:$0xff] }
 0x43b   :  { %8011 = vmatmul.mubr.msk.f32.gmra.mrb[10].mxu0 %vm22010_vm4, %v21953_v11  ;;  %8386 = vmatprep.subr.bf16.mxu1 %v20654_v10  ;;  %vm22020_vm4 = vnez %v22019_v34 }
 0x43c   :  { %8012 = vmatprep.mubr.msk.f32.mxu0 %vm22012_vm11, %v21953_v11  ;;  %8673 = vmatpush1.bf16.msra.mxu0 %v22013_v25  ;;  %vm22022_vm11 = vnez %v22021_v24  ;;  %v22073_v25 = vld [vmem:[#allocation71_spill] sm:$0xff] }
 0x43d   :  { %7821 = vmatmul.mubr.msk.f32.gmra.mrb[12].mxu1 %vm22015_vm5, %v21953_v11  ;;  %8674 = vmatprep.subr.bf16.mxu0 %v20654_v10  ;;  %vm22025_vm5 = vnez %v22024_v4 }
 0x43e   :  { %7822 = vmatprep.mubr.msk.f32.mxu1 %vm22017_vm13, %v21953_v11  ;;  %8388 = vmatpush1.bf16.msra.mxu1 %v22018_v9  ;;  %vm22027_vm13 = vnez %v22026_v8  ;;  %v22074_v9 = vld [vmem:[#allocation196_spill] sm:$0xff] }
 0x43f   :  { %8013 = vmatmul.mubr.msk.f32.gmra.mrb[12].mxu0 %vm22020_vm4, %v21953_v11  ;;  %8389 = vmatprep.subr.bf16.mxu1 %v20654_v10  ;;  %vm22030_vm4 = vnez %v22029_v31 }
 0x440   :  { %8014 = vmatprep.mubr.msk.f32.mxu0 %vm22022_vm11, %v21953_v11  ;;  %8676 = vmatpush1.bf16.msra.mxu0 %v22023_v13  ;;  %vm22032_vm11 = vnez %v22031_v40  ;;  %v22076_v13 = vld [vmem:[#allocation204_spill] sm:$0xff] }
 0x441   :  { %7823 = vmatmul.mubr.msk.f32.gmra.mrb[14].mxu1 %vm22025_vm5, %v21953_v11  ;;  %8677 = vmatprep.subr.bf16.mxu0 %v20654_v10  ;;  %vm22035_vm5 = vnez %v22034_v38 }
 0x442   :  { %7824 = vmatprep.mubr.msk.f32.mxu1 %vm22027_vm13, %v21953_v11  ;;  %8391 = vmatpush1.bf16.msra.mxu1 %v22028_v51  ;;  %vm22037_vm13 = vnez %v22036_v46  ;;  %v22078_v51 = vld [vmem:[#allocation74_spill] sm:$0xff] }
 0x443   :  { %8015 = vmatmul.mubr.msk.f32.gmra.mrb[14].mxu0 %vm22030_vm4, %v21953_v11  ;;  %8392 = vmatprep.subr.bf16.mxu1 %v20654_v10  ;;  %vm22040_vm4 = vnez %v22039_v12 }
 0x444   :  { %8016 = vmatprep.mubr.msk.f32.mxu0 %vm22032_vm11, %v21953_v11  ;;  %8679 = vmatpush1.bf16.msra.mxu0 %v22033_v1  ;;  %vm22042_vm11 = vnez %v22041_v56  ;;  %v22079_v1 = vld [vmem:[#allocation198_spill] sm:$0xff] }
 0x445   :  { %7825 = vmatmul.mubr.msk.f32.gmra.mrb[16].mxu1 %vm22035_vm5, %v21953_v11  ;;  %8680 = vmatprep.subr.bf16.mxu0 %v20654_v10  ;;  %vm22045_vm5 = vnez %v22044_v39 }
 0x446   :  { %7826 = vmatprep.mubr.msk.f32.mxu1 %vm22037_vm13, %v21953_v11  ;;  %8394 = vmatpush1.bf16.msra.mxu1 %v22038_v28  ;;  %vm22047_vm13 = vnez %v22046_v53  ;;  %v22081_v28 = vld [vmem:[#allocation207_spill] sm:$0xff] }
 0x447   :  { %8017 = vmatmul.mubr.msk.f32.gmra.mrb[16].mxu0 %vm22040_vm4, %v21953_v11  ;;  %8395 = vmatprep.subr.bf16.mxu1 %v20654_v10  ;;  %vm22050_vm4 = vnez %v22049_v27 }
 0x448   :  { %8018 = vmatprep.mubr.msk.f32.mxu0 %vm22042_vm11, %v21953_v11  ;;  %8682 = vmatpush1.bf16.msra.mxu0 %v22043_v2  ;;  %vm22052_vm11 = vnez %v22051_v47  ;;  %v22083_v2 = vld [vmem:[#allocation77_spill] sm:$0xff] }
 0x449   :  { %7827 = vmatmul.mubr.msk.f32.gmra.mrb[18].mxu1 %vm22045_vm5, %v21953_v11  ;;  %8683 = vmatprep.subr.bf16.mxu0 %v20654_v10  ;;  %vm22055_vm5 = vnez %v22054_v30 }
 0x44a   :  { %7828 = vmatprep.mubr.msk.f32.mxu1 %vm22047_vm13, %v21953_v11  ;;  %8397 = vmatpush1.bf16.msra.mxu1 %v22048_v44  ;;  %vm22057_vm13 = vnez %v22056_v32  ;;  %v22084_v44 = vld [vmem:[#allocation100_spill] sm:$0xff] }
 0x44b   :  { %8019 = vmatmul.mubr.msk.f32.gmra.mrb[18].mxu0 %vm22050_vm4, %v21953_v11  ;;  %8398 = vmatprep.subr.bf16.mxu1 %v20654_v10  ;;  %vm22060_vm4 = vnez %v22059_v0 }
 0x44c   :  { %8020 = vmatprep.mubr.msk.f32.mxu0 %vm22052_vm11, %v21953_v11  ;;  %8685 = vmatpush1.bf16.msra.mxu0 %v22053_v63  ;;  %vm22062_vm11 = vnez %v22061_v60  ;;  %v22086_v63 = vld [vmem:[#allocation212_spill] sm:$0xff] }
 0x44d   :  { %7829 = vmatmul.mubr.msk.f32.gmra.mrb[20].mxu1 %vm22055_vm5, %v21953_v11  ;;  %8686 = vmatprep.subr.bf16.mxu0 %v20654_v10  ;;  %vm22065_vm5 = vnez %v22064_v43 }
 0x44e   :  { %7830 = vmatprep.mubr.msk.f32.mxu1 %vm22057_vm13, %v21953_v11  ;;  %8400 = vmatpush1.bf16.msra.mxu1 %v22058_v29  ;;  %vm22067_vm13 = vnez %v22066_v62  ;;  %v22088_v29 = vld [vmem:[#allocation80_spill] sm:$0xff] }
 0x44f   :  { %8021 = vmatmul.mubr.msk.f32.gmra.mrb[20].mxu0 %vm22060_vm4, %v21953_v11  ;;  %8401 = vmatprep.subr.bf16.mxu1 %v20654_v10  ;;  %vm22070_vm4 = vnez %v22069_v37 }
 0x450   :  { %8022 = vmatprep.mubr.msk.f32.mxu0 %vm22062_vm11, %v21953_v11  ;;  %8688 = vmatpush1.bf16.msra.mxu0 %v22063_v45  ;;  %vm22072_vm11 = vnez %v22071_v54  ;;  %v22089_v45 = vld [vmem:[#allocation205_spill] sm:$0xff] }
 0x451   :  { %7831 = vmatmul.mubr.msk.f32.gmra.mrb[22].mxu1 %vm22065_vm5, %v21953_v11  ;;  %8689 = vmatprep.subr.bf16.mxu0 %v20654_v10  ;;  %vm22075_vm5 = vnez %v22074_v9 }
 0x452   :  { %7832 = vmatprep.mubr.msk.f32.mxu1 %vm22067_vm13, %v21953_v11  ;;  %8403 = vmatpush1.bf16.msra.mxu1 %v22068_v61  ;;  %vm22077_vm13 = vnez %v22076_v13  ;;  %v22091_v61 = vld [vmem:[#allocation215_spill] sm:$0xff] }
 0x453   :  { %8023 = vmatmul.mubr.msk.f32.gmra.mrb[22].mxu0 %vm22070_vm4, %v21953_v11  ;;  %8404 = vmatprep.subr.bf16.mxu1 %v20654_v10  ;;  %vm22080_vm4 = vnez %v22079_v1 }
 0x454   :  { %8024 = vmatprep.mubr.msk.f32.mxu0 %vm22072_vm11, %v21953_v11  ;;  %8691 = vmatpush1.bf16.msra.mxu0 %v22073_v25  ;;  %vm22082_vm11 = vnez %v22081_v28  ;;  %v22093_v25 = vld [vmem:[#allocation84_spill] sm:$0xff] }
 0x455   :  { %7833 = vmatmul.mubr.msk.f32.gmra.mrb[24].mxu1 %vm22075_vm5, %v21953_v11  ;;  %8692 = vmatprep.subr.bf16.mxu0 %v20654_v10  ;;  %vm22085_vm5 = vnez %v22084_v44 }
 0x456   :  { %7834 = vmatprep.mubr.msk.f32.mxu1 %vm22077_vm13, %v21953_v11  ;;  %8406 = vmatpush1.bf16.msra.mxu1 %v22078_v51  ;;  %vm22087_vm13 = vnez %v22086_v63  ;;  %v22094_v51 = vld [vmem:[#allocation211_spill] sm:$0xff] }
 0x457   :  { %8025 = vmatmul.mubr.msk.f32.gmra.mrb[24].mxu0 %vm22080_vm4, %v21953_v11  ;;  %8407 = vmatprep.subr.bf16.mxu1 %v20654_v10  ;;  %vm22090_vm4 = vnez %v22089_v45  ;;  %v22099_v45 = vld [vmem:[#allocation213_spill] sm:$0xff] }
 0x458   :  { %8026 = vmatprep.mubr.msk.f32.mxu0 %vm22082_vm11, %v21953_v11  ;;  %8694 = vmatpush1.bf16.msra.mxu0 %v22083_v2  ;;  %vm22092_vm11 = vnez %v22091_v61  ;;  %v22096_v2 = vld [vmem:[#allocation220_spill] sm:$0xff]  ;;  %v22104_v61 = vld [vmem:[#allocation219_spill] sm:$0xff] }
 0x459   :  { %7835 = vmatmul.mubr.msk.f32.gmra.mrb[26].mxu1 %vm22085_vm5, %v21953_v11  ;;  %8695 = vmatprep.subr.bf16.mxu0 %v20654_v10  ;;  %vm22095_vm5 = vnez %v22094_v51  ;;  %v22103_v51 = vld [vmem:[#allocation89_spill] sm:$0xff] }
 0x45a   :  { %7836 = vmatprep.mubr.msk.f32.mxu1 %vm22087_vm13, %v21953_v11  ;;  %8409 = vmatpush1.bf16.msra.mxu1 %v22088_v29  ;;  %vm22097_vm13 = vnez %v22096_v2  ;;  %v22098_v29 = vld [vmem:[#allocation86_spill] sm:$0xff]  ;;  %v22109_v2 = vld [vmem:[#allocation221_spill] sm:$0xff] }
 0x45b   :  { %8027 = vmatmul.mubr.msk.f32.gmra.mrb[26].mxu0 %vm22090_vm4, %v21953_v11  ;;  %8410 = vmatprep.subr.bf16.mxu1 %v20654_v10  ;;  %vm22100_vm4 = vnez %v22099_v45  ;;  %v22108_v45 = vld [vmem:[#allocation92_spill] sm:$0xff] }
 0x45c   :  { %8028 = vmatprep.mubr.msk.f32.mxu0 %vm22092_vm11, %v21953_v11  ;;  %8697 = vmatpush1.bf16.msra.mxu0 %v22093_v25  ;;  %v22101_v25 = vld [vmem:[#allocation223_spill] sm:$0xff] }
 0x45d   :  { %7837 = vmatmul.mubr.msk.f32.gmra.mrb[28].mxu1 %vm22095_vm5, %v21953_v11  ;;  %8698 = vmatprep.subr.bf16.mxu0 %v20654_v10  ;;  %vm22102_vm11 = vnez %v22101_v25  ;;  %vm22105_vm5 = vnez %v22104_v61  ;;  %v22111_v25 = vld [vmem:[#allocation229_spill] sm:$0xff] }
 0x45e   :  { %7838 = vmatprep.mubr.msk.f32.mxu1 %vm22097_vm13, %v21953_v11  ;;  %8412 = vmatpush1.bf16.msra.mxu1 %v22098_v29  ;;  %v22106_v29 = vld [vmem:[#allocation227_spill] sm:$0xff]  ;;  %v22114_v61 = vld [vmem:[#allocation101_spill] sm:$0xff] }
 0x45f   :  { %8029 = vmatmul.mubr.msk.f32.gmra.mrb[28].mxu0 %vm22100_vm4, %v21953_v11  ;;  %8413 = vmatprep.subr.bf16.mxu1 %v20654_v10  ;;  %vm22107_vm13 = vnez %v22106_v29  ;;  %vm22110_vm4 = vnez %v22109_v2  ;;  %v22120_v2 = vld [vmem:[#allocation238_spill] sm:$0xff] }
 0x460   :  { %8030 = vmatprep.mubr.msk.f32.mxu0 %vm22102_vm11, %v21953_v11  ;;  %8700 = vmatpush1.bf16.msra.mxu0 %v22103_v51  ;;  %vm22112_vm11 = vnez %v22111_v25  ;;  %v22113_v51 = vld [vmem:[#allocation96_spill] sm:$0xff]  ;;  %v22122_v25 = vld [vmem:[#allocation234_spill] sm:$0xff] }
 0x461   :  { %7839 = vmatmul.mubr.msk.f32.gmra.mrb[30].mxu1 %vm22105_vm5, %v21953_v11  ;;  %8701 = vmatprep.subr.bf16.mxu0 %v20654_v10  ;;  %vm22115_vm5 = vnez %v22114_v61  ;;  %v22116_v10 = vld [vmem:[#allocation235_spill] sm:$0xff]  ;;  %v22126_v61 = vld [vmem:[#allocation236_spill] sm:$0xff] }
 0x462   :  { %7840 = vmatprep.mubr.msk.f32.mxu1 %vm22107_vm13, %v21953_v11  ;;  %8415 = vmatpush1.bf16.msra.mxu1 %v22108_v45  ;;  %vm22117_vm7 = vnez %v22116_v10  ;;  %v22118_v45 = vld [vmem:[#allocation228_spill] sm:$0xff]  ;;  %v22128_v10 = vld [vmem:[#allocation245_spill] sm:$0xff] }
 0x463   :  { %8031 = vmatmul.mubr.msk.f32.gmra.mrb[30].mxu0 %vm22110_vm4, %v21953_v11  ;;  %vm22119_vm13 = vnez %v22118_v45  ;;  %vm22121_vm4 = vnez %v22120_v2  ;;  %v22130_v45 = vld [vmem:[#allocation2_spill] sm:$0xff]  ;;  %v22132_v2 = vld [vmem:[#allocation7_spill] sm:$0xff] }
 0x464   :  { %8032 = vmatprep.mubr.msk.f32.mxu0 %vm22112_vm11, %v21953_v11  ;;  %8703 = vmatpush1.bf16.msra.mxu0 %v22113_v51  ;;  %vm22123_vm11 = vnez %v22122_v25  ;;  %v22124_v51 = vld [vmem:[#allocation242_spill] sm:$0xff]  ;;  %v22134_v25 = vld [vmem:[#allocation243_spill] sm:$0xff] }
 0x465   :  { %7841 = vmatmul.mubr.msk.f32.gmra.mrb[32].mxu1 %vm22115_vm5, %v21953_v11  ;;  %vm22125_vm10 = vnez %v22124_v51  ;;  %vm22127_vm5 = vnez %v22126_v61  ;;  %v22136_v51 = vld [vmem:[#allocation249_spill] sm:$0xff]  ;;  %v22138_v61 = vld [vmem:[#allocation6_spill] sm:$0xff] }
 0x466   :  { %7842 = vmatprep.mubr.msk.f32.mxu1 %vm22117_vm7, %v21953_v11  ;;  %vm22129_vm7 = vnez %v22128_v10  ;;  %v22140_v10 = vld [vmem:[#allocation12_spill] sm:$0xff] }
 0x467   :  { %8033 = vmatmul.mubr.msk.f32.gmra.mrb[32].mxu0 %vm22119_vm13, %v21953_v11  ;;  %vm22131_vm13 = vnez %v22130_v45  ;;  %v22142_v45 = vld [vmem:[#allocation9_spill] sm:$0xff] }
 0x468   :  { %8034 = vmatprep.mubr.msk.f32.mxu0 %vm22121_vm4, %v21953_v11  ;;  %vm22133_vm4 = vnez %v22132_v2  ;;  %v22144_v2 = vld [vmem:[#allocation14_spill] sm:$0xff] }
 0x469   :  { %7843 = vmatmul.mubr.msk.f32.gmra.mrb[34].mxu1 %vm22123_vm11, %v21953_v11  ;;  %vm22135_vm11 = vnez %v22134_v25  ;;  %v22146_v25 = vld [vmem:[#allocation10_spill] sm:$0xff] }
 0x46a   :  { %7844 = vmatprep.mubr.msk.f32.mxu1 %vm22125_vm10, %v21953_v11  ;;  %vm22137_vm10 = vnez %v22136_v51  ;;  %v22148_v51 = vld [vmem:[#allocation18_spill] sm:$0xff] }
 0x46b   :  { %8035 = vmatmul.mubr.msk.f32.gmra.mrb[34].mxu0 %vm22127_vm5, %v21953_v11  ;;  %vm22139_vm5 = vnez %v22138_v61  ;;  %v22150_v61 = vld [vmem:[#allocation13_spill] sm:$0xff] }
 0x46c   :  { %8036 = vmatprep.mubr.msk.f32.mxu0 %vm22129_vm7, %v21953_v11  ;;  %vm22141_vm7 = vnez %v22140_v10  ;;  %v22152_v10 = vld [vmem:[#allocation22_spill] sm:$0xff] }
 0x46d   :  { %7845 = vmatmul.mubr.msk.f32.gmra.mrb[36].mxu1 %vm22131_vm13, %v21953_v11  ;;  %vm22143_vm13 = vnez %v22142_v45  ;;  %v22154_v45 = vld [vmem:[#allocation16_spill] sm:$0xff] }
 0x46e   :  { %7846 = vmatprep.mubr.msk.f32.mxu1 %vm22133_vm4, %v21953_v11  ;;  %vm22145_vm4 = vnez %v22144_v2  ;;  %v22156_v2 = vld [vmem:[#allocation261_spill] sm:$0xff] }
 0x46f   :  { %8037 = vmatmul.mubr.msk.f32.gmra.mrb[36].mxu0 %vm22135_vm11, %v21953_v11  ;;  %vm22147_vm11 = vnez %v22146_v25  ;;  %v22158_v25 = vld [vmem:[#allocation19_spill] sm:$0xff] }
 0x470   :  { %8038 = vmatprep.mubr.msk.f32.mxu0 %vm22137_vm10, %v21953_v11  ;;  %vm22149_vm10 = vnez %v22148_v51  ;;  %v22160_v51 = vld [vmem:[#allocation264_spill] sm:$0xff] }
 0x471   :  { %7847 = vmatmul.mubr.msk.f32.gmra.mrb[38].mxu1 %vm22139_vm5, %v21953_v11  ;;  %vm22151_vm5 = vnez %v22150_v61  ;;  %v22162_v61 = vld [vmem:[#allocation260_spill] sm:$0xff] }
 0x472   :  { %7848 = vmatprep.mubr.msk.f32.mxu1 %vm22141_vm7, %v21953_v11  ;;  %vm22153_vm7 = vnez %v22152_v10  ;;  %v22164_v10 = vld [vmem:[#allocation269_spill] sm:$0xff] }
 0x473   :  { %8039 = vmatmul.mubr.msk.f32.gmra.mrb[38].mxu0 %vm22143_vm13, %v21953_v11  ;;  %vm22155_vm13 = vnez %v22154_v45  ;;  %v22166_v45 = vld [vmem:[#allocation262_spill] sm:$0xff] }
 0x474   :  { %8040 = vmatprep.mubr.msk.f32.mxu0 %vm22145_vm4, %v21953_v11  ;;  %vm22157_vm4 = vnez %v22156_v2  ;;  %v22168_v2 = vld [vmem:[#allocation271_spill] sm:$0xff] }
 0x475   :  { %7849 = vmatmul.mubr.msk.f32.gmra.mrb[40].mxu1 %vm22147_vm11, %v21953_v11  ;;  %vm22159_vm11 = vnez %v22158_v25  ;;  %v22170_v25 = vld [vmem:[#allocation268_spill] sm:$0xff] }
 0x476   :  { %7850 = vmatprep.mubr.msk.f32.mxu1 %vm22149_vm10, %v21953_v11  ;;  %vm22161_vm10 = vnez %v22160_v51  ;;  %v22172_v51 = vld [vmem:[#allocation277_spill] sm:$0xff] }
 0x477   :  { %8041 = vmatmul.mubr.msk.f32.gmra.mrb[40].mxu0 %vm22151_vm5, %v21953_v11  ;;  %vm22163_vm5 = vnez %v22162_v61  ;;  %v22174_v61 = vld [vmem:[#allocation270_spill] sm:$0xff] }
 0x478   :  { %8042 = vmatprep.mubr.msk.f32.mxu0 %vm22153_vm7, %v21953_v11  ;;  %vm22165_vm7 = vnez %v22164_v10  ;;  %v22176_v10 = vld [vmem:[#allocation280_spill] sm:$0xff] }
 0x479   :  { %7851 = vmatmul.mubr.msk.f32.gmra.mrb[42].mxu1 %vm22155_vm13, %v21953_v11  ;;  %vm22167_vm13 = vnez %v22166_v45  ;;  %v22178_v45 = vld [vmem:[#allocation276_spill] sm:$0xff] }
 0x47a   :  { %7852 = vmatprep.mubr.msk.f32.mxu1 %vm22157_vm4, %v21953_v11  ;;  %vm22169_vm4 = vnez %v22168_v2  ;;  %v22180_v2 = vld [vmem:[#allocation285_spill] sm:$0xff] }
 0x47b   :  { %8043 = vmatmul.mubr.msk.f32.gmra.mrb[42].mxu0 %vm22159_vm11, %v21953_v11  ;;  %vm22171_vm11 = vnez %v22170_v25  ;;  %v22182_v25 = vld [vmem:[#allocation278_spill] sm:$0xff] }
 0x47c   :  { %8044 = vmatprep.mubr.msk.f32.mxu0 %vm22161_vm10, %v21953_v11  ;;  %vm22173_vm10 = vnez %v22172_v51  ;;  %v22184_v51 = vld [vmem:[#allocation288_spill] sm:$0xff] }
 0x47d   :  { %7853 = vmatmul.mubr.msk.f32.gmra.mrb[44].mxu1 %vm22163_vm5, %v21953_v11  ;;  %vm22175_vm5 = vnez %v22174_v61  ;;  %v22186_v61 = vld [vmem:[#allocation284_spill] sm:$0xff] }
 0x47e   :  { %7854 = vmatprep.mubr.msk.f32.mxu1 %vm22165_vm7, %v21953_v11  ;;  %vm22177_vm7 = vnez %v22176_v10  ;;  %v22188_v10 = vld [vmem:[#allocation293_spill] sm:$0xff] }
 0x47f   :  { %8045 = vmatmul.mubr.msk.f32.gmra.mrb[44].mxu0 %vm22167_vm13, %v21953_v11  ;;  %vm22179_vm13 = vnez %v22178_v45  ;;  %v22190_v45 = vld [vmem:[#allocation286_spill] sm:$0xff] }
 0x480   :  { %8046 = vmatprep.mubr.msk.f32.mxu0 %vm22169_vm4, %v21953_v11  ;;  %vm22181_vm4 = vnez %v22180_v2  ;;  %v22192_v2 = vld [vmem:[#allocation296_spill] sm:$0xff] }
 0x481   :  { %7855 = vmatmul.mubr.msk.f32.gmra.mrb[46].mxu1 %vm22171_vm11, %v21953_v11  ;;  %vm22183_vm11 = vnez %v22182_v25  ;;  %v22194_v25 = vld [vmem:[#allocation292_spill] sm:$0xff] }
 0x482   :  { %7856 = vmatprep.mubr.msk.f32.mxu1 %vm22173_vm10, %v21953_v11  ;;  %vm22185_vm10 = vnez %v22184_v51  ;;  %v22196_v51 = vld [vmem:[#allocation301_spill] sm:$0xff] }
 0x483   :  { %8047 = vmatmul.mubr.msk.f32.gmra.mrb[46].mxu0 %vm22175_vm5, %v21953_v11  ;;  %vm22187_vm5 = vnez %v22186_v61  ;;  %v22198_v61 = vld [vmem:[#allocation294_spill] sm:$0xff] }
 0x484   :  { %8048 = vmatprep.mubr.msk.f32.mxu0 %vm22177_vm7, %v21953_v11  ;;  %vm22189_vm7 = vnez %v22188_v10  ;;  %v22200_v10 = vld [vmem:[#allocation304_spill] sm:$0xff] }
 0x485   :  { %7857 = vmatmul.mubr.msk.f32.gmra.mrb[48].mxu1 %vm22179_vm13, %v21953_v11  ;;  %vm22191_vm13 = vnez %v22190_v45  ;;  %v22202_v45 = vld [vmem:[#allocation300_spill] sm:$0xff] }
 0x486   :  { %7858 = vmatprep.mubr.msk.f32.mxu1 %vm22181_vm4, %v21953_v11  ;;  %vm22193_vm4 = vnez %v22192_v2  ;;  %v22204_v2 = vld [vmem:[#allocation309_spill] sm:$0xff] }
 0x487   :  { %8049 = vmatmul.mubr.msk.f32.gmra.mrb[48].mxu0 %vm22183_vm11, %v21953_v11  ;;  %vm22195_vm11 = vnez %v22194_v25  ;;  %v22206_v25 = vld [vmem:[#allocation302_spill] sm:$0xff] }
 0x488   :  { %8050 = vmatprep.mubr.msk.f32.mxu0 %vm22185_vm10, %v21953_v11  ;;  %vm22197_vm10 = vnez %v22196_v51  ;;  %v22224_v51 = vld [vmem:[#allocation335_spill] sm:$0xff] }
 0x489   :  { %7859 = vmatmul.mubr.msk.f32.gmra.mrb[50].mxu1 %vm22187_vm5, %v21953_v11  ;;  %vm22199_vm5 = vnez %v22198_v61  ;;  %v22209_v61 = vld [vmem:[#allocation308_spill] sm:$0xff] }
 0x48a   :  { %7860 = vmatprep.mubr.msk.f32.mxu1 %vm22189_vm7, %v21953_v11  ;;  %vm22201_vm7 = vnez %v22200_v10  ;;  %v22211_v10 = vld [vmem:[#allocation317_spill] sm:$0xff] }
 0x48b   :  { %8051 = vmatmul.mubr.msk.f32.gmra.mrb[50].mxu0 %vm22191_vm13, %v21953_v11  ;;  %vm22203_vm13 = vnez %v22202_v45  ;;  %v22213_v45 = vld [vmem:[#allocation310_spill] sm:$0xff] }
 0x48c   :  { %8052 = vmatprep.mubr.msk.f32.mxu0 %vm22193_vm4, %v21953_v11  ;;  %vm22205_vm4 = vnez %v22204_v2  ;;  %v22222_v2 = vld [vmem:[#allocation332_spill] sm:$0xff] }
 0x48d   :  { %7861 = vmatmul.mubr.msk.f32.gmra.mrb[52].mxu1 %vm22195_vm11, %v21953_v11  ;;  %vm22207_vm11 = vnez %v22206_v25  ;;  %v22216_v25 = vld [vmem:[#allocation316_spill] sm:$0xff] }
 0x48e   :  { %7862 = vmatprep.mubr.msk.f32.mxu1 %vm22197_vm10, %v21953_v11 }
 0x48f   :  { %8053 = vmatmul.mubr.msk.f32.gmra.mrb[52].mxu0 %vm22199_vm5, %v21953_v11  ;;  %vm22210_vm5 = vnez %v22209_v61  ;;  %v22225_v61 = vld [vmem:[#allocation331_spill] sm:$0xff] }
 0x490   :  { %8054 = vmatprep.mubr.msk.f32.mxu0 %vm22201_vm7, %v21953_v11  ;;  %vm22212_vm7 = vnez %v22211_v10  ;;  %v22220_v10 = vld [vmem:[#allocation328_spill] sm:$0xff] }
 0x491   :  { %7863 = vmatmul.mubr.msk.f32.gmra.mrb[54].mxu1 %vm22203_vm13, %v21953_v11  ;;  %vm22214_vm13 = vnez %v22213_v45  ;;  %v22227_v45 = vld [vmem:[#allocation333_spill] sm:$0xff] }
 0x492   :  { %7864 = vmatprep.mubr.msk.f32.mxu1 %vm22205_vm4, %v21953_v11 }
 0x493   :  { %8055 = vmatmul.mubr.msk.f32.gmra.mrb[54].mxu0 %vm22207_vm11, %v21953_v11  ;;  %vm22217_vm11 = vnez %v22216_v25  ;;  %v22223_v25 = vld [vmem:[#allocation326_spill] sm:$0xff] }
 0x494   :  { %8056 = vmatprep.mubr.msk.f32.mxu0 %vm21456_vm3, %v21953_v11 }
 0x495   :  { %7865 = vmatmul.mubr.msk.f32.gmra.mrb[56].mxu1 %vm22210_vm5, %v21953_v11 }
 0x496   :  { %7866 = vmatprep.mubr.msk.f32.mxu1 %vm22212_vm7, %v21953_v11 }
 0x497   :  { %8057 = vmatmul.mubr.msk.f32.gmra.mrb[56].mxu0 %vm22214_vm13, %v21953_v11 }
 0x498   :  { %8058 = vmatprep.mubr.msk.f32.mxu0 %vm21462_vm15, %v21953_v11 }
 0x499   :  { %7867 = vmatmul.mubr.msk.f32.gmra.mrb[58].mxu1 %vm22217_vm11, %v21953_v11 }
 0x49a   :  { %7868 = vmatprep.mubr.msk.f32.mxu1 %vm16336_vm0, %v21953_v11 }
 0x49b   :  { %8059 = vmatmul.mubr.msk.f32.gmra.mrb[58].mxu0 %vm21464_vm8, %v21953_v11 }
 0x49c   :  { %8060 = vmatprep.mubr.msk.f32.mxu0 %vm21465_vm1, %v21953_v11  ;;  %vm22226_vm1 = vnez %v21954_v26  ;;  %v22284_v26 = vld [vmem:[#allocation205_spill] sm:$0xff] }
 0x49d   :  { %7869 = vmatmul.mubr.msk.f32.gmra.mrb[60].mxu1 %vm21466_vm6, %v21953_v11  ;;  %vm22228_vm6 = vnez %v22227_v45 }
 0x49e   :  { %7870 = vmatprep.mubr.msk.f32.mxu1 %vm16457_vm14, %v21953_v11  ;;  %vm22229_vm14 = vnez %v21956_v20  ;;  %v22286_v20 = vld [vmem:[#allocation215_spill] sm:$0xff] }
 0x49f   :  { %8061 = vmatmul.mubr.msk.f32.gmra.mrb[60].mxu0 %vm21468_vm2, %v21953_v11  ;;  %vm22230_vm2 = vnez %v21957_v5  ;;  %v22288_v5 = vld [vmem:[#allocation211_spill] sm:$0xff] }
 0x4a0   :  { %8062 = vmatprep.mubr.msk.f32.mxu0 %vm16479_vm12, %v21953_v11  ;;  %vm22231_vm12 = vnez %v21959_v33  ;;  %v22290_v33 = vld [vmem:[#allocation220_spill] sm:$0xff] }
 0x4a1   :  { %7871 = vmatmul.mubr.msk.f32.gmra.mrb[62].mxu1 %vm16449_vm9, %v21953_v11  ;;  %vm22232_vm9 = vnez %v21960_v35  ;;  %v22292_v35 = vld [vmem:[#allocation213_spill] sm:$0xff] }
 0x4a2   :  { %7872 = vmatprep.mubr.msk.f32.mxu1 %vm22226_vm1, %v21953_v11  ;;  %vm22233_vm1 = vnez %v21962_v52  ;;  %v22294_v52 = vld [vmem:[#allocation223_spill] sm:$0xff] }
 0x4a3   :  { %8063 = vmatmul.mubr.msk.f32.gmra.mrb[62].mxu0 %vm22228_vm6, %v21953_v11  ;;  %vm22234_vm6 = vnez %v21964_v48  ;;  %v22296_v48 = vld [vmem:[#allocation219_spill] sm:$0xff] }
 0x4a4   :  { %8064 = vmatprep.mubr.msk.f32.mxu0 %vm22229_vm14, %v21953_v11  ;;  %vm22235_vm14 = vnez %v21966_v42  ;;  %v22299_v42 = vld [vmem:[#allocation221_spill] sm:$0xff] }
 0x4a5   :  { %7873 = vmatmul.mubr.msk.f32.vlgmr.msra.gmra.mrb[0].mxu1 %vm22230_vm2, %v21953_v11  ;;  %vm22236_vm2 = vnez %v21969_v18  ;;  %v22301_v18 = vld [vmem:[#allocation229_spill] sm:$0xff] }
 0x4a6   :  { %7874 = vmatprep.mubr.msk.f32.mxu1 %vm22231_vm12, %v21953_v11  ;;  %vm22237_vm12 = vnez %v21971_v7  ;;  %v22303_v7 = vld [vmem:[#allocation101_spill] sm:$0xff] }
 0x4a7   :  { %8065 = vmatmul.mubr.msk.f32.vlgmr.msra.gmra.mrb[0].mxu0 %vm22232_vm9, %v21953_v11  ;;  %vm22238_vm9 = vnez %v21974_v14  ;;  %v22305_v14 = vld [vmem:[#allocation235_spill] sm:$0xff] }
 0x4a8   :  { %8066 = vmatprep.mubr.msk.f32.mxu0 %vm22233_vm1, %v21953_v11  ;;  %vm22239_vm1 = vnez %v21976_v23  ;;  %v22307_v23 = vld [vmem:[#allocation228_spill] sm:$0xff] }
 0x4a9   :  { %7875 = vmatmul.mubr.msk.f32.gmra.mrb[2].mxu1 %vm22234_vm6, %v21953_v11  ;;  %vm22240_vm6 = vnez %v21979_v41  ;;  %v22309_v41 = vld [vmem:[#allocation238_spill] sm:$0xff] }
 0x4aa   :  { %7876 = vmatprep.mubr.msk.f32.mxu1 %vm22235_vm14, %v21953_v11  ;;  %vm22241_vm14 = vnez %v21981_v19  ;;  %v22311_v19 = vld [vmem:[#allocation234_spill] sm:$0xff] }
 0x4ab   :  { %8067 = vmatmul.mubr.msk.f32.gmra.mrb[2].mxu0 %vm22236_vm2, %v21953_v11  ;;  %vm22242_vm2 = vnez %v21984_v15  ;;  %v22313_v15 = vld [vmem:[#allocation242_spill] sm:$0xff] }
 0x4ac   :  { %8068 = vmatprep.mubr.msk.f32.mxu0 %vm22237_vm12, %v21953_v11  ;;  %vm22243_vm12 = vnez %v21986_v3  ;;  %v22315_v3 = vld [vmem:[#allocation236_spill] sm:$0xff] }
 0x4ad   :  { %7877 = vmatmul.mubr.msk.f32.gmra.mrb[4].mxu1 %vm22238_vm9, %v21953_v11  ;;  %vm22244_vm9 = vnez %v21989_v17  ;;  %v22317_v17 = vld [vmem:[#allocation245_spill] sm:$0xff] }
 0x4ae   :  { %7878 = vmatprep.mubr.msk.f32.mxu1 %vm22239_vm1, %v21953_v11  ;;  %vm22245_vm1 = vnez %v21991_v16  ;;  %v22319_v16 = vld [vmem:[#allocation2_spill] sm:$0xff] }
 0x4af   :  { %8069 = vmatmul.mubr.msk.f32.gmra.mrb[4].mxu0 %vm22240_vm6, %v21953_v11  ;;  %vm22246_vm6 = vnez %v21994_v6  ;;  %v22321_v6 = vld [vmem:[#allocation7_spill] sm:$0xff] }
 0x4b0   :  { %8070 = vmatprep.mubr.msk.f32.mxu0 %vm22241_vm14, %v21953_v11  ;;  %vm22247_vm14 = vnez %v21996_v36  ;;  %v22323_v36 = vld [vmem:[#allocation243_spill] sm:$0xff] }
 0x4b1   :  { %7879 = vmatmul.mubr.msk.f32.gmra.mrb[6].mxu1 %vm22242_vm2, %v21953_v11  ;;  %vm22248_vm2 = vnez %v21999_v50  ;;  %v22325_v50 = vld [vmem:[#allocation249_spill] sm:$0xff] }
 0x4b2   :  { %7880 = vmatprep.mubr.msk.f32.mxu1 %vm22243_vm12, %v21953_v11  ;;  %vm22249_vm12 = vnez %v22001_v21  ;;  %v22327_v21 = vld [vmem:[#allocation6_spill] sm:$0xff] }
 0x4b3   :  { %8071 = vmatmul.mubr.msk.f32.gmra.mrb[6].mxu0 %vm22244_vm9, %v21953_v11  ;;  %vm22250_vm9 = vnez %v22004_v58  ;;  %v22329_v58 = vld [vmem:[#allocation12_spill] sm:$0xff] }
 0x4b4   :  { %8072 = vmatprep.mubr.msk.f32.mxu0 %vm22245_vm1, %v21953_v11  ;;  %vm22251_vm1 = vnez %v22006_v55  ;;  %v22331_v55 = vld [vmem:[#allocation9_spill] sm:$0xff] }
 0x4b5   :  { %7881 = vmatmul.mubr.msk.f32.gmra.mrb[8].mxu1 %vm22246_vm6, %v21953_v11  ;;  %vm22252_vm6 = vnez %v22009_v22  ;;  %v22333_v22 = vld [vmem:[#allocation14_spill] sm:$0xff] }
 0x4b6   :  { %7882 = vmatprep.mubr.msk.f32.mxu1 %vm22247_vm14, %v21953_v11  ;;  %vm22253_vm14 = vnez %v22011_v49  ;;  %v22335_v49 = vld [vmem:[#allocation10_spill] sm:$0xff] }
 0x4b7   :  { %8073 = vmatmul.mubr.msk.f32.gmra.mrb[8].mxu0 %vm22248_vm2, %v21953_v11  ;;  %vm22254_vm2 = vnez %v22014_v57  ;;  %v22337_v57 = vld [vmem:[#allocation18_spill] sm:$0xff] }
 0x4b8   :  { %8074 = vmatprep.mubr.msk.f32.mxu0 %vm22249_vm12, %v21953_v11  ;;  %vm22255_vm12 = vnez %v22016_v59  ;;  %v22339_v59 = vld [vmem:[#allocation13_spill] sm:$0xff] }
 0x4b9   :  { %7883 = vmatmul.mubr.msk.f32.gmra.mrb[10].mxu1 %vm22250_vm9, %v21953_v11  ;;  %vm22256_vm9 = vnez %v22019_v34  ;;  %v22341_v34 = vld [vmem:[#allocation22_spill] sm:$0xff] }
 0x4ba   :  { %7884 = vmatprep.mubr.msk.f32.mxu1 %vm22251_vm1, %v21953_v11  ;;  %vm22257_vm1 = vnez %v22021_v24  ;;  %v22343_v24 = vld [vmem:[#allocation16_spill] sm:$0xff] }
 0x4bb   :  { %8075 = vmatmul.mubr.msk.f32.gmra.mrb[10].mxu0 %vm22252_vm6, %v21953_v11  ;;  %vm22258_vm6 = vnez %v22024_v4  ;;  %v22345_v4 = vld [vmem:[#allocation261_spill] sm:$0xff] }
 0x4bc   :  { %8076 = vmatprep.mubr.msk.f32.mxu0 %vm22253_vm14, %v21953_v11  ;;  %vm22259_vm14 = vnez %v22026_v8  ;;  %v22347_v8 = vld [vmem:[#allocation19_spill] sm:$0xff] }
 0x4bd   :  { %7885 = vmatmul.mubr.msk.f32.gmra.mrb[12].mxu1 %vm22254_vm2, %v21953_v11  ;;  %vm22260_vm2 = vnez %v22029_v31  ;;  %v22349_v31 = vld [vmem:[#allocation264_spill] sm:$0xff] }
 0x4be   :  { %7886 = vmatprep.mubr.msk.f32.mxu1 %vm22255_vm12, %v21953_v11  ;;  %vm22261_vm12 = vnez %v22031_v40  ;;  %v22351_v40 = vld [vmem:[#allocation260_spill] sm:$0xff] }
 0x4bf   :  { %8077 = vmatmul.mubr.msk.f32.gmra.mrb[12].mxu0 %vm22256_vm9, %v21953_v11  ;;  %vm22262_vm9 = vnez %v22034_v38  ;;  %v22353_v38 = vld [vmem:[#allocation269_spill] sm:$0xff] }
 0x4c0   :  { %8078 = vmatprep.mubr.msk.f32.mxu0 %vm22257_vm1, %v21953_v11  ;;  %vm22263_vm1 = vnez %v22036_v46  ;;  %v22355_v46 = vld [vmem:[#allocation262_spill] sm:$0xff] }
 0x4c1   :  { %7887 = vmatmul.mubr.msk.f32.gmra.mrb[14].mxu1 %vm22258_vm6, %v21953_v11  ;;  %vm22264_vm6 = vnez %v22039_v12  ;;  %v22357_v12 = vld [vmem:[#allocation271_spill] sm:$0xff] }
 0x4c2   :  { %7888 = vmatprep.mubr.msk.f32.mxu1 %vm22259_vm14, %v21953_v11  ;;  %vm22265_vm14 = vnez %v22041_v56  ;;  %v22359_v56 = vld [vmem:[#allocation268_spill] sm:$0xff] }
 0x4c3   :  { %8079 = vmatmul.mubr.msk.f32.gmra.mrb[14].mxu0 %vm22260_vm2, %v21953_v11  ;;  %vm22266_vm2 = vnez %v22044_v39  ;;  %v22361_v39 = vld [vmem:[#allocation277_spill] sm:$0xff] }
 0x4c4   :  { %8080 = vmatprep.mubr.msk.f32.mxu0 %vm22261_vm12, %v21953_v11  ;;  %vm22267_vm12 = vnez %v22046_v53  ;;  %v22363_v53 = vld [vmem:[#allocation270_spill] sm:$0xff] }
 0x4c5   :  { %7889 = vmatmul.mubr.msk.f32.gmra.mrb[16].mxu1 %vm22262_vm9, %v21953_v11  ;;  %vm22268_vm9 = vnez %v22049_v27  ;;  %v22365_v27 = vld [vmem:[#allocation280_spill] sm:$0xff] }
 0x4c6   :  { %7890 = vmatprep.mubr.msk.f32.mxu1 %vm22263_vm1, %v21953_v11  ;;  %vm22269_vm1 = vnez %v22051_v47  ;;  %v22367_v47 = vld [vmem:[#allocation276_spill] sm:$0xff] }
 0x4c7   :  { %8081 = vmatmul.mubr.msk.f32.gmra.mrb[16].mxu0 %vm22264_vm6, %v21953_v11  ;;  %vm22270_vm6 = vnez %v22054_v30  ;;  %v22369_v30 = vld [vmem:[#allocation285_spill] sm:$0xff] }
 0x4c8   :  { %8082 = vmatprep.mubr.msk.f32.mxu0 %vm22265_vm14, %v21953_v11  ;;  %vm22271_vm14 = vnez %v22056_v32  ;;  %v22371_v32 = vld [vmem:[#allocation278_spill] sm:$0xff] }
 0x4c9   :  { %7891 = vmatmul.mubr.msk.f32.gmra.mrb[18].mxu1 %vm22266_vm2, %v21953_v11  ;;  %vm22272_vm2 = vnez %v22059_v0  ;;  %v22373_v0 = vld [vmem:[#allocation288_spill] sm:$0xff] }
 0x4ca   :  { %7892 = vmatprep.mubr.msk.f32.mxu1 %vm22267_vm12, %v21953_v11  ;;  %vm22273_vm12 = vnez %v22061_v60  ;;  %v22375_v60 = vld [vmem:[#allocation284_spill] sm:$0xff] }
 0x4cb   :  { %8083 = vmatmul.mubr.msk.f32.gmra.mrb[18].mxu0 %vm22268_vm9, %v21953_v11  ;;  %vm22274_vm9 = vnez %v22064_v43  ;;  %v22377_v43 = vld [vmem:[#allocation293_spill] sm:$0xff] }
 0x4cc   :  { %8084 = vmatprep.mubr.msk.f32.mxu0 %vm22269_vm1, %v21953_v11  ;;  %vm22275_vm1 = vnez %v22066_v62  ;;  %v22379_v62 = vld [vmem:[#allocation286_spill] sm:$0xff] }
 0x4cd   :  { %7893 = vmatmul.mubr.msk.f32.gmra.mrb[20].mxu1 %vm22270_vm6, %v21953_v11  ;;  %vm22276_vm6 = vnez %v22069_v37  ;;  %v22381_v37 = vld [vmem:[#allocation296_spill] sm:$0xff] }
 0x4ce   :  { %7894 = vmatprep.mubr.msk.f32.mxu1 %vm22271_vm14, %v21953_v11  ;;  %vm22277_vm14 = vnez %v22071_v54  ;;  %v22383_v54 = vld [vmem:[#allocation292_spill] sm:$0xff] }
 0x4cf   :  { %8085 = vmatmul.mubr.msk.f32.gmra.mrb[20].mxu0 %vm22272_vm2, %v21953_v11  ;;  %vm22278_vm2 = vnez %v22074_v9 }
 0x4d0   :  { %8086 = vmatprep.mubr.msk.f32.mxu0 %vm22273_vm12, %v21953_v11  ;;  %vm22279_vm12 = vnez %v22076_v13  ;;  %v22386_v13 = vld [vmem:[#allocation294_spill] sm:$0xff] }
 0x4d1   :  { %7895 = vmatmul.mubr.msk.f32.gmra.mrb[22].mxu1 %vm22274_vm9, %v21953_v11  ;;  %vm22280_vm9 = vnez %v22079_v1  ;;  %v22388_v1 = vld [vmem:[#allocation304_spill] sm:$0xff] }
 0x4d2   :  { %7896 = vmatprep.mubr.msk.f32.mxu1 %vm22275_vm1, %v21953_v11  ;;  %vm22281_vm1 = vnez %v22081_v28  ;;  %v22390_v28 = vld [vmem:[#allocation300_spill] sm:$0xff] }
 0x4d3   :  { %8087 = vmatmul.mubr.msk.f32.gmra.mrb[22].mxu0 %vm22276_vm6, %v21953_v11  ;;  %vm22282_vm6 = vnez %v22084_v44 }
 0x4d4   :  { %8088 = vmatprep.mubr.msk.f32.mxu0 %vm22277_vm14, %v21953_v11  ;;  %vm22283_vm14 = vnez %v22086_v63  ;;  %v22393_v63 = vld [vmem:[#allocation302_spill] sm:$0xff] }
 0x4d5   :  { %7897 = vmatmul.mubr.msk.f32.gmra.mrb[24].mxu1 %vm22278_vm2, %v21953_v11  ;;  %vm22285_vm2 = vnez %v22284_v26 }
 0x4d6   :  { %7898 = vmatprep.mubr.msk.f32.mxu1 %vm22279_vm12, %v21953_v11  ;;  %vm22287_vm12 = vnez %v22286_v20 }
 0x4d7   :  { %8089 = vmatmul.mubr.msk.f32.gmra.mrb[24].mxu0 %vm22280_vm9, %v21953_v11  ;;  %vm22289_vm9 = vnez %v22288_v5 }
 0x4d8   :  { %8090 = vmatprep.mubr.msk.f32.mxu0 %vm22281_vm1, %v21953_v11  ;;  %vm22291_vm1 = vnez %v22290_v33 }
 0x4d9   :  { %7899 = vmatmul.mubr.msk.f32.gmra.mrb[26].mxu1 %vm22282_vm6, %v21953_v11  ;;  %vm22293_vm6 = vnez %v22292_v35 }
 0x4da   :  { %7900 = vmatprep.mubr.msk.f32.mxu1 %vm22283_vm14, %v21953_v11  ;;  %vm22295_vm14 = vnez %v22294_v52 }
 0x4db   :  { %8091 = vmatmul.mubr.msk.f32.gmra.mrb[26].mxu0 %vm22285_vm2, %v21953_v11  ;;  %vm22297_vm2 = vnez %v22296_v48 }
 0x4dc   :  { %8092 = vmatprep.mubr.msk.f32.mxu0 %vm22287_vm12, %v21953_v11  ;;  %vm22298_vm12 = vnez %v22106_v29 }
 0x4dd   :  { %7901 = vmatmul.mubr.msk.f32.gmra.mrb[28].mxu1 %vm22289_vm9, %v21953_v11  ;;  %vm22300_vm9 = vnez %v22299_v42  ;;  %v22404_v42 = vld [vmem:[#allocation324_spill] sm:$0xff] }
 0x4de   :  { %7902 = vmatprep.mubr.msk.f32.mxu1 %vm22291_vm1, %v21953_v11  ;;  %vm22302_vm1 = vnez %v22301_v18 }
 0x4df   :  { %8093 = vmatmul.mubr.msk.f32.gmra.mrb[28].mxu0 %vm22293_vm6, %v21953_v11  ;;  %vm22304_vm6 = vnez %v22303_v7 }
 0x4e0   :  { %8094 = vmatprep.mubr.msk.f32.mxu0 %vm22295_vm14, %v21953_v11  ;;  %vm22306_vm14 = vnez %v22305_v14 }
 0x4e1   :  { %7903 = vmatmul.mubr.msk.f32.gmra.mrb[30].mxu1 %vm22297_vm2, %v21953_v11  ;;  %vm22308_vm2 = vnez %v22307_v23 }
 0x4e2   :  { %7904 = vmatprep.mubr.msk.f32.mxu1 %vm22298_vm12, %v21953_v11  ;;  %vm22310_vm12 = vnez %v22309_v41 }
 0x4e3   :  { %8095 = vmatmul.mubr.msk.f32.gmra.mrb[30].mxu0 %vm22300_vm9, %v21953_v11  ;;  %vm22312_vm9 = vnez %v22311_v19 }
 0x4e4   :  { %8096 = vmatprep.mubr.msk.f32.mxu0 %vm22302_vm1, %v21953_v11  ;;  %vm22314_vm1 = vnez %v22313_v15 }
 0x4e5   :  { %7905 = vmatmul.mubr.msk.f32.gmra.mrb[32].mxu1 %vm22304_vm6, %v21953_v11  ;;  %vm22316_vm6 = vnez %v22315_v3 }
 0x4e6   :  { %7906 = vmatprep.mubr.msk.f32.mxu1 %vm22306_vm14, %v21953_v11  ;;  %vm22318_vm14 = vnez %v22317_v17 }
 0x4e7   :  { %8097 = vmatmul.mubr.msk.f32.gmra.mrb[32].mxu0 %vm22308_vm2, %v21953_v11  ;;  %vm22320_vm2 = vnez %v22319_v16 }
 0x4e8   :  { %8098 = vmatprep.mubr.msk.f32.mxu0 %vm22310_vm12, %v21953_v11  ;;  %vm22322_vm12 = vnez %v22321_v6 }
 0x4e9   :  { %7907 = vmatmul.mubr.msk.f32.gmra.mrb[34].mxu1 %vm22312_vm9, %v21953_v11  ;;  %vm22324_vm9 = vnez %v22323_v36 }
 0x4ea   :  { %7908 = vmatprep.mubr.msk.f32.mxu1 %vm22314_vm1, %v21953_v11  ;;  %vm22326_vm1 = vnez %v22325_v50 }
 0x4eb   :  { %8099 = vmatmul.mubr.msk.f32.gmra.mrb[34].mxu0 %vm22316_vm6, %v21953_v11  ;;  %vm22328_vm6 = vnez %v22327_v21 }
 0x4ec   :  { %8100 = vmatprep.mubr.msk.f32.mxu0 %vm22318_vm14, %v21953_v11  ;;  %vm22330_vm14 = vnez %v22329_v58 }
 0x4ed   :  { %7909 = vmatmul.mubr.msk.f32.gmra.mrb[36].mxu1 %vm22320_vm2, %v21953_v11  ;;  %vm22332_vm2 = vnez %v22331_v55 }
 0x4ee   :  { %7910 = vmatprep.mubr.msk.f32.mxu1 %vm22322_vm12, %v21953_v11  ;;  %vm22334_vm12 = vnez %v22333_v22 }
 0x4ef   :  { %8101 = vmatmul.mubr.msk.f32.gmra.mrb[36].mxu0 %vm22324_vm9, %v21953_v11  ;;  %vm22336_vm9 = vnez %v22335_v49 }
 0x4f0   :  { %8102 = vmatprep.mubr.msk.f32.mxu0 %vm22326_vm1, %v21953_v11  ;;  %vm22338_vm1 = vnez %v22337_v57 }
 0x4f1   :  { %7911 = vmatmul.mubr.msk.f32.gmra.mrb[38].mxu1 %vm22328_vm6, %v21953_v11  ;;  %vm22340_vm6 = vnez %v22339_v59 }
 0x4f2   :  { %7912 = vmatprep.mubr.msk.f32.mxu1 %vm22330_vm14, %v21953_v11  ;;  %vm22342_vm14 = vnez %v22341_v34 }
 0x4f3   :  { %8103 = vmatmul.mubr.msk.f32.gmra.mrb[38].mxu0 %vm22332_vm2, %v21953_v11  ;;  %vm22344_vm2 = vnez %v22343_v24 }
 0x4f4   :  { %8104 = vmatprep.mubr.msk.f32.mxu0 %vm22334_vm12, %v21953_v11  ;;  %vm22346_vm12 = vnez %v22345_v4 }
 0x4f5   :  { %7913 = vmatmul.mubr.msk.f32.gmra.mrb[40].mxu1 %vm22336_vm9, %v21953_v11  ;;  %vm22348_vm9 = vnez %v22347_v8 }
 0x4f6   :  { %7914 = vmatprep.mubr.msk.f32.mxu1 %vm22338_vm1, %v21953_v11  ;;  %vm22350_vm1 = vnez %v22349_v31 }
 0x4f7   :  { %8105 = vmatmul.mubr.msk.f32.gmra.mrb[40].mxu0 %vm22340_vm6, %v21953_v11  ;;  %vm22352_vm6 = vnez %v22351_v40 }
 0x4f8   :  { %8106 = vmatprep.mubr.msk.f32.mxu0 %vm22342_vm14, %v21953_v11  ;;  %vm22354_vm14 = vnez %v22353_v38 }
 0x4f9   :  { %7915 = vmatmul.mubr.msk.f32.gmra.mrb[42].mxu1 %vm22344_vm2, %v21953_v11  ;;  %vm22356_vm2 = vnez %v22355_v46 }
 0x4fa   :  { %7916 = vmatprep.mubr.msk.f32.mxu1 %vm22346_vm12, %v21953_v11  ;;  %vm22358_vm12 = vnez %v22357_v12 }
 0x4fb   :  { %8107 = vmatmul.mubr.msk.f32.gmra.mrb[42].mxu0 %vm22348_vm9, %v21953_v11  ;;  %vm22360_vm9 = vnez %v22359_v56 }
 0x4fc   :  { %8108 = vmatprep.mubr.msk.f32.mxu0 %vm22350_vm1, %v21953_v11  ;;  %vm22362_vm1 = vnez %v22361_v39 }
 0x4fd   :  { %7917 = vmatmul.mubr.msk.f32.gmra.mrb[44].mxu1 %vm22352_vm6, %v21953_v11  ;;  %vm22364_vm6 = vnez %v22363_v53 }
 0x4fe   :  { %7918 = vmatprep.mubr.msk.f32.mxu1 %vm22354_vm14, %v21953_v11  ;;  %vm22366_vm14 = vnez %v22365_v27 }
 0x4ff   :  { %8109 = vmatmul.mubr.msk.f32.gmra.mrb[44].mxu0 %vm22356_vm2, %v21953_v11  ;;  %vm22368_vm2 = vnez %v22367_v47 }
 0x500   :  { %8110 = vmatprep.mubr.msk.f32.mxu0 %vm22358_vm12, %v21953_v11  ;;  %vm22370_vm12 = vnez %v22369_v30 }
 0x501   :  { %7919 = vmatmul.mubr.msk.f32.gmra.mrb[46].mxu1 %vm22360_vm9, %v21953_v11  ;;  %vm22372_vm9 = vnez %v22371_v32 }
 0x502   :  { %7920 = vmatprep.mubr.msk.f32.mxu1 %vm22362_vm1, %v21953_v11  ;;  %vm22374_vm1 = vnez %v22373_v0 }
 0x503   :  { %8111 = vmatmul.mubr.msk.f32.gmra.mrb[46].mxu0 %vm22364_vm6, %v21953_v11  ;;  %vm22376_vm6 = vnez %v22375_v60 }
 0x504   :  { %8112 = vmatprep.mubr.msk.f32.mxu0 %vm22366_vm14, %v21953_v11  ;;  %vm22378_vm14 = vnez %v22377_v43 }
 0x505   :  { %7921 = vmatmul.mubr.msk.f32.gmra.mrb[48].mxu1 %vm22368_vm2, %v21953_v11  ;;  %vm22380_vm2 = vnez %v22379_v62 }
 0x506   :  { %7922 = vmatprep.mubr.msk.f32.mxu1 %vm22370_vm12, %v21953_v11  ;;  %vm22382_vm12 = vnez %v22381_v37 }
 0x507   :  { %8113 = vmatmul.mubr.msk.f32.gmra.mrb[48].mxu0 %vm22372_vm9, %v21953_v11  ;;  %vm22384_vm9 = vnez %v22383_v54 }
 0x508   :  { %8114 = vmatprep.mubr.msk.f32.mxu0 %vm22374_vm1, %v21953_v11  ;;  %vm22387_vm1 = vnez %v22386_v13 }
 0x509   :  { %7923 = vmatmul.mubr.msk.f32.gmra.mrb[50].mxu1 %vm22376_vm6, %v21953_v11  ;;  %vm22389_vm6 = vnez %v22388_v1 }
 0x50a   :  { %7924 = vmatprep.mubr.msk.f32.mxu1 %vm22378_vm14, %v21953_v11  ;;  %vm22391_vm14 = vnez %v22390_v28 }
 0x50b   :  { %8115 = vmatmul.mubr.msk.f32.gmra.mrb[50].mxu0 %vm22380_vm2, %v21953_v11  ;;  %vm22394_vm2 = vnez %v22393_v63 }
 0x50c   :  { %8116 = vmatprep.mubr.msk.f32.mxu0 %vm22382_vm12, %v21953_v11 }
 0x50d   :  { %7925 = vmatmul.mubr.msk.f32.gmra.mrb[52].mxu1 %vm22384_vm9, %v21953_v11 }
 0x50e   :  { %7926 = vmatprep.mubr.msk.f32.mxu1 %vm22197_vm10, %v21953_v11  ;;  %vm22405_vm10 = vnez %v22404_v42 }
 0x50f   :  { %8117 = vmatmul.mubr.msk.f32.gmra.mrb[52].mxu0 %vm22387_vm1, %v21953_v11 }
 0x510   :  { %8118 = vmatprep.mubr.msk.f32.mxu0 %vm22389_vm6, %v21953_v11 }
 0x511   :  { %7927 = vmatmul.mubr.msk.f32.gmra.mrb[54].mxu1 %vm22391_vm14, %v21953_v11 }
 0x512   :  { %7928 = vmatprep.mubr.msk.f32.mxu1 %vm22205_vm4, %v21953_v11  ;;  %vm22410_vm4 = vnez %v22227_v45 }
 0x513   :  { %8119 = vmatmul.mubr.msk.f32.gmra.mrb[54].mxu0 %vm22394_vm2, %v21953_v11 }
 0x514   :  { %8120 = vmatprep.mubr.msk.f32.mxu0 %vm21456_vm3, %v21953_v11 }
 0x515   :  { %7929 = vmatmul.mubr.msk.f32.gmra.mrb[56].mxu1 %vm22210_vm5, %v21953_v11  ;;  %vm22406_vm5 = vnez %v22222_v2 }
 0x516   :  { %7930 = vmatprep.mubr.msk.f32.mxu1 %vm22212_vm7, %v21953_v11  ;;  %vm22403_vm7 = vnez %v22220_v10 }
 0x517   :  { %8121 = vmatmul.mubr.msk.f32.gmra.mrb[56].mxu0 %vm22214_vm13, %v21953_v11  ;;  %vm22409_vm13 = vnez %v22225_v61 }
 0x518   :  { %8122 = vmatprep.mubr.msk.f32.mxu0 %vm21462_vm15, %v21953_v11 }
 0x519   :  { %7931 = vmatmul.mubr.msk.f32.gmra.mrb[58].mxu1 %vm22217_vm11, %v21953_v11  ;;  %vm22407_vm11 = vnez %v22223_v25 }
 0x51a   :  { %7932 = vmatprep.mubr.msk.f32.mxu1 %vm16336_vm0, %v21953_v11  ;;  %vm22408_vm0 = vnez %v22224_v51 }
 0x51b   :  { %8123 = vmatmul.mubr.msk.f32.gmra.mrb[58].mxu0 %vm21464_vm8, %v21953_v11 }
 0x51c   :  { %8124 = vmatprep.mubr.msk.f32.mxu0 %vm22403_vm7, %v21953_v11 }
 0x51d   :  { %7933 = vmatmul.mubr.msk.f32.gmra.mrb[60].mxu1 %vm22405_vm10, %v21953_v11 }
 0x51e   :  { %7934 = vmatprep.mubr.msk.f32.mxu1 %vm22406_vm5, %v21953_v11 }
 0x51f   :  { %8125 = vmatmul.mubr.msk.f32.gmra.mrb[60].mxu0 %vm22407_vm11, %v21953_v11 }
 0x520   :  { %8126 = vmatprep.mubr.msk.f32.mxu0 %vm22408_vm0, %v21953_v11 }
 0x521   :  { %7935 = vmatmul.mubr.msk.f32.gmra.mrb[62].mxu1 %vm22409_vm13, %v21953_v11 }
 0x523   :  { %8127 = vmatmul.mubr.msk.f32.gmra.mrb[62].mxu0 %vm22410_vm4, %v21953_v11 }
 0x578   :  { %v4697_v10 = vpop.f32.mrb[0].mxu1 }
 0x579   :  { %v4699_v18 = vpop.f32.mrb[1].mxu1 }
 0x57a   :  { %v7295_v2 = vpop.f32.mrb[0].mxu0 }
 0x57b   :  { %v8704_v7 = vadd.f32 %v7295_v2, %v4697_v10  ;;  %v7297_v14 = vpop.f32.mrb[1].mxu0 }
 0x57c   :  { %v4704_v23 = vpop.f32.mrb[2].mxu1 }
 0x57d   :  { %7516 = vst [vmem:[%s18539_s2] sm:$0xff] %v8704_v7  ;;  %v4706_v25 = vpop.f32.mrb[3].mxu1 }
 0x57e   :  { %v7302_v51 = vpop.f32.mrb[2].mxu0 }
 0x57f   :  { %v8705_v41 = vadd.f32 %v7302_v51, %v4704_v23  ;;  %v7304_v19 = vpop.f32.mrb[3].mxu0 }
 0x580   :  { %v4711_v61 = vpop.f32.mrb[4].mxu1 }
 0x581   :  { %7517 = vst [vmem:[%s18539_s2 + $0x8] sm:$0xff] %v8705_v41  ;;  %v4713_v11 = vpop.f32.mrb[5].mxu1 }
 0x582   :  { %v7309_v45 = vpop.f32.mrb[4].mxu0 }
 0x583   :  { %v8706_v15 = vadd.f32 %v7309_v45, %v4711_v61  ;;  %v7311_v3 = vpop.f32.mrb[5].mxu0 }
 0x584   :  { %v4718_v17 = vpop.f32.mrb[6].mxu1 }
 0x585   :  { %7518 = vst [vmem:[%s18539_s2 + $0x10] sm:$0xff] %v8706_v15  ;;  %v4720_v16 = vpop.f32.mrb[7].mxu1 }
 0x586   :  { %v7316_v6 = vpop.f32.mrb[6].mxu0 }
 0x587   :  { %v8707_v36 = vadd.f32 %v7316_v6, %v4718_v17  ;;  %v7318_v50 = vpop.f32.mrb[7].mxu0 }
 0x588   :  { %v4725_v21 = vpop.f32.mrb[8].mxu1 }
 0x589   :  { %7519 = vst [vmem:[%s18539_s2 + $0x18] sm:$0xff] %v8707_v36  ;;  %v4727_v58 = vpop.f32.mrb[9].mxu1 }
 0x58a   :  { %v7323_v55 = vpop.f32.mrb[8].mxu0 }
 0x58b   :  { %v8708_v22 = vadd.f32 %v7323_v55, %v4725_v21  ;;  %v7325_v49 = vpop.f32.mrb[9].mxu0 }
 0x58c   :  { %v4732_v57 = vpop.f32.mrb[10].mxu1 }
 0x58d   :  { %7520 = vst [vmem:[%s18539_s2 + $0x20] sm:$0xff] %v8708_v22  ;;  %v4734_v59 = vpop.f32.mrb[11].mxu1 }
 0x58e   :  { %v7330_v34 = vpop.f32.mrb[10].mxu0 }
 0x58f   :  { %v8709_v24 = vadd.f32 %v7330_v34, %v4732_v57  ;;  %v7332_v4 = vpop.f32.mrb[11].mxu0 }
 0x590   :  { %v4739_v8 = vpop.f32.mrb[12].mxu1 }
 0x591   :  { %7521 = vst [vmem:[%s18539_s2 + $0x28] sm:$0xff] %v8709_v24  ;;  %v4741_v31 = vpop.f32.mrb[13].mxu1 }
 0x592   :  { %v7337_v40 = vpop.f32.mrb[12].mxu0 }
 0x593   :  { %v8710_v38 = vadd.f32 %v7337_v40, %v4739_v8  ;;  %v7339_v46 = vpop.f32.mrb[13].mxu0 }
 0x594   :  { %v4746_v12 = vpop.f32.mrb[14].mxu1 }
 0x595   :  { %7522 = vst [vmem:[%s18539_s2 + $0x30] sm:$0xff] %v8710_v38  ;;  %v4748_v56 = vpop.f32.mrb[15].mxu1 }
 0x596   :  { %v7344_v39 = vpop.f32.mrb[14].mxu0 }
 0x597   :  { %v8711_v53 = vadd.f32 %v7344_v39, %v4746_v12  ;;  %v7346_v27 = vpop.f32.mrb[15].mxu0 }
 0x598   :  { %v4753_v47 = vpop.f32.mrb[16].mxu1 }
 0x599   :  { %7523 = vst [vmem:[%s18539_s2 + $0x38] sm:$0xff] %v8711_v53  ;;  %v4755_v30 = vpop.f32.mrb[17].mxu1 }
 0x59a   :  { %v7351_v32 = vpop.f32.mrb[16].mxu0 }
 0x59b   :  { %v8712_v0 = vadd.f32 %v7351_v32, %v4753_v47  ;;  %v7353_v60 = vpop.f32.mrb[17].mxu0 }
 0x59c   :  { %v4760_v43 = vpop.f32.mrb[18].mxu1 }
 0x59d   :  { %7524 = vst [vmem:[%s18539_s2 + $0x40] sm:$0xff] %v8712_v0  ;;  %v4762_v62 = vpop.f32.mrb[19].mxu1 }
 0x59e   :  { %v7358_v37 = vpop.f32.mrb[18].mxu0 }
 0x59f   :  { %v8713_v54 = vadd.f32 %v7358_v37, %v4760_v43  ;;  %v7360_v9 = vpop.f32.mrb[19].mxu0 }
 0x5a0   :  { %v4767_v13 = vpop.f32.mrb[20].mxu1 }
 0x5a1   :  { %7525 = vst [vmem:[%s18539_s2 + $0x48] sm:$0xff] %v8713_v54  ;;  %v4769_v1 = vpop.f32.mrb[21].mxu1 }
 0x5a2   :  { %v7365_v28 = vpop.f32.mrb[20].mxu0 }
 0x5a3   :  { %v8714_v44 = vadd.f32 %v7365_v28, %v4767_v13  ;;  %v7367_v63 = vpop.f32.mrb[21].mxu0 }
 0x5a4   :  { %v4774_v29 = vpop.f32.mrb[22].mxu1 }
 0x5a5   :  { %7526 = vst [vmem:[%s18539_s2 + $0x50] sm:$0xff] %v8714_v44  ;;  %v4776_v26 = vpop.f32.mrb[23].mxu1 }
 0x5a6   :  { %v7372_v20 = vpop.f32.mrb[22].mxu0 }
 0x5a7   :  { %v8715_v5 = vadd.f32 %v7372_v20, %v4774_v29  ;;  %v7374_v33 = vpop.f32.mrb[23].mxu0 }
 0x5a8   :  { %v4781_v35 = vpop.f32.mrb[24].mxu1 }
 0x5a9   :  { %7527 = vst [vmem:[%s18539_s2 + $0x58] sm:$0xff] %v8715_v5  ;;  %v4783_v52 = vpop.f32.mrb[25].mxu1 }
 0x5aa   :  { %v7379_v48 = vpop.f32.mrb[24].mxu0 }
 0x5ab   :  { %v8716_v42 = vadd.f32 %v7379_v48, %v4781_v35  ;;  %v7381_v10 = vpop.f32.mrb[25].mxu0 }
 0x5ac   :  { %v4788_v18 = vpop.f32.mrb[26].mxu1 }
 0x5ad   :  { %7528 = vst [vmem:[%s18539_s2 + $0x60] sm:$0xff] %v8716_v42  ;;  %v4790_v2 = vpop.f32.mrb[27].mxu1 }
 0x5ae   :  { %v7386_v7 = vpop.f32.mrb[26].mxu0 }
 0x5af   :  { %v8717_v14 = vadd.f32 %v7386_v7, %v4788_v18  ;;  %v7388_v23 = vpop.f32.mrb[27].mxu0 }
 0x5b0   :  { %v4795_v25 = vpop.f32.mrb[28].mxu1 }
 0x5b1   :  { %7529 = vst [vmem:[%s18539_s2 + $0x68] sm:$0xff] %v8717_v14  ;;  %v4797_v51 = vpop.f32.mrb[29].mxu1 }
 0x5b2   :  { %v7393_v41 = vpop.f32.mrb[28].mxu0 }
 0x5b3   :  { %v8718_v19 = vadd.f32 %v7393_v41, %v4795_v25  ;;  %v7395_v61 = vpop.f32.mrb[29].mxu0 }
 0x5b4   :  { %v4802_v11 = vpop.f32.mrb[30].mxu1 }
 0x5b5   :  { %7530 = vst [vmem:[%s18539_s2 + $0x70] sm:$0xff] %v8718_v19  ;;  %v4804_v45 = vpop.f32.mrb[31].mxu1 }
 0x5b6   :  { %v7400_v15 = vpop.f32.mrb[30].mxu0 }
 0x5b7   :  { %v8719_v3 = vadd.f32 %v7400_v15, %v4802_v11  ;;  %v7402_v17 = vpop.f32.mrb[31].mxu0 }
 0x5b8   :  { %v4809_v16 = vpop.f32.mrb[32].mxu1 }
 0x5b9   :  { %7531 = vst [vmem:[%s18539_s2 + $0x78] sm:$0xff] %v8719_v3  ;;  %v4811_v6 = vpop.f32.mrb[33].mxu1 }
 0x5ba   :  { %v7407_v36 = vpop.f32.mrb[32].mxu0 }
 0x5bb   :  { %v8720_v50 = vadd.f32 %v7407_v36, %v4809_v16  ;;  %v7409_v21 = vpop.f32.mrb[33].mxu0 }
 0x5bc   :  { %v4816_v58 = vpop.f32.mrb[34].mxu1 }
 0x5bd   :  { %7532 = vst [vmem:[%s18539_s2 + $0x80] sm:$0xff] %v8720_v50  ;;  %v4818_v55 = vpop.f32.mrb[35].mxu1 }
 0x5be   :  { %v7414_v22 = vpop.f32.mrb[34].mxu0 }
 0x5bf   :  { %v8721_v49 = vadd.f32 %v7414_v22, %v4816_v58  ;;  %v7416_v57 = vpop.f32.mrb[35].mxu0 }
 0x5c0   :  { %v4823_v59 = vpop.f32.mrb[36].mxu1 }
 0x5c1   :  { %7533 = vst [vmem:[%s18539_s2 + $0x88] sm:$0xff] %v8721_v49  ;;  %v4825_v34 = vpop.f32.mrb[37].mxu1 }
 0x5c2   :  { %v7421_v24 = vpop.f32.mrb[36].mxu0 }
 0x5c3   :  { %v8722_v4 = vadd.f32 %v7421_v24, %v4823_v59  ;;  %v7423_v8 = vpop.f32.mrb[37].mxu0 }
 0x5c4   :  { %v4830_v31 = vpop.f32.mrb[38].mxu1 }
 0x5c5   :  { %7534 = vst [vmem:[%s18539_s2 + $0x90] sm:$0xff] %v8722_v4  ;;  %v4832_v40 = vpop.f32.mrb[39].mxu1 }
 0x5c6   :  { %v7428_v38 = vpop.f32.mrb[38].mxu0 }
 0x5c7   :  { %v8723_v46 = vadd.f32 %v7428_v38, %v4830_v31  ;;  %v7430_v12 = vpop.f32.mrb[39].mxu0 }
 0x5c8   :  { %v4837_v56 = vpop.f32.mrb[40].mxu1 }
 0x5c9   :  { %7535 = vst [vmem:[%s18539_s2 + $0x98] sm:$0xff] %v8723_v46  ;;  %v4839_v39 = vpop.f32.mrb[41].mxu1 }
 0x5ca   :  { %v7435_v53 = vpop.f32.mrb[40].mxu0 }
 0x5cb   :  { %v8724_v27 = vadd.f32 %v7435_v53, %v4837_v56  ;;  %v7437_v47 = vpop.f32.mrb[41].mxu0 }
 0x5cc   :  { %v4844_v30 = vpop.f32.mrb[42].mxu1 }
 0x5cd   :  { %7536 = vst [vmem:[%s18539_s2 + $0xa0] sm:$0xff] %v8724_v27  ;;  %v4846_v32 = vpop.f32.mrb[43].mxu1 }
 0x5ce   :  { %v7442_v0 = vpop.f32.mrb[42].mxu0 }
 0x5cf   :  { %v8725_v60 = vadd.f32 %v7442_v0, %v4844_v30  ;;  %v7444_v43 = vpop.f32.mrb[43].mxu0 }
 0x5d0   :  { %v4851_v62 = vpop.f32.mrb[44].mxu1 }
 0x5d1   :  { %7537 = vst [vmem:[%s18539_s2 + $0xa8] sm:$0xff] %v8725_v60  ;;  %v4853_v37 = vpop.f32.mrb[45].mxu1 }
 0x5d2   :  { %v7449_v54 = vpop.f32.mrb[44].mxu0 }
 0x5d3   :  { %v8726_v9 = vadd.f32 %v7449_v54, %v4851_v62  ;;  %v7451_v13 = vpop.f32.mrb[45].mxu0 }
 0x5d4   :  { %v4858_v1 = vpop.f32.mrb[46].mxu1 }
 0x5d5   :  { %7538 = vst [vmem:[%s18539_s2 + $0xb0] sm:$0xff] %v8726_v9  ;;  %v4860_v28 = vpop.f32.mrb[47].mxu1 }
 0x5d6   :  { %v7456_v44 = vpop.f32.mrb[46].mxu0 }
 0x5d7   :  { %v8727_v63 = vadd.f32 %v7456_v44, %v4858_v1  ;;  %v7458_v29 = vpop.f32.mrb[47].mxu0 }
 0x5d8   :  { %v4865_v26 = vpop.f32.mrb[48].mxu1 }
 0x5d9   :  { %7539 = vst [vmem:[%s18539_s2 + $0xb8] sm:$0xff] %v8727_v63  ;;  %v4867_v20 = vpop.f32.mrb[49].mxu1 }
 0x5da   :  { %v7463_v5 = vpop.f32.mrb[48].mxu0 }
 0x5db   :  { %v8728_v33 = vadd.f32 %v7463_v5, %v4865_v26  ;;  %v7465_v35 = vpop.f32.mrb[49].mxu0 }
 0x5dc   :  { %v4872_v52 = vpop.f32.mrb[50].mxu1 }
 0x5dd   :  { %7540 = vst [vmem:[%s18539_s2 + $0xc0] sm:$0xff] %v8728_v33  ;;  %v4874_v48 = vpop.f32.mrb[51].mxu1 }
 0x5de   :  { %v7470_v42 = vpop.f32.mrb[50].mxu0 }
 0x5df   :  { %v8729_v10 = vadd.f32 %v7470_v42, %v4872_v52  ;;  %v7472_v18 = vpop.f32.mrb[51].mxu0 }
 0x5e0   :  { %v4879_v2 = vpop.f32.mrb[52].mxu1 }
 0x5e1   :  { %7541 = vst [vmem:[%s18539_s2 + $0xc8] sm:$0xff] %v8729_v10  ;;  %v4881_v7 = vpop.f32.mrb[53].mxu1 }
 0x5e2   :  { %v7477_v14 = vpop.f32.mrb[52].mxu0 }
 0x5e3   :  { %v8730_v23 = vadd.f32 %v7477_v14, %v4879_v2  ;;  %v7479_v25 = vpop.f32.mrb[53].mxu0 }
 0x5e4   :  { %v4886_v51 = vpop.f32.mrb[54].mxu1 }
 0x5e5   :  { %7542 = vst [vmem:[%s18539_s2 + $0xd0] sm:$0xff] %v8730_v23  ;;  %v4888_v41 = vpop.f32.mrb[55].mxu1 }
 0x5e6   :  { %v7484_v19 = vpop.f32.mrb[54].mxu0 }
 0x5e7   :  { %v8731_v61 = vadd.f32 %v7484_v19, %v4886_v51  ;;  %v7486_v11 = vpop.f32.mrb[55].mxu0 }
 0x5e8   :  { %v4893_v45 = vpop.f32.mrb[56].mxu1 }
 0x5e9   :  { %7543 = vst [vmem:[%s18539_s2 + $0xd8] sm:$0xff] %v8731_v61  ;;  %v4895_v15 = vpop.f32.mrb[57].mxu1 }
 0x5ea   :  { %v7491_v3 = vpop.f32.mrb[56].mxu0 }
 0x5eb   :  { %v8732_v17 = vadd.f32 %v7491_v3, %v4893_v45  ;;  %v7493_v16 = vpop.f32.mrb[57].mxu0 }
 0x5ec   :  { %v4900_v6 = vpop.f32.mrb[58].mxu1 }
 0x5ed   :  { %7544 = vst [vmem:[%s18539_s2 + $0xe0] sm:$0xff] %v8732_v17  ;;  %v4902_v36 = vpop.f32.mrb[59].mxu1 }
 0x5ee   :  { %v7498_v50 = vpop.f32.mrb[58].mxu0 }
 0x5ef   :  { %v8733_v21 = vadd.f32 %v7498_v50, %v4900_v6  ;;  %v7500_v58 = vpop.f32.mrb[59].mxu0 }
 0x5f0   :  { %v4907_v55 = vpop.f32.mrb[60].mxu1 }
 0x5f1   :  { %7545 = vst [vmem:[%s18539_s2 + $0xe8] sm:$0xff] %v8733_v21  ;;  %v4909_v22 = vpop.f32.mrb[61].mxu1 }
 0x5f2   :  { %v7505_v49 = vpop.f32.mrb[60].mxu0 }
 0x5f3   :  { %v8734_v57 = vadd.f32 %v7505_v49, %v4907_v55  ;;  %v7507_v59 = vpop.f32.mrb[61].mxu0 }
 0x5f4   :  { %v4914_v34 = vpop.f32.mrb[62].mxu1 }
 0x5f5   :  { %7546 = vst [vmem:[%s18539_s2 + $0xf0] sm:$0xff] %v8734_v57  ;;  %v4916_v24 = vpop.f32.mrb[63].mxu1 }
 0x5f6   :  { %v7512_v4 = vpop.f32.mrb[62].mxu0 }
 0x5f7   :  { %v8735_v8 = vadd.f32 %v7512_v4, %v4914_v34  ;;  %v7514_v31 = vpop.f32.mrb[63].mxu0 }
 0x5f9   :  { %7547 = vst [vmem:[%s18539_s2 + $0xf8] sm:$0xff] %v8735_v8 }

</bundles_post_ra>
